<compile_context>
chip_gen: v7x
topology: tpu7x:2x2x1
jax: 0.10.0
libtpu: 0.0.40
codegen_flags: <defaults>
</compile_context>

<pallas_src>
import functools

import numpy as np

import jax
import jax.numpy as jnp
from jax.experimental import pallas as pl
from jax.experimental.pallas import tpu as pltpu


# ----------------------------- Pallas kernels -----------------------------

def _conv_stack_kernel(p1_ref, w1_ref, b1_ref, w2_ref, b2_ref,
                       w3_ref, b3_ref, sel_ref, o_ref, *, batch):
    B = batch

    # ---- conv1: one im2col GEMM over all batch rows (1/255 folded into w1) ----
    y1 = jnp.maximum(
        jnp.dot(p1_ref[...], w1_ref[...], preferred_element_type=jnp.float32)
        + b1_ref[...], 0.0)                                   # (440*B + 8, 32)

    # ---- conv2: 4x4 stride-2 as 16 shifted matmuls on the parity-split layout ----
    # y1 rows are ordered (ph, pw, b, i, j) with a 10x11 grid per parity class, so a
    # stride-2 tap becomes a contiguous row slice.  Extra rows are junk-but-finite and
    # are never read by valid downstream positions.
    w2 = w2_ref[...]
    n2 = 110 * B - 6                                          # 9x11 (+slack) grid rows
    acc2 = jnp.zeros((n2, 64), jnp.float32)
    for kh in range(4):
        for kw in range(4):
            ph, a = kh % 2, kh // 2
            pw, b_ = kw % 2, kw // 2
            start = (ph * 2 + pw) * B * 110 + a * 11 + b_
            tap = kh * 4 + kw
            acc2 = acc2 + jnp.dot(y1[start:start + n2, :],
                                  w2[tap * 32:(tap + 1) * 32, :],
                                  preferred_element_type=jnp.float32)
    y2 = jnp.maximum(acc2 + b2_ref[...], 0.0)

    # ---- conv3: 3x3 stride-1 as 9 shifted matmuls ----
    w3 = w3_ref[...]
    n3 = 110 * B - 33                                         # 7x11 grid rows per batch
    acc3 = jnp.zeros((n3, 64), jnp.float32)
    for kh in range(3):
        for kw in range(3):
            start = kh * 11 + kw
            tap = kh * 3 + kw
            acc3 = acc3 + jnp.dot(y2[start:start + n3, :],
                                  w3[tap * 64:(tap + 1) * 64, :],
                                  preferred_element_type=jnp.float32)
    y3 = jnp.maximum(acc3 + b3_ref[...], 0.0)

    # ---- select the valid 7x7 positions -> (B*50, 64) head-ready features ----
    o_ref[...] = jnp.dot(sel_ref[...], y3, preferred_element_type=jnp.float32)


def _dueling_head_kernel(f_ref, wh_ref, bh_ref, wq_ref, o_ref, acc_ref):
    k = pl.program_id(1)

    @pl.when(k == 0)
    def _():
        acc_ref[...] = jnp.zeros_like(acc_ref)

    acc_ref[...] += jnp.dot(f_ref[...].astype(jnp.bfloat16), wh_ref[...],
                            preferred_element_type=jnp.float32)

    @pl.when(k == pl.num_programs(1) - 1)
    def _():
        h = jnp.maximum(acc_ref[...] + bh_ref[...], 0.0)
        o_ref[0] = jnp.dot(h, wq_ref[...], preferred_element_type=jnp.float32)


# ------------------------------ pallas wrappers ----------------------------

def conv_stack(p1, prep, batch):
    w1, b1 = prep['conv1']
    w2, b2 = prep['conv2']
    w3, b3 = prep['conv3']
    sel = prep['sel']
    args = (p1, w1, b1, w2, b2, w3, b3, sel)
    kern = functools.partial(_conv_stack_kernel, batch=batch)
    return pl.pallas_call(
        kern,
        out_shape=jax.ShapeDtypeStruct((batch * 50, 64), jnp.float32),
        grid=(1,),
        in_specs=[pl.BlockSpec(a.shape, lambda i: (0, 0)) for a in args],
        out_specs=pl.BlockSpec((batch * 50, 64), lambda i: (0, 0)),
        compiler_params=pltpu.CompilerParams(
            dimension_semantics=("arbitrary",)),
    )(*args)


def dueling_head(feat, prep):
    # TODO(synk): overlap the head-weight DMA with the conv kernel via a cross-pallas_call
    # semaphore/VMEM-ref prefetch (P10); currently the bf16 weights are only streamed
    # (K-chunk pipelined) within this call.
    wh, bh, wq = prep['wh'], prep['bh'], prep['wq']
    B = feat.shape[0]
    A = wq.shape[1]
    KC = 640
    nk = wh.shape[0] // KC                                    # 3200 / 640 = 5
    return pl.pallas_call(
        _dueling_head_kernel,
        out_shape=jax.ShapeDtypeStruct((2, B, A), jnp.float32),
        grid=(2, nk),
        in_specs=[
            pl.BlockSpec((B, KC), lambda n, k: (0, k)),       # feat K-chunk
            pl.BlockSpec((KC, 512), lambda n, k: (k, n)),     # bf16 hidden weights
            pl.BlockSpec((1, 512), lambda n, k: (0, n)),      # hidden bias (per branch)
            pl.BlockSpec((512, A), lambda n, k: (n, 0)),      # folded output weights
        ],
        out_specs=pl.BlockSpec((1, B, A), lambda n, k: (n, 0, 0)),
        scratch_shapes=[pltpu.VMEM((B, 512), jnp.float32)],
        compiler_params=pltpu.CompilerParams(
            dimension_semantics=("parallel", "arbitrary")),
    )(feat, wh, bh, wq)


# ------------------------------- host glue --------------------------------

def _im2col_conv1(x_nhwc):
    """(B,84,90,C) -> (B,20,21,64*C) conv1 patches, feature order (kh, kw, c)."""
    B, _, _, C = x_nhwc.shape
    cols = []
    for kh in range(8):
        for kw in range(8):
            cols.append(jax.lax.slice(
                x_nhwc, (0, kh, kw, 0),
                (B, kh + 19 * 4 + 1, kw + 20 * 4 + 1, C),
                (1, 4, 4, 1)))
    p = jnp.stack(cols, axis=3)                               # (B,20,21,64,C)
    return p.reshape(B, 20, 21, 64 * C)


def _parity_layout(p):
    """(B,20,21,F) -> (4*B*110 + 8, F) rows ordered (ph, pw, b, i, j) with zero padding."""
    B, _, _, F = p.shape
    p = jnp.pad(p, ((0, 0), (0, 0), (0, 1), (0, 0)))          # ow 21 -> 22
    p = p.reshape(B, 10, 2, 11, 2, F)                         # (b, i, ph, j, pw, F)
    p = p.transpose(2, 4, 0, 1, 3, 5)                         # (ph, pw, b, i, j, F)
    p = p.reshape(4 * B * 110, F)
    return jnp.pad(p, ((0, 8), (0, 0)))


@jax.jit
def dueling_cnn_forward(x_nchw, prep):
    B = x_nchw.shape[0]
    x = jnp.transpose(x_nchw, (0, 2, 3, 1)).astype(jnp.float32)   # NHWC
    p1 = _parity_layout(_im2col_conv1(x))                          # (440*B+8, 256)
    feat_raw = conv_stack(p1, prep, B)                             # (B*50, 64)
    feat = feat_raw.reshape(B, 50 * 64)                            # (B, 3200) - bitcast
    partial = dueling_head(feat, prep)                             # (2, B, A)
    return partial[0] + partial[1] + prep['bq']


def prepare_params(params, batch):
    """One-time host-side transform of the raw parameters into kernel layouts."""
    B = batch
    w1, b1 = params['conv1']
    w2, b2 = params['conv2']
    w3, b3 = params['conv3']
    wv1, bv1, wv2, bv2, wa1, ba1, wa2, ba2 = params['head']
    A = wa2.shape[1]

    prep = {}
    # conv weights in im2col (kh, kw, cin) row order; fold the 1/255 input scale into w1.
    prep['conv1'] = (w1.reshape(-1, w1.shape[-1]) / 255.0, b1.reshape(1, -1))
    prep['conv2'] = (w2.reshape(-1, w2.shape[-1]), b2.reshape(1, -1))
    prep['conv3'] = (w3.reshape(-1, w3.shape[-1]), b3.reshape(1, -1))

    # 0/1 row-selection matrix picking the valid 7x7 conv3 outputs per batch element
    # (rows b*50+49 stay zero -> free lane padding of the flattened features to 3200).
    sel = np.zeros((B * 50, 110 * B - 33), np.float32)
    for b in range(B):
        for i in range(7):
            for j in range(7):
                sel[b * 50 + i * 7 + j, b * 110 + i * 11 + j] = 1.0
    prep['sel'] = jnp.asarray(sel)

    # Head: permute hidden-weight rows from torch (c,h,w)-flatten order to the kernel's
    # (spatial, channel) order, concat value|advantage branches, pad K to 3200, cast bf16.
    def perm(w):
        return w.reshape(64, 49, w.shape[1]).transpose(1, 0, 2).reshape(w.shape)

    wh = jnp.concatenate([perm(wv1), perm(wa1)], axis=1)          # (3136, 1024)
    prep['wh'] = jnp.pad(wh, ((0, 64), (0, 0))).astype(jnp.bfloat16)   # (3200, 1024)
    prep['bh'] = jnp.concatenate([bv1, ba1]).reshape(1, 1024)

    # Fold the dueling combine (v + a - mean(a)) into the second-layer weights.
    wq_v = wv2 @ jnp.ones((1, A), jnp.float32)                    # value broadcast to A
    wq_a = wa2 - wa2.mean(axis=1, keepdims=True)                  # = wa2 @ (I - 1/A)
    prep['wq'] = jnp.concatenate([wq_v, wq_a], axis=0)            # (1024, A)
    prep['bq'] = (bv2[0] + ba2 - ba2.mean()).reshape(1, A)
    return prep


# ---------------------- deterministic parameter init ----------------------

NOISY_SIGMA_INIT = 2.5


def _uniform(key, shape, bound):
    return jax.random.uniform(key, shape, jnp.float32, -bound, bound)


def init_conv(key, cin, cout, k):
    kw_, kb_ = jax.random.split(key)
    bound = 1.0 / (cin * k * k) ** 0.5
    w = _uniform(kw_, (k, k, cin, cout), bound)        # HWIO
    b = _uniform(kb_, (cout,), bound)
    return w, b


def init_noisy(key, in_f, out_f, sigma_init=NOISY_SIGMA_INIT):
    # Training-mode NoisyLinear: effective w = mu + sigma * eps (factorized noise).
    k1, k2, k3, k4 = jax.random.split(key, 4)
    bound = 1.0 / in_f ** 0.5
    w_mu = _uniform(k1, (out_f, in_f), bound)
    w_sigma = jnp.full((out_f, in_f), sigma_init / in_f ** 0.5, jnp.float32)
    b_mu = _uniform(k2, (out_f,), bound)
    b_sigma = jnp.full((out_f,), sigma_init / out_f ** 0.5, jnp.float32)
    f = lambda t: jnp.sign(t) * jnp.sqrt(jnp.abs(t))
    eps_in = f(jax.random.normal(k3, (in_f,), jnp.float32))
    eps_out = f(jax.random.normal(k4, (out_f,), jnp.float32))
    w = w_mu + w_sigma * jnp.outer(eps_out, eps_in)
    b = b_mu + b_sigma * eps_out
    return w.T, b                                       # (in_f, out_f) for x @ W


# ----------------------------- pure-JAX reference -------------------------

def reference_forward(x_nchw, params):
    x = x_nchw.astype(jnp.float32) / 255.0

    def conv(x, w, b, s):
        y = jax.lax.conv_general_dilated(
            x, w, (s, s), 'VALID',
            dimension_numbers=('NCHW', 'HWIO', 'NCHW'),
            precision=jax.lax.Precision.HIGHEST)
        return jax.nn.relu(y + b[None, :, None, None])

    y = conv(x, *params['conv1'], 4)
    y = conv(y, *params['conv2'], 2)
    y = conv(y, *params['conv3'], 1)
    feat = y.reshape(y.shape[0], -1)
    wv1, bv1, wv2, bv2, wa1, ba1, wa2, ba2 = params['head']
    dot = lambda a, b: jnp.dot(a, b, precision=jax.lax.Precision.HIGHEST)
    v = dot(jax.nn.relu(dot(feat, wv1) + bv1), wv2) + bv2
    a = dot(jax.nn.relu(dot(feat, wa1) + ba1), wa2) + ba2
    return v + (a - a.mean(axis=1, keepdims=True))


# ---------------------------------- main -----------------------------------

if __name__ == "__main__":
    key = jax.random.PRNGKey(0)
    in_c, n_actions, B = 4, 6, 2
    H, W = 84, 90      # DuelingCNN derives feat_dim from an (84, 90) dummy input

    ks = jax.random.split(key, 8)
    params = {
        'conv1': init_conv(ks[0], in_c, 32, 8),
        'conv2': init_conv(ks[1], 32, 64, 4),
        'conv3': init_conv(ks[2], 64, 64, 3),
    }
    feat_dim = 64 * 7 * 7                              # 3136, as in the PyTorch module
    wv1, bv1 = init_noisy(ks[3], feat_dim, 512)
    wv2, bv2 = init_noisy(ks[4], 512, 1)
    wa1, ba1 = init_noisy(ks[5], feat_dim, 512)
    wa2, ba2 = init_noisy(ks[6], 512, n_actions)
    params['head'] = (wv1, bv1, wv2, bv2, wa1, ba1, wa2, ba2)

    x = jax.random.uniform(ks[7], (B, in_c, H, W), jnp.float32, 0.0, 255.0)

    prep = prepare_params(params, B)

    q = jax.block_until_ready(dueling_cnn_forward(x, prep))
    assert q.shape == (B, n_actions)
    assert bool(jnp.all(jnp.isfinite(q)))

    q_ref = jax.block_until_ready(reference_forward(x, params))
    rel_err = float(jnp.max(jnp.abs(q - q_ref)) / (jnp.max(jnp.abs(q_ref)) + 1e-6))
    assert rel_err < 1e-2, f"mismatch vs reference, rel_err={rel_err}"

    print("KERNEL_OK")
</pallas_src>

<mosaic_0001>
module attributes {stable_mosaic.version = 11 : i64} {
  func.func @_conv_stack_kernel(%arg0: i32, %arg1: memref<888x256xf32, #tpu.memory_space<vmem>>, %arg2: memref<256x32xf32, #tpu.memory_space<vmem>>, %arg3: memref<1x32xf32, #tpu.memory_space<vmem>>, %arg4: memref<512x64xf32, #tpu.memory_space<vmem>>, %arg5: memref<1x64xf32, #tpu.memory_space<vmem>>, %arg6: memref<576x64xf32, #tpu.memory_space<vmem>>, %arg7: memref<1x64xf32, #tpu.memory_space<vmem>>, %arg8: memref<100x187xf32, #tpu.memory_space<vmem>>, %arg9: memref<100x64xf32, #tpu.memory_space<vmem>>) attributes {dimension_semantics = [#tpu.dimension_semantics<arbitrary>], iteration_bounds = array<i64: 1>, scalar_prefetch = 0 : i64, scratch_operands = 0 : i64, tpu.core_type = #tpu.core_type<tc>, window_params = [{pipeline_mode = #tpu.pipeline_mode<synchronous>, transform_indices = @transform_0, window_bounds = array<i64: 888, 256>}, {pipeline_mode = #tpu.pipeline_mode<synchronous>, transform_indices = @transform_1, window_bounds = array<i64: 256, 32>}, {pipeline_mode = #tpu.pipeline_mode<synchronous>, transform_indices = @transform_2, window_bounds = array<i64: 1, 32>}, {pipeline_mode = #tpu.pipeline_mode<synchronous>, transform_indices = @transform_3, window_bounds = array<i64: 512, 64>}, {pipeline_mode = #tpu.pipeline_mode<synchronous>, transform_indices = @transform_4, window_bounds = array<i64: 1, 64>}, {pipeline_mode = #tpu.pipeline_mode<synchronous>, transform_indices = @transform_5, window_bounds = array<i64: 576, 64>}, {pipeline_mode = #tpu.pipeline_mode<synchronous>, transform_indices = @transform_6, window_bounds = array<i64: 1, 64>}, {pipeline_mode = #tpu.pipeline_mode<synchronous>, transform_indices = @transform_7, window_bounds = array<i64: 100, 187>}, {pipeline_mode = #tpu.pipeline_mode<synchronous>, transform_indices = @transform_8, window_bounds = array<i64: 100, 64>}]} {
    %c0 = arith.constant 0 : index
    %c0_0 = arith.constant 0 : index
    %0 = vector.load %arg1[%c0, %c0_0] : memref<888x256xf32, #tpu.memory_space<vmem>>, vector<888x256xf32>
    %c0_1 = arith.constant 0 : index
    %c0_2 = arith.constant 0 : index
    %1 = vector.load %arg2[%c0_1, %c0_2] : memref<256x32xf32, #tpu.memory_space<vmem>>, vector<256x32xf32>
    %cst = arith.constant dense<0.000000e+00> : vector<888x32xf32>
    %2 = tpu.matmul %0, %1, %cst {dimension_numbers = #tpu.dot_dimension_numbers<[1], [0], [0], [1], [0, 0, 1, 1], [], []>} : vector<888x256xf32>, vector<256x32xf32>, vector<888x32xf32> -> vector<888x32xf32>
    %c0_3 = arith.constant 0 : index
    %c0_4 = arith.constant 0 : index
    %3 = vector.load %arg3[%c0_3, %c0_4] : memref<1x32xf32, #tpu.memory_space<vmem>>, vector<1x32xf32>
    %4 = vector.broadcast %3 : vector<1x32xf32> to vector<888x32xf32>
    %5 = arith.addf %2, %4 : vector<888x32xf32>
    %cst_5 = arith.constant 0.000000e+00 : f32
    %6 = vector.broadcast %cst_5 : f32 to vector<888x32xf32>
    %7 = arith.maximumf %5, %6 : vector<888x32xf32>
    %c0_6 = arith.constant 0 : index
    %c0_7 = arith.constant 0 : index
    %8 = vector.load %arg4[%c0_6, %c0_7] : memref<512x64xf32, #tpu.memory_space<vmem>>, vector<512x64xf32>
    %cst_8 = arith.constant 0.000000e+00 : f32
    %9 = vector.broadcast %cst_8 : f32 to vector<214x64xf32>
    %10 = vector.extract_strided_slice %7 {offsets = [0, 0], sizes = [214, 32], strides = [1, 1]} : vector<888x32xf32> to vector<214x32xf32>
    %11 = vector.extract_strided_slice %8 {offsets = [0, 0], sizes = [32, 64], strides = [1, 1]} : vector<512x64xf32> to vector<32x64xf32>
    %cst_9 = arith.constant dense<0.000000e+00> : vector<214x64xf32>
    %12 = tpu.matmul %10, %11, %cst_9 {dimension_numbers = #tpu.dot_dimension_numbers<[1], [0], [0], [1], [0, 0, 1, 1], [], []>} : vector<214x32xf32>, vector<32x64xf32>, vector<214x64xf32> -> vector<214x64xf32>
    %13 = arith.addf %9, %12 : vector<214x64xf32>
    %14 = vector.extract_strided_slice %7 {offsets = [220, 0], sizes = [214, 32], strides = [1, 1]} : vector<888x32xf32> to vector<214x32xf32>
    %15 = vector.extract_strided_slice %8 {offsets = [32, 0], sizes = [32, 64], strides = [1, 1]} : vector<512x64xf32> to vector<32x64xf32>
    %cst_10 = arith.constant dense<0.000000e+00> : vector<214x64xf32>
    %16 = tpu.matmul %14, %15, %cst_10 {dimension_numbers = #tpu.dot_dimension_numbers<[1], [0], [0], [1], [0, 0, 1, 1], [], []>} : vector<214x32xf32>, vector<32x64xf32>, vector<214x64xf32> -> vector<214x64xf32>
    %17 = arith.addf %13, %16 : vector<214x64xf32>
    %18 = vector.extract_strided_slice %7 {offsets = [1, 0], sizes = [214, 32], strides = [1, 1]} : vector<888x32xf32> to vector<214x32xf32>
    %19 = vector.extract_strided_slice %8 {offsets = [64, 0], sizes = [32, 64], strides = [1, 1]} : vector<512x64xf32> to vector<32x64xf32>
    %cst_11 = arith.constant dense<0.000000e+00> : vector<214x64xf32>
    %20 = tpu.matmul %18, %19, %cst_11 {dimension_numbers = #tpu.dot_dimension_numbers<[1], [0], [0], [1], [0, 0, 1, 1], [], []>} : vector<214x32xf32>, vector<32x64xf32>, vector<214x64xf32> -> vector<214x64xf32>
    %21 = arith.addf %17, %20 : vector<214x64xf32>
    %22 = vector.extract_strided_slice %7 {offsets = [221, 0], sizes = [214, 32], strides = [1, 1]} : vector<888x32xf32> to vector<214x32xf32>
    %23 = vector.extract_strided_slice %8 {offsets = [96, 0], sizes = [32, 64], strides = [1, 1]} : vector<512x64xf32> to vector<32x64xf32>
    %cst_12 = arith.constant dense<0.000000e+00> : vector<214x64xf32>
    %24 = tpu.matmul %22, %23, %cst_12 {dimension_numbers = #tpu.dot_dimension_numbers<[1], [0], [0], [1], [0, 0, 1, 1], [], []>} : vector<214x32xf32>, vector<32x64xf32>, vector<214x64xf32> -> vector<214x64xf32>
    %25 = arith.addf %21, %24 : vector<214x64xf32>
    %26 = vector.extract_strided_slice %7 {offsets = [440, 0], sizes = [214, 32], strides = [1, 1]} : vector<888x32xf32> to vector<214x32xf32>
    %27 = vector.extract_strided_slice %8 {offsets = [128, 0], sizes = [32, 64], strides = [1, 1]} : vector<512x64xf32> to vector<32x64xf32>
    %cst_13 = arith.constant dense<0.000000e+00> : vector<214x64xf32>
    %28 = tpu.matmul %26, %27, %cst_13 {dimension_numbers = #tpu.dot_dimension_numbers<[1], [0], [0], [1], [0, 0, 1, 1], [], []>} : vector<214x32xf32>, vector<32x64xf32>, vector<214x64xf32> -> vector<214x64xf32>
    %29 = arith.addf %25, %28 : vector<214x64xf32>
    %30 = vector.extract_strided_slice %7 {offsets = [660, 0], sizes = [214, 32], strides = [1, 1]} : vector<888x32xf32> to vector<214x32xf32>
    %31 = vector.extract_strided_slice %8 {offsets = [160, 0], sizes = [32, 64], strides = [1, 1]} : vector<512x64xf32> to vector<32x64xf32>
    %cst_14 = arith.constant dense<0.000000e+00> : vector<214x64xf32>
    %32 = tpu.matmul %30, %31, %cst_14 {dimension_numbers = #tpu.dot_dimension_numbers<[1], [0], [0], [1], [0, 0, 1, 1], [], []>} : vector<214x32xf32>, vector<32x64xf32>, vector<214x64xf32> -> vector<214x64xf32>
    %33 = arith.addf %29, %32 : vector<214x64xf32>
    %34 = vector.extract_strided_slice %7 {offsets = [441, 0], sizes = [214, 32], strides = [1, 1]} : vector<888x32xf32> to vector<214x32xf32>
    %35 = vector.extract_strided_slice %8 {offsets = [192, 0], sizes = [32, 64], strides = [1, 1]} : vector<512x64xf32> to vector<32x64xf32>
    %cst_15 = arith.constant dense<0.000000e+00> : vector<214x64xf32>
    %36 = tpu.matmul %34, %35, %cst_15 {dimension_numbers = #tpu.dot_dimension_numbers<[1], [0], [0], [1], [0, 0, 1, 1], [], []>} : vector<214x32xf32>, vector<32x64xf32>, vector<214x64xf32> -> vector<214x64xf32>
    %37 = arith.addf %33, %36 : vector<214x64xf32>
    %38 = vector.extract_strided_slice %7 {offsets = [661, 0], sizes = [214, 32], strides = [1, 1]} : vector<888x32xf32> to vector<214x32xf32>
    %39 = vector.extract_strided_slice %8 {offsets = [224, 0], sizes = [32, 64], strides = [1, 1]} : vector<512x64xf32> to vector<32x64xf32>
    %cst_16 = arith.constant dense<0.000000e+00> : vector<214x64xf32>
    %40 = tpu.matmul %38, %39, %cst_16 {dimension_numbers = #tpu.dot_dimension_numbers<[1], [0], [0], [1], [0, 0, 1, 1], [], []>} : vector<214x32xf32>, vector<32x64xf32>, vector<214x64xf32> -> vector<214x64xf32>
    %41 = arith.addf %37, %40 : vector<214x64xf32>
    %42 = vector.extract_strided_slice %7 {offsets = [11, 0], sizes = [214, 32], strides = [1, 1]} : vector<888x32xf32> to vector<214x32xf32>
    %43 = vector.extract_strided_slice %8 {offsets = [256, 0], sizes = [32, 64], strides = [1, 1]} : vector<512x64xf32> to vector<32x64xf32>
    %cst_17 = arith.constant dense<0.000000e+00> : vector<214x64xf32>
    %44 = tpu.matmul %42, %43, %cst_17 {dimension_numbers = #tpu.dot_dimension_numbers<[1], [0], [0], [1], [0, 0, 1, 1], [], []>} : vector<214x32xf32>, vector<32x64xf32>, vector<214x64xf32> -> vector<214x64xf32>
    %45 = arith.addf %41, %44 : vector<214x64xf32>
    %46 = vector.extract_strided_slice %7 {offsets = [231, 0], sizes = [214, 32], strides = [1, 1]} : vector<888x32xf32> to vector<214x32xf32>
    %47 = vector.extract_strided_slice %8 {offsets = [288, 0], sizes = [32, 64], strides = [1, 1]} : vector<512x64xf32> to vector<32x64xf32>
    %cst_18 = arith.constant dense<0.000000e+00> : vector<214x64xf32>
    %48 = tpu.matmul %46, %47, %cst_18 {dimension_numbers = #tpu.dot_dimension_numbers<[1], [0], [0], [1], [0, 0, 1, 1], [], []>} : vector<214x32xf32>, vector<32x64xf32>, vector<214x64xf32> -> vector<214x64xf32>
    %49 = arith.addf %45, %48 : vector<214x64xf32>
    %50 = vector.extract_strided_slice %7 {offsets = [12, 0], sizes = [214, 32], strides = [1, 1]} : vector<888x32xf32> to vector<214x32xf32>
    %51 = vector.extract_strided_slice %8 {offsets = [320, 0], sizes = [32, 64], strides = [1, 1]} : vector<512x64xf32> to vector<32x64xf32>
    %cst_19 = arith.constant dense<0.000000e+00> : vector<214x64xf32>
    %52 = tpu.matmul %50, %51, %cst_19 {dimension_numbers = #tpu.dot_dimension_numbers<[1], [0], [0], [1], [0, 0, 1, 1], [], []>} : vector<214x32xf32>, vector<32x64xf32>, vector<214x64xf32> -> vector<214x64xf32>
    %53 = arith.addf %49, %52 : vector<214x64xf32>
    %54 = vector.extract_strided_slice %7 {offsets = [232, 0], sizes = [214, 32], strides = [1, 1]} : vector<888x32xf32> to vector<214x32xf32>
    %55 = vector.extract_strided_slice %8 {offsets = [352, 0], sizes = [32, 64], strides = [1, 1]} : vector<512x64xf32> to vector<32x64xf32>
    %cst_20 = arith.constant dense<0.000000e+00> : vector<214x64xf32>
    %56 = tpu.matmul %54, %55, %cst_20 {dimension_numbers = #tpu.dot_dimension_numbers<[1], [0], [0], [1], [0, 0, 1, 1], [], []>} : vector<214x32xf32>, vector<32x64xf32>, vector<214x64xf32> -> vector<214x64xf32>
    %57 = arith.addf %53, %56 : vector<214x64xf32>
    %58 = vector.extract_strided_slice %7 {offsets = [451, 0], sizes = [214, 32], strides = [1, 1]} : vector<888x32xf32> to vector<214x32xf32>
    %59 = vector.extract_strided_slice %8 {offsets = [384, 0], sizes = [32, 64], strides = [1, 1]} : vector<512x64xf32> to vector<32x64xf32>
    %cst_21 = arith.constant dense<0.000000e+00> : vector<214x64xf32>
    %60 = tpu.matmul %58, %59, %cst_21 {dimension_numbers = #tpu.dot_dimension_numbers<[1], [0], [0], [1], [0, 0, 1, 1], [], []>} : vector<214x32xf32>, vector<32x64xf32>, vector<214x64xf32> -> vector<214x64xf32>
    %61 = arith.addf %57, %60 : vector<214x64xf32>
    %62 = vector.extract_strided_slice %7 {offsets = [671, 0], sizes = [214, 32], strides = [1, 1]} : vector<888x32xf32> to vector<214x32xf32>
    %63 = vector.extract_strided_slice %8 {offsets = [416, 0], sizes = [32, 64], strides = [1, 1]} : vector<512x64xf32> to vector<32x64xf32>
    %cst_22 = arith.constant dense<0.000000e+00> : vector<214x64xf32>
    %64 = tpu.matmul %62, %63, %cst_22 {dimension_numbers = #tpu.dot_dimension_numbers<[1], [0], [0], [1], [0, 0, 1, 1], [], []>} : vector<214x32xf32>, vector<32x64xf32>, vector<214x64xf32> -> vector<214x64xf32>
    %65 = arith.addf %61, %64 : vector<214x64xf32>
    %66 = vector.extract_strided_slice %7 {offsets = [452, 0], sizes = [214, 32], strides = [1, 1]} : vector<888x32xf32> to vector<214x32xf32>
    %67 = vector.extract_strided_slice %8 {offsets = [448, 0], sizes = [32, 64], strides = [1, 1]} : vector<512x64xf32> to vector<32x64xf32>
    %cst_23 = arith.constant dense<0.000000e+00> : vector<214x64xf32>
    %68 = tpu.matmul %66, %67, %cst_23 {dimension_numbers = #tpu.dot_dimension_numbers<[1], [0], [0], [1], [0, 0, 1, 1], [], []>} : vector<214x32xf32>, vector<32x64xf32>, vector<214x64xf32> -> vector<214x64xf32>
    %69 = arith.addf %65, %68 : vector<214x64xf32>
    %70 = vector.extract_strided_slice %7 {offsets = [672, 0], sizes = [214, 32], strides = [1, 1]} : vector<888x32xf32> to vector<214x32xf32>
    %71 = vector.extract_strided_slice %8 {offsets = [480, 0], sizes = [32, 64], strides = [1, 1]} : vector<512x64xf32> to vector<32x64xf32>
    %cst_24 = arith.constant dense<0.000000e+00> : vector<214x64xf32>
    %72 = tpu.matmul %70, %71, %cst_24 {dimension_numbers = #tpu.dot_dimension_numbers<[1], [0], [0], [1], [0, 0, 1, 1], [], []>} : vector<214x32xf32>, vector<32x64xf32>, vector<214x64xf32> -> vector<214x64xf32>
    %73 = arith.addf %69, %72 : vector<214x64xf32>
    %c0_25 = arith.constant 0 : index
    %c0_26 = arith.constant 0 : index
    %74 = vector.load %arg5[%c0_25, %c0_26] : memref<1x64xf32, #tpu.memory_space<vmem>>, vector<1x64xf32>
    %75 = vector.broadcast %74 : vector<1x64xf32> to vector<214x64xf32>
    %76 = arith.addf %73, %75 : vector<214x64xf32>
    %cst_27 = arith.constant 0.000000e+00 : f32
    %77 = vector.broadcast %cst_27 : f32 to vector<214x64xf32>
    %78 = arith.maximumf %76, %77 : vector<214x64xf32>
    %c0_28 = arith.constant 0 : index
    %c0_29 = arith.constant 0 : index
    %79 = vector.load %arg6[%c0_28, %c0_29] : memref<576x64xf32, #tpu.memory_space<vmem>>, vector<576x64xf32>
    %cst_30 = arith.constant 0.000000e+00 : f32
    %80 = vector.broadcast %cst_30 : f32 to vector<187x64xf32>
    %81 = vector.extract_strided_slice %78 {offsets = [0, 0], sizes = [187, 64], strides = [1, 1]} : vector<214x64xf32> to vector<187x64xf32>
    %82 = vector.extract_strided_slice %79 {offsets = [0, 0], sizes = [64, 64], strides = [1, 1]} : vector<576x64xf32> to vector<64x64xf32>
    %cst_31 = arith.constant dense<0.000000e+00> : vector<187x64xf32>
    %83 = tpu.matmul %81, %82, %cst_31 {dimension_numbers = #tpu.dot_dimension_numbers<[1], [0], [0], [1], [0, 0, 1, 1], [], []>} : vector<187x64xf32>, vector<64x64xf32>, vector<187x64xf32> -> vector<187x64xf32>
    %84 = arith.addf %80, %83 : vector<187x64xf32>
    %85 = vector.extract_strided_slice %78 {offsets = [1, 0], sizes = [187, 64], strides = [1, 1]} : vector<214x64xf32> to vector<187x64xf32>
    %86 = vector.extract_strided_slice %79 {offsets = [64, 0], sizes = [64, 64], strides = [1, 1]} : vector<576x64xf32> to vector<64x64xf32>
    %cst_32 = arith.constant dense<0.000000e+00> : vector<187x64xf32>
    %87 = tpu.matmul %85, %86, %cst_32 {dimension_numbers = #tpu.dot_dimension_numbers<[1], [0], [0], [1], [0, 0, 1, 1], [], []>} : vector<187x64xf32>, vector<64x64xf32>, vector<187x64xf32> -> vector<187x64xf32>
    %88 = arith.addf %84, %87 : vector<187x64xf32>
    %89 = vector.extract_strided_slice %78 {offsets = [2, 0], sizes = [187, 64], strides = [1, 1]} : vector<214x64xf32> to vector<187x64xf32>
    %90 = vector.extract_strided_slice %79 {offsets = [128, 0], sizes = [64, 64], strides = [1, 1]} : vector<576x64xf32> to vector<64x64xf32>
    %cst_33 = arith.constant dense<0.000000e+00> : vector<187x64xf32>
    %91 = tpu.matmul %89, %90, %cst_33 {dimension_numbers = #tpu.dot_dimension_numbers<[1], [0], [0], [1], [0, 0, 1, 1], [], []>} : vector<187x64xf32>, vector<64x64xf32>, vector<187x64xf32> -> vector<187x64xf32>
    %92 = arith.addf %88, %91 : vector<187x64xf32>
    %93 = vector.extract_strided_slice %78 {offsets = [11, 0], sizes = [187, 64], strides = [1, 1]} : vector<214x64xf32> to vector<187x64xf32>
    %94 = vector.extract_strided_slice %79 {offsets = [192, 0], sizes = [64, 64], strides = [1, 1]} : vector<576x64xf32> to vector<64x64xf32>
    %cst_34 = arith.constant dense<0.000000e+00> : vector<187x64xf32>
    %95 = tpu.matmul %93, %94, %cst_34 {dimension_numbers = #tpu.dot_dimension_numbers<[1], [0], [0], [1], [0, 0, 1, 1], [], []>} : vector<187x64xf32>, vector<64x64xf32>, vector<187x64xf32> -> vector<187x64xf32>
    %96 = arith.addf %92, %95 : vector<187x64xf32>
    %97 = vector.extract_strided_slice %78 {offsets = [12, 0], sizes = [187, 64], strides = [1, 1]} : vector<214x64xf32> to vector<187x64xf32>
    %98 = vector.extract_strided_slice %79 {offsets = [256, 0], sizes = [64, 64], strides = [1, 1]} : vector<576x64xf32> to vector<64x64xf32>
    %cst_35 = arith.constant dense<0.000000e+00> : vector<187x64xf32>
    %99 = tpu.matmul %97, %98, %cst_35 {dimension_numbers = #tpu.dot_dimension_numbers<[1], [0], [0], [1], [0, 0, 1, 1], [], []>} : vector<187x64xf32>, vector<64x64xf32>, vector<187x64xf32> -> vector<187x64xf32>
    %100 = arith.addf %96, %99 : vector<187x64xf32>
    %101 = vector.extract_strided_slice %78 {offsets = [13, 0], sizes = [187, 64], strides = [1, 1]} : vector<214x64xf32> to vector<187x64xf32>
    %102 = vector.extract_strided_slice %79 {offsets = [320, 0], sizes = [64, 64], strides = [1, 1]} : vector<576x64xf32> to vector<64x64xf32>
    %cst_36 = arith.constant dense<0.000000e+00> : vector<187x64xf32>
    %103 = tpu.matmul %101, %102, %cst_36 {dimension_numbers = #tpu.dot_dimension_numbers<[1], [0], [0], [1], [0, 0, 1, 1], [], []>} : vector<187x64xf32>, vector<64x64xf32>, vector<187x64xf32> -> vector<187x64xf32>
    %104 = arith.addf %100, %103 : vector<187x64xf32>
    %105 = vector.extract_strided_slice %78 {offsets = [22, 0], sizes = [187, 64], strides = [1, 1]} : vector<214x64xf32> to vector<187x64xf32>
    %106 = vector.extract_strided_slice %79 {offsets = [384, 0], sizes = [64, 64], strides = [1, 1]} : vector<576x64xf32> to vector<64x64xf32>
    %cst_37 = arith.constant dense<0.000000e+00> : vector<187x64xf32>
    %107 = tpu.matmul %105, %106, %cst_37 {dimension_numbers = #tpu.dot_dimension_numbers<[1], [0], [0], [1], [0, 0, 1, 1], [], []>} : vector<187x64xf32>, vector<64x64xf32>, vector<187x64xf32> -> vector<187x64xf32>
    %108 = arith.addf %104, %107 : vector<187x64xf32>
    %109 = vector.extract_strided_slice %78 {offsets = [23, 0], sizes = [187, 64], strides = [1, 1]} : vector<214x64xf32> to vector<187x64xf32>
    %110 = vector.extract_strided_slice %79 {offsets = [448, 0], sizes = [64, 64], strides = [1, 1]} : vector<576x64xf32> to vector<64x64xf32>
    %cst_38 = arith.constant dense<0.000000e+00> : vector<187x64xf32>
    %111 = tpu.matmul %109, %110, %cst_38 {dimension_numbers = #tpu.dot_dimension_numbers<[1], [0], [0], [1], [0, 0, 1, 1], [], []>} : vector<187x64xf32>, vector<64x64xf32>, vector<187x64xf32> -> vector<187x64xf32>
    %112 = arith.addf %108, %111 : vector<187x64xf32>
    %113 = vector.extract_strided_slice %78 {offsets = [24, 0], sizes = [187, 64], strides = [1, 1]} : vector<214x64xf32> to vector<187x64xf32>
    %114 = vector.extract_strided_slice %79 {offsets = [512, 0], sizes = [64, 64], strides = [1, 1]} : vector<576x64xf32> to vector<64x64xf32>
    %cst_39 = arith.constant dense<0.000000e+00> : vector<187x64xf32>
    %115 = tpu.matmul %113, %114, %cst_39 {dimension_numbers = #tpu.dot_dimension_numbers<[1], [0], [0], [1], [0, 0, 1, 1], [], []>} : vector<187x64xf32>, vector<64x64xf32>, vector<187x64xf32> -> vector<187x64xf32>
    %116 = arith.addf %112, %115 : vector<187x64xf32>
    %c0_40 = arith.constant 0 : index
    %c0_41 = arith.constant 0 : index
    %117 = vector.load %arg7[%c0_40, %c0_41] : memref<1x64xf32, #tpu.memory_space<vmem>>, vector<1x64xf32>
    %118 = vector.broadcast %117 : vector<1x64xf32> to vector<187x64xf32>
    %119 = arith.addf %116, %118 : vector<187x64xf32>
    %cst_42 = arith.constant 0.000000e+00 : f32
    %120 = vector.broadcast %cst_42 : f32 to vector<187x64xf32>
    %121 = arith.maximumf %119, %120 : vector<187x64xf32>
    %c0_43 = arith.constant 0 : index
    %c0_44 = arith.constant 0 : index
    %122 = vector.load %arg8[%c0_43, %c0_44] : memref<100x187xf32, #tpu.memory_space<vmem>>, vector<100x187xf32>
    %cst_45 = arith.constant dense<0.000000e+00> : vector<100x64xf32>
    %123 = tpu.matmul %122, %121, %cst_45 {dimension_numbers = #tpu.dot_dimension_numbers<[1], [0], [0], [1], [0, 0, 1, 1], [], []>} : vector<100x187xf32>, vector<187x64xf32>, vector<100x64xf32> -> vector<100x64xf32>
    %c0_46 = arith.constant 0 : index
    %c0_47 = arith.constant 0 : index
    %124 = vector.load %arg9[%c0_46, %c0_47] : memref<100x64xf32, #tpu.memory_space<vmem>>, vector<100x64xf32>
    tpu.vector_store %arg9[%c0_46, %c0_47], %123 {strides = array<i32>} : memref<100x64xf32, #tpu.memory_space<vmem>>, vector<100x64xf32>,
    return
  }
  func.func @transform_0(%arg0: i32) -> (i32, i32) {
    %c0_i32 = arith.constant 0 : i32
    %c0_i32_0 = arith.constant 0 : i32
    %c0_i32_1 = arith.constant 0 : i32
    return %c0_i32, %c0_i32_0 : i32, i32
  }
  func.func @transform_1(%arg0: i32) -> (i32, i32) {
    %c0_i32 = arith.constant 0 : i32
    %c0_i32_0 = arith.constant 0 : i32
    %c0_i32_1 = arith.constant 0 : i32
    return %c0_i32, %c0_i32_0 : i32, i32
  }
  func.func @transform_2(%arg0: i32) -> (i32, i32) {
    %c0_i32 = arith.constant 0 : i32
    %c0_i32_0 = arith.constant 0 : i32
    %c0_i32_1 = arith.constant 0 : i32
    return %c0_i32, %c0_i32_0 : i32, i32
  }
  func.func @transform_3(%arg0: i32) -> (i32, i32) {
    %c0_i32 = arith.constant 0 : i32
    %c0_i32_0 = arith.constant 0 : i32
    %c0_i32_1 = arith.constant 0 : i32
    return %c0_i32, %c0_i32_0 : i32, i32
  }
  func.func @transform_4(%arg0: i32) -> (i32, i32) {
    %c0_i32 = arith.constant 0 : i32
    %c0_i32_0 = arith.constant 0 : i32
    %c0_i32_1 = arith.constant 0 : i32
    return %c0_i32, %c0_i32_0 : i32, i32
  }
  func.func @transform_5(%arg0: i32) -> (i32, i32) {
    %c0_i32 = arith.constant 0 : i32
    %c0_i32_0 = arith.constant 0 : i32
    %c0_i32_1 = arith.constant 0 : i32
    return %c0_i32, %c0_i32_0 : i32, i32
  }
  func.func @transform_6(%arg0: i32) -> (i32, i32) {
    %c0_i32 = arith.constant 0 : i32
    %c0_i32_0 = arith.constant 0 : i32
    %c0_i32_1 = arith.constant 0 : i32
    return %c0_i32, %c0_i32_0 : i32, i32
  }
  func.func @transform_7(%arg0: i32) -> (i32, i32) {
    %c0_i32 = arith.constant 0 : i32
    %c0_i32_0 = arith.constant 0 : i32
    %c0_i32_1 = arith.constant 0 : i32
    return %c0_i32, %c0_i32_0 : i32, i32
  }
  func.func @transform_8(%arg0: i32) -> (i32, i32) {
    %c0_i32 = arith.constant 0 : i32
    %c0_i32_0 = arith.constant 0 : i32
    %c0_i32_1 = arith.constant 0 : i32
    return %c0_i32, %c0_i32_0 : i32, i32
  }
}

module attributes {stable_mosaic.version = 11 : i64} {
  func.func @_dueling_head_kernel(%arg0: i32, %arg1: i32, %arg2: memref<2x640xf32, #tpu.memory_space<vmem>>, %arg3: memref<640x512xbf16, #tpu.memory_space<vmem>>, %arg4: memref<1x512xf32, #tpu.memory_space<vmem>>, %arg5: memref<512x6xf32, #tpu.memory_space<vmem>>, %arg6: memref<1x2x6xf32, #tpu.memory_space<vmem>>, %arg7: memref<2x512xf32, #tpu.memory_space<vmem>>) attributes {dimension_semantics = [#tpu.dimension_semantics<parallel>, #tpu.dimension_semantics<arbitrary>], iteration_bounds = array<i64: 2, 5>, scalar_prefetch = 0 : i64, scratch_operands = 1 : i64, tpu.core_type = #tpu.core_type<tc>, window_params = [{transform_indices = @transform_0, window_bounds = array<i64: 2, 640>}, {transform_indices = @transform_1, window_bounds = array<i64: 640, 512>}, {transform_indices = @transform_2, window_bounds = array<i64: 1, 512>}, {transform_indices = @transform_3, window_bounds = array<i64: 512, 6>}, {transform_indices = @transform_4, window_bounds = array<i64: 1, 2, 6>}]} {
    %c0_i32 = arith.constant 0 : i32
    %0 = arith.cmpi eq, %arg1, %c0_i32 : i32
    %1 = arith.extui %0 : i1 to i32
    %c0_i32_0 = arith.constant 0 : i32
    %2 = arith.cmpi ne, %1, %c0_i32_0 : i32
    scf.if %2 {
      %cst_9 = arith.constant 0.000000e+00 : f32
      %13 = vector.broadcast %cst_9 : f32 to vector<2x512xf32>
      %c0_10 = arith.constant 0 : index
      %c0_11 = arith.constant 0 : index
      %14 = vector.load %arg7[%c0_10, %c0_11] : memref<2x512xf32, #tpu.memory_space<vmem>>, vector<2x512xf32>
      tpu.vector_store %arg7[%c0_10, %c0_11], %13 {strides = array<i32>} : memref<2x512xf32, #tpu.memory_space<vmem>>, vector<2x512xf32>,
    } else {
    }
    %c0 = arith.constant 0 : index
    %c0_1 = arith.constant 0 : index
    %3 = vector.load %arg7[%c0, %c0_1] : memref<2x512xf32, #tpu.memory_space<vmem>>, vector<2x512xf32>
    %c0_2 = arith.constant 0 : index
    %c0_3 = arith.constant 0 : index
    %4 = vector.load %arg2[%c0_2, %c0_3] : memref<2x640xf32, #tpu.memory_space<vmem>>, vector<2x640xf32>
    %5 = arith.truncf %4 : vector<2x640xf32> to vector<2x640xbf16>
    %c0_4 = arith.constant 0 : index
    %c0_5 = arith.constant 0 : index
    %6 = vector.load %arg3[%c0_4, %c0_5] : memref<640x512xbf16, #tpu.memory_space<vmem>>, vector<640x512xbf16>
    %cst = arith.constant dense<0.000000e+00> : vector<2x512xf32>
    %7 = tpu.matmul %5, %6, %cst {dimension_numbers = #tpu.dot_dimension_numbers<[1], [0], [0], [1], [0, 0, 1, 1], [], []>} : vector<2x640xbf16>, vector<640x512xbf16>, vector<2x512xf32> -> vector<2x512xf32>
    %8 = arith.addf %3, %7 : vector<2x512xf32>
    %c0_6 = arith.constant 0 : index
    %c0_7 = arith.constant 0 : index
    %9 = vector.load %arg7[%c0_6, %c0_7] : memref<2x512xf32, #tpu.memory_space<vmem>>, vector<2x512xf32>
    tpu.vector_store %arg7[%c0_6, %c0_7], %8 {strides = array<i32>} : memref<2x512xf32, #tpu.memory_space<vmem>>, vector<2x512xf32>,
    %c4_i32 = arith.constant 4 : i32
    %10 = arith.cmpi eq, %arg1, %c4_i32 : i32
    %11 = arith.extui %10 : i1 to i32
    %c0_i32_8 = arith.constant 0 : i32
    %12 = arith.cmpi ne, %11, %c0_i32_8 : i32
    scf.if %12 {
      %c0_9 = arith.constant 0 : index
      %c0_10 = arith.constant 0 : index
      %13 = vector.load %arg7[%c0_9, %c0_10] : memref<2x512xf32, #tpu.memory_space<vmem>>, vector<2x512xf32>
      %c0_11 = arith.constant 0 : index
      %c0_12 = arith.constant 0 : index
      %14 = vector.load %arg4[%c0_11, %c0_12] : memref<1x512xf32, #tpu.memory_space<vmem>>, vector<1x512xf32>
      %15 = vector.broadcast %14 : vector<1x512xf32> to vector<2x512xf32>
      %16 = arith.addf %13, %15 : vector<2x512xf32>
      %cst_13 = arith.constant 0.000000e+00 : f32
      %17 = vector.broadcast %cst_13 : f32 to vector<2x512xf32>
      %18 = arith.maximumf %16, %17 : vector<2x512xf32>
      %c0_14 = arith.constant 0 : index
      %c0_15 = arith.constant 0 : index
      %19 = vector.load %arg5[%c0_14, %c0_15] : memref<512x6xf32, #tpu.memory_space<vmem>>, vector<512x6xf32>
      %cst_16 = arith.constant dense<0.000000e+00> : vector<2x6xf32>
      %20 = tpu.matmul %18, %19, %cst_16 {dimension_numbers = #tpu.dot_dimension_numbers<[1], [0], [0], [1], [0, 0, 1, 1], [], []>} : vector<2x512xf32>, vector<512x6xf32>, vector<2x6xf32> -> vector<2x6xf32>
      %c0_17 = arith.constant 0 : index
      %c0_18 = arith.constant 0 : index
      %c0_19 = arith.constant 0 : index
      %21 = vector.load %arg6[%c0_17, %c0_18, %c0_19] : memref<1x2x6xf32, #tpu.memory_space<vmem>>, vector<1x2x6xf32>
      %22 = vector.shape_cast %21 : vector<1x2x6xf32> to vector<2x6xf32>
      %23 = vector.shape_cast %20 : vector<2x6xf32> to vector<1x2x6xf32>
      tpu.vector_store %arg6[%c0_17, %c0_18, %c0_19], %23 {strides = array<i32>} : memref<1x2x6xf32, #tpu.memory_space<vmem>>, vector<1x2x6xf32>,
    } else {
    }
    return
  }
  func.func @transform_0(%arg0: i32, %arg1: i32) -> (i32, i32) {
    %c0_i32 = arith.constant 0 : i32
    %c0_i32_0 = arith.constant 0 : i32
    return %c0_i32, %arg1 : i32, i32
  }
  func.func @transform_1(%arg0: i32, %arg1: i32) -> (i32, i32) {
    %c0_i32 = arith.constant 0 : i32
    return %arg1, %arg0 : i32, i32
  }
  func.func @transform_2(%arg0: i32, %arg1: i32) -> (i32, i32) {
    %c0_i32 = arith.constant 0 : i32
    %c0_i32_0 = arith.constant 0 : i32
    return %c0_i32, %arg0 : i32, i32
  }
  func.func @transform_3(%arg0: i32, %arg1: i32) -> (i32, i32) {
    %c0_i32 = arith.constant 0 : i32
    %c0_i32_0 = arith.constant 0 : i32
    return %arg0, %c0_i32 : i32, i32
  }
  func.func @transform_4(%arg0: i32, %arg1: i32) -> (i32, i32, i32) {
    %c0_i32 = arith.constant 0 : i32
    %c0_i32_0 = arith.constant 0 : i32
    %c0_i32_1 = arith.constant 0 : i32
    return %arg0, %c0_i32, %c0_i32_0 : i32, i32, i32
  }
}

</mosaic_0001>

<bundles_post_ra>
// kernel: dueling_cnn_forward.3
= control target key start
LH: loop header
LB: loop body
LE: loop exit
PB: predicated region body
PF: predicated region fallthrough
CT: control target
= control target key end

     0   :  { %s2983_s15 = smov 0   ;;  %s2985_s16 = smov 0   ;;  %s3676_s0 = inlined_call_operand.vmem [shape: f32[2,3200], index: 0, kind: input, shape index: {}]   ;;  %s3677_s1 = inlined_call_operand.vmem [shape: bf16[3200,1024], index: 1, kind: input, shape index: {}]   ;;  %s3678_s2 = inlined_call_operand.vmem [shape: f32[1,1024], index: 2, kind: input, shape index: {}]   ;;  %s3679_s3 = inlined_call_operand.vmem [shape: f32[1024,6], index: 3, kind: input, shape index: {}]   ;;  %s3680_s4 = inlined_call_operand.vmem [shape: f32[2,2,6], index: 4, kind: output, shape index: {}]  }
   0x1   :  { %s2987_s17 = smov 0   ;;  %s2989_s18 = smov 0  }
   0x2   :  { %s2991_s19 = smov 0   ;;  %s2993_s20 = smov 0  }
   0x3   :  { %s2995_s21 = smov 0  }
   0x4 LB: > { %s23_s22 = sadd.s32 1, %s2945_s19  ;;  %s26_s23 = sadd.s32 1, %s2949_s20  ;;  %s2953_s21 = sphi %s2995_s21, %s14_s21   ;;  %s2949_s20 = sphi %s2993_s20, %s3686_s20   ;;  %s2945_s19 = sphi %s2991_s19, %s3685_s19   ;;  %s2941_s18 = sphi %s2989_s18, %s3684_s18   ;;  %s2937_s17 = sphi %s2987_s17, %s3683_s17   ;;  %s2933_s16 = sphi %s2985_s16, %s3682_s16   ;;  %s2929_s15 = sphi %s2983_s15, %s3681_s15  }
   0x5   : > { %p24_p0 = scmp.ge.s32.totalorder %s23_s22, 5  ;;  %p68_p1 = scmp.ne.s32.totalorder %s2933_s16, %s2929_s15 }
   0x6   : > { %p69_p2 = scmp.eq.s32.totalorder %s2953_s21, 0  ;;  %s61_s27 = sadd.s32 1, %s2933_s16 }
   0x7   : > { %s3688_s22 = smov (%p24_p0, %s23_s22), 0  ;;  %s3690_s23 = smov (!%p24_p0, %s26_s23), %s2949_s20 }
   0x8   : > { %p70_p3 = por %p69_p2, %p68_p1  ;;  %p28_p4 = scmp.ge.s32.totalorder %s3690_s23, 2 }
   0x9   : > { %s56_s24 = ssub.s32 %s2945_s19, %s3688_s22  ;;  %p2271_p6 = scmp.ge.s32.totalorder %s2953_s21, 10 }
   0xa   : > { %s3692_s23 = smov (%p28_p4, %s3690_s23), 0 }
   0xb   : > { %s57_s25 = ssub.s32 %s2949_s20, %s3692_s23  ;;  %172 = sbr.rel (%p2271_p6) target bundleno = 106 (0x6a), region = 16 }
   0xc   : > { %s58_s26 = sor.u32 %s57_s25, %s56_s24 }
   0xd   : > { %p59_p5 = scmp.eq.s32.totalorder %s58_s26, 0 }
   0xf   : > { %s3034_s28 = scalar_select %p59_p5, %s2933_s16, %s61_s27  }
  0x12   : > { %184 = sbr.rel (!%p70_p3) target bundleno = 106 (0x6a), region = 24  ;;  %s186_s29 = sand.u32 (%p70_p3), 1, %s2933_s16  }
  0x13   : > { %s2597_s30 = smul.u32 (%p70_p3), 1280, %s186_s29  ;;  %s2272_s5 = sshll.u32 (%p70_p3), %s2949_s20, 2 }
  0x14   : > { %s2446_s6 = smul.u32 (%p70_p3), 640, %s2945_s19 }
  0x15   : > { %s3048_s12 = scalar_lea.vmem (%p70_p3), [#allocation3], %s2597_s30 }
  0x16   : > { %s192_s7 = sadd.s32 (%p70_p3), %s2446_s6, %s2272_s5 }
  0x17   : > { %s2274_s8 = sshll.u32 (%p70_p3), %s192_s7, 2 }
  0x18   : > { %s3043_s11 = scalar_lea.vmem (%p70_p3), %s3677_s1, %s2274_s8 }
  0x19   : > { %v207_v0 = vld [vmem:[%s3043_s11] sm:$0xff]  ;;  %v209_v1 = vld [vmem:[%s3043_s11 + $0x8] sm:$0xff] }
  0x1a   : > { %v211_v2 = vld [vmem:[%s3043_s11 + $0x20] sm:$0xff]  ;;  %208 = vst [vmem:[%s3048_s12] sm:$0xff] %v207_v0  ;;  %210 = vst [vmem:[%s3048_s12 + $0x8] sm:$0xff] %v209_v1  ;;  %v213_v3 = vld [vmem:[%s3043_s11 + $0x28] sm:$0xff] }
  0x1b   : > { %212 = vst [vmem:[%s3048_s12 + $0x10] sm:$0xff] %v211_v2  ;;  %v215_v4 = vld [vmem:[%s3043_s11 + $0x40] sm:$0xff]  ;;  %v217_v5 = vld [vmem:[%s3043_s11 + $0x48] sm:$0xff]  ;;  %214 = vst [vmem:[%s3048_s12 + $0x18] sm:$0xff] %v213_v3 }
  0x1c   : > { %216 = vst [vmem:[%s3048_s12 + $0x20] sm:$0xff] %v215_v4  ;;  %218 = vst [vmem:[%s3048_s12 + $0x28] sm:$0xff] %v217_v5  ;;  %v219_v6 = vld [vmem:[%s3043_s11 + $0x60] sm:$0xff]  ;;  %v221_v7 = vld [vmem:[%s3043_s11 + $0x68] sm:$0xff] }
  0x1d   : > { %v223_v8 = vld [vmem:[%s3043_s11 + $0x80] sm:$0xff]  ;;  %220 = vst [vmem:[%s3048_s12 + $0x30] sm:$0xff] %v219_v6  ;;  %222 = vst [vmem:[%s3048_s12 + $0x38] sm:$0xff] %v221_v7  ;;  %v225_v9 = vld [vmem:[%s3043_s11 + $0x88] sm:$0xff] }
  0x1e   : > { %224 = vst [vmem:[%s3048_s12 + $0x40] sm:$0xff] %v223_v8  ;;  %v227_v10 = vld [vmem:[%s3043_s11 + $0xa0] sm:$0xff]  ;;  %v229_v11 = vld [vmem:[%s3043_s11 + $0xa8] sm:$0xff]  ;;  %226 = vst [vmem:[%s3048_s12 + $0x48] sm:$0xff] %v225_v9 }
  0x1f   : > { %228 = vst [vmem:[%s3048_s12 + $0x50] sm:$0xff] %v227_v10  ;;  %230 = vst [vmem:[%s3048_s12 + $0x58] sm:$0xff] %v229_v11  ;;  %v231_v12 = vld [vmem:[%s3043_s11 + $0xc0] sm:$0xff]  ;;  %v233_v13 = vld [vmem:[%s3043_s11 + $0xc8] sm:$0xff] }
  0x20   : > { %v235_v14 = vld [vmem:[%s3043_s11 + $0xe0] sm:$0xff]  ;;  %232 = vst [vmem:[%s3048_s12 + $0x60] sm:$0xff] %v231_v12  ;;  %234 = vst [vmem:[%s3048_s12 + $0x68] sm:$0xff] %v233_v13  ;;  %v237_v15 = vld [vmem:[%s3043_s11 + $0xe8] sm:$0xff] }
  0x21   : > { %236 = vst [vmem:[%s3048_s12 + $0x70] sm:$0xff] %v235_v14  ;;  %v239_v16 = vld [vmem:[%s3043_s11 + $0x100] sm:$0xff]  ;;  %v241_v17 = vld [vmem:[%s3043_s11 + $0x108] sm:$0xff]  ;;  %238 = vst [vmem:[%s3048_s12 + $0x78] sm:$0xff] %v237_v15 }
  0x22   : > { %240 = vst [vmem:[%s3048_s12 + $0x80] sm:$0xff] %v239_v16  ;;  %242 = vst [vmem:[%s3048_s12 + $0x88] sm:$0xff] %v241_v17  ;;  %v243_v18 = vld [vmem:[%s3043_s11 + $0x120] sm:$0xff]  ;;  %v245_v19 = vld [vmem:[%s3043_s11 + $0x128] sm:$0xff] }
  0x23   : > { %v247_v20 = vld [vmem:[%s3043_s11 + $0x140] sm:$0xff]  ;;  %244 = vst [vmem:[%s3048_s12 + $0x90] sm:$0xff] %v243_v18  ;;  %246 = vst [vmem:[%s3048_s12 + $0x98] sm:$0xff] %v245_v19  ;;  %v249_v21 = vld [vmem:[%s3043_s11 + $0x148] sm:$0xff] }
  0x24   : > { %248 = vst [vmem:[%s3048_s12 + $0xa0] sm:$0xff] %v247_v20  ;;  %v251_v22 = vld [vmem:[%s3043_s11 + $0x160] sm:$0xff]  ;;  %v253_v23 = vld [vmem:[%s3043_s11 + $0x168] sm:$0xff]  ;;  %250 = vst [vmem:[%s3048_s12 + $0xa8] sm:$0xff] %v249_v21 }
  0x25   : > { %252 = vst [vmem:[%s3048_s12 + $0xb0] sm:$0xff] %v251_v22  ;;  %254 = vst [vmem:[%s3048_s12 + $0xb8] sm:$0xff] %v253_v23  ;;  %v255_v24 = vld [vmem:[%s3043_s11 + $0x180] sm:$0xff]  ;;  %v257_v25 = vld [vmem:[%s3043_s11 + $0x188] sm:$0xff] }
  0x26   : > { %v259_v26 = vld [vmem:[%s3043_s11 + $0x1a0] sm:$0xff]  ;;  %256 = vst [vmem:[%s3048_s12 + $0xc0] sm:$0xff] %v255_v24  ;;  %258 = vst [vmem:[%s3048_s12 + $0xc8] sm:$0xff] %v257_v25  ;;  %v261_v27 = vld [vmem:[%s3043_s11 + $0x1a8] sm:$0xff] }
  0x27   : > { %260 = vst [vmem:[%s3048_s12 + $0xd0] sm:$0xff] %v259_v26  ;;  %v263_v28 = vld [vmem:[%s3043_s11 + $0x1c0] sm:$0xff]  ;;  %v265_v29 = vld [vmem:[%s3043_s11 + $0x1c8] sm:$0xff]  ;;  %262 = vst [vmem:[%s3048_s12 + $0xd8] sm:$0xff] %v261_v27 }
  0x28   : > { %264 = vst [vmem:[%s3048_s12 + $0xe0] sm:$0xff] %v263_v28  ;;  %266 = vst [vmem:[%s3048_s12 + $0xe8] sm:$0xff] %v265_v29  ;;  %v267_v30 = vld [vmem:[%s3043_s11 + $0x1e0] sm:$0xff]  ;;  %v269_v31 = vld [vmem:[%s3043_s11 + $0x1e8] sm:$0xff] }
  0x29   : > { %v271_v32 = vld [vmem:[%s3043_s11 + $0x200] sm:$0xff]  ;;  %268 = vst [vmem:[%s3048_s12 + $0xf0] sm:$0xff] %v267_v30  ;;  %270 = vst [vmem:[%s3048_s12 + $0xf8] sm:$0xff] %v269_v31  ;;  %v273_v33 = vld [vmem:[%s3043_s11 + $0x208] sm:$0xff] }
  0x2a   : > { %272 = vst [vmem:[%s3048_s12 + $0x100] sm:$0xff] %v271_v32  ;;  %v275_v34 = vld [vmem:[%s3043_s11 + $0x220] sm:$0xff]  ;;  %v277_v35 = vld [vmem:[%s3043_s11 + $0x228] sm:$0xff]  ;;  %274 = vst [vmem:[%s3048_s12 + $0x108] sm:$0xff] %v273_v33 }
  0x2b   : > { %276 = vst [vmem:[%s3048_s12 + $0x110] sm:$0xff] %v275_v34  ;;  %278 = vst [vmem:[%s3048_s12 + $0x118] sm:$0xff] %v277_v35  ;;  %v279_v36 = vld [vmem:[%s3043_s11 + $0x240] sm:$0xff]  ;;  %v281_v37 = vld [vmem:[%s3043_s11 + $0x248] sm:$0xff] }
  0x2c   : > { %v283_v38 = vld [vmem:[%s3043_s11 + $0x260] sm:$0xff]  ;;  %280 = vst [vmem:[%s3048_s12 + $0x120] sm:$0xff] %v279_v36  ;;  %282 = vst [vmem:[%s3048_s12 + $0x128] sm:$0xff] %v281_v37  ;;  %v285_v39 = vld [vmem:[%s3043_s11 + $0x268] sm:$0xff] }
  0x2d   : > { %284 = vst [vmem:[%s3048_s12 + $0x130] sm:$0xff] %v283_v38  ;;  %v287_v40 = vld [vmem:[%s3043_s11 + $0x280] sm:$0xff]  ;;  %v289_v41 = vld [vmem:[%s3043_s11 + $0x288] sm:$0xff]  ;;  %286 = vst [vmem:[%s3048_s12 + $0x138] sm:$0xff] %v285_v39 }
  0x2e   : > { %288 = vst [vmem:[%s3048_s12 + $0x140] sm:$0xff] %v287_v40  ;;  %290 = vst [vmem:[%s3048_s12 + $0x148] sm:$0xff] %v289_v41  ;;  %v291_v42 = vld [vmem:[%s3043_s11 + $0x2a0] sm:$0xff]  ;;  %v293_v43 = vld [vmem:[%s3043_s11 + $0x2a8] sm:$0xff] }
  0x2f   : > { %v295_v44 = vld [vmem:[%s3043_s11 + $0x2c0] sm:$0xff]  ;;  %292 = vst [vmem:[%s3048_s12 + $0x150] sm:$0xff] %v291_v42  ;;  %294 = vst [vmem:[%s3048_s12 + $0x158] sm:$0xff] %v293_v43  ;;  %v297_v45 = vld [vmem:[%s3043_s11 + $0x2c8] sm:$0xff] }
  0x30   : > { %296 = vst [vmem:[%s3048_s12 + $0x160] sm:$0xff] %v295_v44  ;;  %v299_v46 = vld [vmem:[%s3043_s11 + $0x2e0] sm:$0xff]  ;;  %v301_v47 = vld [vmem:[%s3043_s11 + $0x2e8] sm:$0xff]  ;;  %298 = vst [vmem:[%s3048_s12 + $0x168] sm:$0xff] %v297_v45 }
  0x31   : > { %300 = vst [vmem:[%s3048_s12 + $0x170] sm:$0xff] %v299_v46  ;;  %302 = vst [vmem:[%s3048_s12 + $0x178] sm:$0xff] %v301_v47  ;;  %v303_v48 = vld [vmem:[%s3043_s11 + $0x300] sm:$0xff]  ;;  %v305_v49 = vld [vmem:[%s3043_s11 + $0x308] sm:$0xff] }
  0x32   : > { %v307_v50 = vld [vmem:[%s3043_s11 + $0x320] sm:$0xff]  ;;  %304 = vst [vmem:[%s3048_s12 + $0x180] sm:$0xff] %v303_v48  ;;  %306 = vst [vmem:[%s3048_s12 + $0x188] sm:$0xff] %v305_v49  ;;  %v309_v51 = vld [vmem:[%s3043_s11 + $0x328] sm:$0xff] }
  0x33   : > { %308 = vst [vmem:[%s3048_s12 + $0x190] sm:$0xff] %v307_v50  ;;  %v311_v52 = vld [vmem:[%s3043_s11 + $0x340] sm:$0xff]  ;;  %v313_v53 = vld [vmem:[%s3043_s11 + $0x348] sm:$0xff]  ;;  %310 = vst [vmem:[%s3048_s12 + $0x198] sm:$0xff] %v309_v51 }
  0x34   : > { %312 = vst [vmem:[%s3048_s12 + $0x1a0] sm:$0xff] %v311_v52  ;;  %314 = vst [vmem:[%s3048_s12 + $0x1a8] sm:$0xff] %v313_v53  ;;  %v315_v54 = vld [vmem:[%s3043_s11 + $0x360] sm:$0xff]  ;;  %v317_v55 = vld [vmem:[%s3043_s11 + $0x368] sm:$0xff] }
  0x35   : > { %v319_v56 = vld [vmem:[%s3043_s11 + $0x380] sm:$0xff]  ;;  %316 = vst [vmem:[%s3048_s12 + $0x1b0] sm:$0xff] %v315_v54  ;;  %318 = vst [vmem:[%s3048_s12 + $0x1b8] sm:$0xff] %v317_v55  ;;  %v321_v57 = vld [vmem:[%s3043_s11 + $0x388] sm:$0xff] }
  0x36   : > { %320 = vst [vmem:[%s3048_s12 + $0x1c0] sm:$0xff] %v319_v56  ;;  %v323_v58 = vld [vmem:[%s3043_s11 + $0x3a0] sm:$0xff]  ;;  %v325_v59 = vld [vmem:[%s3043_s11 + $0x3a8] sm:$0xff]  ;;  %322 = vst [vmem:[%s3048_s12 + $0x1c8] sm:$0xff] %v321_v57 }
  0x37   : > { %324 = vst [vmem:[%s3048_s12 + $0x1d0] sm:$0xff] %v323_v58  ;;  %326 = vst [vmem:[%s3048_s12 + $0x1d8] sm:$0xff] %v325_v59  ;;  %v327_v60 = vld [vmem:[%s3043_s11 + $0x3c0] sm:$0xff]  ;;  %v329_v61 = vld [vmem:[%s3043_s11 + $0x3c8] sm:$0xff] }
  0x38   : > { %v331_v62 = vld [vmem:[%s3043_s11 + $0x3e0] sm:$0xff]  ;;  %328 = vst [vmem:[%s3048_s12 + $0x1e0] sm:$0xff] %v327_v60  ;;  %330 = vst [vmem:[%s3048_s12 + $0x1e8] sm:$0xff] %v329_v61  ;;  %v333_v63 = vld [vmem:[%s3043_s11 + $0x3e8] sm:$0xff] }
  0x39   : > { %332 = vst [vmem:[%s3048_s12 + $0x1f0] sm:$0xff] %v331_v62  ;;  %v335_v0 = vld [vmem:[%s3043_s11 + $0x400] sm:$0xff]  ;;  %v337_v1 = vld [vmem:[%s3043_s11 + $0x408] sm:$0xff]  ;;  %334 = vst [vmem:[%s3048_s12 + $0x1f8] sm:$0xff] %v333_v63 }
  0x3a   : > { %336 = vst [vmem:[%s3048_s12 + $0x200] sm:$0xff] %v335_v0  ;;  %338 = vst [vmem:[%s3048_s12 + $0x208] sm:$0xff] %v337_v1  ;;  %v339_v2 = vld [vmem:[%s3043_s11 + $0x420] sm:$0xff]  ;;  %v341_v3 = vld [vmem:[%s3043_s11 + $0x428] sm:$0xff] }
  0x3b   : > { %v343_v4 = vld [vmem:[%s3043_s11 + $0x440] sm:$0xff]  ;;  %340 = vst [vmem:[%s3048_s12 + $0x210] sm:$0xff] %v339_v2  ;;  %342 = vst [vmem:[%s3048_s12 + $0x218] sm:$0xff] %v341_v3  ;;  %v345_v5 = vld [vmem:[%s3043_s11 + $0x448] sm:$0xff] }
  0x3c   : > { %344 = vst [vmem:[%s3048_s12 + $0x220] sm:$0xff] %v343_v4  ;;  %v347_v6 = vld [vmem:[%s3043_s11 + $0x460] sm:$0xff]  ;;  %v349_v7 = vld [vmem:[%s3043_s11 + $0x468] sm:$0xff]  ;;  %346 = vst [vmem:[%s3048_s12 + $0x228] sm:$0xff] %v345_v5 }
  0x3d   : > { %348 = vst [vmem:[%s3048_s12 + $0x230] sm:$0xff] %v347_v6  ;;  %350 = vst [vmem:[%s3048_s12 + $0x238] sm:$0xff] %v349_v7  ;;  %v351_v8 = vld [vmem:[%s3043_s11 + $0x480] sm:$0xff]  ;;  %v353_v9 = vld [vmem:[%s3043_s11 + $0x488] sm:$0xff] }
  0x3e   : > { %v355_v10 = vld [vmem:[%s3043_s11 + $0x4a0] sm:$0xff]  ;;  %352 = vst [vmem:[%s3048_s12 + $0x240] sm:$0xff] %v351_v8  ;;  %354 = vst [vmem:[%s3048_s12 + $0x248] sm:$0xff] %v353_v9  ;;  %v357_v11 = vld [vmem:[%s3043_s11 + $0x4a8] sm:$0xff] }
  0x3f   : > { %356 = vst [vmem:[%s3048_s12 + $0x250] sm:$0xff] %v355_v10  ;;  %v359_v12 = vld [vmem:[%s3043_s11 + $0x4c0] sm:$0xff]  ;;  %v361_v13 = vld [vmem:[%s3043_s11 + $0x4c8] sm:$0xff]  ;;  %358 = vst [vmem:[%s3048_s12 + $0x258] sm:$0xff] %v357_v11 }
  0x40   : > { %360 = vst [vmem:[%s3048_s12 + $0x260] sm:$0xff] %v359_v12  ;;  %362 = vst [vmem:[%s3048_s12 + $0x268] sm:$0xff] %v361_v13  ;;  %v363_v14 = vld [vmem:[%s3043_s11 + $0x4e0] sm:$0xff]  ;;  %v365_v15 = vld [vmem:[%s3043_s11 + $0x4e8] sm:$0xff] }
  0x41   : > { %v367_v16 = vld [vmem:[%s3043_s11 + $0x500] sm:$0xff]  ;;  %364 = vst [vmem:[%s3048_s12 + $0x270] sm:$0xff] %v363_v14  ;;  %366 = vst [vmem:[%s3048_s12 + $0x278] sm:$0xff] %v365_v15  ;;  %v369_v17 = vld [vmem:[%s3043_s11 + $0x508] sm:$0xff] }
  0x42   : > { %368 = vst [vmem:[%s3048_s12 + $0x280] sm:$0xff] %v367_v16  ;;  %v371_v18 = vld [vmem:[%s3043_s11 + $0x520] sm:$0xff]  ;;  %v373_v19 = vld [vmem:[%s3043_s11 + $0x528] sm:$0xff]  ;;  %370 = vst [vmem:[%s3048_s12 + $0x288] sm:$0xff] %v369_v17 }
  0x43   : > { %372 = vst [vmem:[%s3048_s12 + $0x290] sm:$0xff] %v371_v18  ;;  %374 = vst [vmem:[%s3048_s12 + $0x298] sm:$0xff] %v373_v19  ;;  %v375_v20 = vld [vmem:[%s3043_s11 + $0x540] sm:$0xff]  ;;  %v377_v21 = vld [vmem:[%s3043_s11 + $0x548] sm:$0xff] }
  0x44   : > { %v379_v22 = vld [vmem:[%s3043_s11 + $0x560] sm:$0xff]  ;;  %376 = vst [vmem:[%s3048_s12 + $0x2a0] sm:$0xff] %v375_v20  ;;  %378 = vst [vmem:[%s3048_s12 + $0x2a8] sm:$0xff] %v377_v21  ;;  %v381_v23 = vld [vmem:[%s3043_s11 + $0x568] sm:$0xff] }
  0x45   : > { %380 = vst [vmem:[%s3048_s12 + $0x2b0] sm:$0xff] %v379_v22  ;;  %v383_v24 = vld [vmem:[%s3043_s11 + $0x580] sm:$0xff]  ;;  %v385_v25 = vld [vmem:[%s3043_s11 + $0x588] sm:$0xff]  ;;  %382 = vst [vmem:[%s3048_s12 + $0x2b8] sm:$0xff] %v381_v23 }
  0x46   : > { %384 = vst [vmem:[%s3048_s12 + $0x2c0] sm:$0xff] %v383_v24  ;;  %386 = vst [vmem:[%s3048_s12 + $0x2c8] sm:$0xff] %v385_v25  ;;  %v387_v26 = vld [vmem:[%s3043_s11 + $0x5a0] sm:$0xff]  ;;  %v389_v27 = vld [vmem:[%s3043_s11 + $0x5a8] sm:$0xff] }
  0x47   : > { %v391_v28 = vld [vmem:[%s3043_s11 + $0x5c0] sm:$0xff]  ;;  %388 = vst [vmem:[%s3048_s12 + $0x2d0] sm:$0xff] %v387_v26  ;;  %390 = vst [vmem:[%s3048_s12 + $0x2d8] sm:$0xff] %v389_v27  ;;  %v393_v29 = vld [vmem:[%s3043_s11 + $0x5c8] sm:$0xff] }
  0x48   : > { %392 = vst [vmem:[%s3048_s12 + $0x2e0] sm:$0xff] %v391_v28  ;;  %v395_v30 = vld [vmem:[%s3043_s11 + $0x5e0] sm:$0xff]  ;;  %v397_v31 = vld [vmem:[%s3043_s11 + $0x5e8] sm:$0xff]  ;;  %394 = vst [vmem:[%s3048_s12 + $0x2e8] sm:$0xff] %v393_v29 }
  0x49   : > { %396 = vst [vmem:[%s3048_s12 + $0x2f0] sm:$0xff] %v395_v30  ;;  %398 = vst [vmem:[%s3048_s12 + $0x2f8] sm:$0xff] %v397_v31  ;;  %v399_v32 = vld [vmem:[%s3043_s11 + $0x600] sm:$0xff]  ;;  %v401_v33 = vld [vmem:[%s3043_s11 + $0x608] sm:$0xff] }
  0x4a   : > { %v403_v34 = vld [vmem:[%s3043_s11 + $0x620] sm:$0xff]  ;;  %400 = vst [vmem:[%s3048_s12 + $0x300] sm:$0xff] %v399_v32  ;;  %402 = vst [vmem:[%s3048_s12 + $0x308] sm:$0xff] %v401_v33  ;;  %v405_v35 = vld [vmem:[%s3043_s11 + $0x628] sm:$0xff] }
  0x4b   : > { %404 = vst [vmem:[%s3048_s12 + $0x310] sm:$0xff] %v403_v34  ;;  %v407_v36 = vld [vmem:[%s3043_s11 + $0x640] sm:$0xff]  ;;  %v409_v37 = vld [vmem:[%s3043_s11 + $0x648] sm:$0xff]  ;;  %406 = vst [vmem:[%s3048_s12 + $0x318] sm:$0xff] %v405_v35 }
  0x4c   : > { %408 = vst [vmem:[%s3048_s12 + $0x320] sm:$0xff] %v407_v36  ;;  %410 = vst [vmem:[%s3048_s12 + $0x328] sm:$0xff] %v409_v37  ;;  %v411_v38 = vld [vmem:[%s3043_s11 + $0x660] sm:$0xff]  ;;  %v413_v39 = vld [vmem:[%s3043_s11 + $0x668] sm:$0xff] }
  0x4d   : > { %v415_v40 = vld [vmem:[%s3043_s11 + $0x680] sm:$0xff]  ;;  %412 = vst [vmem:[%s3048_s12 + $0x330] sm:$0xff] %v411_v38  ;;  %414 = vst [vmem:[%s3048_s12 + $0x338] sm:$0xff] %v413_v39  ;;  %v417_v41 = vld [vmem:[%s3043_s11 + $0x688] sm:$0xff] }
  0x4e   : > { %416 = vst [vmem:[%s3048_s12 + $0x340] sm:$0xff] %v415_v40  ;;  %v419_v42 = vld [vmem:[%s3043_s11 + $0x6a0] sm:$0xff]  ;;  %v421_v43 = vld [vmem:[%s3043_s11 + $0x6a8] sm:$0xff]  ;;  %418 = vst [vmem:[%s3048_s12 + $0x348] sm:$0xff] %v417_v41 }
  0x4f   : > { %420 = vst [vmem:[%s3048_s12 + $0x350] sm:$0xff] %v419_v42  ;;  %422 = vst [vmem:[%s3048_s12 + $0x358] sm:$0xff] %v421_v43  ;;  %v423_v44 = vld [vmem:[%s3043_s11 + $0x6c0] sm:$0xff]  ;;  %v425_v45 = vld [vmem:[%s3043_s11 + $0x6c8] sm:$0xff] }
  0x50   : > { %v427_v46 = vld [vmem:[%s3043_s11 + $0x6e0] sm:$0xff]  ;;  %424 = vst [vmem:[%s3048_s12 + $0x360] sm:$0xff] %v423_v44  ;;  %426 = vst [vmem:[%s3048_s12 + $0x368] sm:$0xff] %v425_v45  ;;  %v429_v47 = vld [vmem:[%s3043_s11 + $0x6e8] sm:$0xff] }
  0x51   : > { %428 = vst [vmem:[%s3048_s12 + $0x370] sm:$0xff] %v427_v46  ;;  %v431_v48 = vld [vmem:[%s3043_s11 + $0x700] sm:$0xff]  ;;  %v433_v49 = vld [vmem:[%s3043_s11 + $0x708] sm:$0xff]  ;;  %430 = vst [vmem:[%s3048_s12 + $0x378] sm:$0xff] %v429_v47 }
  0x52   : > { %432 = vst [vmem:[%s3048_s12 + $0x380] sm:$0xff] %v431_v48  ;;  %434 = vst [vmem:[%s3048_s12 + $0x388] sm:$0xff] %v433_v49  ;;  %v435_v50 = vld [vmem:[%s3043_s11 + $0x720] sm:$0xff]  ;;  %v437_v51 = vld [vmem:[%s3043_s11 + $0x728] sm:$0xff] }
  0x53   : > { %v439_v52 = vld [vmem:[%s3043_s11 + $0x740] sm:$0xff]  ;;  %436 = vst [vmem:[%s3048_s12 + $0x390] sm:$0xff] %v435_v50  ;;  %438 = vst [vmem:[%s3048_s12 + $0x398] sm:$0xff] %v437_v51  ;;  %v441_v53 = vld [vmem:[%s3043_s11 + $0x748] sm:$0xff] }
  0x54   : > { %440 = vst [vmem:[%s3048_s12 + $0x3a0] sm:$0xff] %v439_v52  ;;  %v443_v54 = vld [vmem:[%s3043_s11 + $0x760] sm:$0xff]  ;;  %v445_v55 = vld [vmem:[%s3043_s11 + $0x768] sm:$0xff]  ;;  %442 = vst [vmem:[%s3048_s12 + $0x3a8] sm:$0xff] %v441_v53 }
  0x55   : > { %444 = vst [vmem:[%s3048_s12 + $0x3b0] sm:$0xff] %v443_v54  ;;  %446 = vst [vmem:[%s3048_s12 + $0x3b8] sm:$0xff] %v445_v55  ;;  %v447_v56 = vld [vmem:[%s3043_s11 + $0x780] sm:$0xff]  ;;  %v449_v57 = vld [vmem:[%s3043_s11 + $0x788] sm:$0xff] }
  0x56   : > { %v451_v58 = vld [vmem:[%s3043_s11 + $0x7a0] sm:$0xff]  ;;  %448 = vst [vmem:[%s3048_s12 + $0x3c0] sm:$0xff] %v447_v56  ;;  %450 = vst [vmem:[%s3048_s12 + $0x3c8] sm:$0xff] %v449_v57  ;;  %v453_v59 = vld [vmem:[%s3043_s11 + $0x7a8] sm:$0xff] }
  0x57   : > { %452 = vst [vmem:[%s3048_s12 + $0x3d0] sm:$0xff] %v451_v58  ;;  %v455_v60 = vld [vmem:[%s3043_s11 + $0x7c0] sm:$0xff]  ;;  %v457_v61 = vld [vmem:[%s3043_s11 + $0x7c8] sm:$0xff]  ;;  %454 = vst [vmem:[%s3048_s12 + $0x3d8] sm:$0xff] %v453_v59 }
  0x58   : > { %456 = vst [vmem:[%s3048_s12 + $0x3e0] sm:$0xff] %v455_v60  ;;  %458 = vst [vmem:[%s3048_s12 + $0x3e8] sm:$0xff] %v457_v61  ;;  %v459_v62 = vld [vmem:[%s3043_s11 + $0x7e0] sm:$0xff]  ;;  %v461_v63 = vld [vmem:[%s3043_s11 + $0x7e8] sm:$0xff] }
  0x59   : > { %v463_v0 = vld [vmem:[%s3043_s11 + $0x800] sm:$0xff]  ;;  %460 = vst [vmem:[%s3048_s12 + $0x3f0] sm:$0xff] %v459_v62  ;;  %462 = vst [vmem:[%s3048_s12 + $0x3f8] sm:$0xff] %v461_v63  ;;  %v465_v1 = vld [vmem:[%s3043_s11 + $0x808] sm:$0xff] }
  0x5a   : > { %464 = vst [vmem:[%s3048_s12 + $0x400] sm:$0xff] %v463_v0  ;;  %v467_v2 = vld [vmem:[%s3043_s11 + $0x820] sm:$0xff]  ;;  %v469_v3 = vld [vmem:[%s3043_s11 + $0x828] sm:$0xff]  ;;  %466 = vst [vmem:[%s3048_s12 + $0x408] sm:$0xff] %v465_v1 }
  0x5b   : > { %468 = vst [vmem:[%s3048_s12 + $0x410] sm:$0xff] %v467_v2  ;;  %470 = vst [vmem:[%s3048_s12 + $0x418] sm:$0xff] %v469_v3  ;;  %v471_v4 = vld [vmem:[%s3043_s11 + $0x840] sm:$0xff]  ;;  %v473_v5 = vld [vmem:[%s3043_s11 + $0x848] sm:$0xff] }
  0x5c   : > { %v475_v6 = vld [vmem:[%s3043_s11 + $0x860] sm:$0xff]  ;;  %472 = vst [vmem:[%s3048_s12 + $0x420] sm:$0xff] %v471_v4  ;;  %474 = vst [vmem:[%s3048_s12 + $0x428] sm:$0xff] %v473_v5  ;;  %v477_v7 = vld [vmem:[%s3043_s11 + $0x868] sm:$0xff] }
  0x5d   : > { %476 = vst [vmem:[%s3048_s12 + $0x430] sm:$0xff] %v475_v6  ;;  %v479_v8 = vld [vmem:[%s3043_s11 + $0x880] sm:$0xff]  ;;  %v481_v9 = vld [vmem:[%s3043_s11 + $0x888] sm:$0xff]  ;;  %478 = vst [vmem:[%s3048_s12 + $0x438] sm:$0xff] %v477_v7 }
  0x5e   : > { %480 = vst [vmem:[%s3048_s12 + $0x440] sm:$0xff] %v479_v8  ;;  %482 = vst [vmem:[%s3048_s12 + $0x448] sm:$0xff] %v481_v9  ;;  %v483_v10 = vld [vmem:[%s3043_s11 + $0x8a0] sm:$0xff]  ;;  %v485_v11 = vld [vmem:[%s3043_s11 + $0x8a8] sm:$0xff] }
  0x5f   : > { %v487_v12 = vld [vmem:[%s3043_s11 + $0x8c0] sm:$0xff]  ;;  %484 = vst [vmem:[%s3048_s12 + $0x450] sm:$0xff] %v483_v10  ;;  %486 = vst [vmem:[%s3048_s12 + $0x458] sm:$0xff] %v485_v11  ;;  %v489_v13 = vld [vmem:[%s3043_s11 + $0x8c8] sm:$0xff] }
  0x60   : > { %488 = vst [vmem:[%s3048_s12 + $0x460] sm:$0xff] %v487_v12  ;;  %v491_v14 = vld [vmem:[%s3043_s11 + $0x8e0] sm:$0xff]  ;;  %v493_v15 = vld [vmem:[%s3043_s11 + $0x8e8] sm:$0xff]  ;;  %490 = vst [vmem:[%s3048_s12 + $0x468] sm:$0xff] %v489_v13 }
  0x61   : > { %492 = vst [vmem:[%s3048_s12 + $0x470] sm:$0xff] %v491_v14  ;;  %494 = vst [vmem:[%s3048_s12 + $0x478] sm:$0xff] %v493_v15  ;;  %v495_v16 = vld [vmem:[%s3043_s11 + $0x900] sm:$0xff]  ;;  %v497_v17 = vld [vmem:[%s3043_s11 + $0x908] sm:$0xff] }
  0x62   : > { %v499_v18 = vld [vmem:[%s3043_s11 + $0x920] sm:$0xff]  ;;  %496 = vst [vmem:[%s3048_s12 + $0x480] sm:$0xff] %v495_v16  ;;  %498 = vst [vmem:[%s3048_s12 + $0x488] sm:$0xff] %v497_v17  ;;  %v501_v19 = vld [vmem:[%s3043_s11 + $0x928] sm:$0xff] }
  0x63   : > { %500 = vst [vmem:[%s3048_s12 + $0x490] sm:$0xff] %v499_v18  ;;  %v503_v20 = vld [vmem:[%s3043_s11 + $0x940] sm:$0xff]  ;;  %v505_v21 = vld [vmem:[%s3043_s11 + $0x948] sm:$0xff]  ;;  %502 = vst [vmem:[%s3048_s12 + $0x498] sm:$0xff] %v501_v19 }
  0x64   : > { %504 = vst [vmem:[%s3048_s12 + $0x4a0] sm:$0xff] %v503_v20  ;;  %506 = vst [vmem:[%s3048_s12 + $0x4a8] sm:$0xff] %v505_v21  ;;  %v507_v22 = vld [vmem:[%s3043_s11 + $0x960] sm:$0xff]  ;;  %v509_v23 = vld [vmem:[%s3043_s11 + $0x968] sm:$0xff] }
  0x65   : > { %v511_v24 = vld [vmem:[%s3043_s11 + $0x980] sm:$0xff]  ;;  %508 = vst [vmem:[%s3048_s12 + $0x4b0] sm:$0xff] %v507_v22  ;;  %510 = vst [vmem:[%s3048_s12 + $0x4b8] sm:$0xff] %v509_v23  ;;  %v513_v25 = vld [vmem:[%s3043_s11 + $0x988] sm:$0xff] }
  0x66   : > { %512 = vst [vmem:[%s3048_s12 + $0x4c0] sm:$0xff] %v511_v24  ;;  %v515_v26 = vld [vmem:[%s3043_s11 + $0x9a0] sm:$0xff]  ;;  %v517_v27 = vld [vmem:[%s3043_s11 + $0x9a8] sm:$0xff]  ;;  %514 = vst [vmem:[%s3048_s12 + $0x4c8] sm:$0xff] %v513_v25 }
  0x67   : > { %516 = vst [vmem:[%s3048_s12 + $0x4d0] sm:$0xff] %v515_v26  ;;  %518 = vst [vmem:[%s3048_s12 + $0x4d8] sm:$0xff] %v517_v27  ;;  %v519_v28 = vld [vmem:[%s3043_s11 + $0x9c0] sm:$0xff]  ;;  %v521_v29 = vld [vmem:[%s3043_s11 + $0x9c8] sm:$0xff] }
  0x68   : > { %v523_v30 = vld [vmem:[%s3043_s11 + $0x9e0] sm:$0xff]  ;;  %520 = vst [vmem:[%s3048_s12 + $0x4e0] sm:$0xff] %v519_v28  ;;  %522 = vst [vmem:[%s3048_s12 + $0x4e8] sm:$0xff] %v521_v29  ;;  %v525_v31 = vld [vmem:[%s3043_s11 + $0x9e8] sm:$0xff] }
  0x69   : > { %524 = vst [vmem:[%s3048_s12 + $0x4f0] sm:$0xff] %v523_v30  ;;  %526 = vst [vmem:[%s3048_s12 + $0x4f8] sm:$0xff] %v525_v31 }
  0x6a PF: > { %p2275_p7 = scmp.ge.s32.totalorder %s2953_s21, 1  ;;  %p548_p8 = scmp.lt.s32.totalorder %s2953_s21, 11 }
  0x6c   : > { %p549_p9 = pnand %p2275_p7, %p548_p8 }
  0x6d   : > { %s555_s13 = sand.u32 (!%p549_p9), 1, %s2929_s15   ;;  %s593_s14 = smul.u32 (!%p549_p9), 5, %s2937_s17 }
  0x6e   : > { %552 = sbr.rel (%p549_p9) target bundleno = 749 (0x2ed), region = 55  ;;  %s2277_s25 = sshll.u32 (!%p549_p9), %s2941_s18, 2 }
  0x6f   : > { %s2598_s24 = smul.u32 (!%p549_p9), 1280, %s555_s13  ;;  %p594_p10 = scmp.lt.s32.totalorder (!%p549_p9), %s593_s14, 24 }
  0x70   : > { %p602_p11 = scmp.lt.s32.totalorder (!%p549_p9), %s2277_s25, 7  ;;  %s2278_s26 = sshll.u32 (!%p549_p9), %s2941_s18, 6 }
  0x71   : > { %p607_p12 = scmp.lt.s32.totalorder (!%p549_p9), %s2278_s26, 127  ;;  %p612_p13 = scmp.lt.s32.totalorder (!%p549_p9), %s2941_s18, 1 }
  0x72   : > { %p2281_p0 = scmp.ne.s32.totalorder (!%p549_p9), %s2937_s17, 0 }
  0x75   : > { %s3694_s14 = smov (!%p594_p10, %s593_s14), 24  ;;  %s3696_s25 = smov (!%p602_p11, %s2277_s25), 7 }
  0x76   : > { %s2276_s27 = sshll.u32 %s3694_s14, 1  ;;  %s604_s7 = scalar_lea.vmem %s3678_s2, %s3696_s25  ;;  %v2955_v32 = vmov (!%p2281_p0), 0.0  }
  0x77   : > { %s3378_s5 = scalar_lea.vmem %s3676_s0, %s2276_s27  ;;  %s3698_s26 = smov (!%p607_p12, %s2278_s26), 127  ;;  %621 = vst [vmem:[#allocation2] sm:$0xff] (!%p2281_p0), %v2955_v32 }
  0x78   : > { %s2279_s8 = sshll.u32 %s3698_s26, 3  ;;  %s3700_s18 = smov (!%p612_p13, %s2941_s18), 1 }
  0x79   : > { %s3388_s11 = scalar_lea.vmem %s3679_s3, %s2279_s8  ;;  %s2280_s12 = sshll.u32 %s3700_s18, 1 }
  0x7a   : > { %s3394_s29 = scalar_lea.vmem %s3680_s4, %s2280_s12  ;;  %s3396_s27 = scalar_lea.vmem [#allocation3], %s2598_s24 }
  0x7b   : > { %620 = sbr.rel (%p2281_p0) target bundleno = 130 (0x82), region = 63 }
  0x82 PF: > { %v2658_v33 = vld [vmem:[%s3396_s27 + $0x4] ss:$16 sps:$4 sm:$0xff]   ;;  %v2660_v34 = vld [vmem:[%s3396_s27 + $0xc] ss:$16 sps:$4 sm:$0xff]   ;;  %v2662_v35 = vld [vmem:[%s3396_s27] ss:$16 sps:$4 sm:$0xff]   ;;  %v631_v7 = vlaneseq }
  0x83   : > { %1621 = vmatprep.subr.bf16.mxu0 %v2658_v33  ;;  %v2663_v36 = vld [vmem:[%s3396_s27 + $0x8] ss:$16 sps:$4 sm:$0xff]   ;;  %1744 = vmatprep.subr.bf16.mxu1 %v2660_v34  ;;  %v2664_v37 = vld [vmem:[%s3396_s27 + $0x24] ss:$16 sps:$4 sm:$0xff]   ;;  %v2666_v38 = vld [vmem:[%s3396_s27 + $0x2c] ss:$16 sps:$4 sm:$0xff]  }
  0x84   : > { %1622 = vmatpush1.bf16.msra.mxu0 %v2662_v35  ;;  %1745 = vmatpush1.bf16.msra.mxu1 %v2663_v36  ;;  %v2668_v39 = vld [vmem:[%s3396_s27 + $0x20] ss:$16 sps:$4 sm:$0xff]   ;;  %v2669_v40 = vld [vmem:[%s3396_s27 + $0x28] ss:$16 sps:$4 sm:$0xff]   ;;  %v2670_v41 = vld [vmem:[%s3396_s27 + $0x44] ss:$16 sps:$4 sm:$0xff]  }
  0x85   : > { %1623 = vmatprep.subr.bf16.mxu0 %v2664_v37  ;;  %1746 = vmatprep.subr.bf16.mxu1 %v2666_v38  ;;  %v2672_v42 = vld [vmem:[%s3396_s27 + $0x4c] ss:$16 sps:$4 sm:$0xff]   ;;  %v2674_v43 = vld [vmem:[%s3396_s27 + $0x40] ss:$16 sps:$4 sm:$0xff]   ;;  %v2675_v44 = vld [vmem:[%s3396_s27 + $0x48] ss:$16 sps:$4 sm:$0xff]  }
  0x86   : > { %v2676_v45 = vld [vmem:[%s3396_s27 + $0x64] ss:$16 sps:$4 sm:$0xff]   ;;  %v2678_v46 = vld [vmem:[%s3396_s27 + $0x6c] ss:$16 sps:$4 sm:$0xff]   ;;  %v2680_v47 = vld [vmem:[%s3396_s27 + $0x60] ss:$16 sps:$4 sm:$0xff]  }
  0x87   : > { %v2681_v48 = vld [vmem:[%s3396_s27 + $0x68] ss:$16 sps:$4 sm:$0xff]   ;;  %v2682_v49 = vld [vmem:[%s3396_s27 + $0x84] ss:$16 sps:$4 sm:$0xff]   ;;  %v2684_v50 = vld [vmem:[%s3396_s27 + $0x8c] ss:$16 sps:$4 sm:$0xff]  }
  0x88   : > { %1624 = vmatpush1.bf16.msra.mxu0 %v2668_v39  ;;  %1747 = vmatpush1.bf16.msra.mxu1 %v2669_v40  ;;  %v2686_v51 = vld [vmem:[%s3396_s27 + $0x80] ss:$16 sps:$4 sm:$0xff]   ;;  %v2687_v52 = vld [vmem:[%s3396_s27 + $0x88] ss:$16 sps:$4 sm:$0xff]   ;;  %v2688_v53 = vld [vmem:[%s3396_s27 + $0xa4] ss:$16 sps:$4 sm:$0xff]  }
  0x89   : > { %1625 = vmatprep.subr.bf16.mxu0 %v2670_v41  ;;  %1748 = vmatprep.subr.bf16.mxu1 %v2672_v42  ;;  %v2690_v54 = vld [vmem:[%s3396_s27 + $0xac] ss:$16 sps:$4 sm:$0xff]   ;;  %v2692_v55 = vld [vmem:[%s3396_s27 + $0xa0] ss:$16 sps:$4 sm:$0xff]   ;;  %v2693_v56 = vld [vmem:[%s3396_s27 + $0xa8] ss:$16 sps:$4 sm:$0xff]  }
  0x8a   : > { %v2694_v57 = vld [vmem:[%s3396_s27 + $0xc4] ss:$16 sps:$4 sm:$0xff]   ;;  %v2696_v58 = vld [vmem:[%s3396_s27 + $0xcc] ss:$16 sps:$4 sm:$0xff]   ;;  %v2698_v59 = vld [vmem:[%s3396_s27 + $0xc0] ss:$16 sps:$4 sm:$0xff]  }
  0x8b   : > { %v2699_v60 = vld [vmem:[%s3396_s27 + $0xc8] ss:$16 sps:$4 sm:$0xff]   ;;  %v2700_v61 = vld [vmem:[%s3396_s27 + $0xe4] ss:$16 sps:$4 sm:$0xff]   ;;  %v2702_v62 = vld [vmem:[%s3396_s27 + $0xec] ss:$16 sps:$4 sm:$0xff]  }
  0x8c   : > { %1626 = vmatpush1.bf16.msra.mxu0 %v2674_v43  ;;  %1749 = vmatpush1.bf16.msra.mxu1 %v2675_v44  ;;  %v2704_v63 = vld [vmem:[%s3396_s27 + $0xe0] ss:$16 sps:$4 sm:$0xff]   ;;  %v2705_v0 = vld [vmem:[%s3396_s27 + $0xe8] ss:$16 sps:$4 sm:$0xff]   ;;  %v2706_v1 = vld [vmem:[%s3396_s27 + $0x104] ss:$16 sps:$4 sm:$0xff]  }
  0x8d   : > { %1627 = vmatprep.subr.bf16.mxu0 %v2676_v45  ;;  %1750 = vmatprep.subr.bf16.mxu1 %v2678_v46  ;;  %v2708_v2 = vld [vmem:[%s3396_s27 + $0x10c] ss:$16 sps:$4 sm:$0xff]   ;;  %v2710_v3 = vld [vmem:[%s3396_s27 + $0x100] ss:$16 sps:$4 sm:$0xff]   ;;  %v2711_v4 = vld [vmem:[%s3396_s27 + $0x108] ss:$16 sps:$4 sm:$0xff]  }
  0x8e   : > { %v2956_v5 = vmov 1983009808   ;;  %v2712_v8 = vld [vmem:[%s3396_s27 + $0x124] ss:$16 sps:$4 sm:$0xff]   ;;  %v2714_v9 = vld [vmem:[%s3396_s27 + $0x12c] ss:$16 sps:$4 sm:$0xff]  }
  0x8f   : > { %v629_v6 = vunpack.c.l.s4 %v2956_v5  ;;  %v2716_v10 = vld [vmem:[%s3396_s27 + $0x120] ss:$16 sps:$4 sm:$0xff]   ;;  %v3438_v12 = vshrl.u32 %v631_v7, 7  ;;  %v2717_v13 = vld [vmem:[%s3396_s27 + $0x128] ss:$16 sps:$4 sm:$0xff]   ;;  %p2443_p1 = scmp.ne.s32.totalorder %s2937_s17, 4 }
  0x90   : > { %1628 = vmatpush1.bf16.msra.mxu0 %v2680_v47  ;;  %1751 = vmatpush1.bf16.msra.mxu1 %v2681_v48  ;;  %v2718_v14 = vld [vmem:[%s3396_s27 + $0x144] ss:$16 sps:$4 sm:$0xff]   ;;  %v2720_v15 = vld [vmem:[%s3396_s27 + $0x14c] ss:$16 sps:$4 sm:$0xff]   ;;  %v2722_v16 = vld [vmem:[%s3396_s27 + $0x140] ss:$16 sps:$4 sm:$0xff]  }
  0x91   : > { %1629 = vmatprep.subr.bf16.mxu0 %v2682_v49  ;;  %1752 = vmatprep.subr.bf16.mxu1 %v2684_v50  ;;  %v630_v11 = vunpack.c.0.s8 %v629_v6  ;;  %v2723_v17 = vld [vmem:[%s3396_s27 + $0x148] ss:$16 sps:$4 sm:$0xff]   ;;  %v2724_v19 = vld [vmem:[%s3396_s27 + $0x164] ss:$16 sps:$4 sm:$0xff]   ;;  %v2726_v20 = vld [vmem:[%s3396_s27 + $0x16c] ss:$16 sps:$4 sm:$0xff]  }
  0x92   : > { %v623_v21 = vld [vmem:[%s3378_s5] sm:$0xff]  ;;  %v2728_v22 = vld [vmem:[%s3396_s27 + $0x160] ss:$16 sps:$4 sm:$0xff]   ;;  %v2730_v25 = vld [vmem:[%s3396_s27 + $0x184] ss:$16 sps:$4 sm:$0xff]   ;;  %vm2160_vm0 = vcmask (!%p2443_p1), 41984  }
  0x93   : > { %v3446_v18 = vsub.s32 %v630_v11, %v3438_v12  ;;  %v2729_v24 = vld [vmem:[%s3396_s27 + $0x168] ss:$16 sps:$4 sm:$0xff]   ;;  %v2732_v26 = vld [vmem:[%s3396_s27 + $0x18c] ss:$16 sps:$4 sm:$0xff]   ;;  %v2734_v28 = vld [vmem:[%s3396_s27 + $0x180] ss:$16 sps:$4 sm:$0xff]   ;;  %v627_v37 = vcombine.high %v623_v21, %v623_v21 }
  0x94   : > { %1630 = vmatpush1.bf16.msra.mxu0 %v2686_v51  ;;  %1753 = vmatpush1.bf16.msra.mxu1 %v2687_v52  ;;  %v2735_v30 = vld [vmem:[%s3396_s27 + $0x188] ss:$16 sps:$4 sm:$0xff]   ;;  %v2736_v31 = vld [vmem:[%s3396_s27 + $0x1a4] ss:$16 sps:$4 sm:$0xff]   ;;  %v2738_v32 = vld [vmem:[%s3396_s27 + $0x1ac] ss:$16 sps:$4 sm:$0xff]  }
  0x95   : > { %1631 = vmatprep.subr.bf16.mxu0 %v2688_v53  ;;  %1754 = vmatprep.subr.bf16.mxu1 %v2690_v54  ;;  %v634_v23 = vrot.slane %v623_v21, %v3446_v18  ;;  %v2740_v33 = vld [vmem:[%s3396_s27 + $0x1a0] ss:$16 sps:$4 sm:$0xff]   ;;  %v2741_v34 = vld [vmem:[%s3396_s27 + $0x1a8] ss:$16 sps:$4 sm:$0xff]   ;;  %v2742_v35 = vld [vmem:[%s3396_s27 + $0x1c4] ss:$16 sps:$4 sm:$0xff]   ;;  %v3469_v42 = vrot.slane %v627_v37, %v3446_v18 }
  0x96   : > { %v2744_v36 = vld [vmem:[%s3396_s27 + $0x1cc] ss:$16 sps:$4 sm:$0xff]   ;;  %v2746_v38 = vld [vmem:[%s3396_s27 + $0x1c0] ss:$16 sps:$4 sm:$0xff]   ;;  %v2747_v39 = vld [vmem:[%s3396_s27 + $0x1c8] ss:$16 sps:$4 sm:$0xff]  }
  0x97   : > { %v642_v27 = vcombine.high %v634_v23, %v634_v23  ;;  %v2748_v40 = vld [vmem:[%s3396_s27 + $0x1e4] ss:$16 sps:$4 sm:$0xff]   ;;  %v2750_v41 = vld [vmem:[%s3396_s27 + $0x1ec] ss:$16 sps:$4 sm:$0xff]   ;;  %v2752_v43 = vld [vmem:[%s3396_s27 + $0x1e0] ss:$16 sps:$4 sm:$0xff]   ;;  %v643_v47 = vcombine.high %v3469_v42, %v3469_v42  ;;  %v656_v49 = vpack.c.bf16 %v634_v23, %v634_v23 }
  0x98   : > { %1632 = vmatpush1.bf16.msra.mxu0 %v2692_v55  ;;  %1755 = vmatpush1.bf16.msra.mxu1 %v2693_v56  ;;  %v2753_v44 = vld [vmem:[%s3396_s27 + $0x1e8] ss:$16 sps:$4 sm:$0xff]   ;;  %v2757_v45 = vld [vmem:[%s3396_s27 + $0x204] ss:$16 sps:$4 sm:$0xff]   ;;  %v2760_v46 = vld [vmem:[%s3396_s27 + $0x20c] ss:$16 sps:$4 sm:$0xff]  }
  0x99   : > { %1633 = vmatprep.subr.bf16.mxu0 %v2694_v57  ;;  %1756 = vmatprep.subr.bf16.mxu1 %v2696_v58  ;;  %v657_v29 = vpack.c.bf16 %v642_v27, %v642_v27  ;;  %v2755_v48 = vld [vmem:[%s3396_s27 + $0x200] ss:$16 sps:$4 sm:$0xff]   ;;  %v2758_v50 = vld [vmem:[%s3396_s27 + $0x208] ss:$16 sps:$4 sm:$0xff]   ;;  %v2763_v51 = vld [vmem:[%s3396_s27 + $0x224] ss:$16 sps:$4 sm:$0xff]   ;;  %v659_v53 = vpack.c.bf16 %v643_v47, %v643_v47 }
  0x9a   : > { %v2766_v52 = vld [vmem:[%s3396_s27 + $0x22c] ss:$16 sps:$4 sm:$0xff]   ;;  %v2761_v54 = vld [vmem:[%s3396_s27 + $0x220] ss:$16 sps:$4 sm:$0xff]   ;;  %v2764_v55 = vld [vmem:[%s3396_s27 + $0x228] ss:$16 sps:$4 sm:$0xff]  }
  0x9b   : > { %1653 = vmatprep.mubr.bf16.mxu0 %v657_v29  ;;  %1776 = vmatprep.mubr.bf16.mxu1 %v657_v29  ;;  %v2769_v56 = vld [vmem:[%s3396_s27 + $0x244] ss:$16 sps:$4 sm:$0xff]   ;;  %v2772_v57 = vld [vmem:[%s3396_s27 + $0x24c] ss:$16 sps:$4 sm:$0xff]   ;;  %v2767_v58 = vld [vmem:[%s3396_s27 + $0x240] ss:$16 sps:$4 sm:$0xff]  }
  0x9c   : > { %1634 = vmatpush1.bf16.msra.mxu0 %v2698_v59  ;;  %1757 = vmatpush1.bf16.msra.mxu1 %v2699_v60  ;;  %v2770_v59 = vld [vmem:[%s3396_s27 + $0x248] ss:$16 sps:$4 sm:$0xff]   ;;  %v2775_v60 = vld [vmem:[%s3396_s27 + $0x264] ss:$16 sps:$4 sm:$0xff]   ;;  %v2790_v5 = vld [vmem:[%s3396_s27 + $0x2ac] ss:$16 sps:$4 sm:$0xff]  }
  0x9d   : > { %1635 = vmatprep.subr.bf16.mxu0 %v2700_v61  ;;  %1758 = vmatprep.subr.bf16.mxu1 %v2702_v62  ;;  %v2778_v61 = vld [vmem:[%s3396_s27 + $0x26c] ss:$16 sps:$4 sm:$0xff]   ;;  %v2773_v62 = vld [vmem:[%s3396_s27 + $0x260] ss:$16 sps:$4 sm:$0xff]   ;;  %v2788_v7 = vld [vmem:[%s3396_s27 + $0x2a8] ss:$16 sps:$4 sm:$0xff]  }
  0x9e   : > { %v2785_v6 = vld [vmem:[%s3396_s27 + $0x2a0] ss:$16 sps:$4 sm:$0xff]   ;;  %v2794_v11 = vld [vmem:[%s3396_s27 + $0x2c8] ss:$16 sps:$4 sm:$0xff]   ;;  %v2814_v23 = vld [vmem:[%s3396_s27 + $0x32c] ss:$16 sps:$4 sm:$0xff]  }
  0x9f   : > { %v2806_v21 = vld [vmem:[%s3396_s27 + $0x308] ss:$16 sps:$4 sm:$0xff]   ;;  %v2820_v27 = vld [vmem:[%s3396_s27 + $0x34c] ss:$16 sps:$4 sm:$0xff]   ;;  %v2847_v47 = vld [vmem:[%s3396_s27 + $0x3e4] ss:$16 sps:$4 sm:$0xff]  }
  0xa0   : > { %1636 = vmatpush1.bf16.msra.mxu0 %v2704_v63  ;;  %1759 = vmatpush1.bf16.msra.mxu1 %v2705_v0  ;;  %v2776_v63 = vld [vmem:[%s3396_s27 + $0x268] ss:$16 sps:$4 sm:$0xff]   ;;  %v2781_v0 = vld [vmem:[%s3396_s27 + $0x284] ss:$16 sps:$4 sm:$0xff]  }
  0xa1   : > { %1637 = vmatprep.subr.bf16.mxu0 %v2706_v1  ;;  %1760 = vmatprep.subr.bf16.mxu1 %v2708_v2  ;;  %v2784_v1 = vld [vmem:[%s3396_s27 + $0x28c] ss:$16 sps:$4 sm:$0xff]   ;;  %v2779_v2 = vld [vmem:[%s3396_s27 + $0x280] ss:$16 sps:$4 sm:$0xff]   ;;  %v2818_v29 = vld [vmem:[%s3396_s27 + $0x348] ss:$16 sps:$4 sm:$0xff]  }
  0xa2   : > { %v2830_v37 = vld [vmem:[%s3396_s27 + $0x388] ss:$16 sps:$4 sm:$0xff]  }
  0xa4   : > { %1638 = vmatpush1.bf16.msra.mxu0 %v2710_v3  ;;  %1761 = vmatpush1.bf16.msra.mxu1 %v2711_v4  ;;  %v2782_v3 = vld [vmem:[%s3396_s27 + $0x288] ss:$16 sps:$4 sm:$0xff]   ;;  %v2787_v4 = vld [vmem:[%s3396_s27 + $0x2a4] ss:$16 sps:$4 sm:$0xff]  }
  0xa5   : > { %1639 = vmatprep.subr.bf16.mxu0 %v2712_v8  ;;  %1762 = vmatprep.subr.bf16.mxu1 %v2714_v9  ;;  %v2793_v8 = vld [vmem:[%s3396_s27 + $0x2c4] ss:$16 sps:$4 sm:$0xff]   ;;  %v2796_v9 = vld [vmem:[%s3396_s27 + $0x2cc] ss:$16 sps:$4 sm:$0xff]  }
  0xa8   : > { %1640 = vmatpush1.bf16.msra.mxu0 %v2716_v10  ;;  %1763 = vmatpush1.bf16.msra.mxu1 %v2717_v13  ;;  %v2791_v10 = vld [vmem:[%s3396_s27 + $0x2c0] ss:$16 sps:$4 sm:$0xff]   ;;  %v2799_v13 = vld [vmem:[%s3396_s27 + $0x2e4] ss:$16 sps:$4 sm:$0xff]  }
  0xa9   : > { %1641 = vmatprep.subr.bf16.mxu0 %v2718_v14  ;;  %1764 = vmatprep.subr.bf16.mxu1 %v2720_v15  ;;  %v2802_v14 = vld [vmem:[%s3396_s27 + $0x2ec] ss:$16 sps:$4 sm:$0xff]   ;;  %v2797_v15 = vld [vmem:[%s3396_s27 + $0x2e0] ss:$16 sps:$4 sm:$0xff]  }
  0xac   : > { %1642 = vmatpush1.bf16.msra.mxu0 %v2722_v16  ;;  %1765 = vmatpush1.bf16.msra.mxu1 %v2723_v17  ;;  %v2800_v16 = vld [vmem:[%s3396_s27 + $0x2e8] ss:$16 sps:$4 sm:$0xff]   ;;  %v2805_v17 = vld [vmem:[%s3396_s27 + $0x304] ss:$16 sps:$4 sm:$0xff]  }
  0xad   : > { %1643 = vmatprep.subr.bf16.mxu0 %v2724_v19  ;;  %1766 = vmatprep.subr.bf16.mxu1 %v2726_v20  ;;  %v2808_v19 = vld [vmem:[%s3396_s27 + $0x30c] ss:$16 sps:$4 sm:$0xff]   ;;  %v2803_v20 = vld [vmem:[%s3396_s27 + $0x300] ss:$16 sps:$4 sm:$0xff]  }
  0xb0   : > { %1644 = vmatpush1.bf16.msra.mxu0 %v2728_v22  ;;  %1767 = vmatpush1.bf16.msra.mxu1 %v2729_v24  ;;  %v2811_v22 = vld [vmem:[%s3396_s27 + $0x324] ss:$16 sps:$4 sm:$0xff]   ;;  %v2809_v24 = vld [vmem:[%s3396_s27 + $0x320] ss:$16 sps:$4 sm:$0xff]  }
  0xb1   : > { %1645 = vmatprep.subr.bf16.mxu0 %v2730_v25  ;;  %1768 = vmatprep.subr.bf16.mxu1 %v2732_v26  ;;  %v2812_v25 = vld [vmem:[%s3396_s27 + $0x328] ss:$16 sps:$4 sm:$0xff]   ;;  %v2817_v26 = vld [vmem:[%s3396_s27 + $0x344] ss:$16 sps:$4 sm:$0xff]  }
  0xb4   : > { %1646 = vmatpush1.bf16.msra.mxu0 %v2734_v28  ;;  %1769 = vmatpush1.bf16.msra.mxu1 %v2735_v30  ;;  %v2815_v28 = vld [vmem:[%s3396_s27 + $0x340] ss:$16 sps:$4 sm:$0xff]   ;;  %v2823_v30 = vld [vmem:[%s3396_s27 + $0x364] ss:$16 sps:$4 sm:$0xff]  }
  0xb5   : > { %1647 = vmatprep.subr.bf16.mxu0 %v2736_v31  ;;  %1770 = vmatprep.subr.bf16.mxu1 %v2738_v32  ;;  %v2826_v31 = vld [vmem:[%s3396_s27 + $0x36c] ss:$16 sps:$4 sm:$0xff]   ;;  %v2821_v32 = vld [vmem:[%s3396_s27 + $0x360] ss:$16 sps:$4 sm:$0xff]  }
  0xb8   : > { %1648 = vmatpush1.bf16.msra.mxu0 %v2740_v33  ;;  %1771 = vmatpush1.bf16.msra.mxu1 %v2741_v34  ;;  %v2824_v33 = vld [vmem:[%s3396_s27 + $0x368] ss:$16 sps:$4 sm:$0xff]   ;;  %v2829_v34 = vld [vmem:[%s3396_s27 + $0x384] ss:$16 sps:$4 sm:$0xff]  }
  0xb9   : > { %1649 = vmatprep.subr.bf16.mxu0 %v2742_v35  ;;  %1772 = vmatprep.subr.bf16.mxu1 %v2744_v36  ;;  %v2832_v35 = vld [vmem:[%s3396_s27 + $0x38c] ss:$16 sps:$4 sm:$0xff]   ;;  %v2827_v36 = vld [vmem:[%s3396_s27 + $0x380] ss:$16 sps:$4 sm:$0xff]  }
  0xbc   : > { %1650 = vmatpush1.bf16.msra.mxu0 %v2746_v38  ;;  %1773 = vmatpush1.bf16.msra.mxu1 %v2747_v39  ;;  %v2835_v38 = vld [vmem:[%s3396_s27 + $0x3a4] ss:$16 sps:$4 sm:$0xff]   ;;  %v2838_v39 = vld [vmem:[%s3396_s27 + $0x3ac] ss:$16 sps:$4 sm:$0xff]  }
  0xbd   : > { %1651 = vmatprep.subr.bf16.mxu0 %v2748_v40  ;;  %1774 = vmatprep.subr.bf16.mxu1 %v2750_v41  ;;  %v2833_v40 = vld [vmem:[%s3396_s27 + $0x3a0] ss:$16 sps:$4 sm:$0xff]   ;;  %v2836_v41 = vld [vmem:[%s3396_s27 + $0x3a8] ss:$16 sps:$4 sm:$0xff]  }
  0xc0   : > { %1652 = vmatpush1.bf16.msra.mxu0 %v2752_v43  ;;  %1775 = vmatpush1.bf16.msra.mxu1 %v2753_v44  ;;  %v2841_v43 = vld [vmem:[%s3396_s27 + $0x3c4] ss:$16 sps:$4 sm:$0xff]   ;;  %v2844_v44 = vld [vmem:[%s3396_s27 + $0x3cc] ss:$16 sps:$4 sm:$0xff]  }
  0xc1   : > { %1662 = vmatprep.subr.bf16.mxu0 %v2757_v45  ;;  %1785 = vmatprep.subr.bf16.mxu1 %v2760_v46  ;;  %v2839_v45 = vld [vmem:[%s3396_s27 + $0x3c0] ss:$16 sps:$4 sm:$0xff]   ;;  %v2842_v46 = vld [vmem:[%s3396_s27 + $0x3c8] ss:$16 sps:$4 sm:$0xff]  }
  0xc3   : > { %1654 = vmatmul.mubr.bf16.vlgmr.msra.gmra.mrb[0].mxu0 %v656_v49  ;;  %1777 = vmatmul.mubr.bf16.vlgmr.msra.gmra.mrb[0].mxu1 %v656_v49  ;;  %v2845_v49 = vld [vmem:[%s3396_s27 + $0x3e0] ss:$16 sps:$4 sm:$0xff]  }
  0xc4   : > { %1663 = vmatpush1.bf16.msra.mxu0 %v2755_v48  ;;  %1786 = vmatpush1.bf16.msra.mxu1 %v2758_v50  ;;  %v2850_v48 = vld [vmem:[%s3396_s27 + $0x3ec] ss:$16 sps:$4 sm:$0xff]   ;;  %v2848_v50 = vld [vmem:[%s3396_s27 + $0x3e8] ss:$16 sps:$4 sm:$0xff]  }
  0xc5   : > { %1664 = vmatprep.subr.bf16.mxu0 %v2763_v51  ;;  %1787 = vmatprep.subr.bf16.mxu1 %v2766_v52  ;;  %v2853_v51 = vld [vmem:[%s3396_s27 + $0x404] ss:$16 sps:$4 sm:$0xff]   ;;  %v2856_v52 = vld [vmem:[%s3396_s27 + $0x40c] ss:$16 sps:$4 sm:$0xff]  }
  0xc6   : > { %1694 = vmatprep.mubr.bf16.mxu0 %v659_v53  ;;  %1817 = vmatprep.mubr.bf16.mxu1 %v659_v53  ;;  %v658_v53 = vpack.c.bf16 %v3469_v42, %v3469_v42  ;;  %v2860_v42 = vld [vmem:[%s3396_s27 + $0x428] ss:$16 sps:$4 sm:$0xff]  }
  0xc8   : > { %1665 = vmatpush1.bf16.msra.mxu0 %v2761_v54  ;;  %1788 = vmatpush1.bf16.msra.mxu1 %v2764_v55  ;;  %v2851_v54 = vld [vmem:[%s3396_s27 + $0x400] ss:$16 sps:$4 sm:$0xff]   ;;  %v2854_v55 = vld [vmem:[%s3396_s27 + $0x408] ss:$16 sps:$4 sm:$0xff]  }
  0xc9   : > { %1666 = vmatprep.subr.bf16.mxu0 %v2769_v56  ;;  %1789 = vmatprep.subr.bf16.mxu1 %v2772_v57  ;;  %v2859_v56 = vld [vmem:[%s3396_s27 + $0x424] ss:$16 sps:$4 sm:$0xff]   ;;  %v2862_v57 = vld [vmem:[%s3396_s27 + $0x42c] ss:$16 sps:$4 sm:$0xff]  }
  0xcc   : > { %1667 = vmatpush1.bf16.msra.mxu0 %v2767_v58  ;;  %1790 = vmatpush1.bf16.msra.mxu1 %v2770_v59  ;;  %v2857_v58 = vld [vmem:[%s3396_s27 + $0x420] ss:$16 sps:$4 sm:$0xff]   ;;  %v2865_v59 = vld [vmem:[%s3396_s27 + $0x444] ss:$16 sps:$4 sm:$0xff]  }
  0xcd   : > { %1668 = vmatprep.subr.bf16.mxu0 %v2775_v60  ;;  %1791 = vmatprep.subr.bf16.mxu1 %v2778_v61  ;;  %v2868_v60 = vld [vmem:[%s3396_s27 + $0x44c] ss:$16 sps:$4 sm:$0xff]   ;;  %v2957_v61 = vmov 0  }
  0xd0   : > { %1669 = vmatpush1.bf16.msra.mxu0 %v2773_v62  ;;  %1792 = vmatpush1.bf16.msra.mxu1 %v2776_v63  ;;  %v2863_v62 = vld [vmem:[%s3396_s27 + $0x440] ss:$16 sps:$4 sm:$0xff]   ;;  %v2866_v63 = vld [vmem:[%s3396_s27 + $0x448] ss:$16 sps:$4 sm:$0xff]  }
  0xd1   : > { %1670 = vmatprep.subr.bf16.mxu0 %v2781_v0  ;;  %1793 = vmatprep.subr.bf16.mxu1 %v2784_v1  ;;  %v2871_v0 = vld [vmem:[%s3396_s27 + $0x464] ss:$16 sps:$4 sm:$0xff]   ;;  %v2874_v1 = vld [vmem:[%s3396_s27 + $0x46c] ss:$16 sps:$4 sm:$0xff]  }
  0xd4   : > { %1671 = vmatpush1.bf16.msra.mxu0 %v2779_v2  ;;  %1794 = vmatpush1.bf16.msra.mxu1 %v2782_v3  ;;  %v2869_v2 = vld [vmem:[%s3396_s27 + $0x460] ss:$16 sps:$4 sm:$0xff]   ;;  %v2872_v3 = vld [vmem:[%s3396_s27 + $0x468] ss:$16 sps:$4 sm:$0xff]  }
  0xd5   : > { %1672 = vmatprep.subr.bf16.mxu0 %v2787_v4  ;;  %1795 = vmatprep.subr.bf16.mxu1 %v2790_v5  ;;  %v2877_v4 = vld [vmem:[%s3396_s27 + $0x484] ss:$16 sps:$4 sm:$0xff]   ;;  %v2880_v5 = vld [vmem:[%s3396_s27 + $0x48c] ss:$16 sps:$4 sm:$0xff]  }
  0xd8   : > { %1673 = vmatpush1.bf16.msra.mxu0 %v2785_v6  ;;  %1796 = vmatpush1.bf16.msra.mxu1 %v2788_v7  ;;  %v2875_v6 = vld [vmem:[%s3396_s27 + $0x480] ss:$16 sps:$4 sm:$0xff]   ;;  %v2878_v7 = vld [vmem:[%s3396_s27 + $0x488] ss:$16 sps:$4 sm:$0xff]  }
  0xd9   : > { %1674 = vmatprep.subr.bf16.mxu0 %v2793_v8  ;;  %1797 = vmatprep.subr.bf16.mxu1 %v2796_v9  ;;  %v2883_v8 = vld [vmem:[%s3396_s27 + $0x4a4] ss:$16 sps:$4 sm:$0xff]   ;;  %v2886_v9 = vld [vmem:[%s3396_s27 + $0x4ac] ss:$16 sps:$4 sm:$0xff]  }
  0xdc   : > { %1675 = vmatpush1.bf16.msra.mxu0 %v2791_v10  ;;  %1798 = vmatpush1.bf16.msra.mxu1 %v2794_v11  ;;  %v2881_v10 = vld [vmem:[%s3396_s27 + $0x4a0] ss:$16 sps:$4 sm:$0xff]   ;;  %v2884_v11 = vld [vmem:[%s3396_s27 + $0x4a8] ss:$16 sps:$4 sm:$0xff]  }
  0xdd   : > { %1676 = vmatprep.subr.bf16.mxu0 %v2799_v13  ;;  %1799 = vmatprep.subr.bf16.mxu1 %v2802_v14  ;;  %v2889_v13 = vld [vmem:[%s3396_s27 + $0x4c4] ss:$16 sps:$4 sm:$0xff]   ;;  %v2892_v14 = vld [vmem:[%s3396_s27 + $0x4cc] ss:$16 sps:$4 sm:$0xff]  }
  0xe0   : > { %1677 = vmatpush1.bf16.msra.mxu0 %v2797_v15  ;;  %1800 = vmatpush1.bf16.msra.mxu1 %v2800_v16  ;;  %v2887_v15 = vld [vmem:[%s3396_s27 + $0x4c0] ss:$16 sps:$4 sm:$0xff]   ;;  %v2890_v16 = vld [vmem:[%s3396_s27 + $0x4c8] ss:$16 sps:$4 sm:$0xff]  }
  0xe1   : > { %1678 = vmatprep.subr.bf16.mxu0 %v2805_v17  ;;  %1801 = vmatprep.subr.bf16.mxu1 %v2808_v19  ;;  %v2895_v17 = vld [vmem:[%s3396_s27 + $0x4e4] ss:$16 sps:$4 sm:$0xff]   ;;  %v2898_v19 = vld [vmem:[%s3396_s27 + $0x4ec] ss:$16 sps:$4 sm:$0xff]  }
  0xe4   : > { %1679 = vmatpush1.bf16.msra.mxu0 %v2803_v20  ;;  %1802 = vmatpush1.bf16.msra.mxu1 %v2806_v21  ;;  %v2893_v20 = vld [vmem:[%s3396_s27 + $0x4e0] ss:$16 sps:$4 sm:$0xff]   ;;  %v2896_v21 = vld [vmem:[%s3396_s27 + $0x4e8] ss:$16 sps:$4 sm:$0xff]  }
  0xe5   : > { %1680 = vmatprep.subr.bf16.mxu0 %v2811_v22  ;;  %1803 = vmatprep.subr.bf16.mxu1 %v2814_v23  ;;  %v2282_v22 = vld.sshfl [vmem:[%s3378_s5 + $0x8] sm:$0x3 pattern:$0x76325410] }
  0xe6   : > { %v660_v23 = vpack.c.bf16 %v2282_v22, %v2282_v22  ;;  %v1973_v22 = vld [vmem:[%s3388_s11 + $0x138] sm:$0xff] (!%p2443_p1) }
  0xe8   : > { %1681 = vmatpush1.bf16.msra.mxu0 %v2809_v24  ;;  %1804 = vmatpush1.bf16.msra.mxu1 %v2812_v25 }
  0xe9   : > { %1682 = vmatprep.subr.bf16.mxu0 %v2817_v26  ;;  %1805 = vmatprep.subr.bf16.mxu1 %v2820_v27 }
  0xec   : > { %1683 = vmatpush1.bf16.msra.mxu0 %v2815_v28  ;;  %1806 = vmatpush1.bf16.msra.mxu1 %v2818_v29 }
  0xed   : > { %1684 = vmatprep.subr.bf16.mxu0 %v2823_v30  ;;  %1807 = vmatprep.subr.bf16.mxu1 %v2826_v31 }
  0xf0   : > { %1685 = vmatpush1.bf16.msra.mxu0 %v2821_v32  ;;  %1808 = vmatpush1.bf16.msra.mxu1 %v2824_v33 }
  0xf1   : > { %1686 = vmatprep.subr.bf16.mxu0 %v2829_v34  ;;  %1809 = vmatprep.subr.bf16.mxu1 %v2832_v35 }
  0xf4   : > { %1687 = vmatpush1.bf16.msra.mxu0 %v2827_v36  ;;  %1810 = vmatpush1.bf16.msra.mxu1 %v2830_v37  ;;  %v622_v36 = vld [vmem:[#allocation2] sm:$0xff] }
  0xf5   : > { %1688 = vmatprep.subr.bf16.mxu0 %v2835_v38  ;;  %1811 = vmatprep.subr.bf16.mxu1 %v2838_v39  ;;  %v1950_v39 = vld [vmem:[%s3388_s11 + $0x80] sm:$0xff] (!%p2443_p1) }
  0xf8   : > { %1689 = vmatpush1.bf16.msra.mxu0 %v2833_v40  ;;  %1812 = vmatpush1.bf16.msra.mxu1 %v2836_v41  ;;  %v1951_v40 = vld [vmem:[%s3388_s11 + $0x88] sm:$0xff] (!%p2443_p1)  ;;  %v1982_v41 = vld [vmem:[%s3388_s11 + $0x180] sm:$0xff] (!%p2443_p1) }
  0xf9   : > { %1690 = vmatprep.subr.bf16.mxu0 %v2841_v43  ;;  %1813 = vmatprep.subr.bf16.mxu1 %v2844_v44  ;;  %v2517_v43 = vpack.c.bf16 (!%p2443_p1), %v1951_v40, %v1950_v39  ;;  %v1983_v44 = vld [vmem:[%s3388_s11 + $0x188] sm:$0xff] (!%p2443_p1) }
  0xfc   : > { %1691 = vmatpush1.bf16.msra.mxu0 %v2839_v45  ;;  %1814 = vmatpush1.bf16.msra.mxu1 %v2842_v46  ;;  %v1934_v45 = vld [vmem:[%s3388_s11] sm:$0xff] (!%p2443_p1)  ;;  %v1935_v46 = vld [vmem:[%s3388_s11 + $0x8] sm:$0xff] (!%p2443_p1) }
  0xfd   : > { %1692 = vmatprep.subr.bf16.mxu0 %v2847_v47  ;;  %1815 = vmatprep.subr.bf16.mxu1 %v2850_v48  ;;  %v2549_v47 = vpack.c.bf16 (!%p2443_p1), %v1983_v44, %v1982_v41  ;;  %v2519_v48 = vpack.c.bf16 (!%p2443_p1), %v1935_v46, %v1934_v45  ;;  %v1945_v44 = vld [vmem:[%s3388_s11 + $0x58] sm:$0xff] (!%p2443_p1)  ;;  %v1976_v45 = vld [vmem:[%s3388_s11 + $0x150] sm:$0xff] (!%p2443_p1) }
 0x100   : > { %1693 = vmatpush1.bf16.msra.mxu0 %v2845_v49  ;;  %1816 = vmatpush1.bf16.msra.mxu1 %v2848_v50  ;;  %v1966_v49 = vld [vmem:[%s3388_s11 + $0x100] sm:$0xff] (!%p2443_p1)  ;;  %v1967_v50 = vld [vmem:[%s3388_s11 + $0x108] sm:$0xff] (!%p2443_p1) }
 0x101   : > { %1703 = vmatprep.subr.bf16.mxu0 %v2853_v51  ;;  %1826 = vmatprep.subr.bf16.mxu1 %v2856_v52  ;;  %v1952_v51 = vld [vmem:[%s3388_s11 + $0x90] sm:$0xff] (!%p2443_p1)  ;;  %v2551_v52 = vpack.c.bf16 (!%p2443_p1), %v1967_v50, %v1966_v49  ;;  %v1963_v49 = vld [vmem:[%s3388_s11 + $0xe8] sm:$0xff] (!%p2443_p1)  ;;  %v1900_v50 = vsub.s32 (!%p2443_p1), 0, %v3438_v12 }
 0x103   : > { %1695 = vmatmul.mubr.bf16.vlgmr.msra.gmra.mrb[0].mxu0 %v658_v53  ;;  %1818 = vmatmul.mubr.bf16.vlgmr.msra.gmra.mrb[0].mxu1 %v658_v53  ;;  %v1953_v53 = vld [vmem:[%s3388_s11 + $0x98] sm:$0xff] (!%p2443_p1) }
 0x104   : > { %1704 = vmatpush1.bf16.msra.mxu0 %v2851_v54  ;;  %1827 = vmatpush1.bf16.msra.mxu1 %v2854_v55  ;;  %v1984_v54 = vld [vmem:[%s3388_s11 + $0x190] sm:$0xff] (!%p2443_p1)  ;;  %v1985_v55 = vld [vmem:[%s3388_s11 + $0x198] sm:$0xff] (!%p2443_p1) }
 0x105   : > { %1705 = vmatprep.subr.bf16.mxu0 %v2859_v56  ;;  %1828 = vmatprep.subr.bf16.mxu1 %v2862_v57  ;;  %v2521_v56 = vpack.c.bf16 (!%p2443_p1), %v1953_v53, %v1952_v51  ;;  %v2553_v57 = vpack.c.bf16 (!%p2443_p1), %v1985_v55, %v1984_v54  ;;  %v1904_v51 = vsub.s32 (!%p2443_p1), 1, %v3438_v12  ;;  %v1994_v53 = vld [vmem:[%s3388_s11 + $0x1e0] sm:$0xff] (!%p2443_p1)  ;;  %v1995_v54 = vld [vmem:[%s3388_s11 + $0x1e8] sm:$0xff] (!%p2443_p1)  ;;  %v1912_v55 = vsub.s32 (!%p2443_p1), 3, %v3438_v12 }
 0x106   : > { %1735 = vmatprep.mubr.bf16.mxu0 %v2957_v61  ;;  %1858 = vmatprep.mubr.bf16.mxu1 %v2957_v61  ;;  %v1969_v61 = vld [vmem:[%s3388_s11 + $0x118] sm:$0xff] (!%p2443_p1) }
 0x108   : > { %1706 = vmatpush1.bf16.msra.mxu0 %v2857_v58  ;;  %1829 = vmatpush1.bf16.msra.mxu1 %v2860_v42  ;;  %v1936_v58 = vld [vmem:[%s3388_s11 + $0x10] sm:$0xff] (!%p2443_p1)  ;;  %v1937_v42 = vld [vmem:[%s3388_s11 + $0x18] sm:$0xff] (!%p2443_p1) }
 0x109   : > { %1707 = vmatprep.subr.bf16.mxu0 %v2865_v59  ;;  %1830 = vmatprep.subr.bf16.mxu1 %v2868_v60  ;;  %v1968_v59 = vld [vmem:[%s3388_s11 + $0x110] sm:$0xff] (!%p2443_p1)  ;;  %v2523_v60 = vpack.c.bf16 (!%p2443_p1), %v1937_v42, %v1936_v58 }
 0x10c   : > { %1708 = vmatpush1.bf16.msra.mxu0 %v2863_v62  ;;  %1831 = vmatpush1.bf16.msra.mxu1 %v2866_v63  ;;  %v1954_v62 = vld [vmem:[%s3388_s11 + $0xa0] sm:$0xff] (!%p2443_p1)  ;;  %v1955_v63 = vld [vmem:[%s3388_s11 + $0xa8] sm:$0xff] (!%p2443_p1) }
 0x10d   : > { %1709 = vmatprep.subr.bf16.mxu0 %v2871_v0  ;;  %1832 = vmatprep.subr.bf16.mxu1 %v2874_v1  ;;  %v2555_v0 = vpack.c.bf16 (!%p2443_p1), %v1969_v61, %v1968_v59  ;;  %v2525_v1 = vpack.c.bf16 (!%p2443_p1), %v1955_v63, %v1954_v62  ;;  %v1947_v59 = vld [vmem:[%s3388_s11 + $0x68] sm:$0xff] (!%p2443_p1)  ;;  %v1896_v61 = vld [vmem:[%s604_s7] sm:$0xf] (!%p2443_p1)  ;;  %v2573_v62 = vpack.c.bf16 (!%p2443_p1), %v1995_v54, %v1994_v53 }
 0x10e   : > { %v1979_v63 = vld [vmem:[%s3388_s11 + $0x168] sm:$0xff] (!%p2443_p1) }
 0x110   : > { %1710 = vmatpush1.bf16.msra.mxu0 %v2869_v2  ;;  %1833 = vmatpush1.bf16.msra.mxu1 %v2872_v3  ;;  %v1986_v2 = vld [vmem:[%s3388_s11 + $0x1a0] sm:$0xff] (!%p2443_p1)  ;;  %v1987_v3 = vld [vmem:[%s3388_s11 + $0x1a8] sm:$0xff] (!%p2443_p1) }
 0x111   : > { %1711 = vmatprep.subr.bf16.mxu0 %v2877_v4  ;;  %1834 = vmatprep.subr.bf16.mxu1 %v2880_v5  ;;  %v1938_v4 = vld [vmem:[%s3388_s11 + $0x20] sm:$0xff] (!%p2443_p1)  ;;  %v2557_v5 = vpack.c.bf16 (!%p2443_p1), %v1987_v3, %v1986_v2  ;;  %v1905_v2 = vrot.slane (!%p2443_p1), %v1896_v61, %v1904_v51 }
 0x114   : > { %1712 = vmatpush1.bf16.msra.mxu0 %v2875_v6  ;;  %1835 = vmatpush1.bf16.msra.mxu1 %v2878_v7  ;;  %v1939_v6 = vld [vmem:[%s3388_s11 + $0x28] sm:$0xff] (!%p2443_p1)  ;;  %v1970_v7 = vld [vmem:[%s3388_s11 + $0x120] sm:$0xff] (!%p2443_p1) }
 0x115   : > { %1713 = vmatprep.subr.bf16.mxu0 %v2883_v8  ;;  %1836 = vmatprep.subr.bf16.mxu1 %v2886_v9  ;;  %v1971_v8 = vld [vmem:[%s3388_s11 + $0x128] sm:$0xff] (!%p2443_p1)  ;;  %v2527_v9 = vpack.c.bf16 (!%p2443_p1), %v1939_v6, %v1938_v4  ;;  %v1996_v4 = vld [vmem:[%s3388_s11 + $0x1f0] sm:$0xff] (!%p2443_p1)  ;;  %v1913_v6 = vrot.slane (!%p2443_p1), %v1896_v61, %v1912_v55 }
 0x118   : > { %1714 = vmatpush1.bf16.msra.mxu0 %v2881_v10  ;;  %1837 = vmatpush1.bf16.msra.mxu1 %v2884_v11  ;;  %v1956_v10 = vld [vmem:[%s3388_s11 + $0xb0] sm:$0xff] (!%p2443_p1)  ;;  %v1957_v11 = vld [vmem:[%s3388_s11 + $0xb8] sm:$0xff] (!%p2443_p1) }
 0x119   : > { %1715 = vmatprep.subr.bf16.mxu0 %v2889_v13  ;;  %1838 = vmatprep.subr.bf16.mxu1 %v2892_v14  ;;  %v1988_v13 = vld [vmem:[%s3388_s11 + $0x1b0] sm:$0xff] (!%p2443_p1)  ;;  %v2559_v14 = vpack.c.bf16 (!%p2443_p1), %v1971_v8, %v1970_v7 }
 0x11c   : > { %1716 = vmatpush1.bf16.msra.mxu0 %v2887_v15  ;;  %1839 = vmatpush1.bf16.msra.mxu1 %v2890_v16  ;;  %v2529_v15 = vpack.c.bf16 (!%p2443_p1), %v1957_v11, %v1956_v10  ;;  %v1989_v16 = vld [vmem:[%s3388_s11 + $0x1b8] sm:$0xff] (!%p2443_p1)  ;;  %v1948_v11 = vld [vmem:[%s3388_s11 + $0x70] sm:$0xff] (!%p2443_p1) }
 0x11d   : > { %1717 = vmatprep.subr.bf16.mxu0 %v2895_v17  ;;  %1840 = vmatprep.subr.bf16.mxu1 %v2898_v19  ;;  %v1940_v17 = vld [vmem:[%s3388_s11 + $0x30] sm:$0xff] (!%p2443_p1)  ;;  %v1941_v19 = vld [vmem:[%s3388_s11 + $0x38] sm:$0xff] (!%p2443_p1) }
 0x120   : > { %1718 = vmatpush1.bf16.msra.mxu0 %v2893_v20  ;;  %1841 = vmatpush1.bf16.msra.mxu1 %v2896_v21  ;;  %v2561_v20 = vpack.c.bf16 (!%p2443_p1), %v1989_v16, %v1988_v13  ;;  %v1972_v21 = vld [vmem:[%s3388_s11 + $0x130] sm:$0xff] (!%p2443_p1)  ;;  %v1949_v13 = vld [vmem:[%s3388_s11 + $0x78] sm:$0xff] (!%p2443_p1) }
 0x121   : > { %2518 = vmatprep.subr.bf16.mxu0 (!%p2443_p1), %v2517_v43  ;;  %2550 = vmatprep.subr.bf16.mxu1 (!%p2443_p1), %v2549_v47  ;;  %v1944_v43 = vld [vmem:[%s3388_s11 + $0x50] sm:$0xff] (!%p2443_p1)  ;;  %v1977_v47 = vld [vmem:[%s3388_s11 + $0x158] sm:$0xff] (!%p2443_p1) }
 0x122   : > { %v2571_v58 = vpack.c.bf16 (!%p2443_p1), %v1977_v47, %v1976_v45  ;;  %v1980_v16 = vld [vmem:[%s3388_s11 + $0x170] sm:$0xff] (!%p2443_p1) }
 0x123   : > { %1736 = vmatmul.mubr.bf16.vlgmr.msra.gmra.mrb[0].mxu0 %v660_v23  ;;  %1859 = vmatmul.mubr.bf16.vlgmr.msra.gmra.mrb[0].mxu1 %v660_v23  ;;  %v1958_v23 = vld [vmem:[%s3388_s11 + $0xc0] sm:$0xff] (!%p2443_p1) }
 0x124   : > { %2520 = vmatpush3.bf16.msra.mxu0 (!%p2443_p1), %v2519_v48  ;;  %2552 = vmatpush3.bf16.msra.mxu1 (!%p2443_p1), %v2551_v52  ;;  %v1962_v48 = vld [vmem:[%s3388_s11 + $0xe0] sm:$0xff] (!%p2443_p1)  ;;  %v1908_v52 = vsub.s32 (!%p2443_p1), 2, %v3438_v12  ;;  %v1964_v12 = vld [vmem:[%s3388_s11 + $0xf0] sm:$0xff] (!%p2443_p1) }
 0x125   : > { %2522 = vmatprep.subr.bf16.mxu0 (!%p2443_p1), %v2521_v56  ;;  %2554 = vmatprep.subr.bf16.mxu1 (!%p2443_p1), %v2553_v57  ;;  %v2539_v56 = vpack.c.bf16 (!%p2443_p1), %v1945_v44, %v1944_v43  ;;  %v1946_v57 = vld [vmem:[%s3388_s11 + $0x60] sm:$0xff] (!%p2443_p1)  ;;  %v2541_v42 = vpack.c.bf16 (!%p2443_p1), %v1963_v49, %v1962_v48 }
 0x126   : > { %v1909_v3 = vrot.slane (!%p2443_p1), %v1896_v61, %v1908_v52  ;;  %v2543_v7 = vpack.c.bf16 (!%p2443_p1), %v1947_v59, %v1946_v57 }
 0x128   : > { %2524 = vmatpush3.bf16.msra.mxu0 (!%p2443_p1), %v2523_v60  ;;  %2556 = vmatpush3.bf16.msra.mxu1 (!%p2443_p1), %v2555_v0  ;;  %v1978_v60 = vld [vmem:[%s3388_s11 + $0x160] sm:$0xff] (!%p2443_p1)  ;;  %v1965_v0 = vld [vmem:[%s3388_s11 + $0xf8] sm:$0xff] (!%p2443_p1) }
 0x129   : > { %2526 = vmatprep.subr.bf16.mxu0 (!%p2443_p1), %v2525_v1  ;;  %2558 = vmatprep.subr.bf16.mxu1 (!%p2443_p1), %v2557_v5  ;;  %v1901_v1 = vrot.slane (!%p2443_p1), %v1896_v61, %v1900_v50  ;;  %v1997_v5 = vld [vmem:[%s3388_s11 + $0x1f8] sm:$0xff] (!%p2443_p1)  ;;  %v2545_v10 = vpack.c.bf16 (!%p2443_p1), %v1965_v0, %v1964_v12 }
 0x12b   : > { %v1914_v8 = vcombine.low (!%p2443_p1), %v1901_v1, %v1905_v2 }
 0x12c   : > { %2528 = vmatpush3.bf16.msra.mxu0 (!%p2443_p1), %v2527_v9  ;;  %2560 = vmatpush3.bf16.msra.mxu1 (!%p2443_p1), %v2559_v14  ;;  %v2575_v9 = vpack.c.bf16 (!%p2443_p1), %v1979_v63, %v1978_v60  ;;  %v1915_v14 = vcombine.low (!%p2443_p1), %v1909_v3, %v1913_v6 }
 0x12d   : > { %2530 = vmatprep.subr.bf16.mxu0 (!%p2443_p1), %v2529_v15  ;;  %2562 = vmatprep.subr.bf16.mxu1 (!%p2443_p1), %v2561_v20  ;;  %v2577_v15 = vpack.c.bf16 (!%p2443_p1), %v1997_v5, %v1996_v4 }
 0x12e   : > { %v1929_v20 = vrot.slane (!%p2443_p1), %v1915_v14, %v3446_v18 }
 0x1f6   : > { %v1737_v24 = vpop.f32.mrb[0].mxu0  ;;  %v1860_v25 = vpop.f32.mrb[0].mxu1 }
 0x1f7   : > { %v1739_v26 = vpop.f32.mrb[1].mxu0  ;;  %v1862_v27 = vpop.f32.mrb[1].mxu1 }
 0x1f8   : > { %v1871_v28 = vcombine.low %v1737_v24, %v1739_v26  ;;  %v1872_v29 = vcombine.low %v1860_v25, %v1862_v27  ;;  %v1741_v30 = vpop.f32.mrb[2].mxu0  ;;  %v1864_v31 = vpop.f32.mrb[2].mxu1  ;;  %v1959_v24 = vld [vmem:[%s3388_s11 + $0xc8] sm:$0xff] (!%p2443_p1)  ;;  %v1990_v25 = vld [vmem:[%s3388_s11 + $0x1c0] sm:$0xff] (!%p2443_p1)  ;;  %v2531_v27 = vpack.c.bf16 (!%p2443_p1), %v1941_v19, %v1940_v17  ;;  %v1981_v17 = vld [vmem:[%s3388_s11 + $0x178] sm:$0xff] (!%p2443_p1)  ;;  %v1922_v19 = vrot.slane (!%p2443_p1), %v1914_v8, %v3446_v18 }
 0x1f9   : > { %v1742_v32 = vpop.f32.mrb[3].mxu0  ;;  %v1865_v33 = vpop.f32.mrb[3].mxu1  ;;  %v1991_v26 = vld [vmem:[%s3388_s11 + $0x1c8] sm:$0xff] (!%p2443_p1)  ;;  %v1942_v30 = vld [vmem:[%s3388_s11 + $0x40] sm:$0xff] (!%p2443_p1) }
 0x1fa   : > { %v1879_v34 = vrot.slane %v1871_v28, %v3446_v18  ;;  %v1886_v35 = vrot.slane %v1872_v29, %v3446_v18  ;;  %1894 = sbr.rel (%p2443_p1) target bundleno = 749 (0x2ed), region = 67  ;;  %v2563_v28 = vpack.c.bf16 (!%p2443_p1), %v1973_v22, %v1972_v21  ;;  %v2533_v29 = vpack.c.bf16 (!%p2443_p1), %v1959_v24, %v1958_v23  ;;  %v1943_v31 = vld [vmem:[%s3388_s11 + $0x48] sm:$0xff] (!%p2443_p1)  ;;  %v1974_v32 = vld [vmem:[%s3388_s11 + $0x140] sm:$0xff] (!%p2443_p1)  ;;  %2532 = vmatpush3.bf16.msra.mxu0 (!%p2443_p1), %v2531_v27 }
 0x1fb   : > { %v2565_v33 = vpack.c.bf16 (!%p2443_p1), %v1991_v26, %v1990_v25  ;;  %v2535_v39 = vpack.c.bf16 (!%p2443_p1), %v1943_v31, %v1942_v30  ;;  %v2547_v21 = vpack.c.bf16 (!%p2443_p1), %v1949_v13, %v1948_v11  ;;  %v2579_v23 = vpack.c.bf16 (!%p2443_p1), %v1981_v17, %v1980_v16 }
 0x1fc   : > { %v1887_v37 = vcombine.low %v1879_v34, %v1886_v35  ;;  %v1975_v34 = vld [vmem:[%s3388_s11 + $0x148] sm:$0xff] (!%p2443_p1)  ;;  %v1960_v35 = vld [vmem:[%s3388_s11 + $0xd0] sm:$0xff] (!%p2443_p1)  ;;  %2564 = vmatpush3.bf16.msra.mxu1 (!%p2443_p1), %v2563_v28  ;;  %2534 = vmatprep.subr.bf16.mxu0 (!%p2443_p1), %v2533_v29  ;;  %v1930_v24 = vcombine.low (!%p2443_p1), %v1922_v19, %v1929_v20 }
 0x1fd   : > { %v2567_v40 = vpack.c.bf16 (!%p2443_p1), %v1975_v34, %v1974_v32  ;;  %2566 = vmatprep.subr.bf16.mxu1 (!%p2443_p1), %v2565_v33 }
 0x1fe   : > { %v1889_v38 = vadd.f32 %v1887_v37, %v622_v36  ;;  %v1961_v36 = vld [vmem:[%s3388_s11 + $0xd8] sm:$0xff] (!%p2443_p1)  ;;  %v1992_v37 = vld [vmem:[%s3388_s11 + $0x1d0] sm:$0xff] (!%p2443_p1)  ;;  %2536 = vmatpush3.bf16.msra.mxu0 (!%p2443_p1), %v2535_v39 }
 0x1ff   : > { %v2537_v41 = vpack.c.bf16 (!%p2443_p1), %v1961_v36, %v1960_v35 }
 0x200   : > { %1890 = vst [vmem:[#allocation2] sm:$0xff] %v1889_v38  ;;  %v1993_v38 = vld [vmem:[%s3388_s11 + $0x1d8] sm:$0xff] (!%p2443_p1)  ;;  %2568 = vmatpush3.bf16.msra.mxu1 (!%p2443_p1), %v2567_v40 }
 0x201   : > { %v2569_v46 = vpack.c.bf16 %v1993_v38, %v1992_v37  ;;  %2538 = vmatprep.subr.bf16.mxu0 %v2537_v41 }
 0x202   : > { %2540 = vmatpush3.bf16.msra.mxu0 %v2539_v56 }
 0x203   : > { %2570 = vmatprep.subr.bf16.mxu1 %v2569_v46  ;;  %2542 = vmatprep.subr.bf16.mxu0 %v2541_v42 }
 0x204   : > { %2572 = vmatpush3.bf16.msra.mxu1 %v2571_v58 }
 0x205   : > { %2574 = vmatprep.subr.bf16.mxu1 %v2573_v62 }
 0x206   : > { %2544 = vmatpush3.bf16.msra.mxu0 %v2543_v7 }
 0x207   : > { %v1895_v22 = vld [vmem:[#allocation2] sm:$0xff]  ;;  %2546 = vmatprep.subr.bf16.mxu0 %v2545_v10 }
 0x208   : > { %2576 = vmatpush3.bf16.msra.mxu1 %v2575_v9  ;;  %v1932_v25 = vadd.f32 %v1930_v24, %v1895_v22 }
 0x209   : > { %2578 = vmatprep.subr.bf16.mxu1 %v2577_v15 }
 0x20a   : > { %2548 = vmatpush3.bf16.msra.mxu0 %v2547_v21  ;;  %v1933_v26 = vmax.f32 %v1932_v25, 0.0 }
 0x20c   : > { %2580 = vmatpush3.bf16.msra.mxu1 %v2579_v23  ;;  %v2006_v27 = vrot.slane %v1933_v26, %v3446_v18  ;;  %v1999_v28 = vcombine.high %v1933_v26, %v1933_v26 }
 0x20e   : > { %v2014_v29 = vcombine.high %v2006_v27, %v2006_v27  ;;  %v2013_v30 = vrot.slane %v1999_v28, %v3446_v18 }
 0x210   : > { %2084 = vmatprep.mubr.f32.mxu0 %v2014_v29  ;;  %v2015_v31 = vcombine.high %v2013_v30, %v2013_v30 }
 0x211   : > { %2085 = vmatmul.mubr.f32.vlgmr.msra.gmra.mrb[0].mxu0 %v2006_v27 }
 0x212   : > { %2154 = vmatprep.mubr.f32.mxu1 %v2015_v31 }
 0x213   : > { %2155 = vmatmul.mubr.f32.vlgmr.msra.gmra.mrb[0].mxu1 %v2013_v30 }
 0x2e4   : > { %v2479_v32 = vpop.f32.mrb[0].mxu0 }
 0x2e5   : > { %v2480_v33 = vpop.f32.mrb[1].mxu0 }
 0x2e6   : > { %v2514_v34 = vpop.f32.mrb[0].mxu1  ;;  %v2481_v35 = vadd.f32 %v2480_v33, %v2479_v32 }
 0x2e7   : > { %v2515_v36 = vpop.f32.mrb[1].mxu1 }
 0x2e8   : > { %v2516_v37 = vadd.f32 %v2515_v36, %v2514_v34 }
 0x2ea   : > { %v2157_v38 = vadd.f32 %v2516_v37, %v2481_v35 }
 0x2ec   : > { %2161 = vst.msk [vmem:[%s3394_s29] sm:$0x3] %vm2160_vm0, %v2157_v38 }
 0x2ed PF: > { %s14_s21 = sadd.s32 1, %s2953_s21   ;;  %s3681_s15 = smov %s2933_s16 }
 0x2ee   : > { %p11_p2 = scmp.ge.s32.totalorder %s14_s21, 12   ;;  %s3682_s16 = smov %s3034_s28 }
 0x2ef   : > { %s3683_s17 = smov %s2945_s19  ;;  %s3684_s18 = smov %s2949_s20 }
 0x2f0   : > { %s3685_s19 = smov %s3688_s22  ;;  %s3686_s20 = smov %s3692_s23 }
 0x2f1   :  { %13 = sbr.rel (!%p11_p2) target bundleno = 4 (0x4), region = 111 }

// kernel: dueling_cnn_forward.2
= control target key start
LH: loop header
LB: loop body
LE: loop exit
PB: predicated region body
PF: predicated region fallthrough
CT: control target
= control target key end

     0   :  { %v19350_v0 = vmov 0.0|0.0   ;;  %vm13150_vm0 = vmmov 0   ;;  %vm1169_vm1 = vcmask 261120   ;;  %vm1705_vm2 = vcmask 1046528   ;;  %s19338_s1 = inlined_call_operand.vmem [shape: f32[256,32], index: 1, kind: input, shape index: {}]   ;;  %s19339_s0 = inlined_call_operand.vmem [shape: f32[888,256], index: 0, kind: input, shape index: {}]   ;;  %s19340_s3 = inlined_call_operand.vmem [shape: f32[512,64], index: 3, kind: input, shape index: {}]   ;;  %s19341_s2 = inlined_call_operand.vmem [shape: f32[1,32], index: 2, kind: input, shape index: {}]   ;;  %s19342_s5 = inlined_call_operand.vmem [shape: f32[576,64], index: 5, kind: input, shape index: {}]   ;;  %s19343_s4 = inlined_call_operand.vmem [shape: f32[1,64], index: 4, kind: input, shape index: {}]   ;;  %s19344_s7 = inlined_call_operand.vmem [shape: f32[100,187], index: 7, kind: input, shape index: {}]   ;;  %s19345_s6 = inlined_call_operand.vmem [shape: f32[1,64], index: 6, kind: input, shape index: {}]   ;;  %s19346_s8 = inlined_call_operand.vmem [shape: f32[100,64], index: 8, kind: output, shape index: {}]  }
   0x1   :  { %12620 = vmatprep.subr.bf16.mxu0 %v19350_v0  ;;  %v251_v1 = vld [vmem:[%s19338_s1] sm:$0xff]  ;;  %v252_v2 = vld [vmem:[%s19338_s1 + $0x8] sm:$0xff]  ;;  %v253_v3 = vld [vmem:[%s19338_s1 + $0x10] sm:$0xff]  ;;  %12945 = vmatprep.subr.bf16.mxu1 %v19350_v0  ;;  %vm1113_vm3 = vcmask 1043456   ;;  %vm3719_vm4 = vcmask 1044480   ;;  %vm2040_vm5 = vcmask 1042432  }
   0x2   :  { %v12621_v4 = vpack.c.bf16 %v252_v2, %v251_v1  ;;  %v254_v5 = vld [vmem:[%s19338_s1 + $0x18] sm:$0xff]  ;;  %v255_v7 = vld [vmem:[%s19338_s1 + $0x20] sm:$0xff]  ;;  %v256_v8 = vld [vmem:[%s19338_s1 + $0x28] sm:$0xff]  ;;  %vm4056_vm6 = vcmask 1040384   ;;  %vm6492_vm7 = vcmask 523264   ;;  %vm6959_vm8 = vcmask 1045504  }
   0x3   :  { %v12624_v6 = vpack.c.bf16 %v254_v5, %v253_v3  ;;  %v12627_v9 = vpack.c.bf16 %v256_v8, %v255_v7  ;;  %v257_v10 = vld [vmem:[%s19338_s1 + $0x30] sm:$0xff]  ;;  %v258_v11 = vld [vmem:[%s19338_s1 + $0x38] sm:$0xff]  ;;  %v30_v12 = vld [vmem:[%s19339_s0 + $0x8] sm:$0xff]  ;;  %vm8179_vm9 = vcmask 1041408   ;;  %vm9088_vm10 = vcmask 482304  }
   0x4   :  { %12622 = vmatpush1.bf16.msra.mxu0 %v12621_v4  ;;  %v12630_v13 = vpack.c.bf16 %v258_v11, %v257_v10  ;;  %354 = vmatprep.mubr.f32.mxu0 %v30_v12  ;;  %v259_v14 = vld [vmem:[%s19338_s1 + $0x40] sm:$0xff]  ;;  %v260_v15 = vld [vmem:[%s19338_s1 + $0x48] sm:$0xff]  ;;  %v261_v17 = vld [vmem:[%s19338_s1 + $0x50] sm:$0xff]  ;;  %vm13152_vm11 = vmmov 1   ;;  %vm9273_vm13 = vcmask 519168  }
   0x5   :  { %12623 = vmatprep.subr.bf16.mxu0 %v19350_v0  ;;  %v12633_v16 = vpack.c.bf16 %v260_v15, %v259_v14  ;;  %v262_v18 = vld [vmem:[%s19338_s1 + $0x58] sm:$0xff]  ;;  %v263_v20 = vld [vmem:[%s19338_s1 + $0x60] sm:$0xff]  ;;  %v264_v21 = vld [vmem:[%s19338_s1 + $0x68] sm:$0xff] }
   0x6   :  { %v12636_v19 = vpack.c.bf16 %v262_v18, %v261_v17  ;;  %v12639_v22 = vpack.c.bf16 %v264_v21, %v263_v20  ;;  %v265_v23 = vld [vmem:[%s19338_s1 + $0x70] sm:$0xff]  ;;  %v266_v24 = vld [vmem:[%s19338_s1 + $0x78] sm:$0xff]  ;;  %v267_v26 = vld [vmem:[%s19338_s1 + $0x80] sm:$0xff] }
   0x7   :  { %v12642_v25 = vpack.c.bf16 %v266_v24, %v265_v23  ;;  %v268_v27 = vld [vmem:[%s19338_s1 + $0x88] sm:$0xff]  ;;  %v269_v29 = vld [vmem:[%s19338_s1 + $0x90] sm:$0xff]  ;;  %v270_v30 = vld [vmem:[%s19338_s1 + $0x98] sm:$0xff] }
   0x8   :  { %12625 = vmatpush1.bf16.msra.mxu0 %v12624_v6  ;;  %v12645_v28 = vpack.c.bf16 %v268_v27, %v267_v26  ;;  %v12648_v31 = vpack.c.bf16 %v270_v30, %v269_v29  ;;  %v271_v32 = vld [vmem:[%s19338_s1 + $0xa0] sm:$0xff]  ;;  %v272_v33 = vld [vmem:[%s19338_s1 + $0xa8] sm:$0xff]  ;;  %v273_v35 = vld [vmem:[%s19338_s1 + $0xb0] sm:$0xff] }
   0x9   :  { %12626 = vmatprep.subr.bf16.mxu0 %v19350_v0  ;;  %v12651_v34 = vpack.c.bf16 %v272_v33, %v271_v32  ;;  %v274_v36 = vld [vmem:[%s19338_s1 + $0xb8] sm:$0xff]  ;;  %v275_v38 = vld [vmem:[%s19338_s1 + $0xc0] sm:$0xff]  ;;  %v276_v39 = vld [vmem:[%s19338_s1 + $0xc8] sm:$0xff] }
   0xa   :  { %v12654_v37 = vpack.c.bf16 %v274_v36, %v273_v35  ;;  %v12657_v40 = vpack.c.bf16 %v276_v39, %v275_v38  ;;  %v277_v41 = vld [vmem:[%s19338_s1 + $0xd0] sm:$0xff]  ;;  %v278_v42 = vld [vmem:[%s19338_s1 + $0xd8] sm:$0xff]  ;;  %v279_v44 = vld [vmem:[%s19338_s1 + $0xe0] sm:$0xff] }
   0xb   :  { %v12660_v43 = vpack.c.bf16 %v278_v42, %v277_v41  ;;  %v280_v45 = vld [vmem:[%s19338_s1 + $0xe8] sm:$0xff]  ;;  %v281_v47 = vld [vmem:[%s19338_s1 + $0xf0] sm:$0xff]  ;;  %v282_v48 = vld [vmem:[%s19338_s1 + $0xf8] sm:$0xff] }
   0xc   :  { %12628 = vmatpush1.bf16.msra.mxu0 %v12627_v9  ;;  %v12663_v46 = vpack.c.bf16 %v280_v45, %v279_v44  ;;  %v12666_v49 = vpack.c.bf16 %v282_v48, %v281_v47  ;;  %v1025_v50 = vld [vmem:[%s19340_s3 + $0x20] sm:$0xff]  ;;  %v1026_v51 = vld [vmem:[%s19340_s3 + $0x28] sm:$0xff]  ;;  %v32_v54 = vld [vmem:[%s19339_s0 + $0x18] sm:$0xff] }
   0xd   :  { %12629 = vmatprep.subr.bf16.mxu0 %v19350_v0  ;;  %v29_v52 = vld [vmem:[%s19339_s0] sm:$0xff]  ;;  %v12669_v53 = vpack.c.bf16 %v1026_v51, %v1025_v50  ;;  %v31_v55 = vld [vmem:[%s19339_s0 + $0x10] sm:$0xff]  ;;  %v34_v56 = vld [vmem:[%s19339_s0 + $0x28] sm:$0xff] }
   0xe   :  { %v33_v57 = vld [vmem:[%s19339_s0 + $0x20] sm:$0xff]  ;;  %v36_v58 = vld [vmem:[%s19339_s0 + $0x38] sm:$0xff]  ;;  %v35_v59 = vld [vmem:[%s19339_s0 + $0x30] sm:$0xff] }
   0xf   :  { %v38_v60 = vld [vmem:[%s19339_s0 + $0x48] sm:$0xff]  ;;  %v37_v61 = vld [vmem:[%s19339_s0 + $0x40] sm:$0xff]  ;;  %v40_v62 = vld [vmem:[%s19339_s0 + $0x58] sm:$0xff] }
  0x10   :  { %12631 = vmatpush1.bf16.msra.mxu0 %v12630_v13  ;;  %v39_v63 = vld [vmem:[%s19339_s0 + $0x50] sm:$0xff]  ;;  %v42_v1 = vld [vmem:[%s19339_s0 + $0x68] sm:$0xff]  ;;  %v41_v2 = vld [vmem:[%s19339_s0 + $0x60] sm:$0xff] }
  0x11   :  { %12632 = vmatprep.subr.bf16.mxu0 %v19350_v0  ;;  %v44_v3 = vld [vmem:[%s19339_s0 + $0x78] sm:$0xff]  ;;  %v43_v4 = vld [vmem:[%s19339_s0 + $0x70] sm:$0xff]  ;;  %v46_v5 = vld [vmem:[%s19339_s0 + $0x88] sm:$0xff] }
  0x12   :  { %v45_v6 = vld [vmem:[%s19339_s0 + $0x80] sm:$0xff]  ;;  %v48_v7 = vld [vmem:[%s19339_s0 + $0x98] sm:$0xff]  ;;  %v47_v8 = vld [vmem:[%s19339_s0 + $0x90] sm:$0xff] }
  0x13   :  { %v50_v9 = vld [vmem:[%s19339_s0 + $0xa8] sm:$0xff]  ;;  %v49_v10 = vld [vmem:[%s19339_s0 + $0xa0] sm:$0xff]  ;;  %v52_v11 = vld [vmem:[%s19339_s0 + $0xb8] sm:$0xff] }
  0x14   :  { %12634 = vmatpush1.bf16.msra.mxu0 %v12633_v16  ;;  %v51_v12 = vld [vmem:[%s19339_s0 + $0xb0] sm:$0xff]  ;;  %v54_v13 = vld [vmem:[%s19339_s0 + $0xc8] sm:$0xff]  ;;  %v53_v14 = vld [vmem:[%s19339_s0 + $0xc0] sm:$0xff] }
  0x15   :  { %12635 = vmatprep.subr.bf16.mxu0 %v19350_v0  ;;  %v56_v15 = vld [vmem:[%s19339_s0 + $0xd8] sm:$0xff]  ;;  %v55_v16 = vld [vmem:[%s19339_s0 + $0xd0] sm:$0xff]  ;;  %v58_v17 = vld [vmem:[%s19339_s0 + $0xe8] sm:$0xff] }
  0x16   :  { %v57_v18 = vld [vmem:[%s19339_s0 + $0xe0] sm:$0xff]  ;;  %v59_v20 = vld [vmem:[%s19339_s0 + $0xf0] sm:$0xff]  ;;  %v62_v21 = vld [vmem:[%s19339_s0 + $0x108] sm:$0xff] }
  0x17   :  { %v64_v23 = vld [vmem:[%s19339_s0 + $0x118] sm:$0xff]  ;;  %v63_v24 = vld [vmem:[%s19339_s0 + $0x110] sm:$0xff]  ;;  %v65_v26 = vld [vmem:[%s19339_s0 + $0x120] sm:$0xff] }
  0x18   :  { %12637 = vmatpush1.bf16.msra.mxu0 %v12636_v19  ;;  %v60_v19 = vld [vmem:[%s19339_s0 + $0xf8] sm:$0xff]  ;;  %v70_v29 = vld [vmem:[%s19339_s0 + $0x148] sm:$0xff]  ;;  %v69_v30 = vld [vmem:[%s19339_s0 + $0x140] sm:$0xff] }
  0x19   :  { %12638 = vmatprep.subr.bf16.mxu0 %v19350_v0  ;;  %v68_v27 = vld [vmem:[%s19339_s0 + $0x138] sm:$0xff]  ;;  %v71_v32 = vld [vmem:[%s19339_s0 + $0x150] sm:$0xff]  ;;  %v74_v33 = vld [vmem:[%s19339_s0 + $0x168] sm:$0xff] }
  0x1a   :  { %v76_v35 = vld [vmem:[%s19339_s0 + $0x178] sm:$0xff]  ;;  %v75_v36 = vld [vmem:[%s19339_s0 + $0x170] sm:$0xff]  ;;  %v77_v38 = vld [vmem:[%s19339_s0 + $0x180] sm:$0xff] }
  0x1b   :  { %v80_v39 = vld [vmem:[%s19339_s0 + $0x198] sm:$0xff]  ;;  %v82_v41 = vld [vmem:[%s19339_s0 + $0x1a8] sm:$0xff]  ;;  %v81_v42 = vld [vmem:[%s19339_s0 + $0x1a0] sm:$0xff] }
  0x1c   :  { %12640 = vmatpush1.bf16.msra.mxu0 %v12639_v22  ;;  %v61_v22 = vld [vmem:[%s19339_s0 + $0x100] sm:$0xff]  ;;  %v83_v44 = vld [vmem:[%s19339_s0 + $0x1b0] sm:$0xff]  ;;  %v86_v45 = vld [vmem:[%s19339_s0 + $0x1c8] sm:$0xff] }
  0x1d   :  { %12641 = vmatprep.subr.bf16.mxu0 %v19350_v0  ;;  %v88_v47 = vld [vmem:[%s19339_s0 + $0x1d8] sm:$0xff]  ;;  %v87_v48 = vld [vmem:[%s19339_s0 + $0x1d0] sm:$0xff]  ;;  %v89_v50 = vld [vmem:[%s19339_s0 + $0x1e0] sm:$0xff] }
  0x1e   :  { %v92_v51 = vld [vmem:[%s19339_s0 + $0x1f8] sm:$0xff]  ;;  %vm12943_vm12 = vmpackc.low %vm2040_vm5, %vm13152_vm11 }
  0x20   :  { %12643 = vmatpush1.bf16.msra.mxu0 %v12642_v25  ;;  %v66_v25 = vld [vmem:[%s19339_s0 + $0x128] sm:$0xff] }
  0x21   :  { %12644 = vmatprep.subr.bf16.mxu0 %v19350_v0 }
  0x24   :  { %12646 = vmatpush1.bf16.msra.mxu0 %v12645_v28  ;;  %v67_v28 = vld [vmem:[%s19339_s0 + $0x130] sm:$0xff] }
  0x25   :  { %12647 = vmatprep.subr.bf16.mxu0 %v19350_v0 }
  0x28   :  { %12649 = vmatpush1.bf16.msra.mxu0 %v12648_v31  ;;  %v72_v31 = vld [vmem:[%s19339_s0 + $0x158] sm:$0xff] }
  0x29   :  { %12650 = vmatprep.subr.bf16.mxu0 %v19350_v0 }
  0x2c   :  { %12652 = vmatpush1.bf16.msra.mxu0 %v12651_v34  ;;  %v73_v34 = vld [vmem:[%s19339_s0 + $0x160] sm:$0xff] }
  0x2d   :  { %12653 = vmatprep.subr.bf16.mxu0 %v19350_v0 }
  0x30   :  { %12655 = vmatpush1.bf16.msra.mxu0 %v12654_v37  ;;  %v78_v37 = vld [vmem:[%s19339_s0 + $0x188] sm:$0xff] }
  0x31   :  { %12656 = vmatprep.subr.bf16.mxu0 %v19350_v0 }
  0x34   :  { %12658 = vmatpush1.bf16.msra.mxu0 %v12657_v40  ;;  %v79_v40 = vld [vmem:[%s19339_s0 + $0x190] sm:$0xff] }
  0x35   :  { %12659 = vmatprep.subr.bf16.mxu0 %v19350_v0 }
  0x38   :  { %12661 = vmatpush1.bf16.msra.mxu0 %v12660_v43  ;;  %v84_v43 = vld [vmem:[%s19339_s0 + $0x1b8] sm:$0xff] }
  0x39   :  { %12662 = vmatprep.subr.bf16.mxu0 %v19350_v0 }
  0x3c   :  { %12664 = vmatpush1.bf16.msra.mxu0 %v12663_v46  ;;  %v85_v46 = vld [vmem:[%s19339_s0 + $0x1c0] sm:$0xff] }
  0x3d   :  { %12665 = vmatprep.subr.bf16.mxu0 %v19350_v0 }
  0x40   :  { %12667 = vmatpush1.bf16.msra.mxu0 %v12666_v49  ;;  %v90_v49 = vld [vmem:[%s19339_s0 + $0x1e8] sm:$0xff] }
  0x41   :  { %12668 = vmatprep.subr.bf16.mxu0 %v19350_v0 }
  0x43   :  { %355 = vmatmul.mubr.f32.vlgmr.msra.gmra.mrb[0].mxu0 %v29_v52  ;;  %v91_v52 = vld [vmem:[%s19339_s0 + $0x1f0] sm:$0xff] }
  0x44   :  { %359 = vmatprep.mubr.f32.mxu0 %v32_v54  ;;  %12670 = vmatpush3.bf16.msra.mxu0 %v12669_v53  ;;  %v94_v53 = vld [vmem:[%s19339_s0 + $0x208] sm:$0xff]  ;;  %v93_v54 = vld [vmem:[%s19339_s0 + $0x200] sm:$0xff] }
  0x45   :  { %12671 = vmatprep.subr.bf16.mxu0 %v19350_v0 }
  0x47   :  { %360 = vmatmul.mubr.f32.gmra.mrb[2].mxu0 %v31_v55  ;;  %v96_v55 = vld [vmem:[%s19339_s0 + $0x218] sm:$0xff] }
  0x48   :  { %364 = vmatprep.mubr.f32.mxu0 %v34_v56  ;;  %v1021_v56 = vld [vmem:[%s19340_s3] sm:$0xff] }
  0x4b   :  { %365 = vmatmul.mubr.f32.gmra.mrb[4].mxu0 %v33_v57  ;;  %v1022_v57 = vld [vmem:[%s19340_s3 + $0x8] sm:$0xff] }
  0x4c   :  { %369 = vmatprep.mubr.f32.mxu0 %v36_v58  ;;  %v13526_v58 = vpack.c.bf16 %v1022_v57, %v1021_v56  ;;  %v144_v56 = vld [vmem:[%s19339_s0 + $0x398] sm:$0xff] }
  0x4e   :  { %12947 = vmatpush3.bf16.msra.mxu1 %v13526_v58 }
  0x4f   :  { %370 = vmatmul.mubr.f32.gmra.mrb[6].mxu0 %v35_v59  ;;  %v95_v59 = vld [vmem:[%s19339_s0 + $0x210] sm:$0xff]  ;;  %12946 = vmatprep.subr.bf16.mxu1 %v19350_v0 }
  0x50   :  { %374 = vmatprep.mubr.f32.mxu0 %v38_v60  ;;  %v98_v60 = vld [vmem:[%s19339_s0 + $0x228] sm:$0xff] }
  0x53   :  { %375 = vmatmul.mubr.f32.gmra.mrb[8].mxu0 %v37_v61  ;;  %v1023_v61 = vld [vmem:[%s19340_s3 + $0x10] sm:$0xff] }
  0x54   :  { %379 = vmatprep.mubr.f32.mxu0 %v40_v62  ;;  %v1024_v62 = vld [vmem:[%s19340_s3 + $0x18] sm:$0xff] }
  0x57   :  { %380 = vmatmul.mubr.f32.gmra.mrb[10].mxu0 %v39_v63  ;;  %v13542_v63 = vpack.c.bf16 %v1024_v62, %v1023_v61  ;;  %v146_v61 = vld [vmem:[%s19339_s0 + $0x3a8] sm:$0xff] }
  0x58   :  { %384 = vmatprep.mubr.f32.mxu0 %v42_v1  ;;  %v97_v1 = vld [vmem:[%s19339_s0 + $0x220] sm:$0xff] }
  0x59   :  { %12948 = vmatpush3.bf16.msra.mxu1 %v13542_v63 }
  0x5a   :  { %12680 = vmatprep.subr.bf16.mxu1 %v19350_v0 }
  0x5b   :  { %385 = vmatmul.mubr.f32.gmra.mrb[12].mxu0 %v41_v2  ;;  %v100_v2 = vld [vmem:[%s19339_s0 + $0x238] sm:$0xff] }
  0x5c   :  { %389 = vmatprep.mubr.f32.mxu0 %v44_v3  ;;  %v19352_v3 = vmov 0.0  }
  0x5d   :  { %10861 = vmatprep.mubr.msk.f32.mxu1 %vm13150_vm0, %v19352_v3 }
  0x5f   :  { %390 = vmatmul.mubr.f32.gmra.mrb[14].mxu0 %v43_v4  ;;  %v99_v4 = vld [vmem:[%s19339_s0 + $0x230] sm:$0xff] }
  0x60   :  { %394 = vmatprep.mubr.f32.mxu0 %v46_v5  ;;  %v102_v5 = vld [vmem:[%s19339_s0 + $0x248] sm:$0xff] }
  0x63   :  { %395 = vmatmul.mubr.f32.gmra.mrb[16].mxu0 %v45_v6  ;;  %v101_v6 = vld [vmem:[%s19339_s0 + $0x240] sm:$0xff] }
  0x64   :  { %399 = vmatprep.mubr.f32.mxu0 %v48_v7  ;;  %v104_v7 = vld [vmem:[%s19339_s0 + $0x258] sm:$0xff] }
  0x67   :  { %400 = vmatmul.mubr.f32.gmra.mrb[18].mxu0 %v47_v8  ;;  %v103_v8 = vld [vmem:[%s19339_s0 + $0x250] sm:$0xff] }
  0x68   :  { %404 = vmatprep.mubr.f32.mxu0 %v50_v9  ;;  %v106_v9 = vld [vmem:[%s19339_s0 + $0x268] sm:$0xff] }
  0x6b   :  { %405 = vmatmul.mubr.f32.gmra.mrb[20].mxu0 %v49_v10  ;;  %v105_v10 = vld [vmem:[%s19339_s0 + $0x260] sm:$0xff] }
  0x6c   :  { %409 = vmatprep.mubr.f32.mxu0 %v52_v11  ;;  %v108_v11 = vld [vmem:[%s19339_s0 + $0x278] sm:$0xff] }
  0x6f   :  { %410 = vmatmul.mubr.f32.gmra.mrb[22].mxu0 %v51_v12  ;;  %v107_v12 = vld [vmem:[%s19339_s0 + $0x270] sm:$0xff] }
  0x70   :  { %414 = vmatprep.mubr.f32.mxu0 %v54_v13  ;;  %v110_v13 = vld [vmem:[%s19339_s0 + $0x288] sm:$0xff] }
  0x73   :  { %415 = vmatmul.mubr.f32.gmra.mrb[24].mxu0 %v53_v14  ;;  %v109_v14 = vld [vmem:[%s19339_s0 + $0x280] sm:$0xff] }
  0x74   :  { %419 = vmatprep.mubr.f32.mxu0 %v56_v15  ;;  %v112_v15 = vld [vmem:[%s19339_s0 + $0x298] sm:$0xff] }
  0x77   :  { %420 = vmatmul.mubr.f32.gmra.mrb[26].mxu0 %v55_v16  ;;  %v1027_v16 = vld [vmem:[%s19340_s3 + $0x30] sm:$0xff] }
  0x78   :  { %424 = vmatprep.mubr.f32.mxu0 %v58_v17  ;;  %v1028_v17 = vld [vmem:[%s19340_s3 + $0x38] sm:$0xff] }
  0x7b   :  { %425 = vmatmul.mubr.f32.gmra.mrb[28].mxu0 %v57_v18  ;;  %v111_v18 = vld [vmem:[%s19339_s0 + $0x290] sm:$0xff] }
  0x7c   :  { %429 = vmatprep.mubr.f32.mxu0 %v60_v19  ;;  %v12672_v19 = vpack.c.bf16 %v1028_v17, %v1027_v16  ;;  %v154_v16 = vld [vmem:[%s19339_s0 + $0x3e8] sm:$0xff] }
  0x7e   :  { %12673 = vmatpush3.bf16.msra.mxu0 %v12672_v19  ;;  %v153_v19 = vld [vmem:[%s19339_s0 + $0x3e0] sm:$0xff] }
  0x7f   :  { %430 = vmatmul.mubr.f32.gmra.mrb[30].mxu0 %v59_v20  ;;  %v114_v20 = vld [vmem:[%s19339_s0 + $0x2a8] sm:$0xff]  ;;  %12674 = vmatprep.subr.bf16.mxu0 %v19350_v0 }
  0x80   :  { %434 = vmatprep.mubr.f32.mxu0 %v62_v21  ;;  %v113_v21 = vld [vmem:[%s19339_s0 + $0x2a0] sm:$0xff] }
  0x83   :  { %435 = vmatmul.mubr.f32.gmra.mrb[32].mxu0 %v61_v22  ;;  %v116_v22 = vld [vmem:[%s19339_s0 + $0x2b8] sm:$0xff] }
  0x84   :  { %439 = vmatprep.mubr.f32.mxu0 %v64_v23  ;;  %v115_v23 = vld [vmem:[%s19339_s0 + $0x2b0] sm:$0xff] }
  0x87   :  { %440 = vmatmul.mubr.f32.gmra.mrb[34].mxu0 %v63_v24  ;;  %v118_v24 = vld [vmem:[%s19339_s0 + $0x2c8] sm:$0xff] }
  0x88   :  { %444 = vmatprep.mubr.f32.mxu0 %v66_v25  ;;  %v117_v25 = vld [vmem:[%s19339_s0 + $0x2c0] sm:$0xff] }
  0x8b   :  { %445 = vmatmul.mubr.f32.gmra.mrb[36].mxu0 %v65_v26  ;;  %v120_v26 = vld [vmem:[%s19339_s0 + $0x2d8] sm:$0xff] }
  0x8c   :  { %449 = vmatprep.mubr.f32.mxu0 %v68_v27  ;;  %v119_v27 = vld [vmem:[%s19339_s0 + $0x2d0] sm:$0xff] }
  0x8f   :  { %450 = vmatmul.mubr.f32.gmra.mrb[38].mxu0 %v67_v28  ;;  %v122_v28 = vld [vmem:[%s19339_s0 + $0x2e8] sm:$0xff] }
  0x90   :  { %454 = vmatprep.mubr.f32.mxu0 %v70_v29  ;;  %v121_v29 = vld [vmem:[%s19339_s0 + $0x2e0] sm:$0xff] }
  0x93   :  { %455 = vmatmul.mubr.f32.gmra.mrb[40].mxu0 %v69_v30  ;;  %v124_v30 = vld [vmem:[%s19339_s0 + $0x2f8] sm:$0xff] }
  0x94   :  { %459 = vmatprep.mubr.f32.mxu0 %v72_v31  ;;  %v123_v31 = vld [vmem:[%s19339_s0 + $0x2f0] sm:$0xff] }
  0x97   :  { %460 = vmatmul.mubr.f32.gmra.mrb[42].mxu0 %v71_v32  ;;  %v126_v32 = vld [vmem:[%s19339_s0 + $0x308] sm:$0xff] }
  0x98   :  { %464 = vmatprep.mubr.f32.mxu0 %v74_v33  ;;  %v125_v33 = vld [vmem:[%s19339_s0 + $0x300] sm:$0xff] }
  0x9b   :  { %465 = vmatmul.mubr.f32.gmra.mrb[44].mxu0 %v73_v34  ;;  %v128_v34 = vld [vmem:[%s19339_s0 + $0x318] sm:$0xff] }
  0x9c   :  { %469 = vmatprep.mubr.f32.mxu0 %v76_v35  ;;  %v127_v35 = vld [vmem:[%s19339_s0 + $0x310] sm:$0xff] }
  0x9f   :  { %470 = vmatmul.mubr.f32.gmra.mrb[46].mxu0 %v75_v36  ;;  %v130_v36 = vld [vmem:[%s19339_s0 + $0x328] sm:$0xff] }
  0xa0   :  { %474 = vmatprep.mubr.f32.mxu0 %v78_v37  ;;  %v129_v37 = vld [vmem:[%s19339_s0 + $0x320] sm:$0xff] }
  0xa3   :  { %475 = vmatmul.mubr.f32.gmra.mrb[48].mxu0 %v77_v38  ;;  %v132_v38 = vld [vmem:[%s19339_s0 + $0x338] sm:$0xff] }
  0xa4   :  { %479 = vmatprep.mubr.f32.mxu0 %v80_v39  ;;  %v131_v39 = vld [vmem:[%s19339_s0 + $0x330] sm:$0xff] }
  0xa7   :  { %480 = vmatmul.mubr.f32.gmra.mrb[50].mxu0 %v79_v40  ;;  %v134_v40 = vld [vmem:[%s19339_s0 + $0x348] sm:$0xff] }
  0xa8   :  { %484 = vmatprep.mubr.f32.mxu0 %v82_v41  ;;  %v133_v41 = vld [vmem:[%s19339_s0 + $0x340] sm:$0xff] }
  0xab   :  { %485 = vmatmul.mubr.f32.gmra.mrb[52].mxu0 %v81_v42  ;;  %v136_v42 = vld [vmem:[%s19339_s0 + $0x358] sm:$0xff] }
  0xac   :  { %489 = vmatprep.mubr.f32.mxu0 %v84_v43  ;;  %v135_v43 = vld [vmem:[%s19339_s0 + $0x350] sm:$0xff] }
  0xaf   :  { %490 = vmatmul.mubr.f32.gmra.mrb[54].mxu0 %v83_v44  ;;  %v138_v44 = vld [vmem:[%s19339_s0 + $0x368] sm:$0xff] }
  0xb0   :  { %494 = vmatprep.mubr.f32.mxu0 %v86_v45 }
  0xb3   :  { %495 = vmatmul.mubr.f32.gmra.mrb[56].mxu0 %v85_v46 }
  0xb4   :  { %499 = vmatprep.mubr.f32.mxu0 %v88_v47  ;;  %v137_v47 = vld [vmem:[%s19339_s0 + $0x360] sm:$0xff] }
  0xb7   :  { %500 = vmatmul.mubr.f32.gmra.mrb[58].mxu0 %v87_v48  ;;  %v140_v48 = vld [vmem:[%s19339_s0 + $0x378] sm:$0xff] }
  0xb8   :  { %504 = vmatprep.mubr.f32.mxu0 %v90_v49 }
  0xbb   :  { %505 = vmatmul.mubr.f32.gmra.mrb[60].mxu0 %v89_v50 }
  0xbc   :  { %509 = vmatprep.mubr.f32.mxu0 %v92_v51  ;;  %v139_v51 = vld [vmem:[%s19339_s0 + $0x370] sm:$0xff] }
  0xbf   :  { %510 = vmatmul.mubr.f32.gmra.mrb[62].mxu0 %v91_v52  ;;  %v142_v52 = vld [vmem:[%s19339_s0 + $0x388] sm:$0xff] }
  0xc0   :  { %514 = vmatprep.mubr.f32.mxu0 %v94_v53 }
  0xc3   :  { %515 = vmatmul.mubr.f32.gmra.mrb[64].mxu0 %v93_v54 }
  0xc4   :  { %519 = vmatprep.mubr.f32.mxu0 %v96_v55  ;;  %v141_v55 = vld [vmem:[%s19339_s0 + $0x380] sm:$0xff] }
  0xc7   :  { %520 = vmatmul.mubr.f32.gmra.mrb[66].mxu0 %v95_v59 }
  0xc8   :  { %524 = vmatprep.mubr.f32.mxu0 %v98_v60  ;;  %v143_v60 = vld [vmem:[%s19339_s0 + $0x390] sm:$0xff] }
  0xcb   :  { %525 = vmatmul.mubr.f32.gmra.mrb[68].mxu0 %v97_v1 }
  0xcc   :  { %529 = vmatprep.mubr.f32.mxu0 %v100_v2  ;;  %v145_v2 = vld [vmem:[%s19339_s0 + $0x3a0] sm:$0xff] }
  0xcf   :  { %530 = vmatmul.mubr.f32.gmra.mrb[70].mxu0 %v99_v4  ;;  %v148_v4 = vld [vmem:[%s19339_s0 + $0x3b8] sm:$0xff] }
  0xd0   :  { %534 = vmatprep.mubr.f32.mxu0 %v102_v5 }
  0xd3   :  { %535 = vmatmul.mubr.f32.gmra.mrb[72].mxu0 %v101_v6 }
  0xd4   :  { %539 = vmatprep.mubr.f32.mxu0 %v104_v7  ;;  %v147_v7 = vld [vmem:[%s19339_s0 + $0x3b0] sm:$0xff] }
  0xd7   :  { %540 = vmatmul.mubr.f32.gmra.mrb[74].mxu0 %v103_v8  ;;  %v150_v8 = vld [vmem:[%s19339_s0 + $0x3c8] sm:$0xff] }
  0xd8   :  { %544 = vmatprep.mubr.f32.mxu0 %v106_v9 }
  0xdb   :  { %545 = vmatmul.mubr.f32.gmra.mrb[76].mxu0 %v105_v10 }
  0xdc   :  { %549 = vmatprep.mubr.f32.mxu0 %v108_v11  ;;  %v149_v11 = vld [vmem:[%s19339_s0 + $0x3c0] sm:$0xff] }
  0xdf   :  { %550 = vmatmul.mubr.f32.gmra.mrb[78].mxu0 %v107_v12  ;;  %v152_v12 = vld [vmem:[%s19339_s0 + $0x3d8] sm:$0xff] }
  0xe0   :  { %554 = vmatprep.mubr.f32.mxu0 %v110_v13 }
  0xe3   :  { %555 = vmatmul.mubr.f32.gmra.mrb[80].mxu0 %v109_v14 }
  0xe4   :  { %559 = vmatprep.mubr.f32.mxu0 %v112_v15  ;;  %v151_v15 = vld [vmem:[%s19339_s0 + $0x3d0] sm:$0xff] }
  0xe7   :  { %560 = vmatmul.mubr.f32.gmra.mrb[82].mxu0 %v111_v18 }
  0xe8   :  { %564 = vmatprep.mubr.f32.mxu0 %v114_v20  ;;  %v156_v20 = vld [vmem:[%s19339_s0 + $0x3f8] sm:$0xff] }
  0xeb   :  { %565 = vmatmul.mubr.f32.gmra.mrb[84].mxu0 %v113_v21 }
  0xec   :  { %569 = vmatprep.mubr.f32.mxu0 %v116_v22 }
  0xef   :  { %570 = vmatmul.mubr.f32.gmra.mrb[86].mxu0 %v115_v23  ;;  %v155_v23 = vld [vmem:[%s19339_s0 + $0x3f0] sm:$0xff] }
  0xf0   :  { %574 = vmatprep.mubr.f32.mxu0 %v118_v24  ;;  %v158_v24 = vld [vmem:[%s19339_s0 + $0x408] sm:$0xff] }
  0xf3   :  { %575 = vmatmul.mubr.f32.gmra.mrb[88].mxu0 %v117_v25 }
  0xf4   :  { %579 = vmatprep.mubr.f32.mxu0 %v120_v26 }
  0xf7   :  { %580 = vmatmul.mubr.f32.gmra.mrb[90].mxu0 %v119_v27  ;;  %v157_v27 = vld [vmem:[%s19339_s0 + $0x400] sm:$0xff] }
  0xf8   :  { %584 = vmatprep.mubr.f32.mxu0 %v122_v28  ;;  %v160_v28 = vld [vmem:[%s19339_s0 + $0x418] sm:$0xff] }
  0xfb   :  { %585 = vmatmul.mubr.f32.gmra.mrb[92].mxu0 %v121_v29 }
  0xfc   :  { %589 = vmatprep.mubr.f32.mxu0 %v124_v30 }
  0xff   :  { %590 = vmatmul.mubr.f32.gmra.mrb[94].mxu0 %v123_v31  ;;  %v159_v31 = vld [vmem:[%s19339_s0 + $0x410] sm:$0xff] }
 0x100   :  { %594 = vmatprep.mubr.f32.mxu0 %v126_v32  ;;  %v162_v32 = vld [vmem:[%s19339_s0 + $0x428] sm:$0xff] }
 0x103   :  { %595 = vmatmul.mubr.f32.gmra.mrb[96].mxu0 %v125_v33  ;;  %v13774_v33 = vld [vmem:[%s19341_s2] ss:$0 sm:$0xff] }
 0x104   :  { %599 = vmatprep.mubr.f32.mxu0 %v128_v34 }
 0x107   :  { %600 = vmatmul.mubr.f32.gmra.mrb[98].mxu0 %v127_v35  ;;  %v1029_v35 = vld [vmem:[%s19340_s3 + $0x40] sm:$0xff] }
 0x108   :  { %604 = vmatprep.mubr.f32.mxu0 %v130_v36  ;;  %v1030_v36 = vld [vmem:[%s19340_s3 + $0x48] sm:$0xff] }
 0x10b   :  { %605 = vmatmul.mubr.f32.gmra.mrb[100].mxu0 %v129_v37 }
 0x10c   :  { %609 = vmatprep.mubr.f32.mxu0 %v132_v38 }
 0x10f   :  { %610 = vmatmul.mubr.f32.gmra.mrb[102].mxu0 %v131_v39  ;;  %v161_v39 = vld [vmem:[%s19339_s0 + $0x420] sm:$0xff] }
 0x110   :  { %614 = vmatprep.mubr.f32.mxu0 %v134_v40 }
 0x113   :  { %615 = vmatmul.mubr.f32.gmra.mrb[104].mxu0 %v133_v41  ;;  %v164_v41 = vld [vmem:[%s19339_s0 + $0x438] sm:$0xff] }
 0x114   :  { %619 = vmatprep.mubr.f32.mxu0 %v136_v42  ;;  %v12681_v42 = vpack.c.bf16 %v1030_v36, %v1029_v35 }
 0x116   :  { %v13675_v45 = vpop.f32.mrb[0].mxu0 }
 0x117   :  { %v358_v46 = vpop.f32.mrb[1].mxu0  ;;  %620 = vmatmul.mubr.f32.gmra.mrb[106].mxu0 %v135_v43 }
 0x118   :  { %624 = vmatprep.mubr.f32.mxu0 %v138_v44  ;;  %v1031_v44 = vld [vmem:[%s19340_s3 + $0x50] sm:$0xff]  ;;  %v1032_v46 = vld [vmem:[%s19340_s3 + $0x58] sm:$0xff] }
 0x11a   :  { %v13683_v49 = vpop.f32.mrb[2].mxu0 }
 0x11b   :  { %v363_v50 = vpop.f32.mrb[3].mxu0  ;;  %625 = vmatmul.mubr.f32.gmra.mrb[108].mxu0 %v137_v47 }
 0x11c   :  { %629 = vmatprep.mubr.f32.mxu0 %v140_v48  ;;  %v163_v50 = vld [vmem:[%s19339_s0 + $0x430] sm:$0xff] }
 0x11e   :  { %v13691_v53 = vpop.f32.mrb[4].mxu0 }
 0x11f   :  { %v368_v54 = vpop.f32.mrb[5].mxu0  ;;  %630 = vmatmul.mubr.f32.gmra.mrb[110].mxu0 %v139_v51 }
 0x120   :  { %634 = vmatprep.mubr.f32.mxu0 %v142_v52  ;;  %v166_v52 = vld [vmem:[%s19339_s0 + $0x448] sm:$0xff]  ;;  %v12684_v54 = vpack.c.bf16 %v1032_v46, %v1031_v44 }
 0x122   :  { %v13699_v57 = vpop.f32.mrb[6].mxu0 }
 0x123   :  { %v373_v59 = vpop.f32.mrb[7].mxu0  ;;  %635 = vmatmul.mubr.f32.gmra.mrb[112].mxu0 %v141_v55 }
 0x124   :  { %639 = vmatprep.mubr.f32.mxu0 %v144_v56 }
 0x126   :  { %v13707_v62 = vpop.f32.mrb[8].mxu0 }
 0x127   :  { %v378_v1 = vpop.f32.mrb[9].mxu0  ;;  %640 = vmatmul.mubr.f32.gmra.mrb[114].mxu0 %v143_v60 }
 0x128   :  { %644 = vmatprep.mubr.f32.mxu0 %v146_v61 }
 0x12a   :  { %v13715_v5 = vpop.f32.mrb[10].mxu0 }
 0x12b   :  { %v383_v6 = vpop.f32.mrb[11].mxu0  ;;  %645 = vmatmul.mubr.f32.gmra.mrb[116].mxu0 %v145_v2 }
 0x12c   :  { %649 = vmatprep.mubr.f32.mxu0 %v148_v4 }
 0x12e   :  { %v13723_v9 = vpop.f32.mrb[12].mxu0 }
 0x12f   :  { %v388_v10 = vpop.f32.mrb[13].mxu0  ;;  %650 = vmatmul.mubr.f32.gmra.mrb[118].mxu0 %v147_v7  ;;  %v165_v7 = vld [vmem:[%s19339_s0 + $0x440] sm:$0xff] }
 0x130   :  { %654 = vmatprep.mubr.f32.mxu0 %v150_v8  ;;  %v168_v10 = vld [vmem:[%s19339_s0 + $0x458] sm:$0xff] }
 0x132   :  { %v13731_v13 = vpop.f32.mrb[14].mxu0 }
 0x133   :  { %v393_v14 = vpop.f32.mrb[15].mxu0  ;;  %655 = vmatmul.mubr.f32.gmra.mrb[120].mxu0 %v149_v11 }
 0x134   :  { %659 = vmatprep.mubr.f32.mxu0 %v152_v12 }
 0x136   :  { %v13739_v17 = vpop.f32.mrb[16].mxu0 }
 0x137   :  { %v398_v18 = vpop.f32.mrb[17].mxu0  ;;  %660 = vmatmul.mubr.f32.gmra.mrb[122].mxu0 %v151_v15 }
 0x138   :  { %664 = vmatprep.mubr.f32.mxu0 %v154_v16 }
 0x13a   :  { %v13747_v21 = vpop.f32.mrb[18].mxu0 }
 0x13b   :  { %v403_v22 = vpop.f32.mrb[19].mxu0  ;;  %665 = vmatmul.mubr.f32.gmra.mrb[124].mxu0 %v153_v19 }
 0x13c   :  { %669 = vmatprep.mubr.f32.mxu0 %v156_v20 }
 0x13e   :  { %v13755_v25 = vpop.f32.mrb[20].mxu0 }
 0x13f   :  { %v408_v26 = vpop.f32.mrb[21].mxu0  ;;  %670 = vmatmul.mubr.f32.gmra.mrb[126].mxu0 %v155_v23  ;;  %v167_v23 = vld [vmem:[%s19339_s0 + $0x450] sm:$0xff] }
 0x140   :  { %674 = vmatprep.mubr.f32.mxu0 %v158_v24  ;;  %v170_v26 = vld [vmem:[%s19339_s0 + $0x468] sm:$0xff] }
 0x142   :  { %v13763_v29 = vpop.f32.mrb[22].mxu0 }
 0x143   :  { %v413_v30 = vpop.f32.mrb[23].mxu0  ;;  %675 = vmatmul.mubr.f32.gmra.mrb[128].mxu0 %v157_v27 }
 0x144   :  { %679 = vmatprep.mubr.f32.mxu0 %v160_v28 }
 0x146   :  { %v416_v34 = vpop.f32.mrb[24].mxu0 }
 0x147   :  { %v417_v37 = vadd.f32 %v13774_v33, %v416_v34  ;;  %v418_v38 = vpop.f32.mrb[25].mxu0  ;;  %680 = vmatmul.mubr.f32.gmra.mrb[130].mxu0 %v159_v31 }
 0x148   :  { %684 = vmatprep.mubr.f32.mxu0 %v162_v32  ;;  %v169_v38 = vld [vmem:[%s19339_s0 + $0x460] sm:$0xff] }
 0x149   :  { %v13786_v40 = vmax.f32 %v417_v37, 0.0 }
 0x14a   :  { %v421_v43 = vpop.f32.mrb[26].mxu0 }
 0x14b   :  { %19548 = vst [vmem:[#allocation2_spill] sm:$0xff] %v13786_v40  ;;  %v422_v47 = vadd.f32 %v13774_v33, %v421_v43  ;;  %v423_v48 = vpop.f32.mrb[27].mxu0  ;;  %685 = vmatmul.mubr.f32.gmra.mrb[132].mxu0 %v161_v39  ;;  %10862 = vmatmul.mubr.msk.f32.vlgmr.msra.gmra.mrb[0].mxu1 %vm1169_vm1, %v13786_v40  ;;  %v19348_v55 = vrot.slane %v13786_v40, 3  ;;  %v19347_v56 = vrot.slane %v13786_v40, 4  ;;  %v19349_v60 = vrot.slane %v13786_v40, 1 }
 0x14c   :  { %689 = vmatprep.mubr.f32.mxu0 %v164_v41  ;;  %10864 = vmatprep.mubr.msk.f32.mxu1 %vm13150_vm0, %v19352_v3  ;;  %v172_v41 = vld [vmem:[%s19339_s0 + $0x478] sm:$0xff] }
 0x14d   :  { %v923_v51 = vmax.f32 %v422_v47, 0.0  ;;  %12682 = vmatpush3.bf16.msra.mxu1 %v12681_v42 }
 0x14e   :  { %v426_v59 = vpop.f32.mrb[28].mxu0  ;;  %12683 = vmatprep.subr.bf16.mxu1 %v19350_v0 }
 0x14f   :  { %v3743_v61 = vrot.slane %v923_v51, 3  ;;  %v4416_v1 = vrot.slane %v923_v51, 4  ;;  %v427_v2 = vadd.f32 %v13774_v33, %v426_v59  ;;  %v428_v4 = vpop.f32.mrb[29].mxu0  ;;  %690 = vmatmul.mubr.f32.gmra.mrb[134].mxu0 %v163_v50  ;;  %10865 = vmatmul.mubr.msk.f32.gmra.mrb[2].mxu1 %vm1169_vm1, %v923_v51  ;;  %v1731_v6 = vrot.slane %v923_v51, 1 }
 0x150   :  { %694 = vmatprep.mubr.f32.mxu0 %v166_v52  ;;  %10867 = vmatprep.mubr.msk.f32.mxu1 %vm13150_vm0, %v19352_v3 }
 0x151   :  { %v924_v8 = vmax.f32 %v427_v2, 0.0  ;;  %12685 = vmatpush3.bf16.msra.mxu1 %v12684_v54  ;;  %v13825_v11 = vsel %vm1705_vm2, %v19349_v60, %v1731_v6  ;;  %v13830_v12 = vsel %vm3719_vm4, %v19348_v55, %v3743_v61  ;;  %v13835_v14 = vsel %vm1113_vm3, %v19347_v56, %v4416_v1  ;;  %v171_v54 = vld [vmem:[%s19339_s0 + $0x470] sm:$0xff] }
 0x152   :  { %19549 = vst [vmem:[#allocation3_spill] sm:$0xff] %v13830_v12  ;;  %19550 = vst [vmem:[#allocation4_spill] sm:$0xff] %v13835_v14  ;;  %v431_v15 = vpop.f32.mrb[30].mxu0  ;;  %12686 = vmatprep.subr.bf16.mxu1 %v19350_v0 }
 0x153   :  { %v3745_v16 = vrot.slane %v924_v8, 3  ;;  %v4418_v18 = vrot.slane %v924_v8, 4  ;;  %v432_v19 = vadd.f32 %v13774_v33, %v431_v15  ;;  %v433_v20 = vpop.f32.mrb[31].mxu0  ;;  %695 = vmatmul.mubr.f32.gmra.mrb[136].mxu0 %v165_v7  ;;  %10868 = vmatmul.mubr.msk.f32.gmra.mrb[4].mxu1 %vm1169_vm1, %v924_v8  ;;  %v1733_v22 = vrot.slane %v924_v8, 1 }
 0x154   :  { %699 = vmatprep.mubr.f32.mxu0 %v168_v10  ;;  %10870 = vmatprep.mubr.msk.f32.mxu1 %vm13150_vm0, %v19352_v3  ;;  %v176_v20 = vld [vmem:[%s19339_s0 + $0x498] sm:$0xff] }
 0x155   :  { %v925_v24 = vmax.f32 %v432_v19, 0.0  ;;  %v13849_v27 = vsel %vm1705_vm2, %v1731_v6, %v1733_v22  ;;  %v13852_v28 = vsel %vm3719_vm4, %v3743_v61, %v3745_v16  ;;  %v13855_v30 = vsel %vm1113_vm3, %v4416_v1, %v4418_v18  ;;  %v174_v61 = vld [vmem:[%s19339_s0 + $0x488] sm:$0xff] }
 0x156   :  { %19551 = vst [vmem:[#allocation5_spill] sm:$0xff] %v13852_v28  ;;  %19552 = vst [vmem:[#allocation6_spill] sm:$0xff] %v13855_v30  ;;  %v436_v31 = vpop.f32.mrb[32].mxu0 }
 0x157   :  { %v3747_v32 = vrot.slane %v925_v24, 3  ;;  %v4420_v34 = vrot.slane %v925_v24, 4  ;;  %v437_v35 = vadd.f32 %v13774_v33, %v436_v31  ;;  %v438_v36 = vpop.f32.mrb[33].mxu0  ;;  %700 = vmatmul.mubr.f32.gmra.mrb[138].mxu0 %v167_v23  ;;  %10871 = vmatmul.mubr.msk.f32.gmra.mrb[6].mxu1 %vm1169_vm1, %v925_v24  ;;  %v1735_v37 = vrot.slane %v925_v24, 1 }
 0x158   :  { %704 = vmatprep.mubr.f32.mxu0 %v170_v26  ;;  %10873 = vmatprep.mubr.msk.f32.mxu1 %vm13150_vm0, %v19352_v3 }
 0x159   :  { %v926_v39 = vmax.f32 %v437_v35, 0.0  ;;  %v13868_v42 = vsel %vm1705_vm2, %v1733_v22, %v1735_v37  ;;  %v13871_v43 = vsel %vm3719_vm4, %v3745_v16, %v3747_v32  ;;  %v13874_v44 = vsel %vm1113_vm3, %v4418_v18, %v4420_v34  ;;  %v173_v18 = vld [vmem:[%s19339_s0 + $0x480] sm:$0xff] }
 0x15a   :  { %19553 = vst [vmem:[#allocation7_spill] sm:$0xff] %v13871_v43  ;;  %19554 = vst [vmem:[#allocation8_spill] sm:$0xff] %v13874_v44  ;;  %v441_v46 = vpop.f32.mrb[34].mxu0 }
 0x15b   :  { %v3749_v47 = vrot.slane %v926_v39, 3  ;;  %v4422_v48 = vrot.slane %v926_v39, 4  ;;  %v442_v50 = vadd.f32 %v13774_v33, %v441_v46  ;;  %v443_v51 = vpop.f32.mrb[35].mxu0  ;;  %705 = vmatmul.mubr.f32.gmra.mrb[140].mxu0 %v169_v38  ;;  %10874 = vmatmul.mubr.msk.f32.gmra.mrb[8].mxu1 %vm1169_vm1, %v926_v39  ;;  %v1737_v52 = vrot.slane %v926_v39, 1  ;;  %v178_v39 = vld [vmem:[%s19339_s0 + $0x4a8] sm:$0xff] }
 0x15c   :  { %709 = vmatprep.mubr.f32.mxu0 %v172_v41  ;;  %10876 = vmatprep.mubr.msk.f32.mxu1 %vm13150_vm0, %v19352_v3 }
 0x15d   :  { %v927_v59 = vmax.f32 %v442_v50, 0.0  ;;  %v13887_v1 = vsel %vm1705_vm2, %v1735_v37, %v1737_v52  ;;  %v13890_v2 = vsel %vm3719_vm4, %v3747_v32, %v3749_v47  ;;  %v13893_v4 = vsel %vm1113_vm3, %v4420_v34, %v4422_v48  ;;  %v175_v37 = vld [vmem:[%s19339_s0 + $0x490] sm:$0xff] }
 0x15e   :  { %19555 = vst [vmem:[#allocation9_spill] sm:$0xff] %v13890_v2  ;;  %19556 = vst [vmem:[#allocation10_spill] sm:$0xff] %v13893_v4  ;;  %v446_v6 = vpop.f32.mrb[36].mxu0 }
 0x15f   :  { %v3751_v7 = vrot.slane %v927_v59, 3  ;;  %v4424_v8 = vrot.slane %v927_v59, 4  ;;  %v447_v10 = vadd.f32 %v13774_v33, %v446_v6  ;;  %v448_v15 = vpop.f32.mrb[37].mxu0  ;;  %710 = vmatmul.mubr.f32.gmra.mrb[142].mxu0 %v171_v54  ;;  %10877 = vmatmul.mubr.msk.f32.gmra.mrb[10].mxu1 %vm1169_vm1, %v927_v59  ;;  %v1739_v16 = vrot.slane %v927_v59, 1 }
 0x160   :  { %714 = vmatprep.mubr.f32.mxu0 %v174_v61  ;;  %10879 = vmatprep.mubr.msk.f32.mxu1 %vm13150_vm0, %v19352_v3  ;;  %v177_v61 = vld [vmem:[%s19339_s0 + $0x4a0] sm:$0xff] }
 0x161   :  { %v928_v19 = vmax.f32 %v447_v10, 0.0  ;;  %v13906_v22 = vsel %vm1705_vm2, %v1737_v52, %v1739_v16  ;;  %v13909_v23 = vsel %vm3719_vm4, %v3749_v47, %v3751_v7  ;;  %v13912_v24 = vsel %vm1113_vm3, %v4422_v48, %v4424_v8 }
 0x162   :  { %19557 = vst [vmem:[#allocation11_spill] sm:$0xff] %v13909_v23  ;;  %19558 = vst [vmem:[#allocation12_spill] sm:$0xff] %v13912_v24  ;;  %v451_v26 = vpop.f32.mrb[38].mxu0 }
 0x163   :  { %v3753_v31 = vrot.slane %v928_v19, 3  ;;  %v4426_v32 = vrot.slane %v928_v19, 4  ;;  %v452_v34 = vadd.f32 %v13774_v33, %v451_v26  ;;  %v453_v35 = vpop.f32.mrb[39].mxu0  ;;  %715 = vmatmul.mubr.f32.gmra.mrb[144].mxu0 %v173_v18  ;;  %10880 = vmatmul.mubr.msk.f32.gmra.mrb[12].mxu1 %vm1169_vm1, %v928_v19  ;;  %v1741_v36 = vrot.slane %v928_v19, 1 }
 0x164   :  { %719 = vmatprep.mubr.f32.mxu0 %v176_v20  ;;  %10882 = vmatprep.mubr.msk.f32.mxu1 %vm13150_vm0, %v19352_v3  ;;  %v182_v35 = vld [vmem:[%s19339_s0 + $0x4c8] sm:$0xff] }
 0x165   :  { %v929_v38 = vmax.f32 %v452_v34, 0.0  ;;  %v13925_v41 = vsel %vm1705_vm2, %v1739_v16, %v1741_v36  ;;  %v13928_v46 = vsel %vm3719_vm4, %v3751_v7, %v3753_v31  ;;  %v13931_v47 = vsel %vm1113_vm3, %v4424_v8, %v4426_v32  ;;  %v180_v7 = vld [vmem:[%s19339_s0 + $0x4b8] sm:$0xff] }
 0x166   :  { %19559 = vst [vmem:[#allocation13_spill] sm:$0xff] %v13928_v46  ;;  %19560 = vst [vmem:[#allocation14_spill] sm:$0xff] %v13931_v47  ;;  %v456_v48 = vpop.f32.mrb[40].mxu0 }
 0x167   :  { %v3755_v50 = vrot.slane %v929_v38, 3  ;;  %v4428_v51 = vrot.slane %v929_v38, 4  ;;  %v457_v52 = vadd.f32 %v13774_v33, %v456_v48  ;;  %v458_v54 = vpop.f32.mrb[41].mxu0  ;;  %720 = vmatmul.mubr.f32.gmra.mrb[146].mxu0 %v175_v37  ;;  %10883 = vmatmul.mubr.msk.f32.gmra.mrb[14].mxu1 %vm1169_vm1, %v929_v38  ;;  %v1743_v59 = vrot.slane %v929_v38, 1 }
 0x168   :  { %724 = vmatprep.mubr.f32.mxu0 %v178_v39  ;;  %10885 = vmatprep.mubr.msk.f32.mxu1 %vm13150_vm0, %v19352_v3 }
 0x169   :  { %v930_v6 = vmax.f32 %v457_v52, 0.0  ;;  %v13944_v8 = vsel %vm1705_vm2, %v1741_v36, %v1743_v59  ;;  %v13947_v10 = vsel %vm3719_vm4, %v3753_v31, %v3755_v50  ;;  %v13950_v15 = vsel %vm1113_vm3, %v4426_v32, %v4428_v51  ;;  %v179_v31 = vld [vmem:[%s19339_s0 + $0x4b0] sm:$0xff] }
 0x16a   :  { %19561 = vst [vmem:[#allocation15_spill] sm:$0xff] %v13947_v10  ;;  %19562 = vst [vmem:[#allocation16_spill] sm:$0xff] %v13950_v15  ;;  %v461_v16 = vpop.f32.mrb[42].mxu0 }
 0x16b   :  { %v3757_v18 = vrot.slane %v930_v6, 3  ;;  %v4430_v19 = vrot.slane %v930_v6, 4  ;;  %v462_v20 = vadd.f32 %v13774_v33, %v461_v16  ;;  %v463_v26 = vpop.f32.mrb[43].mxu0  ;;  %725 = vmatmul.mubr.f32.gmra.mrb[148].mxu0 %v177_v61  ;;  %10886 = vmatmul.mubr.msk.f32.gmra.mrb[16].mxu1 %vm1169_vm1, %v930_v6  ;;  %v1745_v34 = vrot.slane %v930_v6, 1 }
 0x16c   :  { %729 = vmatprep.mubr.f32.mxu0 %v180_v7  ;;  %10888 = vmatprep.mubr.msk.f32.mxu1 %vm13150_vm0, %v19352_v3 }
 0x16d   :  { %v931_v32 = vmax.f32 %v462_v20, 0.0  ;;  %v13963_v36 = vsel %vm1705_vm2, %v1743_v59, %v1745_v34  ;;  %v13966_v37 = vsel %vm3719_vm4, %v3755_v50, %v3757_v18  ;;  %v13969_v38 = vsel %vm1113_vm3, %v4428_v51, %v4430_v19  ;;  %v181_v50 = vld [vmem:[%s19339_s0 + $0x4c0] sm:$0xff]  ;;  %v184_v59 = vld [vmem:[%s19339_s0 + $0x4d8] sm:$0xff] }
 0x16e   :  { %19563 = vst [vmem:[#allocation17_spill] sm:$0xff] %v13966_v37  ;;  %19564 = vst [vmem:[#allocation18_spill] sm:$0xff] %v13969_v38  ;;  %v466_v39 = vpop.f32.mrb[44].mxu0 }
 0x16f   :  { %v3759_v48 = vrot.slane %v931_v32, 3  ;;  %v4432_v52 = vrot.slane %v931_v32, 4  ;;  %v467_v54 = vadd.f32 %v13774_v33, %v466_v39  ;;  %v468_v61 = vpop.f32.mrb[45].mxu0  ;;  %730 = vmatmul.mubr.f32.gmra.mrb[150].mxu0 %v179_v31  ;;  %10889 = vmatmul.mubr.msk.f32.gmra.mrb[18].mxu1 %vm1169_vm1, %v931_v32  ;;  %v1747_v6 = vrot.slane %v931_v32, 1 }
 0x170   :  { %734 = vmatprep.mubr.f32.mxu0 %v182_v35  ;;  %10891 = vmatprep.mubr.msk.f32.mxu1 %vm13150_vm0, %v19352_v3 }
 0x171   :  { %v932_v51 = vmax.f32 %v467_v54, 0.0  ;;  %v13982_v7 = vsel %vm1705_vm2, %v1745_v34, %v1747_v6  ;;  %v13985_v16 = vsel %vm3719_vm4, %v3757_v18, %v3759_v48  ;;  %v13988_v20 = vsel %vm1113_vm3, %v4430_v19, %v4432_v52  ;;  %v183_v18 = vld [vmem:[%s19339_s0 + $0x4d0] sm:$0xff]  ;;  %v186_v34 = vld [vmem:[%s19339_s0 + $0x4e8] sm:$0xff] }
 0x172   :  { %19565 = vst [vmem:[#allocation19_spill] sm:$0xff] %v13985_v16  ;;  %19566 = vst [vmem:[#allocation20_spill] sm:$0xff] %v13988_v20  ;;  %v471_v26 = vpop.f32.mrb[46].mxu0 }
 0x173   :  { %v3761_v31 = vrot.slane %v932_v51, 3  ;;  %v4434_v32 = vrot.slane %v932_v51, 4  ;;  %v472_v35 = vadd.f32 %v13774_v33, %v471_v26  ;;  %v473_v39 = vpop.f32.mrb[47].mxu0  ;;  %735 = vmatmul.mubr.f32.gmra.mrb[152].mxu0 %v181_v50  ;;  %10892 = vmatmul.mubr.msk.f32.gmra.mrb[20].mxu1 %vm1169_vm1, %v932_v51  ;;  %v1749_v54 = vrot.slane %v932_v51, 1 }
 0x174   :  { %739 = vmatprep.mubr.f32.mxu0 %v184_v59  ;;  %10894 = vmatprep.mubr.msk.f32.mxu1 %vm13150_vm0, %v19352_v3 }
 0x175   :  { %v933_v19 = vmax.f32 %v472_v35, 0.0  ;;  %v14001_v61 = vsel %vm1705_vm2, %v1747_v6, %v1749_v54  ;;  %v14004_v50 = vsel %vm3719_vm4, %v3759_v48, %v3761_v31  ;;  %v14007_v51 = vsel %vm1113_vm3, %v4432_v52, %v4434_v32  ;;  %v185_v48 = vld [vmem:[%s19339_s0 + $0x4e0] sm:$0xff]  ;;  %v188_v6 = vld [vmem:[%s19339_s0 + $0x4f8] sm:$0xff] }
 0x176   :  { %19567 = vst [vmem:[#allocation21_spill] sm:$0xff] %v14004_v50  ;;  %19568 = vst [vmem:[#allocation22_spill] sm:$0xff] %v14007_v51  ;;  %v476_v59 = vpop.f32.mrb[48].mxu0 }
 0x177   :  { %v3763_v26 = vrot.slane %v933_v19, 3  ;;  %v4436_v39 = vrot.slane %v933_v19, 4  ;;  %v477_v56 = vadd.f32 %v13774_v33, %v476_v59  ;;  %v478_v55 = vpop.f32.mrb[49].mxu0  ;;  %740 = vmatmul.mubr.f32.gmra.mrb[154].mxu0 %v183_v18  ;;  %10895 = vmatmul.mubr.msk.f32.gmra.mrb[22].mxu1 %vm1169_vm1, %v933_v19  ;;  %v1751_v35 = vrot.slane %v933_v19, 1 }
 0x178   :  { %744 = vmatprep.mubr.f32.mxu0 %v186_v34  ;;  %10897 = vmatprep.mubr.msk.f32.mxu1 %vm13150_vm0, %v19352_v3  ;;  %v362_v19 = vadd.f32 %v13774_v33, %v13683_v49  ;;  %v187_v49 = vld [vmem:[%s19339_s0 + $0x4f0] sm:$0xff] }
 0x179   :  { %v934_v52 = vmax.f32 %v477_v56, 0.0  ;;  %v14020_v59 = vsel %vm1705_vm2, %v1749_v54, %v1751_v35  ;;  %v14023_v55 = vsel %vm3719_vm4, %v3761_v31, %v3763_v26  ;;  %v14026_v18 = vsel %vm1113_vm3, %v4434_v32, %v4436_v39 }
 0x17a   :  { %19569 = vst [vmem:[#allocation23_spill] sm:$0xff] %v14023_v55  ;;  %19570 = vst [vmem:[#allocation24_spill] sm:$0xff] %v14026_v18  ;;  %v481_v34 = vpop.f32.mrb[50].mxu0  ;;  %v14034_v31 = vadd.f32 %v13774_v33, %v13675_v45  ;;  %v19571_v32 = vmov 0.0   ;;  %v19586_v55 = vmov 0.0|0.0  }
 0x17b   :  { %v3765_v60 = vrot.slane %v934_v52, 3  ;;  %v4438_v0 = vrot.slane %v934_v52, 4  ;;  %v482_v56 = vadd.f32 %v13774_v33, %v481_v34  ;;  %v483_v3 = vpop.f32.mrb[51].mxu0  ;;  %745 = vmatmul.mubr.f32.gmra.mrb[156].mxu0 %v185_v48  ;;  %10898 = vmatmul.mubr.msk.f32.gmra.mrb[24].mxu1 %vm1169_vm1, %v934_v52  ;;  %v1753_v54 = vrot.slane %v934_v52, 1 }
 0x17c   :  { %749 = vmatprep.mubr.f32.mxu0 %v188_v6  ;;  %10900 = vmatprep.mubr.msk.f32.mxu1 %vm13150_vm0, %v19571_v32  ;;  %v190_v3 = vld [vmem:[%s19339_s0 + $0x508] sm:$0xff]  ;;  %v14053_v6 = vmax.f32 %v362_v19, 0.0  ;;  %v367_v34 = vadd.f32 %v13774_v33, %v13691_v53  ;;  %v189_v53 = vld [vmem:[%s19339_s0 + $0x500] sm:$0xff] }
 0x17d   :  { %v935_v18 = vmax.f32 %v482_v56, 0.0  ;;  %v14045_v48 = vsel %vm1705_vm2, %v1751_v35, %v1753_v54  ;;  %v14048_v52 = vsel %vm3719_vm4, %v3763_v26, %v3765_v60  ;;  %v14051_v45 = vsel %vm1113_vm3, %v4436_v39, %v4438_v0  ;;  %v1034_v19 = vld [vmem:[%s19340_s3 + $0x68] sm:$0xff] }
 0x17e   :  { %19572 = vst [vmem:[#allocation25_spill] sm:$0xff] %v14048_v52  ;;  %19573 = vst [vmem:[#allocation26_spill] sm:$0xff] %v14051_v45  ;;  %v486_v51 = vpop.f32.mrb[52].mxu0  ;;  %v14086_v26 = vmax.f32 %v367_v34, 0.0 }
 0x17f   :  { %19574 = vst [vmem:[#allocation27_spill] sm:$0xff] %v14053_v6  ;;  %v3767_v56 = vrot.slane %v935_v18, 3  ;;  %v4440_v20 = vrot.slane %v935_v18, 4  ;;  %v487_v38 = vadd.f32 %v13774_v33, %v486_v51  ;;  %v488_v15 = vpop.f32.mrb[53].mxu0  ;;  %750 = vmatmul.mubr.f32.gmra.mrb[158].mxu0 %v187_v49  ;;  %10901 = vmatmul.mubr.msk.f32.gmra.mrb[26].mxu1 %vm1169_vm1, %v935_v18  ;;  %v1755_v35 = vrot.slane %v935_v18, 1  ;;  %v1033_v18 = vld [vmem:[%s19340_s3 + $0x60] sm:$0xff] }
 0x180   :  { %754 = vmatprep.mubr.f32.mxu0 %v190_v3  ;;  %10903 = vmatprep.mubr.msk.f32.mxu1 %vm13150_vm0, %v19571_v32  ;;  %v192_v15 = vld [vmem:[%s19339_s0 + $0x518] sm:$0xff]  ;;  %v1707_v3 = vrot.slane %v14053_v6, 1  ;;  %19577 = vst [vmem:[#allocation30_spill] sm:$0xff] %v14086_v26  ;;  %v1709_v14 = vrot.slane %v14086_v26, 1 }
 0x181   :  { %v14065_v39 = vmax.f32 %v487_v38, 0.0  ;;  %v14071_v51 = vsel %vm1705_vm2, %v1753_v54, %v1755_v35  ;;  %v14080_v49 = vsel %vm3719_vm4, %v3765_v60, %v3767_v56  ;;  %v14083_v38 = vsel %vm1113_vm3, %v4438_v0, %v4440_v20 }
 0x182   :  { %19575 = vst [vmem:[#allocation28_spill] sm:$0xff] %v14080_v49  ;;  %19576 = vst [vmem:[#allocation29_spill] sm:$0xff] %v14083_v38  ;;  %v372_v54 = vadd.f32 %v13774_v33, %v13699_v57  ;;  %v491_v45 = vpop.f32.mrb[54].mxu0  ;;  %v19578_v60 = vmax.f32 %v14034_v31, 0.0  ;;  %v191_v57 = vld [vmem:[%s19339_s0 + $0x510] sm:$0xff]  ;;  %v12687_v38 = vpack.c.bf16 %v1034_v19, %v1033_v18 }
 0x183   :  { %v3769_v47 = vrot.slane %v14065_v39, 3  ;;  %v4442_v24 = vrot.slane %v14065_v39, 4  ;;  %v492_v4 = vadd.f32 %v13774_v33, %v491_v45  ;;  %v493_v44 = vpop.f32.mrb[55].mxu0  ;;  %755 = vmatmul.mubr.f32.gmra.mrb[160].mxu0 %v189_v53  ;;  %10904 = vmatmul.mubr.msk.f32.gmra.mrb[28].mxu1 %vm1169_vm1, %v14065_v39  ;;  %v19354_v0 = vrot.slane %v14065_v39, 1 }
 0x184   :  { %v1706_v34 = vrot.slane %v19578_v60, 1  ;;  %759 = vmatprep.mubr.f32.mxu0 %v192_v15  ;;  %10914 = vmatprep.mubr.msk.f32.mxu1 %vm13150_vm0, %v19571_v32  ;;  %v194_v44 = vld [vmem:[%s19339_s0 + $0x528] sm:$0xff]  ;;  %v14117_v30 = vmax.f32 %v372_v54, 0.0 }
 0x185   :  { %v937_v45 = vmax.f32 %v492_v4, 0.0  ;;  %v14109_v53 = vsel %vm1705_vm2, %v1755_v35, %v19354_v0  ;;  %v14112_v15 = vsel %vm3719_vm4, %v3767_v56, %v3769_v47  ;;  %v14115_v60 = vsel %vm1113_vm3, %v4440_v20, %v4442_v24  ;;  %v1035_v35 = vld [vmem:[%s19340_s3 + $0x70] sm:$0xff]  ;;  %v1036_v56 = vld [vmem:[%s19340_s3 + $0x78] sm:$0xff] }
 0x186   :  { %19579 = vst [vmem:[#allocation31_spill] sm:$0xff] %v14112_v15  ;;  %19580 = vst [vmem:[#allocation32_spill] sm:$0xff] %v14115_v60  ;;  %v377_v4 = vadd.f32 %v13774_v33, %v13707_v62  ;;  %v496_v18 = vpop.f32.mrb[56].mxu0  ;;  %v1708_v19 = vsel %vm1705_vm2, %v1706_v34, %v1707_v3  ;;  %v193_v62 = vld [vmem:[%s19339_s0 + $0x520] sm:$0xff]  ;;  %v196_v15 = vld [vmem:[%s19339_s0 + $0x538] sm:$0xff]  ;;  %v1711_v52 = vrot.slane %v14117_v30, 1 }
 0x187   :  { %19581 = vst [vmem:[#allocation33_spill] sm:$0xff] %v14117_v30  ;;  %v1114_v20 = vrot.slane %v937_v45, 4  ;;  %v3771_v0 = vrot.slane %v937_v45, 3  ;;  %v497_v54 = vadd.f32 %v13774_v33, %v496_v18  ;;  %v498_v60 = vpop.f32.mrb[57].mxu0  ;;  %760 = vmatmul.mubr.f32.gmra.mrb[162].mxu0 %v191_v57  ;;  %10915 = vmatmul.mubr.msk.f32.vlgmr.msra.gmra.mrb[30].mxu1 %vm1169_vm1, %v1708_v19  ;;  %v382_v19 = vadd.f32 %v13774_v33, %v13715_v5  ;;  %v195_v5 = vld [vmem:[%s19339_s0 + $0x530] sm:$0xff] }
 0x188   :  { %764 = vmatprep.mubr.f32.mxu0 %v194_v44  ;;  %10917 = vmatprep.mubr.msk.f32.mxu1 %vm13150_vm0, %v19571_v32  ;;  %v12690_v60 = vpack.c.bf16 %v1036_v56, %v1035_v35  ;;  %v14147_v18 = vmax.f32 %v377_v4, 0.0 }
 0x189   :  { %v14136_v34 = vmax.f32 %v497_v54, 0.0  ;;  %12688 = vmatpush3.bf16.msra.mxu1 %v12687_v38  ;;  %v14142_v57 = vsel %vm3719_vm4, %v3769_v47, %v3771_v0  ;;  %v14145_v44 = vsel %vm1113_vm3, %v4442_v24, %v1114_v20  ;;  %v1710_v54 = vsel %vm1705_vm2, %v1707_v3, %v1709_v14  ;;  %v198_v3 = vld [vmem:[%s19339_s0 + $0x548] sm:$0xff] }
 0x18a   :  { %19583 = vst [vmem:[#allocation35_spill] sm:$0xff] %v14142_v57  ;;  %19584 = vst [vmem:[#allocation36_spill] sm:$0xff] %v14145_v44  ;;  %v14151_v49 = vpop.f32.mrb[58].mxu0  ;;  %12689 = vmatprep.subr.bf16.mxu1 %v19586_v55  ;;  %v2041_v38 = vrot.slane %v937_v45, 5 }
 0x18b   :  { %19582 = vst [vmem:[#allocation34_spill] sm:$0xff] %v14136_v34  ;;  %19585 = vst [vmem:[#allocation37_spill] sm:$0xff] %v14147_v18  ;;  %v19356_v47 = vrot.slane %v14136_v34, 4  ;;  %v19355_v35 = vrot.slane %v14136_v34, 5  ;;  %v3773_v24 = vrot.slane %v14136_v34, 3  ;;  %v503_v4 = vpop.f32.mrb[59].mxu0  ;;  %765 = vmatmul.mubr.f32.gmra.mrb[164].mxu0 %v193_v62  ;;  %10918 = vmatmul.mubr.msk.f32.gmra.mrb[32].mxu1 %vm1169_vm1, %v1710_v54  ;;  %v387_v54 = vadd.f32 %v13774_v33, %v13723_v9 }
 0x18c   :  { %769 = vmatprep.mubr.f32.mxu0 %v196_v15  ;;  %10920 = vmatprep.mubr.msk.f32.mxu1 %vm13150_vm0, %v19571_v32  ;;  %v14181_v62 = vmax.f32 %v382_v19, 0.0  ;;  %v197_v9 = vld [vmem:[%s19339_s0 + $0x540] sm:$0xff] }
 0x18d   :  { %12691 = vmatpush3.bf16.msra.mxu1 %v12690_v60  ;;  %v14171_v45 = vsel %vm2040_vm5, %v2041_v38, %v19355_v35  ;;  %v14176_v15 = vsel %vm1113_vm3, %v1114_v20, %v19356_v47  ;;  %v14179_v56 = vsel %vm3719_vm4, %v3771_v0, %v3773_v24  ;;  %v1712_v60 = vsel %vm1705_vm2, %v1709_v14, %v1711_v52  ;;  %v200_v14 = vld [vmem:[%s19339_s0 + $0x558] sm:$0xff] }
 0x18e   :  { %19587 = vst [vmem:[#allocation38_spill] sm:$0xff] %v14176_v15  ;;  %19588 = vst [vmem:[#allocation39_spill] sm:$0xff] %v14179_v56  ;;  %v14185_v4 = vpop.f32.mrb[60].mxu0  ;;  %v1713_v38 = vrot.slane %v14147_v18, 1  ;;  %12692 = vmatprep.subr.bf16.mxu1 %v19586_v55  ;;  %v14199_v0 = vmax.f32 %v387_v54, 0.0  ;;  %v392_v20 = vadd.f32 %v13774_v33, %v13731_v13  ;;  %v1715_v24 = vrot.slane %v14181_v62, 1 }
 0x18f   :  { %19589 = vst [vmem:[#allocation40_spill] sm:$0xff] %v14181_v62  ;;  %v508_v35 = vpop.f32.mrb[61].mxu0  ;;  %770 = vmatmul.mubr.f32.gmra.mrb[166].mxu0 %v195_v5  ;;  %10921 = vmatmul.mubr.msk.f32.gmra.mrb[34].mxu1 %vm1169_vm1, %v1712_v60  ;;  %v202_v13 = vld [vmem:[%s19339_s0 + $0x568] sm:$0xff] }
 0x190   :  { %774 = vmatprep.mubr.f32.mxu0 %v198_v3  ;;  %10923 = vmatprep.mubr.msk.f32.mxu1 %vm13150_vm0, %v19571_v32  ;;  %19590 = vst [vmem:[#allocation41_spill] sm:$0xff] %v14199_v0  ;;  %v1714_v35 = vsel %vm1705_vm2, %v1711_v52, %v1713_v38  ;;  %v199_v3 = vld [vmem:[%s19339_s0 + $0x550] sm:$0xff]  ;;  %v14216_v54 = vmax.f32 %v392_v20, 0.0  ;;  %v397_v52 = vadd.f32 %v13774_v33, %v13739_v17  ;;  %v201_v20 = vld [vmem:[%s19339_s0 + $0x560] sm:$0xff]  ;;  %v204_v17 = vld [vmem:[%s19339_s0 + $0x578] sm:$0xff] }
 0x192   :  { %v14203_v19 = vpop.f32.mrb[62].mxu0  ;;  %19591 = vst [vmem:[#allocation42_spill] sm:$0xff] %v14216_v54 }
 0x193   :  { %v513_v5 = vpop.f32.mrb[63].mxu0  ;;  %775 = vmatmul.mubr.f32.gmra.mrb[168].mxu0 %v197_v9  ;;  %10924 = vmatmul.mubr.msk.f32.gmra.mrb[36].mxu1 %vm1169_vm1, %v1714_v35  ;;  %v1716_v9 = vsel %vm1705_vm2, %v1713_v38, %v1715_v24  ;;  %v402_v38 = vadd.f32 %v13774_v33, %v13747_v21  ;;  %v206_v21 = vld [vmem:[%s19339_s0 + $0x588] sm:$0xff] }
 0x194   :  { %779 = vmatprep.mubr.f32.mxu0 %v200_v14  ;;  %10926 = vmatprep.mubr.msk.f32.mxu1 %vm13150_vm0, %v19571_v32  ;;  %v1717_v14 = vrot.slane %v14199_v0, 1  ;;  %v14233_v5 = vmax.f32 %v397_v52, 0.0  ;;  %v203_v52 = vld [vmem:[%s19339_s0 + $0x570] sm:$0xff] }
 0x195   :  { %v14250_v47 = vmax.f32 %v402_v38, 0.0  ;;  %v205_v38 = vld [vmem:[%s19339_s0 + $0x580] sm:$0xff] }
 0x196   :  { %v14220_v60 = vpop.f32.mrb[64].mxu0  ;;  %19592 = vst [vmem:[#allocation43_spill] sm:$0xff] %v14233_v5 }
 0x197   :  { %v518_v35 = vpop.f32.mrb[65].mxu0  ;;  %780 = vmatmul.mubr.f32.gmra.mrb[170].mxu0 %v199_v3  ;;  %10927 = vmatmul.mubr.msk.f32.gmra.mrb[38].mxu1 %vm1169_vm1, %v1716_v9  ;;  %v1719_v9 = vrot.slane %v14216_v54, 1  ;;  %19593 = vst [vmem:[#allocation44_spill] sm:$0xff] %v14250_v47 }
 0x198   :  { %784 = vmatprep.mubr.f32.mxu0 %v202_v13  ;;  %10929 = vmatprep.mubr.msk.f32.mxu1 %vm13150_vm0, %v19571_v32  ;;  %v1718_v13 = vsel %vm1705_vm2, %v1715_v24, %v1717_v14  ;;  %v407_v24 = vadd.f32 %v13774_v33, %v13755_v25  ;;  %v208_v25 = vld [vmem:[%s19339_s0 + $0x598] sm:$0xff] }
 0x19a   :  { %v14237_v3 = vpop.f32.mrb[66].mxu0  ;;  %v14267_v44 = vmax.f32 %v407_v24, 0.0  ;;  %v207_v24 = vld [vmem:[%s19339_s0 + $0x590] sm:$0xff] }
 0x19b   :  { %v523_v35 = vpop.f32.mrb[67].mxu0  ;;  %785 = vmatmul.mubr.f32.gmra.mrb[172].mxu0 %v201_v20  ;;  %10930 = vmatmul.mubr.msk.f32.gmra.mrb[40].mxu1 %vm1169_vm1, %v1718_v13  ;;  %v1721_v13 = vrot.slane %v14233_v5, 1 }
 0x19c   :  { %789 = vmatprep.mubr.f32.mxu0 %v204_v17  ;;  %10932 = vmatprep.mubr.msk.f32.mxu1 %vm13150_vm0, %v19571_v32  ;;  %v1720_v17 = vsel %vm1705_vm2, %v1717_v14, %v1719_v9  ;;  %19594 = vst [vmem:[#allocation45_spill] sm:$0xff] %v14267_v44  ;;  %v412_v14 = vadd.f32 %v13774_v33, %v13763_v29  ;;  %v210_v29 = vld [vmem:[%s19339_s0 + $0x5a8] sm:$0xff] }
 0x19e   :  { %v14254_v20 = vpop.f32.mrb[68].mxu0  ;;  %v14284_v33 = vmax.f32 %v412_v14, 0.0  ;;  %v212_v14 = vld [vmem:[%s19339_s0 + $0x5b8] sm:$0xff] }
 0x19f   :  { %v528_v35 = vpop.f32.mrb[69].mxu0  ;;  %790 = vmatmul.mubr.f32.gmra.mrb[174].mxu0 %v203_v52  ;;  %10933 = vmatmul.mubr.msk.f32.gmra.mrb[42].mxu1 %vm1169_vm1, %v1720_v17  ;;  %v1723_v17 = vrot.slane %v14250_v47, 1 }
 0x1a0   :  { %794 = vmatprep.mubr.f32.mxu0 %v206_v21  ;;  %10935 = vmatprep.mubr.msk.f32.mxu1 %vm13150_vm0, %v19571_v32  ;;  %v1722_v21 = vsel %vm1705_vm2, %v1719_v9, %v1721_v13  ;;  %19595 = vst [vmem:[#allocation46_spill] sm:$0xff] %v14284_v33 }
 0x1a2   :  { %v14271_v52 = vpop.f32.mrb[70].mxu0 }
 0x1a3   :  { %v533_v35 = vpop.f32.mrb[71].mxu0  ;;  %795 = vmatmul.mubr.f32.gmra.mrb[176].mxu0 %v205_v38  ;;  %10936 = vmatmul.mubr.msk.f32.gmra.mrb[44].mxu1 %vm1169_vm1, %v1722_v21  ;;  %v1724_v38 = vsel %vm1705_vm2, %v1721_v13, %v1723_v17  ;;  %v1725_v21 = vrot.slane %v14267_v44, 1 }
 0x1a4   :  { %799 = vmatprep.mubr.f32.mxu0 %v208_v25  ;;  %10938 = vmatprep.mubr.msk.f32.mxu1 %vm13150_vm0, %v19571_v32  ;;  %v209_v35 = vld [vmem:[%s19339_s0 + $0x5a0] sm:$0xff] }
 0x1a5   :  { %v1726_v13 = vsel %vm1705_vm2, %v1723_v17, %v1725_v21 }
 0x1a6   :  { %v14286_v9 = vpop.f32.mrb[72].mxu0 }
 0x1a7   :  { %v538_v25 = vpop.f32.mrb[73].mxu0  ;;  %800 = vmatmul.mubr.f32.gmra.mrb[178].mxu0 %v207_v24  ;;  %10939 = vmatmul.mubr.msk.f32.gmra.mrb[46].mxu1 %vm1169_vm1, %v1724_v38  ;;  %v1727_v24 = vrot.slane %v14284_v33, 1  ;;  %v214_v38 = vld [vmem:[%s19339_s0 + $0x5c8] sm:$0xff] }
 0x1a8   :  { %804 = vmatprep.mubr.f32.mxu0 %v210_v29  ;;  %10941 = vmatprep.mubr.msk.f32.mxu1 %vm13150_vm0, %v19571_v32  ;;  %v211_v29 = vld [vmem:[%s19339_s0 + $0x5b0] sm:$0xff] }
 0x1a9   :  { %v1728_v17 = vsel %vm1705_vm2, %v1725_v21, %v1727_v24  ;;  %v19596_v21 = vrot.slane %v13786_v40, 1 }
 0x1aa   :  { %v14299_v56 = vpop.f32.mrb[74].mxu0 }
 0x1ab   :  { %v543_v25 = vpop.f32.mrb[75].mxu0  ;;  %805 = vmatmul.mubr.f32.gmra.mrb[180].mxu0 %v209_v35  ;;  %10942 = vmatmul.mubr.msk.f32.gmra.mrb[48].mxu1 %vm1169_vm1, %v1726_v13  ;;  %v213_v35 = vld [vmem:[%s19339_s0 + $0x5c0] sm:$0xff] }
 0x1ac   :  { %809 = vmatprep.mubr.f32.mxu0 %v212_v14  ;;  %10944 = vmatprep.mubr.msk.f32.mxu1 %vm13150_vm0, %v19571_v32  ;;  %v216_v14 = vld [vmem:[%s19339_s0 + $0x5d8] sm:$0xff] }
 0x1ae   :  { %v14312_v57 = vpop.f32.mrb[76].mxu0 }
 0x1af   :  { %v548_v25 = vpop.f32.mrb[77].mxu0  ;;  %810 = vmatmul.mubr.f32.gmra.mrb[182].mxu0 %v211_v29  ;;  %10945 = vmatmul.mubr.msk.f32.gmra.mrb[50].mxu1 %vm1169_vm1, %v1728_v17  ;;  %v1730_v29 = vsel %vm1705_vm2, %v1727_v24, %v19596_v21  ;;  %v218_v17 = vld [vmem:[%s19339_s0 + $0x5e8] sm:$0xff]  ;;  %v217_v24 = vld [vmem:[%s19339_s0 + $0x5e0] sm:$0xff] }
 0x1b0   :  { %814 = vmatprep.mubr.f32.mxu0 %v214_v38  ;;  %10947 = vmatprep.mubr.msk.f32.mxu1 %vm13150_vm0, %v19571_v32  ;;  %v215_v38 = vld [vmem:[%s19339_s0 + $0x5d0] sm:$0xff] }
 0x1b2   :  { %v14324_v13 = vpop.f32.mrb[78].mxu0 }
 0x1b3   :  { %v553_v25 = vpop.f32.mrb[79].mxu0  ;;  %815 = vmatmul.mubr.f32.gmra.mrb[184].mxu0 %v213_v35  ;;  %10948 = vmatmul.mubr.msk.f32.gmra.mrb[52].mxu1 %vm1169_vm1, %v1730_v29  ;;  %v220_v35 = vld [vmem:[%s19339_s0 + $0x5f8] sm:$0xff] }
 0x1b4   :  { %819 = vmatprep.mubr.f32.mxu0 %v216_v14  ;;  %10950 = vmatprep.mubr.msk.f32.mxu1 %vm13150_vm0, %v19571_v32 }
 0x1b6   :  { %v14338_v50 = vpop.f32.mrb[80].mxu0 }
 0x1b7   :  { %v558_v16 = vpop.f32.mrb[81].mxu0  ;;  %820 = vmatmul.mubr.f32.gmra.mrb[186].mxu0 %v215_v38  ;;  %10951 = vmatmul.mubr.msk.f32.gmra.mrb[54].mxu1 %vm1169_vm1, %v13825_v11  ;;  %v219_v11 = vld [vmem:[%s19339_s0 + $0x5f0] sm:$0xff]  ;;  %v224_v38 = vld [vmem:[%s19339_s0 + $0x618] sm:$0xff] }
 0x1b8   :  { %824 = vmatprep.mubr.f32.mxu0 %v218_v17  ;;  %10953 = vmatprep.mubr.msk.f32.mxu1 %vm13150_vm0, %v19571_v32  ;;  %v222_v16 = vld [vmem:[%s19339_s0 + $0x608] sm:$0xff] }
 0x1ba   :  { %v14350_v14 = vpop.f32.mrb[82].mxu0 }
 0x1bb   :  { %v563_v21 = vpop.f32.mrb[83].mxu0  ;;  %825 = vmatmul.mubr.f32.gmra.mrb[188].mxu0 %v217_v24  ;;  %10954 = vmatmul.mubr.msk.f32.gmra.mrb[56].mxu1 %vm1169_vm1, %v13849_v27  ;;  %v221_v27 = vld [vmem:[%s19339_s0 + $0x600] sm:$0xff] }
 0x1bc   :  { %829 = vmatprep.mubr.f32.mxu0 %v220_v35  ;;  %10956 = vmatprep.mubr.msk.f32.mxu1 %vm13150_vm0, %v19571_v32  ;;  %v226_v35 = vld [vmem:[%s19339_s0 + $0x628] sm:$0xff] }
 0x1be   :  { %v14362_v29 = vpop.f32.mrb[84].mxu0 }
 0x1bf   :  { %v568_v25 = vpop.f32.mrb[85].mxu0  ;;  %830 = vmatmul.mubr.f32.gmra.mrb[190].mxu0 %v219_v11  ;;  %10957 = vmatmul.mubr.msk.f32.gmra.mrb[58].mxu1 %vm1169_vm1, %v13868_v42  ;;  %v223_v42 = vld [vmem:[%s19339_s0 + $0x610] sm:$0xff] }
 0x1c0   :  { %834 = vmatprep.mubr.f32.mxu0 %v222_v16  ;;  %10959 = vmatprep.mubr.msk.f32.mxu1 %vm13150_vm0, %v19571_v32  ;;  %v228_v16 = vld [vmem:[%s19339_s0 + $0x638] sm:$0xff] }
 0x1c2   :  { %v14374_v17 = vpop.f32.mrb[86].mxu0 }
 0x1c3   :  { %v573_v24 = vpop.f32.mrb[87].mxu0  ;;  %835 = vmatmul.mubr.f32.gmra.mrb[192].mxu0 %v221_v27  ;;  %10960 = vmatmul.mubr.msk.f32.gmra.mrb[60].mxu1 %vm1169_vm1, %v13887_v1  ;;  %v225_v1 = vld [vmem:[%s19339_s0 + $0x620] sm:$0xff] }
 0x1c4   :  { %839 = vmatprep.mubr.f32.mxu0 %v224_v38  ;;  %10962 = vmatprep.mubr.msk.f32.mxu1 %vm13150_vm0, %v19571_v32  ;;  %v230_v38 = vld [vmem:[%s19339_s0 + $0x648] sm:$0xff] }
 0x1c6   :  { %v14386_v21 = vpop.f32.mrb[88].mxu0 }
 0x1c7   :  { %v578_v11 = vpop.f32.mrb[89].mxu0  ;;  %840 = vmatmul.mubr.f32.gmra.mrb[194].mxu0 %v223_v42  ;;  %10963 = vmatmul.mubr.msk.f32.gmra.mrb[62].mxu1 %vm1169_vm1, %v13906_v22  ;;  %v227_v22 = vld [vmem:[%s19339_s0 + $0x630] sm:$0xff] }
 0x1c8   :  { %844 = vmatprep.mubr.f32.mxu0 %v226_v35  ;;  %10965 = vmatprep.mubr.msk.f32.mxu1 %vm13150_vm0, %v19571_v32  ;;  %v232_v35 = vld [vmem:[%s19339_s0 + $0x658] sm:$0xff] }
 0x1ca   :  { %v14398_v25 = vpop.f32.mrb[90].mxu0 }
 0x1cb   :  { %v583_v27 = vpop.f32.mrb[91].mxu0  ;;  %845 = vmatmul.mubr.f32.gmra.mrb[196].mxu0 %v225_v1  ;;  %10966 = vmatmul.mubr.msk.f32.gmra.mrb[64].mxu1 %vm1169_vm1, %v13925_v41  ;;  %v229_v41 = vld [vmem:[%s19339_s0 + $0x640] sm:$0xff] }
 0x1cc   :  { %849 = vmatprep.mubr.f32.mxu0 %v228_v16  ;;  %10968 = vmatprep.mubr.msk.f32.mxu1 %vm13150_vm0, %v19571_v32  ;;  %v234_v16 = vld [vmem:[%s19339_s0 + $0x668] sm:$0xff] }
 0x1ce   :  { %v14410_v24 = vpop.f32.mrb[92].mxu0 }
 0x1cf   :  { %v588_v42 = vpop.f32.mrb[93].mxu0  ;;  %850 = vmatmul.mubr.f32.gmra.mrb[198].mxu0 %v227_v22  ;;  %10969 = vmatmul.mubr.msk.f32.gmra.mrb[66].mxu1 %vm1169_vm1, %v13944_v8  ;;  %v231_v8 = vld [vmem:[%s19339_s0 + $0x650] sm:$0xff] }
 0x1d0   :  { %854 = vmatprep.mubr.f32.mxu0 %v230_v38  ;;  %10971 = vmatprep.mubr.msk.f32.mxu1 %vm13150_vm0, %v19571_v32  ;;  %v236_v38 = vld [vmem:[%s19339_s0 + $0x678] sm:$0xff] }
 0x1d2   :  { %v14422_v11 = vpop.f32.mrb[94].mxu0 }
 0x1d3   :  { %v593_v1 = vpop.f32.mrb[95].mxu0  ;;  %855 = vmatmul.mubr.f32.gmra.mrb[200].mxu0 %v229_v41  ;;  %10972 = vmatmul.mubr.msk.f32.gmra.mrb[68].mxu1 %vm1169_vm1, %v13963_v36  ;;  %v233_v36 = vld [vmem:[%s19339_s0 + $0x660] sm:$0xff] }
 0x1d4   :  { %859 = vmatprep.mubr.f32.mxu0 %v232_v35  ;;  %10974 = vmatprep.mubr.msk.f32.mxu1 %vm13150_vm0, %v19571_v32  ;;  %v238_v35 = vld [vmem:[%s19339_s0 + $0x688] sm:$0xff] }
 0x1d6   :  { %v14434_v27 = vpop.f32.mrb[96].mxu0 }
 0x1d7   :  { %v598_v22 = vpop.f32.mrb[97].mxu0  ;;  %860 = vmatmul.mubr.f32.gmra.mrb[202].mxu0 %v231_v8  ;;  %10975 = vmatmul.mubr.msk.f32.gmra.mrb[70].mxu1 %vm1169_vm1, %v13982_v7  ;;  %v235_v7 = vld [vmem:[%s19339_s0 + $0x670] sm:$0xff] }
 0x1d8   :  { %864 = vmatprep.mubr.f32.mxu0 %v234_v16  ;;  %10977 = vmatprep.mubr.msk.f32.mxu1 %vm13150_vm0, %v19571_v32  ;;  %v240_v16 = vld [vmem:[%s19339_s0 + $0x698] sm:$0xff] }
 0x1da   :  { %v14446_v42 = vpop.f32.mrb[98].mxu0 }
 0x1db   :  { %v603_v41 = vpop.f32.mrb[99].mxu0  ;;  %865 = vmatmul.mubr.f32.gmra.mrb[204].mxu0 %v233_v36  ;;  %10978 = vmatmul.mubr.msk.f32.gmra.mrb[72].mxu1 %vm1169_vm1, %v14001_v61  ;;  %v237_v61 = vld [vmem:[%s19339_s0 + $0x680] sm:$0xff] }
 0x1dc   :  { %869 = vmatprep.mubr.f32.mxu0 %v236_v38  ;;  %10980 = vmatprep.mubr.msk.f32.mxu1 %vm13150_vm0, %v19571_v32  ;;  %v242_v38 = vld [vmem:[%s19339_s0 + $0x6a8] sm:$0xff] }
 0x1de   :  { %v14458_v1 = vpop.f32.mrb[100].mxu0 }
 0x1df   :  { %v608_v8 = vpop.f32.mrb[101].mxu0  ;;  %870 = vmatmul.mubr.f32.gmra.mrb[206].mxu0 %v235_v7  ;;  %10981 = vmatmul.mubr.msk.f32.gmra.mrb[74].mxu1 %vm1169_vm1, %v14020_v59  ;;  %v239_v59 = vld [vmem:[%s19339_s0 + $0x690] sm:$0xff] }
 0x1e0   :  { %874 = vmatprep.mubr.f32.mxu0 %v238_v35  ;;  %10983 = vmatprep.mubr.msk.f32.mxu1 %vm13150_vm0, %v19571_v32  ;;  %v244_v35 = vld [vmem:[%s19339_s0 + $0x6b8] sm:$0xff]  ;;  %v14497_v8 = vld [vmem:[%s19341_s2] ss:$0 sm:$0xff] }
 0x1e2   :  { %v14470_v22 = vpop.f32.mrb[102].mxu0 }
 0x1e3   :  { %v613_v36 = vpop.f32.mrb[103].mxu0  ;;  %875 = vmatmul.mubr.f32.gmra.mrb[208].mxu0 %v237_v61  ;;  %10984 = vmatmul.mubr.msk.f32.gmra.mrb[76].mxu1 %vm1169_vm1, %v14045_v48  ;;  %v241_v48 = vld [vmem:[%s19339_s0 + $0x6a0] sm:$0xff] }
 0x1e4   :  { %879 = vmatprep.mubr.f32.mxu0 %v240_v16  ;;  %10986 = vmatprep.mubr.msk.f32.mxu1 %vm13150_vm0, %v19571_v32  ;;  %v243_v36 = vld [vmem:[%s19339_s0 + $0x6b0] sm:$0xff] }
 0x1e6   :  { %v14482_v41 = vpop.f32.mrb[104].mxu0 }
 0x1e7   :  { %v618_v7 = vpop.f32.mrb[105].mxu0  ;;  %880 = vmatmul.mubr.f32.gmra.mrb[210].mxu0 %v239_v59  ;;  %10987 = vmatmul.mubr.msk.f32.gmra.mrb[78].mxu1 %vm1169_vm1, %v14071_v51  ;;  %v502_v51 = vadd.f32 %v14497_v8, %v14151_v49  ;;  %v246_v59 = vld [vmem:[%s19339_s0 + $0x6c8] sm:$0xff] }
 0x1e8   :  { %884 = vmatprep.mubr.f32.mxu0 %v242_v38  ;;  %10989 = vmatprep.mubr.msk.f32.mxu1 %vm13150_vm0, %v19571_v32  ;;  %v507_v38 = vadd.f32 %v14497_v8, %v14185_v4  ;;  %v245_v4 = vld [vmem:[%s19339_s0 + $0x6c0] sm:$0xff] }
 0x1e9   :  { %v14513_v49 = vmax.f32 %v502_v51, 0.0  ;;  %v248_v51 = vld [vmem:[%s19339_s0 + $0x6d8] sm:$0xff] }
 0x1ea   :  { %v14501_v61 = vpop.f32.mrb[106].mxu0  ;;  %v14536_v10 = vmax.f32 %v507_v38, 0.0  ;;  %v250_v38 = vld [vmem:[%s19339_s0 + $0x6e8] sm:$0xff] }
 0x1eb   :  { %v623_v16 = vpop.f32.mrb[107].mxu0  ;;  %885 = vmatmul.mubr.f32.gmra.mrb[212].mxu0 %v241_v48  ;;  %10990 = vmatmul.mubr.msk.f32.gmra.mrb[80].mxu1 %vm1169_vm1, %v14109_v53  ;;  %19597 = vst [vmem:[#allocation47_spill] sm:$0xff] %v14513_v49  ;;  %v1037_v53 = vld [vmem:[%s19340_s3 + $0x80] sm:$0xff]  ;;  %v1038_v48 = vld [vmem:[%s19340_s3 + $0x88] sm:$0xff] }
 0x1ec   :  { %889 = vmatprep.mubr.f32.mxu0 %v244_v35  ;;  %10992 = vmatprep.mubr.msk.f32.mxu1 %vm13150_vm0, %v19571_v32  ;;  %v19598_v16 = vrot.slane %v14065_v39, 1  ;;  %v12693_v37 = vpack.c.bf16 %v1038_v48, %v1037_v53  ;;  %19599 = vst [vmem:[#allocation48_spill] sm:$0xff] %v14536_v10  ;;  %v512_v39 = vadd.f32 %v14497_v8, %v14203_v19  ;;  %v247_v19 = vld [vmem:[%s19339_s0 + $0x6d0] sm:$0xff]  ;;  %v2046_v23 = vrot.slane %v14536_v10, 5 }
 0x1ee   :  { %v14517_v7 = vpop.f32.mrb[108].mxu0  ;;  %v14559_v48 = vmax.f32 %v512_v39, 0.0  ;;  %v522_v39 = vadd.f32 %v14497_v8, %v14237_v3  ;;  %v1117_v3 = vrot.slane %v14513_v49, 4 }
 0x1ef   :  { %v628_v35 = vpop.f32.mrb[109].mxu0  ;;  %890 = vmatmul.mubr.f32.gmra.mrb[214].mxu0 %v243_v36  ;;  %10993 = vmatmul.mubr.msk.f32.gmra.mrb[82].mxu1 %vm1169_vm1, %v19598_v16  ;;  %v1040_v16 = vld [vmem:[%s19340_s3 + $0x98] sm:$0xff] }
 0x1f0   :  { %894 = vmatprep.mubr.f32.mxu0 %v246_v59  ;;  %11003 = vmatprep.mubr.msk.f32.mxu1 %vm13150_vm0, %v19571_v32  ;;  %v2044_v59 = vrot.slane %v14513_v49, 5  ;;  %v1039_v35 = vld [vmem:[%s19340_s3 + $0x90] sm:$0xff]  ;;  %19600 = vst [vmem:[#allocation49_spill] sm:$0xff] %v14559_v48 }
 0x1f1   :  { %v12696_v53 = vpack.c.bf16 %v1040_v16, %v1039_v35  ;;  %v2048_v16 = vrot.slane %v14559_v48, 5 }
 0x1f2   :  { %v14540_v36 = vpop.f32.mrb[110].mxu0 }
 0x1f3   :  { %v633_v46 = vpop.f32.mrb[111].mxu0  ;;  %895 = vmatmul.mubr.f32.gmra.mrb[216].mxu0 %v245_v4  ;;  %11004 = vmatmul.mubr.msk.f32.vlgmr.msra.gmra.mrb[84].mxu1 %vm1169_vm1, %v14171_v45  ;;  %v19601_v4 = vrot.slane %v14136_v34, 5 }
 0x1f4   :  { %899 = vmatprep.mubr.f32.mxu0 %v248_v51  ;;  %11006 = vmatprep.mubr.msk.f32.mxu1 %vm13150_vm0, %v19571_v32  ;;  %v517_v46 = vadd.f32 %v14497_v8, %v14220_v60 }
 0x1f5   :  { %12694 = vmatpush3.bf16.msra.mxu1 %v12693_v37  ;;  %v2045_v51 = vsel %vm2040_vm5, %v19601_v4, %v2044_v59  ;;  %v249_v37 = vld [vmem:[%s19339_s0 + $0x6e0] sm:$0xff] }
 0x1f6   :  { %v14563_v45 = vpop.f32.mrb[112].mxu0  ;;  %12695 = vmatprep.subr.bf16.mxu1 %v19586_v55  ;;  %v14576_v60 = vmax.f32 %v517_v46, 0.0  ;;  %v2049_v46 = vsel %vm2040_vm5, %v2046_v23, %v2048_v16 }
 0x1f7   :  { %v638_v2 = vpop.f32.mrb[113].mxu0  ;;  %900 = vmatmul.mubr.f32.gmra.mrb[218].mxu0 %v247_v19  ;;  %11007 = vmatmul.mubr.msk.f32.gmra.mrb[86].mxu1 %vm1169_vm1, %v2045_v51 }
 0x1f8   :  { %904 = vmatprep.mubr.f32.mxu0 %v250_v38  ;;  %11009 = vmatprep.mubr.msk.f32.mxu1 %vm13150_vm0, %v19571_v32  ;;  %19602 = vst [vmem:[#allocation50_spill] sm:$0xff] %v14576_v60  ;;  %v2047_v2 = vsel %vm2040_vm5, %v2044_v59, %v2046_v23  ;;  %v14591_v38 = vmax.f32 %v522_v39, 0.0  ;;  %v527_v59 = vadd.f32 %v14497_v8, %v14254_v20  ;;  %v2050_v4 = vrot.slane %v14576_v60, 5 }
 0x1f9   :  { %12697 = vmatpush3.bf16.msra.mxu1 %v12696_v53  ;;  %v19604_v20 = vrot.slane %v14136_v34, 4  ;;  %v1119_v23 = vrot.slane %v14536_v10, 4 }
 0x1fa   :  { %v14580_v35 = vpop.f32.mrb[114].mxu0  ;;  %12704 = vmatprep.subr.bf16.mxu1 %v19586_v55  ;;  %19603 = vst [vmem:[#allocation51_spill] sm:$0xff] %v14591_v38  ;;  %v14611_v39 = vmax.f32 %v527_v59, 0.0 }
 0x1fb   :  { %v643_v19 = vpop.f32.mrb[115].mxu0  ;;  %905 = vmatmul.mubr.f32.gmra.mrb[220].mxu0 %v249_v37  ;;  %11010 = vmatmul.mubr.msk.f32.gmra.mrb[88].mxu1 %vm1169_vm1, %v2047_v2  ;;  %v1118_v37 = vsel %vm1113_vm3, %v19604_v20, %v1117_v3  ;;  %v532_v2 = vadd.f32 %v14497_v8, %v14271_v52  ;;  %v1121_v52 = vrot.slane %v14559_v48, 4 }
 0x1fc   :  { %10736 = vmatprep.mubr.msk.f32.mxu0 %vm13150_vm0, %v19571_v32  ;;  %11012 = vmatprep.mubr.msk.f32.mxu1 %vm13150_vm0, %v19571_v32  ;;  %19605 = vst [vmem:[#allocation52_spill] sm:$0xff] %v14611_v39 }
 0x1fe   :  { %v14595_v53 = vpop.f32.mrb[116].mxu0 }
 0x1ff   :  { %v648_v51 = vpop.f32.mrb[117].mxu0  ;;  %10737 = vmatmul.mubr.msk.f32.vlgmr.msra.gmra.mrb[222].mxu0 %vm1169_vm1, %v14176_v15  ;;  %11013 = vmatmul.mubr.msk.f32.gmra.mrb[90].mxu1 %vm1169_vm1, %v2049_v46  ;;  %v2051_v46 = vsel %vm2040_vm5, %v2048_v16, %v2050_v4  ;;  %v14629_v16 = vmax.f32 %v532_v2, 0.0 }
 0x200   :  { %10739 = vmatprep.mubr.msk.f32.mxu0 %vm13150_vm0, %v19571_v32  ;;  %11015 = vmatprep.mubr.msk.f32.mxu1 %vm13150_vm0, %v19571_v32  ;;  %v2052_v51 = vrot.slane %v14591_v38, 5 }
 0x201   :  { %12676 = vmatpush3.bf16.msra.mxu0 %v13526_v58  ;;  %v1120_v58 = vsel %vm1113_vm3, %v1117_v3, %v1119_v23  ;;  %19606 = vst [vmem:[#allocation53_spill] sm:$0xff] %v14629_v16 }
 0x202   :  { %v14615_v19 = vpop.f32.mrb[118].mxu0  ;;  %12677 = vmatprep.subr.bf16.mxu0 %v19586_v55  ;;  %v2053_v20 = vsel %vm2040_vm5, %v2050_v4, %v2052_v51  ;;  %v542_v4 = vadd.f32 %v14497_v8, %v14299_v56  ;;  %v1125_v56 = vrot.slane %v14591_v38, 4 }
 0x203   :  { %v653_v15 = vpop.f32.mrb[119].mxu0  ;;  %10740 = vmatmul.mubr.msk.f32.gmra.mrb[224].mxu0 %vm1169_vm1, %v1118_v37  ;;  %11016 = vmatmul.mubr.msk.f32.gmra.mrb[92].mxu1 %vm1169_vm1, %v2051_v46  ;;  %v2054_v37 = vrot.slane %v14611_v39, 5 }
 0x204   :  { %10742 = vmatprep.mubr.msk.f32.mxu0 %vm13150_vm0, %v19571_v32  ;;  %11018 = vmatprep.mubr.msk.f32.mxu1 %vm13150_vm0, %v19571_v32  ;;  %v537_v15 = vadd.f32 %v14497_v8, %v14286_v9  ;;  %v1123_v9 = vrot.slane %v14576_v60, 4 }
 0x205   :  { %12679 = vmatpush3.bf16.msra.mxu0 %v13542_v63  ;;  %v1122_v63 = vsel %vm1113_vm3, %v1119_v23, %v1121_v52 }
 0x206   :  { %v14633_v59 = vpop.f32.mrb[120].mxu0  ;;  %12698 = vmatprep.subr.bf16.mxu0 %v19586_v55  ;;  %v14646_v3 = vmax.f32 %v537_v15, 0.0  ;;  %v1124_v23 = vsel %vm1113_vm3, %v1121_v52, %v1123_v9  ;;  %v14662_v15 = vmax.f32 %v542_v4, 0.0  ;;  %v1126_v52 = vsel %vm1113_vm3, %v1123_v9, %v1125_v56 }
 0x207   :  { %v658_v46 = vpop.f32.mrb[121].mxu0  ;;  %10743 = vmatmul.mubr.msk.f32.gmra.mrb[226].mxu0 %vm1169_vm1, %v1120_v58  ;;  %11019 = vmatmul.mubr.msk.f32.gmra.mrb[94].mxu1 %vm1169_vm1, %v2053_v20  ;;  %v2055_v58 = vsel %vm2040_vm5, %v2052_v51, %v2054_v37  ;;  %v2056_v20 = vrot.slane %v14629_v16, 5  ;;  %v547_v51 = vadd.f32 %v14497_v8, %v14312_v57  ;;  %v1127_v57 = vrot.slane %v14611_v39, 4 }
 0x208   :  { %10745 = vmatprep.mubr.msk.f32.mxu0 %vm13150_vm0, %v19571_v32  ;;  %11021 = vmatprep.mubr.msk.f32.mxu1 %vm13150_vm0, %v19571_v32  ;;  %19607 = vst [vmem:[#allocation54_spill] sm:$0xff] %v14646_v3  ;;  %19608 = vst [vmem:[#allocation55_spill] sm:$0xff] %v14662_v15 }
 0x209   :  { %v14678_v4 = vmax.f32 %v547_v51, 0.0  ;;  %v1128_v9 = vsel %vm1113_vm3, %v1125_v56, %v1127_v57 }
 0x20a   :  { %v14650_v2 = vpop.f32.mrb[122].mxu0 }
 0x20b   :  { %v663_v46 = vpop.f32.mrb[123].mxu0  ;;  %10746 = vmatmul.mubr.msk.f32.gmra.mrb[228].mxu0 %vm1169_vm1, %v1122_v63  ;;  %11022 = vmatmul.mubr.msk.f32.gmra.mrb[96].mxu1 %vm1169_vm1, %v2055_v58  ;;  %v2057_v63 = vsel %vm2040_vm5, %v2054_v37, %v2056_v20  ;;  %v2058_v58 = vrot.slane %v14646_v3, 5  ;;  %19609 = vst [vmem:[#allocation56_spill] sm:$0xff] %v14678_v4  ;;  %v552_v37 = vadd.f32 %v14497_v8, %v14324_v13  ;;  %v1129_v13 = vrot.slane %v14629_v16, 4 }
 0x20c   :  { %10748 = vmatprep.mubr.msk.f32.mxu0 %vm13150_vm0, %v19571_v32  ;;  %11024 = vmatprep.mubr.msk.f32.mxu1 %vm13150_vm0, %v19571_v32 }
 0x20d   :  { %v14694_v51 = vmax.f32 %v552_v37, 0.0  ;;  %v1130_v56 = vsel %vm1113_vm3, %v1127_v57, %v1129_v13 }
 0x20e   :  { %v14666_v46 = vpop.f32.mrb[124].mxu0 }
 0x20f   :  { %v668_v60 = vpop.f32.mrb[125].mxu0  ;;  %10749 = vmatmul.mubr.msk.f32.gmra.mrb[230].mxu0 %vm1169_vm1, %v1124_v23  ;;  %11025 = vmatmul.mubr.msk.f32.gmra.mrb[98].mxu1 %vm1169_vm1, %v2057_v63  ;;  %v2059_v23 = vsel %vm2040_vm5, %v2056_v20, %v2058_v58  ;;  %v2060_v63 = vrot.slane %v14662_v15, 5  ;;  %19610 = vst [vmem:[#allocation57_spill] sm:$0xff] %v14694_v51  ;;  %v557_v20 = vadd.f32 %v14497_v8, %v14338_v50  ;;  %v1131_v50 = vrot.slane %v14646_v3, 4 }
 0x210   :  { %10751 = vmatprep.mubr.msk.f32.mxu0 %vm13150_vm0, %v19571_v32  ;;  %11027 = vmatprep.mubr.msk.f32.mxu1 %vm13150_vm0, %v19571_v32 }
 0x211   :  { %v14710_v37 = vmax.f32 %v557_v20, 0.0  ;;  %v1132_v57 = vsel %vm1113_vm3, %v1129_v13, %v1131_v50  ;;  %v1135_v13 = vrot.slane %v14678_v4, 4 }
 0x212   :  { %v14682_v60 = vpop.f32.mrb[126].mxu0 }
 0x213   :  { %v673_v38 = vpop.f32.mrb[127].mxu0  ;;  %10752 = vmatmul.mubr.msk.f32.gmra.mrb[232].mxu0 %vm1169_vm1, %v1126_v52  ;;  %11028 = vmatmul.mubr.msk.f32.gmra.mrb[100].mxu1 %vm1169_vm1, %v2059_v23  ;;  %v2061_v52 = vsel %vm2040_vm5, %v2058_v58, %v2060_v63  ;;  %v2062_v23 = vrot.slane %v14678_v4, 5  ;;  %19611 = vst [vmem:[#allocation58_spill] sm:$0xff] %v14710_v37  ;;  %v562_v58 = vadd.f32 %v14497_v8, %v14350_v14  ;;  %v1133_v14 = vrot.slane %v14662_v15, 4 }
 0x214   :  { %10754 = vmatprep.mubr.msk.f32.mxu0 %vm13150_vm0, %v19571_v32  ;;  %11030 = vmatprep.mubr.msk.f32.mxu1 %vm13150_vm0, %v19571_v32  ;;  %v2066_v3 = vrot.slane %v14710_v37, 5 }
 0x215   :  { %v14726_v20 = vmax.f32 %v562_v58, 0.0 }
 0x216   :  { %v14698_v38 = vpop.f32.mrb[128].mxu0 }
 0x217   :  { %v678_v39 = vpop.f32.mrb[129].mxu0  ;;  %10755 = vmatmul.mubr.msk.f32.gmra.mrb[234].mxu0 %vm1169_vm1, %v1128_v9  ;;  %11031 = vmatmul.mubr.msk.f32.gmra.mrb[102].mxu1 %vm1169_vm1, %v2061_v52  ;;  %v2063_v9 = vsel %vm2040_vm5, %v2060_v63, %v2062_v23  ;;  %v2064_v52 = vrot.slane %v14694_v51, 5  ;;  %19612 = vst [vmem:[#allocation59_spill] sm:$0xff] %v14726_v20  ;;  %v567_v63 = vadd.f32 %v14497_v8, %v14362_v29 }
 0x218   :  { %10757 = vmatprep.mubr.msk.f32.mxu0 %vm13150_vm0, %v19571_v32  ;;  %11033 = vmatprep.mubr.msk.f32.mxu1 %vm13150_vm0, %v19571_v32  ;;  %v1134_v29 = vsel %vm1113_vm3, %v1131_v50, %v1133_v14  ;;  %v1137_v50 = vrot.slane %v14694_v51, 4 }
 0x219   :  { %v14744_v58 = vmax.f32 %v567_v63, 0.0 }
 0x21a   :  { %v14714_v39 = vpop.f32.mrb[130].mxu0 }
 0x21b   :  { %v683_v16 = vpop.f32.mrb[131].mxu0  ;;  %10758 = vmatmul.mubr.msk.f32.gmra.mrb[236].mxu0 %vm1169_vm1, %v1130_v56  ;;  %11034 = vmatmul.mubr.msk.f32.gmra.mrb[104].mxu1 %vm1169_vm1, %v2063_v9  ;;  %v2065_v9 = vsel %vm2040_vm5, %v2062_v23, %v2064_v52  ;;  %19613 = vst [vmem:[#allocation60_spill] sm:$0xff] %v14744_v58 }
 0x21c   :  { %10760 = vmatprep.mubr.msk.f32.mxu0 %vm13150_vm0, %v19571_v32  ;;  %11036 = vmatprep.mubr.msk.f32.mxu1 %vm13150_vm0, %v19571_v32 }
 0x21e   :  { %v14730_v16 = vpop.f32.mrb[132].mxu0  ;;  %v14732_v56 = vpop.f32.mrb[0].mxu1 }
 0x21f   :  { %v688_v48 = vpop.f32.mrb[133].mxu0  ;;  %10761 = vmatmul.mubr.msk.f32.gmra.mrb[238].mxu0 %vm1169_vm1, %v1132_v57  ;;  %v10863_v10 = vpop.f32.mrb[1].mxu1  ;;  %11037 = vmatmul.mubr.msk.f32.gmra.mrb[106].mxu1 %vm1169_vm1, %v2065_v9  ;;  %v2067_v57 = vsel %vm2040_vm5, %v2064_v52, %v2066_v3  ;;  %v2068_v9 = vrot.slane %v14726_v20, 5 }
 0x220   :  { %10763 = vmatprep.mubr.msk.f32.mxu0 %vm13150_vm0, %v19571_v32  ;;  %11039 = vmatprep.mubr.msk.f32.mxu1 %vm13150_vm0, %v19571_v32  ;;  %v572_v48 = vadd.f32 %v14497_v8, %v14374_v17  ;;  %v1136_v17 = vsel %vm1113_vm3, %v1133_v14, %v1135_v13  ;;  %v1139_v14 = vrot.slane %v14710_v37, 4 }
 0x222   :  { %v14748_v23 = vpop.f32.mrb[134].mxu0  ;;  %v14750_v10 = vpop.f32.mrb[2].mxu1  ;;  %v14762_v63 = vmax.f32 %v572_v48, 0.0 }
 0x223   :  { %v693_v15 = vpop.f32.mrb[135].mxu0  ;;  %10764 = vmatmul.mubr.msk.f32.gmra.mrb[240].mxu0 %vm1169_vm1, %v1134_v29  ;;  %v10866_v34 = vpop.f32.mrb[3].mxu1  ;;  %11040 = vmatmul.mubr.msk.f32.gmra.mrb[108].mxu1 %vm1169_vm1, %v2067_v57  ;;  %v2069_v29 = vsel %vm2040_vm5, %v2066_v3, %v2068_v9  ;;  %v2070_v57 = vrot.slane %v14744_v58, 5  ;;  %v582_v3 = vadd.f32 %v14497_v8, %v14398_v25  ;;  %v1140_v25 = vsel %vm1113_vm3, %v1137_v50, %v1139_v14 }
 0x224   :  { %10766 = vmatprep.mubr.msk.f32.mxu0 %vm13150_vm0, %v19571_v32  ;;  %11042 = vmatprep.mubr.msk.f32.mxu1 %vm13150_vm0, %v19571_v32  ;;  %19614 = vst [vmem:[#allocation61_spill] sm:$0xff] %v14762_v63  ;;  %v577_v15 = vadd.f32 %v14497_v8, %v14386_v21  ;;  %v1138_v21 = vsel %vm1113_vm3, %v1135_v13, %v1137_v50  ;;  %v1141_v13 = vrot.slane %v14726_v20, 4  ;;  %v1143_v50 = vrot.slane %v14744_v58, 4 }
 0x226   :  { %v14766_v52 = vpop.f32.mrb[136].mxu0  ;;  %v14768_v34 = vpop.f32.mrb[4].mxu1  ;;  %v14780_v48 = vmax.f32 %v577_v15, 0.0  ;;  %v14798_v15 = vmax.f32 %v582_v3, 0.0 }
 0x227   :  { %v698_v4 = vpop.f32.mrb[137].mxu0  ;;  %10767 = vmatmul.mubr.msk.f32.gmra.mrb[242].mxu0 %vm1169_vm1, %v1136_v17  ;;  %v10869_v49 = vpop.f32.mrb[5].mxu1  ;;  %11043 = vmatmul.mubr.msk.f32.gmra.mrb[110].mxu1 %vm1169_vm1, %v2069_v29  ;;  %v2071_v17 = vsel %vm2040_vm5, %v2068_v9, %v2070_v57  ;;  %v2072_v29 = vrot.slane %v14762_v63, 5 }
 0x228   :  { %10769 = vmatprep.mubr.msk.f32.mxu0 %vm13150_vm0, %v19571_v32  ;;  %11045 = vmatprep.mubr.msk.f32.mxu1 %vm13150_vm0, %v19571_v32  ;;  %19615 = vst [vmem:[#allocation62_spill] sm:$0xff] %v14780_v48  ;;  %19617 = vst [vmem:[#allocation64_spill] sm:$0xff] %v14798_v15 }
 0x22a   :  { %v14784_v4 = vpop.f32.mrb[138].mxu0  ;;  %v14786_v49 = vpop.f32.mrb[6].mxu1 }
 0x22b   :  { %19616 = vst [vmem:[#allocation63_spill] sm:$0xff] %v14786_v49  ;;  %v703_v51 = vpop.f32.mrb[139].mxu0  ;;  %10770 = vmatmul.mubr.msk.f32.gmra.mrb[244].mxu0 %vm1169_vm1, %v1138_v21  ;;  %v10872_v43 = vpop.f32.mrb[7].mxu1  ;;  %11046 = vmatmul.mubr.msk.f32.gmra.mrb[112].mxu1 %vm1169_vm1, %v2071_v17  ;;  %v2073_v21 = vsel %vm2040_vm5, %v2070_v57, %v2072_v29  ;;  %v2074_v17 = vrot.slane %v14780_v48, 5 }
 0x22c   :  { %10772 = vmatprep.mubr.msk.f32.mxu0 %vm13150_vm0, %v19571_v32  ;;  %11048 = vmatprep.mubr.msk.f32.mxu1 %vm13150_vm0, %v19571_v32  ;;  %v587_v51 = vadd.f32 %v14497_v8, %v14410_v24  ;;  %v1142_v24 = vsel %vm1113_vm3, %v1139_v14, %v1141_v13  ;;  %v1145_v14 = vrot.slane %v14762_v63, 4 }
 0x22e   :  { %v14802_v9 = vpop.f32.mrb[140].mxu0  ;;  %v14804_v43 = vpop.f32.mrb[8].mxu1  ;;  %v14816_v3 = vmax.f32 %v587_v51, 0.0 }
 0x22f   :  { %19618 = vst [vmem:[#allocation65_spill] sm:$0xff] %v14804_v43  ;;  %v708_v37 = vpop.f32.mrb[141].mxu0  ;;  %10773 = vmatmul.mubr.msk.f32.gmra.mrb[246].mxu0 %vm1169_vm1, %v1140_v25  ;;  %v10875_v28 = vpop.f32.mrb[9].mxu1  ;;  %11049 = vmatmul.mubr.msk.f32.gmra.mrb[114].mxu1 %vm1169_vm1, %v2073_v21  ;;  %v2075_v25 = vsel %vm2040_vm5, %v2072_v29, %v2074_v17  ;;  %v2076_v21 = vrot.slane %v14798_v15, 5 }
 0x230   :  { %10775 = vmatprep.mubr.msk.f32.mxu0 %vm13150_vm0, %v19571_v32  ;;  %11051 = vmatprep.mubr.msk.f32.mxu1 %vm13150_vm0, %v19571_v32  ;;  %19619 = vst [vmem:[#allocation66_spill] sm:$0xff] %v14816_v3  ;;  %v592_v37 = vadd.f32 %v14497_v8, %v14422_v11  ;;  %v1144_v11 = vsel %vm1113_vm3, %v1141_v13, %v1143_v50  ;;  %v1147_v13 = vrot.slane %v14780_v48, 4 }
 0x232   :  { %v14820_v57 = vpop.f32.mrb[142].mxu0  ;;  %v14822_v28 = vpop.f32.mrb[10].mxu1  ;;  %v14834_v51 = vmax.f32 %v592_v37, 0.0 }
 0x233   :  { %19620 = vst [vmem:[#allocation67_spill] sm:$0xff] %v14822_v28  ;;  %v713_v20 = vpop.f32.mrb[143].mxu0  ;;  %10776 = vmatmul.mubr.msk.f32.gmra.mrb[248].mxu0 %vm1169_vm1, %v1142_v24  ;;  %v10878_v12 = vpop.f32.mrb[11].mxu1  ;;  %11052 = vmatmul.mubr.msk.f32.gmra.mrb[116].mxu1 %vm1169_vm1, %v2075_v25  ;;  %v2077_v24 = vsel %vm2040_vm5, %v2074_v17, %v2076_v21  ;;  %v2078_v25 = vrot.slane %v14816_v3, 5 }
 0x234   :  { %10778 = vmatprep.mubr.msk.f32.mxu0 %vm13150_vm0, %v19571_v32  ;;  %11054 = vmatprep.mubr.msk.f32.mxu1 %vm13150_vm0, %v19571_v32  ;;  %19621 = vst [vmem:[#allocation68_spill] sm:$0xff] %v14834_v51  ;;  %v597_v20 = vadd.f32 %v14497_v8, %v14434_v27  ;;  %v1146_v27 = vsel %vm1113_vm3, %v1143_v50, %v1145_v14 }
 0x235   :  { %v1148_v50 = vsel %vm1113_vm3, %v1145_v14, %v1147_v13 }
 0x236   :  { %v14838_v29 = vpop.f32.mrb[144].mxu0  ;;  %v14840_v12 = vpop.f32.mrb[12].mxu1  ;;  %v14852_v37 = vmax.f32 %v597_v20, 0.0 }
 0x237   :  { %19622 = vst [vmem:[#allocation69_spill] sm:$0xff] %v14840_v12  ;;  %v718_v58 = vpop.f32.mrb[145].mxu0  ;;  %10779 = vmatmul.mubr.msk.f32.gmra.mrb[250].mxu0 %vm1169_vm1, %v1144_v11  ;;  %v10881_v40 = vpop.f32.mrb[13].mxu1  ;;  %11055 = vmatmul.mubr.msk.f32.gmra.mrb[118].mxu1 %vm1169_vm1, %v2077_v24  ;;  %v2079_v11 = vsel %vm2040_vm5, %v2076_v21, %v2078_v25  ;;  %v2080_v24 = vrot.slane %v14834_v51, 5 }
 0x238   :  { %10781 = vmatprep.mubr.msk.f32.mxu0 %vm13150_vm0, %v19571_v32  ;;  %11057 = vmatprep.mubr.msk.f32.mxu1 %vm13150_vm0, %v19571_v32  ;;  %19623 = vst [vmem:[#allocation70_spill] sm:$0xff] %v14852_v37  ;;  %v602_v58 = vadd.f32 %v14497_v8, %v14446_v42  ;;  %v1149_v42 = vrot.slane %v14798_v15, 4 }
 0x23a   :  { %v14856_v17 = vpop.f32.mrb[146].mxu0  ;;  %v14858_v40 = vpop.f32.mrb[14].mxu1  ;;  %v14870_v20 = vmax.f32 %v602_v58, 0.0  ;;  %v1150_v14 = vsel %vm1113_vm3, %v1147_v13, %v1149_v42 }
 0x23b   :  { %19624 = vst [vmem:[#allocation71_spill] sm:$0xff] %v14858_v40  ;;  %v723_v63 = vpop.f32.mrb[147].mxu0  ;;  %10782 = vmatmul.mubr.msk.f32.gmra.mrb[252].mxu0 %vm1169_vm1, %v1146_v27  ;;  %v10884_v12 = vpop.f32.mrb[15].mxu1  ;;  %11058 = vmatmul.mubr.msk.f32.gmra.mrb[120].mxu1 %vm1169_vm1, %v2079_v11  ;;  %v2081_v27 = vsel %vm2040_vm5, %v2078_v25, %v2080_v24  ;;  %v2082_v11 = vrot.slane %v14852_v37, 5 }
 0x23c   :  { %10784 = vmatprep.mubr.msk.f32.mxu0 %vm13150_vm0, %v19571_v32  ;;  %11060 = vmatprep.mubr.msk.f32.mxu1 %vm13150_vm0, %v19571_v32  ;;  %19625 = vst [vmem:[#allocation72_spill] sm:$0xff] %v14870_v20  ;;  %v607_v63 = vadd.f32 %v14497_v8, %v14458_v1  ;;  %v1151_v1 = vrot.slane %v14816_v3, 4 }
 0x23e   :  { %v14874_v21 = vpop.f32.mrb[148].mxu0  ;;  %v14876_v12 = vpop.f32.mrb[16].mxu1  ;;  %v14888_v58 = vmax.f32 %v607_v63, 0.0  ;;  %v1152_v13 = vsel %vm1113_vm3, %v1149_v42, %v1151_v1 }
 0x23f   :  { %19626 = vst [vmem:[#allocation73_spill] sm:$0xff] %v14876_v12  ;;  %v728_v48 = vpop.f32.mrb[149].mxu0  ;;  %10785 = vmatmul.mubr.msk.f32.gmra.mrb[254].mxu0 %vm1169_vm1, %v1148_v50  ;;  %v10887_v40 = vpop.f32.mrb[17].mxu1  ;;  %11061 = vmatmul.mubr.msk.f32.gmra.mrb[122].mxu1 %vm1169_vm1, %v2081_v27  ;;  %v2083_v50 = vsel %vm2040_vm5, %v2080_v24, %v2082_v11  ;;  %v2084_v27 = vrot.slane %v14870_v20, 5 }
 0x240   :  { %10787 = vmatprep.mubr.msk.f32.mxu0 %vm13150_vm0, %v19571_v32  ;;  %11063 = vmatprep.mubr.msk.f32.mxu1 %vm13150_vm0, %v19571_v32  ;;  %19627 = vst [vmem:[#allocation74_spill] sm:$0xff] %v14888_v58  ;;  %v612_v48 = vadd.f32 %v14497_v8, %v14470_v22  ;;  %v1153_v22 = vrot.slane %v14834_v51, 4 }
 0x242   :  { %v14892_v25 = vpop.f32.mrb[150].mxu0  ;;  %v14894_v40 = vpop.f32.mrb[18].mxu1  ;;  %v14906_v63 = vmax.f32 %v612_v48, 0.0  ;;  %v1154_v42 = vsel %vm1113_vm3, %v1151_v1, %v1153_v22 }
 0x243   :  { %19628 = vst [vmem:[#allocation75_spill] sm:$0xff] %v14894_v40  ;;  %v733_v15 = vpop.f32.mrb[151].mxu0  ;;  %10788 = vmatmul.mubr.msk.f32.gmra.mrb[0].mxu0 %vm1169_vm1, %v1150_v14  ;;  %v10890_v12 = vpop.f32.mrb[19].mxu1  ;;  %11064 = vmatmul.mubr.msk.f32.gmra.mrb[124].mxu1 %vm1169_vm1, %v2083_v50  ;;  %v2085_v14 = vsel %vm2040_vm5, %v2082_v11, %v2084_v27  ;;  %v2086_v50 = vrot.slane %v14888_v58, 5 }
 0x244   :  { %10790 = vmatprep.mubr.msk.f32.mxu0 %vm13150_vm0, %v19571_v32  ;;  %11066 = vmatprep.mubr.msk.f32.mxu1 %vm13150_vm0, %v19571_v32  ;;  %19629 = vst [vmem:[#allocation76_spill] sm:$0xff] %v14906_v63  ;;  %v617_v15 = vadd.f32 %v14497_v8, %v14482_v41  ;;  %v1155_v41 = vrot.slane %v14852_v37, 4 }
 0x246   :  { %v14910_v24 = vpop.f32.mrb[152].mxu0  ;;  %v14912_v12 = vpop.f32.mrb[20].mxu1  ;;  %v14924_v48 = vmax.f32 %v617_v15, 0.0  ;;  %v1156_v1 = vsel %vm1113_vm3, %v1153_v22, %v1155_v41  ;;  %v1159_v22 = vrot.slane %v14888_v58, 4 }
 0x247   :  { %19630 = vst [vmem:[#allocation77_spill] sm:$0xff] %v14912_v12  ;;  %v738_v3 = vpop.f32.mrb[153].mxu0  ;;  %10791 = vmatmul.mubr.msk.f32.gmra.mrb[2].mxu0 %vm1169_vm1, %v1152_v13  ;;  %v10893_v40 = vpop.f32.mrb[21].mxu1  ;;  %11067 = vmatmul.mubr.msk.f32.gmra.mrb[126].mxu1 %vm1169_vm1, %v2085_v14  ;;  %v2087_v13 = vsel %vm2040_vm5, %v2084_v27, %v2086_v50  ;;  %v2088_v14 = vrot.slane %v14906_v63, 5 }
 0x248   :  { %10793 = vmatprep.mubr.msk.f32.mxu0 %vm13150_vm0, %v19571_v32  ;;  %11069 = vmatprep.mubr.msk.f32.mxu1 %vm13150_vm0, %v19571_v32  ;;  %19631 = vst [vmem:[#allocation78_spill] sm:$0xff] %v14924_v48  ;;  %v622_v3 = vadd.f32 %v14497_v8, %v14501_v61  ;;  %v1157_v61 = vrot.slane %v14870_v20, 4 }
 0x24a   :  { %v14928_v11 = vpop.f32.mrb[154].mxu0  ;;  %v14930_v40 = vpop.f32.mrb[22].mxu1  ;;  %v14942_v15 = vmax.f32 %v622_v3, 0.0 }
 0x24b   :  { %19632 = vst [vmem:[#allocation79_spill] sm:$0xff] %v14930_v40  ;;  %v743_v51 = vpop.f32.mrb[155].mxu0  ;;  %10794 = vmatmul.mubr.msk.f32.gmra.mrb[4].mxu0 %vm1169_vm1, %v1154_v42  ;;  %v10896_v12 = vpop.f32.mrb[23].mxu1  ;;  %11070 = vmatmul.mubr.msk.f32.gmra.mrb[128].mxu1 %vm1169_vm1, %v2087_v13  ;;  %v2089_v42 = vsel %vm2040_vm5, %v2086_v50, %v2088_v14  ;;  %v2090_v13 = vrot.slane %v14924_v48, 5 }
 0x24c   :  { %10796 = vmatprep.mubr.msk.f32.mxu0 %vm13150_vm0, %v19571_v32  ;;  %11072 = vmatprep.mubr.msk.f32.mxu1 %vm13150_vm0, %v19571_v32  ;;  %19633 = vst [vmem:[#allocation80_spill] sm:$0xff] %v14942_v15  ;;  %v627_v51 = vadd.f32 %v14497_v8, %v14517_v7  ;;  %v1158_v7 = vsel %vm1113_vm3, %v1155_v41, %v1157_v61  ;;  %v1161_v41 = vrot.slane %v14906_v63, 4 }
 0x24d   :  { %v632_v63 = vadd.f32 %v14497_v8, %v14540_v36 }
 0x24e   :  { %v14946_v27 = vpop.f32.mrb[156].mxu0  ;;  %v14948_v12 = vpop.f32.mrb[24].mxu1  ;;  %v14960_v3 = vmax.f32 %v627_v51, 0.0 }
 0x24f   :  { %19634 = vst [vmem:[#allocation81_spill] sm:$0xff] %v14948_v12  ;;  %v748_v37 = vpop.f32.mrb[157].mxu0  ;;  %10797 = vmatmul.mubr.msk.f32.gmra.mrb[6].mxu0 %vm1169_vm1, %v1156_v1  ;;  %v10899_v40 = vpop.f32.mrb[25].mxu1  ;;  %11073 = vmatmul.mubr.msk.f32.gmra.mrb[130].mxu1 %vm1169_vm1, %v2089_v42  ;;  %v2092_v1 = vrot.slane %v14942_v15, 5 }
 0x250   :  { %10799 = vmatprep.mubr.msk.f32.mxu0 %vm13150_vm0, %v19571_v32  ;;  %11075 = vmatprep.mubr.msk.f32.mxu1 %vm13150_vm0, %v19571_v32  ;;  %19635 = vst [vmem:[#allocation82_spill] sm:$0xff] %v14960_v3  ;;  %v2091_v40 = vsel %vm2040_vm5, %v2088_v14, %v2090_v13  ;;  %v1160_v14 = vsel %vm1113_vm3, %v1157_v61, %v1159_v22  ;;  %v1163_v61 = vrot.slane %v14924_v48, 4  ;;  %v1165_v48 = vrot.slane %v14942_v15, 4 }
 0x252   :  { %v14962_v50 = vpop.f32.mrb[158].mxu0  ;;  %v14964_v37 = vpop.f32.mrb[26].mxu1  ;;  %v1166_v15 = vsel %vm1113_vm3, %v1163_v61, %v1165_v48 }
 0x253   :  { %19636 = vst [vmem:[#allocation83_spill] sm:$0xff] %v14964_v37  ;;  %v753_v42 = vpop.f32.mrb[159].mxu0  ;;  %10800 = vmatmul.mubr.msk.f32.gmra.mrb[8].mxu0 %vm1169_vm1, %v1158_v7  ;;  %v10902_v20 = vpop.f32.mrb[27].mxu1  ;;  %11076 = vmatmul.mubr.msk.f32.gmra.mrb[132].mxu1 %vm1169_vm1, %v2091_v40 }
 0x254   :  { %10802 = vmatprep.mubr.msk.f32.mxu0 %vm13150_vm0, %v19571_v32  ;;  %11078 = vmatprep.mubr.msk.f32.mxu1 %vm13150_vm0, %v19571_v32  ;;  %v2093_v42 = vsel %vm2040_vm5, %v2090_v13, %v2092_v1  ;;  %v2094_v20 = vrot.slane %v14960_v3, 5 }
 0x256   :  { %v14975_v51 = vpop.f32.mrb[160].mxu0  ;;  %v14977_v58 = vpop.f32.mrb[28].mxu1 }
 0x257   :  { %19637 = vst [vmem:[#allocation84_spill] sm:$0xff] %v14977_v58  ;;  %v758_v7 = vpop.f32.mrb[161].mxu0  ;;  %10803 = vmatmul.mubr.msk.f32.gmra.mrb[10].mxu0 %vm1169_vm1, %v1160_v14  ;;  %v10905_v40 = vpop.f32.mrb[29].mxu1  ;;  %11079 = vmatmul.mubr.msk.f32.gmra.mrb[134].mxu1 %vm1169_vm1, %v2093_v42  ;;  %v1162_v14 = vsel %vm1113_vm3, %v1159_v22, %v1161_v41  ;;  %v1045_v42 = vld [vmem:[%s19340_s3 + $0xc0] sm:$0xff]  ;;  %v15009_v22 = vmax.f32 %v632_v63, 0.0  ;;  %v1048_v63 = vld [vmem:[%s19340_s3 + $0xd8] sm:$0xff] }
 0x258   :  { %10805 = vmatprep.mubr.msk.f32.mxu0 %vm13150_vm0, %v19571_v32  ;;  %11081 = vmatprep.mubr.msk.f32.mxu1 %vm13150_vm0, %v19571_v32  ;;  %v2095_v7 = vsel %vm2040_vm5, %v2092_v1, %v2094_v20  ;;  %v1046_v40 = vld [vmem:[%s19340_s3 + $0xc8] sm:$0xff]  ;;  %v637_v1 = vadd.f32 %v14497_v8, %v14563_v45 }
 0x259   :  { %19639 = vst [vmem:[#allocation86_spill] sm:$0xff] %v15009_v22  ;;  %v12705_v20 = vpack.c.bf16 %v1046_v40, %v1045_v42  ;;  %v642_v42 = vadd.f32 %v14497_v8, %v14580_v35  ;;  %v647_v35 = vadd.f32 %v14497_v8, %v14595_v53 }
 0x25a   :  { %v14991_v13 = vpop.f32.mrb[162].mxu0  ;;  %v14993_v58 = vpop.f32.mrb[30].mxu1 }
 0x25b   :  { %19638 = vst [vmem:[#allocation85_spill] sm:$0xff] %v14993_v58  ;;  %v763_v37 = vpop.f32.mrb[163].mxu0  ;;  %10806 = vmatmul.mubr.msk.f32.gmra.mrb[12].mxu0 %vm1169_vm1, %v1162_v14  ;;  %v10916_v36 = vpop.f32.mrb[31].mxu1  ;;  %11082 = vmatmul.mubr.msk.f32.gmra.mrb[136].mxu1 %vm1169_vm1, %v2095_v7  ;;  %v1164_v14 = vsel %vm1113_vm3, %v1161_v41, %v1163_v61  ;;  %v1047_v7 = vld [vmem:[%s19340_s3 + $0xd0] sm:$0xff]  ;;  %v15031_v41 = vmax.f32 %v637_v1, 0.0  ;;  %v15052_v61 = vmax.f32 %v642_v42, 0.0 }
 0x25c   :  { %10808 = vmatprep.mubr.msk.f32.mxu0 %vm13150_vm0, %v19571_v32  ;;  %11092 = vmatprep.mubr.msk.f32.mxu1 %vm13150_vm0, %v19571_v32  ;;  %v12708_v40 = vpack.c.bf16 %v1048_v63, %v1047_v7 }
 0x25d   :  { %19641 = vst [vmem:[#allocation88_spill] sm:$0xff] %v15031_v41  ;;  %19644 = vst [vmem:[#allocation91_spill] sm:$0xff] %v15052_v61 }
 0x25e   :  { %v766_v37 = vpop.f32.mrb[164].mxu0  ;;  %v15014_v58 = vpop.f32.mrb[32].mxu1 }
 0x25f   :  { %19640 = vst [vmem:[#allocation87_spill] sm:$0xff] %v15014_v58  ;;  %v767_v36 = vadd.f32 %v14497_v8, %v766_v37  ;;  %v768_v12 = vpop.f32.mrb[165].mxu0  ;;  %10809 = vmatmul.mubr.msk.f32.gmra.mrb[14].mxu0 %vm1169_vm1, %v1164_v14  ;;  %v10919_v45 = vpop.f32.mrb[33].mxu1  ;;  %11093 = vmatmul.mubr.msk.f32.vlgmr.msra.gmra.mrb[138].mxu1 %vm1169_vm1, %v15009_v22 }
 0x260   :  { %10811 = vmatprep.mubr.msk.f32.mxu0 %vm13150_vm0, %v19571_v32  ;;  %11095 = vmatprep.mubr.msk.f32.mxu1 %vm13150_vm0, %v19571_v32  ;;  %v1167_v12 = vrot.slane %v14960_v3, 4  ;;  %v652_v3 = vadd.f32 %v14497_v8, %v14615_v19 }
 0x261   :  { %12706 = vmatpush3.bf16.msra.mxu1 %v12705_v20  ;;  %v15036_v37 = vmax.f32 %v767_v36, 0.0  ;;  %v1041_v36 = vld [vmem:[%s19340_s3 + $0xa0] sm:$0xff] }
 0x262   :  { %v771_v14 = vpop.f32.mrb[166].mxu0  ;;  %v15038_v45 = vpop.f32.mrb[34].mxu1  ;;  %12707 = vmatprep.subr.bf16.mxu1 %v19586_v55  ;;  %v1168_v53 = vsel %vm1113_vm3, %v1165_v48, %v1167_v12  ;;  %v15077_v12 = vmax.f32 %v647_v35, 0.0 }
 0x263   :  { %19642 = vst [vmem:[#allocation89_spill] sm:$0xff] %v15036_v37  ;;  %19643 = vst [vmem:[#allocation90_spill] sm:$0xff] %v15038_v45  ;;  %v772_v58 = vadd.f32 %v14497_v8, %v771_v14  ;;  %v773_v1 = vpop.f32.mrb[167].mxu0  ;;  %10812 = vmatmul.mubr.msk.f32.gmra.mrb[16].mxu0 %vm1169_vm1, %v1166_v15  ;;  %v10922_v28 = vpop.f32.mrb[35].mxu1  ;;  %11096 = vmatmul.mubr.msk.f32.gmra.mrb[140].mxu1 %vm1169_vm1, %v15031_v41  ;;  %v19650_v19 = vrot.slane %v15036_v37, 3 }
 0x264   :  { %10814 = vmatprep.mubr.msk.f32.mxu0 %vm13150_vm0, %v19571_v32  ;;  %11098 = vmatprep.mubr.msk.f32.mxu1 %vm13150_vm0, %v19571_v32  ;;  %v3383_v28 = vrot.slane %v15036_v37, 5  ;;  %19647 = vst [vmem:[#allocation94_spill] sm:$0xff] %v15077_v12 }
 0x265   :  { %v15054_v20 = vmax.f32 %v772_v58, 0.0  ;;  %12709 = vmatpush3.bf16.msra.mxu1 %v12708_v40  ;;  %v1042_v58 = vld [vmem:[%s19340_s3 + $0xa8] sm:$0xff] }
 0x266   :  { %v15058_v7 = vpop.f32.mrb[168].mxu0  ;;  %v15060_v63 = vpop.f32.mrb[36].mxu1  ;;  %12716 = vmatprep.subr.bf16.mxu1 %v19586_v55  ;;  %v12699_v42 = vpack.c.bf16 %v1042_v58, %v1041_v36  ;;  %v1043_v58 = vld [vmem:[%s19340_s3 + $0xb0] sm:$0xff] }
 0x267   :  { %19645 = vst [vmem:[#allocation92_spill] sm:$0xff] %v15054_v20  ;;  %19646 = vst [vmem:[#allocation93_spill] sm:$0xff] %v15060_v63  ;;  %v19413_v40 = vrot.slane %v15054_v20, 4  ;;  %v19414_v14 = vrot.slane %v15054_v20, 5  ;;  %v5056_v1 = vrot.slane %v15054_v20, 3  ;;  %v778_v15 = vpop.f32.mrb[169].mxu0  ;;  %10815 = vmatmul.mubr.msk.f32.gmra.mrb[18].mxu0 %vm1169_vm1, %v1168_v53  ;;  %11099 = vmatmul.mubr.msk.f32.gmra.mrb[142].mxu1 %vm1169_vm1, %v15052_v61 }
 0x268   :  { %v10925_v48 = vpop.f32.mrb[37].mxu1  ;;  %10825 = vmatprep.mubr.msk.f32.mxu0 %vm13150_vm0, %v19571_v32  ;;  %11101 = vmatprep.mubr.msk.f32.mxu1 %vm13150_vm0, %v19571_v32  ;;  %v19648_v15 = vrot.slane %v15036_v37, 4 }
 0x269   :  { %v15095_v35 = vsel %vm2040_vm5, %v3383_v28, %v19414_v14  ;;  %v15100_v48 = vsel %vm3719_vm4, %v19650_v19, %v5056_v1  ;;  %v19653_v28 = vmax.f32 %v14034_v31, 0.0  ;;  %v15121_v1 = vmax.f32 %v652_v3, 0.0 }
 0x26a   :  { %v15090_v53 = vsel %vm1113_vm3, %v19648_v15, %v19413_v40  ;;  %19651 = vst [vmem:[#allocation96_spill] sm:$0xff] %v15100_v48  ;;  %v15102_v63 = vpop.f32.mrb[170].mxu0  ;;  %v15104_v36 = vpop.f32.mrb[38].mxu1  ;;  %v1044_v15 = vld [vmem:[%s19340_s3 + $0xb8] sm:$0xff]  ;;  %v657_v19 = vadd.f32 %v14497_v8, %v14633_v59  ;;  %v662_v3 = vadd.f32 %v14497_v8, %v14650_v2 }
 0x26b   :  { %19649 = vst [vmem:[#allocation95_spill] sm:$0xff] %v15090_v53  ;;  %19652 = vst [vmem:[#allocation97_spill] sm:$0xff] %v15104_v36  ;;  %v783_v40 = vpop.f32.mrb[171].mxu0  ;;  %10826 = vmatmul.mubr.msk.f32.vlgmr.msra.gmra.mrb[20].mxu0 %vm1169_vm1, %v19653_v28  ;;  %v10928_v14 = vpop.f32.mrb[39].mxu1  ;;  %11102 = vmatmul.mubr.msk.f32.gmra.mrb[144].mxu1 %vm1169_vm1, %v15077_v12 }
 0x26c   :  { %10828 = vmatprep.mubr.msk.f32.mxu0 %vm13150_vm0, %v19571_v32  ;;  %11104 = vmatprep.mubr.msk.f32.mxu1 %vm13150_vm0, %v19571_v32  ;;  %19654 = vst [vmem:[#allocation98_spill] sm:$0xff] %v15121_v1  ;;  %v12702_v40 = vpack.c.bf16 %v1044_v15, %v1043_v58  ;;  %v15138_v59 = vmax.f32 %v657_v19, 0.0  ;;  %v15155_v2 = vmax.f32 %v662_v3, 0.0  ;;  %v667_v19 = vadd.f32 %v14497_v8, %v14666_v46 }
 0x26d   :  { %12700 = vmatpush3.bf16.msra.mxu0 %v12699_v42  ;;  %v672_v46 = vadd.f32 %v14497_v8, %v14682_v60  ;;  %v677_v60 = vadd.f32 %v14497_v8, %v14698_v38  ;;  %v682_v38 = vadd.f32 %v14497_v8, %v14714_v39  ;;  %v15224_v8 = vld [vmem:[%s19341_s2] ss:$0 sm:$0xff] }
 0x26e   :  { %v15125_v31 = vpop.f32.mrb[172].mxu0  ;;  %v15127_v28 = vpop.f32.mrb[40].mxu1  ;;  %12701 = vmatprep.subr.bf16.mxu0 %v19586_v55  ;;  %19656 = vst [vmem:[#allocation100_spill] sm:$0xff] %v15138_v59  ;;  %19658 = vst [vmem:[#allocation102_spill] sm:$0xff] %v15155_v2  ;;  %v15171_v3 = vmax.f32 %v667_v19, 0.0  ;;  %v687_v39 = vadd.f32 %v15224_v8, %v14730_v16  ;;  %v692_v16 = vadd.f32 %v15224_v8, %v14748_v23 }
 0x26f   :  { %19655 = vst [vmem:[#allocation99_spill] sm:$0xff] %v15127_v28  ;;  %v788_v14 = vpop.f32.mrb[173].mxu0  ;;  %10829 = vmatmul.mubr.msk.f32.gmra.mrb[22].mxu0 %vm1169_vm1, %v14053_v6  ;;  %v10931_v48 = vpop.f32.mrb[41].mxu1  ;;  %11105 = vmatmul.mubr.msk.f32.gmra.mrb[146].mxu1 %vm1169_vm1, %v15121_v1  ;;  %v15187_v19 = vmax.f32 %v672_v46, 0.0  ;;  %v15203_v46 = vmax.f32 %v677_v60, 0.0  ;;  %v15219_v60 = vmax.f32 %v682_v38, 0.0  ;;  %v697_v23 = vadd.f32 %v15224_v8, %v14766_v52 }
 0x270   :  { %10831 = vmatprep.mubr.msk.f32.mxu0 %vm13150_vm0, %v19571_v32  ;;  %11107 = vmatprep.mubr.msk.f32.mxu1 %vm13150_vm0, %v19571_v32  ;;  %19660 = vst [vmem:[#allocation104_spill] sm:$0xff] %v15171_v3  ;;  %v15240_v38 = vmax.f32 %v687_v39, 0.0  ;;  %v15256_v39 = vmax.f32 %v692_v16, 0.0  ;;  %v702_v52 = vadd.f32 %v15224_v8, %v14784_v4 }
 0x271   :  { %12703 = vmatpush3.bf16.msra.mxu0 %v12702_v40  ;;  %19662 = vst [vmem:[#allocation106_spill] sm:$0xff] %v15187_v19  ;;  %19664 = vst [vmem:[#allocation108_spill] sm:$0xff] %v15203_v46  ;;  %v15272_v16 = vmax.f32 %v697_v23, 0.0 }
 0x272   :  { %v15142_v42 = vpop.f32.mrb[174].mxu0  ;;  %v15144_v58 = vpop.f32.mrb[42].mxu1  ;;  %12710 = vmatprep.subr.bf16.mxu0 %v19586_v55  ;;  %19666 = vst [vmem:[#allocation110_spill] sm:$0xff] %v15219_v60  ;;  %19668 = vst [vmem:[#allocation112_spill] sm:$0xff] %v15240_v38  ;;  %v15290_v4 = vmax.f32 %v702_v52, 0.0  ;;  %v1050_v52 = vld [vmem:[%s19340_s3 + $0xe8] sm:$0xff] }
 0x273   :  { %19657 = vst [vmem:[#allocation101_spill] sm:$0xff] %v15144_v58  ;;  %v793_v48 = vpop.f32.mrb[175].mxu0  ;;  %10832 = vmatmul.mubr.msk.f32.gmra.mrb[24].mxu0 %vm1169_vm1, %v14086_v26  ;;  %v10934_v15 = vpop.f32.mrb[43].mxu1  ;;  %11108 = vmatmul.mubr.msk.f32.gmra.mrb[148].mxu1 %vm1169_vm1, %v15138_v59  ;;  %19669 = vst [vmem:[#allocation113_spill] sm:$0xff] %v15256_v39 }
 0x274   :  { %10834 = vmatprep.mubr.msk.f32.mxu0 %vm13150_vm0, %v19571_v32  ;;  %11110 = vmatprep.mubr.msk.f32.mxu1 %vm13150_vm0, %v19571_v32  ;;  %19670 = vst [vmem:[#allocation114_spill] sm:$0xff] %v15272_v16  ;;  %19672 = vst [vmem:[#allocation116_spill] sm:$0xff] %v15290_v4 }
 0x276   :  { %v15159_v40 = vpop.f32.mrb[176].mxu0  ;;  %v15161_v14 = vpop.f32.mrb[44].mxu1 }
 0x277   :  { %19659 = vst [vmem:[#allocation103_spill] sm:$0xff] %v15161_v14  ;;  %v798_v48 = vpop.f32.mrb[177].mxu0  ;;  %10835 = vmatmul.mubr.msk.f32.gmra.mrb[26].mxu0 %vm1169_vm1, %v14117_v30  ;;  %v10937_v15 = vpop.f32.mrb[45].mxu1  ;;  %11111 = vmatmul.mubr.msk.f32.gmra.mrb[150].mxu1 %vm1169_vm1, %v15155_v2 }
 0x278   :  { %10837 = vmatprep.mubr.msk.f32.mxu0 %vm13150_vm0, %v19571_v32  ;;  %11113 = vmatprep.mubr.msk.f32.mxu1 %vm13150_vm0, %v19571_v32 }
 0x27a   :  { %v15175_v37 = vpop.f32.mrb[178].mxu0  ;;  %v15177_v48 = vpop.f32.mrb[46].mxu1 }
 0x27b   :  { %19661 = vst [vmem:[#allocation105_spill] sm:$0xff] %v15177_v48  ;;  %v803_v14 = vpop.f32.mrb[179].mxu0  ;;  %10838 = vmatmul.mubr.msk.f32.gmra.mrb[28].mxu0 %vm1169_vm1, %v14147_v18  ;;  %v10940_v15 = vpop.f32.mrb[47].mxu1  ;;  %11114 = vmatmul.mubr.msk.f32.gmra.mrb[152].mxu1 %vm1169_vm1, %v15171_v3  ;;  %v1049_v18 = vld [vmem:[%s19340_s3 + $0xe0] sm:$0xff] }
 0x27c   :  { %10840 = vmatprep.mubr.msk.f32.mxu0 %vm13150_vm0, %v19571_v32  ;;  %11116 = vmatprep.mubr.msk.f32.mxu1 %vm13150_vm0, %v19571_v32  ;;  %v12711_v6 = vpack.c.bf16 %v1050_v52, %v1049_v18 }
 0x27e   :  { %v15191_v48 = vpop.f32.mrb[180].mxu0  ;;  %v15193_v14 = vpop.f32.mrb[48].mxu1 }
 0x27f   :  { %19663 = vst [vmem:[#allocation107_spill] sm:$0xff] %v15193_v14  ;;  %v808_v58 = vpop.f32.mrb[181].mxu0  ;;  %10841 = vmatmul.mubr.msk.f32.gmra.mrb[30].mxu0 %vm1169_vm1, %v14181_v62  ;;  %v10943_v15 = vpop.f32.mrb[49].mxu1  ;;  %11117 = vmatmul.mubr.msk.f32.gmra.mrb[154].mxu1 %vm1169_vm1, %v15187_v19 }
 0x280   :  { %10843 = vmatprep.mubr.msk.f32.mxu0 %vm13150_vm0, %v19571_v32  ;;  %11119 = vmatprep.mubr.msk.f32.mxu1 %vm13150_vm0, %v19571_v32 }
 0x282   :  { %v15207_v14 = vpop.f32.mrb[182].mxu0  ;;  %v15209_v58 = vpop.f32.mrb[50].mxu1 }
 0x283   :  { %19665 = vst [vmem:[#allocation109_spill] sm:$0xff] %v15209_v58  ;;  %v813_v28 = vpop.f32.mrb[183].mxu0  ;;  %10844 = vmatmul.mubr.msk.f32.gmra.mrb[32].mxu0 %vm1169_vm1, %v14199_v0  ;;  %v10946_v15 = vpop.f32.mrb[51].mxu1  ;;  %11120 = vmatmul.mubr.msk.f32.gmra.mrb[156].mxu1 %vm1169_vm1, %v15203_v46 }
 0x284   :  { %10846 = vmatprep.mubr.msk.f32.mxu0 %vm13150_vm0, %v19571_v32  ;;  %11122 = vmatprep.mubr.msk.f32.mxu1 %vm13150_vm0, %v19571_v32 }
 0x286   :  { %v15228_v28 = vpop.f32.mrb[184].mxu0  ;;  %v15230_v15 = vpop.f32.mrb[52].mxu1 }
 0x287   :  { %19667 = vst [vmem:[#allocation111_spill] sm:$0xff] %v15230_v15  ;;  %v818_v58 = vpop.f32.mrb[185].mxu0  ;;  %10847 = vmatmul.mubr.msk.f32.gmra.mrb[34].mxu0 %vm1169_vm1, %v14216_v54  ;;  %v10949_v36 = vpop.f32.mrb[53].mxu1  ;;  %11123 = vmatmul.mubr.msk.f32.gmra.mrb[158].mxu1 %vm1169_vm1, %v15219_v60 }
 0x288   :  { %10849 = vmatprep.mubr.msk.f32.mxu0 %vm13150_vm0, %v19571_v32  ;;  %11125 = vmatprep.mubr.msk.f32.mxu1 %vm13150_vm0, %v19571_v32 }
 0x28a   :  { %v15244_v15 = vpop.f32.mrb[186].mxu0  ;;  %v15246_v58 = vpop.f32.mrb[54].mxu1 }
 0x28b   :  { %v823_v45 = vpop.f32.mrb[187].mxu0  ;;  %10850 = vmatmul.mubr.msk.f32.gmra.mrb[36].mxu0 %vm1169_vm1, %v14233_v5  ;;  %v10952_v36 = vpop.f32.mrb[55].mxu1  ;;  %11126 = vmatmul.mubr.msk.f32.gmra.mrb[160].mxu1 %vm1169_vm1, %v15240_v38 }
 0x28c   :  { %10852 = vmatprep.mubr.msk.f32.mxu0 %vm13150_vm0, %v19571_v32  ;;  %11128 = vmatprep.mubr.msk.f32.mxu1 %vm13150_vm0, %v19571_v32 }
 0x28e   :  { %v15260_v54 = vpop.f32.mrb[188].mxu0  ;;  %v15262_v45 = vpop.f32.mrb[56].mxu1 }
 0x28f   :  { %v828_v5 = vpop.f32.mrb[189].mxu0  ;;  %10853 = vmatmul.mubr.msk.f32.gmra.mrb[38].mxu0 %vm1169_vm1, %v14250_v47  ;;  %v10955_v36 = vpop.f32.mrb[57].mxu1  ;;  %11129 = vmatmul.mubr.msk.f32.gmra.mrb[162].mxu1 %vm1169_vm1, %v15256_v39 }
 0x290   :  { %10855 = vmatprep.mubr.msk.f32.mxu0 %vm13150_vm0, %v19571_v32  ;;  %11131 = vmatprep.mubr.msk.f32.mxu1 %vm13150_vm0, %v19571_v32  ;;  %v777_v5 = vadd.f32 %v15224_v8, %v15058_v7  ;;  %v707_v7 = vadd.f32 %v15224_v8, %v14802_v9 }
 0x292   :  { %v15278_v0 = vpop.f32.mrb[190].mxu0  ;;  %v15280_v36 = vpop.f32.mrb[58].mxu1  ;;  %v15294_v23 = vmax.f32 %v777_v5, 0.0  ;;  %v712_v5 = vadd.f32 %v15224_v8, %v14820_v57  ;;  %v1052_v57 = vld [vmem:[%s19340_s3 + $0xf8] sm:$0xff] }
 0x293   :  { %19671 = vst [vmem:[#allocation115_spill] sm:$0xff] %v15280_v36  ;;  %v833_v47 = vpop.f32.mrb[191].mxu0  ;;  %10856 = vmatmul.mubr.msk.f32.gmra.mrb[40].mxu0 %vm1169_vm1, %v14267_v44  ;;  %v10958_v62 = vpop.f32.mrb[59].mxu1  ;;  %11132 = vmatmul.mubr.msk.f32.gmra.mrb[164].mxu1 %vm1169_vm1, %v15272_v16  ;;  %v19681_v36 = vrot.slane %v15054_v20, 4 }
 0x294   :  { %10858 = vmatprep.mubr.msk.f32.mxu0 %vm13150_vm0, %v19571_v32  ;;  %11134 = vmatprep.mubr.msk.f32.mxu1 %vm13150_vm0, %v19571_v32  ;;  %19673 = vst [vmem:[#allocation117_spill] sm:$0xff] %v15294_v23  ;;  %v782_v47 = vadd.f32 %v15224_v8, %v15102_v63  ;;  %v15316_v63 = vmax.f32 %v707_v7, 0.0  ;;  %v1051_v7 = vld [vmem:[%s19340_s3 + $0xf0] sm:$0xff] }
 0x296   :  { %v15298_v62 = vpop.f32.mrb[192].mxu0  ;;  %v15300_v44 = vpop.f32.mrb[60].mxu1  ;;  %19675 = vst [vmem:[#allocation119_spill] sm:$0xff] %v15316_v63  ;;  %v15321_v26 = vmax.f32 %v782_v47, 0.0  ;;  %v717_v47 = vadd.f32 %v15224_v8, %v14838_v29 }
 0x297   :  { %19674 = vst [vmem:[#allocation118_spill] sm:$0xff] %v15300_v44  ;;  %v838_v30 = vpop.f32.mrb[193].mxu0  ;;  %10859 = vmatmul.mubr.msk.f32.gmra.mrb[42].mxu0 %vm1169_vm1, %v14284_v33  ;;  %v10961_v9 = vpop.f32.mrb[61].mxu1  ;;  %11135 = vmatmul.mubr.msk.f32.gmra.mrb[166].mxu1 %vm1169_vm1, %v15290_v4 }
 0x298   :  { %11137 = vmatprep.mubr.msk.f32.mxu1 %vm13150_vm0, %v19571_v32  ;;  %11181 = vmatprep.mubr.msk.f32.mxu0 %vm13150_vm0, %v19571_v32  ;;  %v2716_v30 = vrot.slane %v15294_v23, 4  ;;  %19676 = vst [vmem:[#allocation120_spill] sm:$0xff] %v15321_v26  ;;  %v787_v9 = vadd.f32 %v15224_v8, %v15125_v31  ;;  %v15343_v31 = vmax.f32 %v712_v5, 0.0 }
 0x29a   :  { %v15325_v33 = vpop.f32.mrb[194].mxu0  ;;  %v15327_v43 = vpop.f32.mrb[62].mxu1  ;;  %19678 = vst [vmem:[#allocation122_spill] sm:$0xff] %v15343_v31  ;;  %v2717_v5 = vsel %vm1113_vm3, %v19681_v36, %v2716_v30  ;;  %v722_v36 = vadd.f32 %v15224_v8, %v14856_v17 }
 0x29b   :  { %19677 = vst [vmem:[#allocation121_spill] sm:$0xff] %v15327_v43  ;;  %v843_v18 = vpop.f32.mrb[195].mxu0  ;;  %v10964_v52 = vpop.f32.mrb[63].mxu1  ;;  %11138 = vmatmul.mubr.msk.f32.gmra.mrb[168].mxu1 %vm1169_vm1, %v15316_v63  ;;  %11182 = vmatmul.mubr.msk.f32.vlgmr.msra.gmra.mrb[44].mxu0 %vm1169_vm1, %v15090_v53  ;;  %v15348_v43 = vmax.f32 %v787_v9, 0.0  ;;  %v792_v53 = vadd.f32 %v15224_v8, %v15142_v42  ;;  %v15367_v42 = vmax.f32 %v717_v47, 0.0 }
 0x29c   :  { %11140 = vmatprep.mubr.msk.f32.mxu1 %vm13150_vm0, %v19571_v32  ;;  %11184 = vmatprep.mubr.msk.f32.mxu0 %vm13150_vm0, %v19571_v32  ;;  %v12714_v18 = vpack.c.bf16 %v1052_v57, %v1051_v7  ;;  %v2718_v52 = vrot.slane %v15321_v26, 4  ;;  %v797_v57 = vadd.f32 %v15224_v8, %v15159_v40  ;;  %v15389_v17 = vmax.f32 %v722_v36, 0.0 }
 0x29d   :  { %12712 = vmatpush3.bf16.msra.mxu0 %v12711_v6  ;;  %19679 = vst [vmem:[#allocation123_spill] sm:$0xff] %v15348_v43  ;;  %19682 = vst [vmem:[#allocation125_spill] sm:$0xff] %v15367_v42  ;;  %v2720_v9 = vrot.slane %v15348_v43, 4  ;;  %v15372_v7 = vmax.f32 %v792_v53, 0.0  ;;  %v727_v53 = vadd.f32 %v15224_v8, %v14874_v21 }
 0x29e   :  { %v15352_v44 = vpop.f32.mrb[196].mxu0  ;;  %v15354_v49 = vpop.f32.mrb[64].mxu1  ;;  %12713 = vmatprep.subr.bf16.mxu0 %v19586_v55  ;;  %19685 = vst [vmem:[#allocation128_spill] sm:$0xff] %v15389_v17 }
 0x29f   :  { %19680 = vst [vmem:[#allocation124_spill] sm:$0xff] %v15354_v49  ;;  %v848_v29 = vpop.f32.mrb[197].mxu0  ;;  %v10967_v6 = vpop.f32.mrb[65].mxu1  ;;  %11141 = vmatmul.mubr.msk.f32.gmra.mrb[170].mxu1 %vm1169_vm1, %v15343_v31  ;;  %11185 = vmatmul.mubr.msk.f32.gmra.mrb[46].mxu0 %vm1169_vm1, %v2717_v5  ;;  %19683 = vst [vmem:[#allocation126_spill] sm:$0xff] %v15372_v7  ;;  %v2722_v40 = vrot.slane %v15372_v7, 4  ;;  %v15410_v21 = vmax.f32 %v727_v53, 0.0 }
 0x2a0   :  { %11143 = vmatprep.mubr.msk.f32.mxu1 %vm13150_vm0, %v19571_v32  ;;  %11187 = vmatprep.mubr.msk.f32.mxu0 %vm13150_vm0, %v19571_v32  ;;  %v2719_v6 = vsel %vm1113_vm3, %v2716_v30, %v2718_v52  ;;  %v15394_v30 = vmax.f32 %v797_v57, 0.0 }
 0x2a1   :  { %12715 = vmatpush3.bf16.msra.mxu0 %v12714_v18  ;;  %19688 = vst [vmem:[#allocation131_spill] sm:$0xff] %v15410_v21 }
 0x2a2   :  { %v15376_v5 = vpop.f32.mrb[198].mxu0  ;;  %v15378_v29 = vpop.f32.mrb[66].mxu1  ;;  %12722 = vmatprep.subr.bf16.mxu0 %v19586_v55  ;;  %19686 = vst [vmem:[#allocation129_spill] sm:$0xff] %v15394_v30 }
 0x2a3   :  { %19684 = vst [vmem:[#allocation127_spill] sm:$0xff] %v15378_v29  ;;  %v853_v47 = vpop.f32.mrb[199].mxu0  ;;  %v10970_v49 = vpop.f32.mrb[67].mxu1  ;;  %11144 = vmatmul.mubr.msk.f32.gmra.mrb[172].mxu1 %vm1169_vm1, %v15367_v42  ;;  %11188 = vmatmul.mubr.msk.f32.gmra.mrb[48].mxu0 %vm1169_vm1, %v2719_v6 }
 0x2a4   :  { %11146 = vmatprep.mubr.msk.f32.mxu1 %vm13150_vm0, %v19571_v32  ;;  %11190 = vmatprep.mubr.msk.f32.mxu0 %vm13150_vm0, %v19571_v32  ;;  %v802_v49 = vadd.f32 %v15224_v8, %v15175_v37  ;;  %v2721_v47 = vsel %vm1113_vm3, %v2718_v52, %v2720_v9  ;;  %v732_v37 = vadd.f32 %v15224_v8, %v14892_v25  ;;  %v2724_v52 = vrot.slane %v15394_v30, 4 }
 0x2a6   :  { %v15398_v18 = vpop.f32.mrb[200].mxu0  ;;  %v15400_v6 = vpop.f32.mrb[68].mxu1  ;;  %v15415_v36 = vmax.f32 %v802_v49, 0.0  ;;  %v15431_v25 = vmax.f32 %v732_v37, 0.0 }
 0x2a7   :  { %19687 = vst [vmem:[#allocation130_spill] sm:$0xff] %v15400_v6  ;;  %v858_v29 = vpop.f32.mrb[201].mxu0  ;;  %v10973_v43 = vpop.f32.mrb[69].mxu1  ;;  %11147 = vmatmul.mubr.msk.f32.gmra.mrb[174].mxu1 %vm1169_vm1, %v15389_v17  ;;  %11191 = vmatmul.mubr.msk.f32.gmra.mrb[50].mxu0 %vm1169_vm1, %v2721_v47  ;;  %v2723_v47 = vsel %vm1113_vm3, %v2720_v9, %v2722_v40 }
 0x2a8   :  { %11149 = vmatprep.mubr.msk.f32.mxu1 %vm13150_vm0, %v19571_v32  ;;  %11193 = vmatprep.mubr.msk.f32.mxu0 %vm13150_vm0, %v19571_v32  ;;  %19689 = vst [vmem:[#allocation132_spill] sm:$0xff] %v15415_v36  ;;  %v807_v43 = vadd.f32 %v15224_v8, %v15191_v48  ;;  %19691 = vst [vmem:[#allocation134_spill] sm:$0xff] %v15431_v25  ;;  %v737_v48 = vadd.f32 %v15224_v8, %v14910_v24  ;;  %v2726_v9 = vrot.slane %v15415_v36, 4 }
 0x2aa   :  { %v15419_v57 = vpop.f32.mrb[202].mxu0  ;;  %v15421_v29 = vpop.f32.mrb[70].mxu1  ;;  %v15436_v53 = vmax.f32 %v807_v43, 0.0  ;;  %v15452_v24 = vmax.f32 %v737_v48, 0.0 }
 0x2ab   :  { %19690 = vst [vmem:[#allocation133_spill] sm:$0xff] %v15421_v29  ;;  %v863_v6 = vpop.f32.mrb[203].mxu0  ;;  %v10976_v7 = vpop.f32.mrb[71].mxu1  ;;  %11150 = vmatmul.mubr.msk.f32.gmra.mrb[176].mxu1 %vm1169_vm1, %v15410_v21  ;;  %11194 = vmatmul.mubr.msk.f32.gmra.mrb[52].mxu0 %vm1169_vm1, %v2723_v47  ;;  %v2725_v47 = vsel %vm1113_vm3, %v2722_v40, %v2724_v52 }
 0x2ac   :  { %11152 = vmatprep.mubr.msk.f32.mxu1 %vm13150_vm0, %v19571_v32  ;;  %11196 = vmatprep.mubr.msk.f32.mxu0 %vm13150_vm0, %v19571_v32  ;;  %19692 = vst [vmem:[#allocation135_spill] sm:$0xff] %v15436_v53  ;;  %v812_v7 = vadd.f32 %v15224_v8, %v15207_v14  ;;  %19694 = vst [vmem:[#allocation137_spill] sm:$0xff] %v15452_v24  ;;  %v742_v14 = vadd.f32 %v15224_v8, %v14928_v11  ;;  %v2728_v40 = vrot.slane %v15436_v53, 4 }
 0x2ae   :  { %v15440_v49 = vpop.f32.mrb[204].mxu0  ;;  %v15442_v6 = vpop.f32.mrb[72].mxu1  ;;  %v15457_v37 = vmax.f32 %v812_v7, 0.0  ;;  %v15473_v11 = vmax.f32 %v742_v14, 0.0 }
 0x2af   :  { %19693 = vst [vmem:[#allocation136_spill] sm:$0xff] %v15442_v6  ;;  %v868_v29 = vpop.f32.mrb[205].mxu0  ;;  %v10979_v30 = vpop.f32.mrb[73].mxu1  ;;  %11153 = vmatmul.mubr.msk.f32.gmra.mrb[178].mxu1 %vm1169_vm1, %v15431_v25  ;;  %11197 = vmatmul.mubr.msk.f32.gmra.mrb[54].mxu0 %vm1169_vm1, %v2725_v47  ;;  %v2727_v47 = vsel %vm1113_vm3, %v2724_v52, %v2726_v9 }
 0x2b0   :  { %11155 = vmatprep.mubr.msk.f32.mxu1 %vm13150_vm0, %v19571_v32  ;;  %11199 = vmatprep.mubr.msk.f32.mxu0 %vm13150_vm0, %v19571_v32  ;;  %19695 = vst [vmem:[#allocation138_spill] sm:$0xff] %v15457_v37  ;;  %v817_v30 = vadd.f32 %v15224_v8, %v15228_v28  ;;  %19697 = vst [vmem:[#allocation140_spill] sm:$0xff] %v15473_v11  ;;  %v747_v28 = vadd.f32 %v15224_v8, %v14946_v27  ;;  %v2730_v52 = vrot.slane %v15457_v37, 4 }
 0x2b2   :  { %v15461_v43 = vpop.f32.mrb[206].mxu0  ;;  %v15463_v29 = vpop.f32.mrb[74].mxu1  ;;  %v15478_v48 = vmax.f32 %v817_v30, 0.0  ;;  %v15494_v27 = vmax.f32 %v747_v28, 0.0 }
 0x2b3   :  { %19696 = vst [vmem:[#allocation139_spill] sm:$0xff] %v15463_v29  ;;  %v873_v6 = vpop.f32.mrb[207].mxu0  ;;  %v10982_v36 = vpop.f32.mrb[75].mxu1  ;;  %11156 = vmatmul.mubr.msk.f32.gmra.mrb[180].mxu1 %vm1169_vm1, %v15452_v24  ;;  %11200 = vmatmul.mubr.msk.f32.gmra.mrb[56].mxu0 %vm1169_vm1, %v2727_v47  ;;  %v2729_v47 = vsel %vm1113_vm3, %v2726_v9, %v2728_v40 }
 0x2b4   :  { %11158 = vmatprep.mubr.msk.f32.mxu1 %vm13150_vm0, %v19571_v32  ;;  %11202 = vmatprep.mubr.msk.f32.mxu0 %vm13150_vm0, %v19571_v32  ;;  %19698 = vst [vmem:[#allocation141_spill] sm:$0xff] %v15478_v48  ;;  %v822_v36 = vadd.f32 %v15224_v8, %v15244_v15  ;;  %19700 = vst [vmem:[#allocation143_spill] sm:$0xff] %v15494_v27  ;;  %v752_v15 = vadd.f32 %v15224_v8, %v14962_v50  ;;  %v2732_v9 = vrot.slane %v15478_v48, 4 }
 0x2b5   :  { %v757_v50 = vadd.f32 %v15224_v8, %v14975_v51  ;;  %v762_v51 = vadd.f32 %v15224_v8, %v14991_v13  ;;  %v3050_v13 = vrot.slane %v15031_v41, 1 }
 0x2b6   :  { %v15482_v7 = vpop.f32.mrb[208].mxu0  ;;  %v15484_v6 = vpop.f32.mrb[76].mxu1  ;;  %v15499_v14 = vmax.f32 %v822_v36, 0.0 }
 0x2b7   :  { %19699 = vst [vmem:[#allocation142_spill] sm:$0xff] %v15484_v6  ;;  %v878_v29 = vpop.f32.mrb[209].mxu0  ;;  %v10985_v53 = vpop.f32.mrb[77].mxu1  ;;  %11159 = vmatmul.mubr.msk.f32.gmra.mrb[182].mxu1 %vm1169_vm1, %v15473_v11  ;;  %11203 = vmatmul.mubr.msk.f32.gmra.mrb[58].mxu0 %vm1169_vm1, %v2729_v47  ;;  %v2731_v47 = vsel %vm1113_vm3, %v2728_v40, %v2730_v52 }
 0x2b8   :  { %11161 = vmatprep.mubr.msk.f32.mxu1 %vm13150_vm0, %v19571_v32  ;;  %11205 = vmatprep.mubr.msk.f32.mxu0 %vm13150_vm0, %v19571_v32  ;;  %19701 = vst [vmem:[#allocation144_spill] sm:$0xff] %v15499_v14  ;;  %v827_v53 = vadd.f32 %v15224_v8, %v15260_v54  ;;  %v15515_v54 = vmax.f32 %v752_v15, 0.0  ;;  %v2734_v40 = vrot.slane %v15499_v14, 4 }
 0x2ba   :  { %v15503_v30 = vpop.f32.mrb[210].mxu0  ;;  %v15505_v29 = vpop.f32.mrb[78].mxu1  ;;  %19703 = vst [vmem:[#allocation146_spill] sm:$0xff] %v15515_v54  ;;  %v15520_v28 = vmax.f32 %v827_v53, 0.0 }
 0x2bb   :  { %19702 = vst [vmem:[#allocation145_spill] sm:$0xff] %v15505_v29  ;;  %v883_v6 = vpop.f32.mrb[211].mxu0  ;;  %v10988_v37 = vpop.f32.mrb[79].mxu1  ;;  %11162 = vmatmul.mubr.msk.f32.gmra.mrb[184].mxu1 %vm1169_vm1, %v15494_v27  ;;  %11206 = vmatmul.mubr.msk.f32.gmra.mrb[60].mxu0 %vm1169_vm1, %v2731_v47  ;;  %v2733_v47 = vsel %vm1113_vm3, %v2730_v52, %v2732_v9 }
 0x2bc   :  { %11164 = vmatprep.mubr.msk.f32.mxu1 %vm13150_vm0, %v19571_v32  ;;  %11208 = vmatprep.mubr.msk.f32.mxu0 %vm13150_vm0, %v19571_v32  ;;  %19704 = vst [vmem:[#allocation147_spill] sm:$0xff] %v15520_v28  ;;  %v832_v37 = vadd.f32 %v15224_v8, %v15278_v0  ;;  %v15536_v0 = vmax.f32 %v757_v50, 0.0  ;;  %v2736_v52 = vrot.slane %v15520_v28, 4 }
 0x2be   :  { %v15524_v36 = vpop.f32.mrb[212].mxu0  ;;  %v15526_v6 = vpop.f32.mrb[80].mxu1  ;;  %19706 = vst [vmem:[#allocation149_spill] sm:$0xff] %v15536_v0  ;;  %v15541_v15 = vmax.f32 %v832_v37, 0.0 }
 0x2bf   :  { %19705 = vst [vmem:[#allocation148_spill] sm:$0xff] %v15526_v6  ;;  %v888_v29 = vpop.f32.mrb[213].mxu0  ;;  %v10991_v48 = vpop.f32.mrb[81].mxu1  ;;  %11165 = vmatmul.mubr.msk.f32.gmra.mrb[186].mxu1 %vm1169_vm1, %v15515_v54  ;;  %11209 = vmatmul.mubr.msk.f32.gmra.mrb[62].mxu0 %vm1169_vm1, %v2733_v47  ;;  %v2735_v47 = vsel %vm1113_vm3, %v2732_v9, %v2734_v40 }
 0x2c0   :  { %11167 = vmatprep.mubr.msk.f32.mxu1 %vm13150_vm0, %v19571_v32  ;;  %11211 = vmatprep.mubr.msk.f32.mxu0 %vm13150_vm0, %v19571_v32  ;;  %19707 = vst [vmem:[#allocation150_spill] sm:$0xff] %v15541_v15  ;;  %v837_v48 = vadd.f32 %v15224_v8, %v15298_v62  ;;  %v15558_v62 = vmax.f32 %v762_v51, 0.0  ;;  %v2738_v50 = vrot.slane %v15541_v15, 4  ;;  %v1054_v51 = vld [vmem:[%s19340_s3 + $0x108] sm:$0xff] }
 0x2c2   :  { %v15545_v53 = vpop.f32.mrb[214].mxu0  ;;  %v15547_v29 = vpop.f32.mrb[82].mxu1  ;;  %19709 = vst [vmem:[#allocation152_spill] sm:$0xff] %v15558_v62  ;;  %v15561_v9 = vmax.f32 %v837_v48, 0.0  ;;  %v3049_v48 = vrot.slane %v15009_v22, 1 }
 0x2c3   :  { %19708 = vst [vmem:[#allocation151_spill] sm:$0xff] %v15547_v29  ;;  %v893_v6 = vpop.f32.mrb[215].mxu0  ;;  %v10994_v14 = vpop.f32.mrb[83].mxu1  ;;  %11168 = vmatmul.mubr.msk.f32.gmra.mrb[188].mxu1 %vm1169_vm1, %v15536_v0  ;;  %11212 = vmatmul.mubr.msk.f32.gmra.mrb[64].mxu0 %vm1169_vm1, %v2735_v47  ;;  %v2737_v47 = vsel %vm1113_vm3, %v2734_v40, %v2736_v52  ;;  %v1053_v29 = vld [vmem:[%s19340_s3 + $0x100] sm:$0xff]  ;;  %v3052_v40 = vrot.slane %v15052_v61, 1 }
 0x2c4   :  { %11170 = vmatprep.mubr.msk.f32.mxu1 %vm13150_vm0, %v19571_v32  ;;  %11214 = vmatprep.mubr.msk.f32.mxu0 %vm13150_vm0, %v19571_v32  ;;  %19710 = vst [vmem:[#allocation153_spill] sm:$0xff] %v15561_v9  ;;  %v842_v14 = vadd.f32 %v15224_v8, %v15325_v33  ;;  %v3051_v33 = vsel %vm1705_vm2, %v3049_v48, %v3050_v13  ;;  %v2740_v22 = vrot.slane %v15561_v9, 4  ;;  %v1055_v48 = vld [vmem:[%s19340_s3 + $0x110] sm:$0xff] }
 0x2c6   :  { %v15565_v37 = vpop.f32.mrb[216].mxu0  ;;  %v15567_v6 = vpop.f32.mrb[84].mxu1  ;;  %v2741_v9 = vsel %vm1113_vm3, %v2738_v50, %v2740_v22 }
 0x2c7   :  { %19711 = vst [vmem:[#allocation154_spill] sm:$0xff] %v15567_v6  ;;  %v898_v41 = vpop.f32.mrb[217].mxu0  ;;  %v11005_v15 = vpop.f32.mrb[85].mxu1  ;;  %11171 = vmatmul.mubr.msk.f32.gmra.mrb[190].mxu1 %vm1169_vm1, %v15558_v62  ;;  %11215 = vmatmul.mubr.msk.f32.gmra.mrb[66].mxu0 %vm1169_vm1, %v2737_v47  ;;  %v12717_v6 = vpack.c.bf16 %v1054_v51, %v1053_v29  ;;  %v2739_v62 = vsel %vm1113_vm3, %v2736_v52, %v2738_v50  ;;  %v1056_v29 = vld [vmem:[%s19340_s3 + $0x118] sm:$0xff]  ;;  %v3054_v52 = vrot.slane %v15077_v12, 1 }
 0x2c8   :  { %11217 = vmatprep.mubr.msk.f32.mxu0 %vm13150_vm0, %v19571_v32  ;;  %11270 = vmatprep.mubr.msk.f32.mxu1 %vm13150_vm0, %v19571_v32  ;;  %v15587_v41 = vmax.f32 %v842_v14, 0.0  ;;  %v847_v15 = vadd.f32 %v15224_v8, %v15352_v44  ;;  %v3053_v44 = vsel %vm1705_vm2, %v3050_v13, %v3052_v40  ;;  %v12720_v61 = vpack.c.bf16 %v1056_v29, %v1055_v48 }
 0x2ca   :  { %19712 = vst [vmem:[#allocation155_spill] sm:$0xff] %v15587_v41  ;;  %v15591_v28 = vpop.f32.mrb[218].mxu0  ;;  %v15593_v47 = vpop.f32.mrb[86].mxu1 }
 0x2cb   :  { %19713 = vst [vmem:[#allocation156_spill] sm:$0xff] %v15593_v47  ;;  %v903_v51 = vpop.f32.mrb[219].mxu0  ;;  %v11008_v14 = vpop.f32.mrb[87].mxu1  ;;  %11218 = vmatmul.mubr.msk.f32.gmra.mrb[68].mxu0 %vm1169_vm1, %v2739_v62  ;;  %11271 = vmatmul.mubr.msk.f32.vlgmr.msra.gmra.mrb[192].mxu1 %vm1169_vm1, %v3051_v33  ;;  %v2742_v47 = vrot.slane %v15587_v41, 4  ;;  %v852_v62 = vadd.f32 %v15224_v8, %v15376_v5  ;;  %v3055_v5 = vsel %vm1705_vm2, %v3052_v40, %v3054_v52 }
 0x2cc   :  { %11220 = vmatprep.mubr.msk.f32.mxu0 %vm13150_vm0, %v19571_v32  ;;  %11273 = vmatprep.mubr.msk.f32.mxu1 %vm13150_vm0, %v19571_v32  ;;  %v15611_v51 = vmax.f32 %v847_v15, 0.0 }
 0x2cd   :  { %12718 = vmatpush3.bf16.msra.mxu1 %v12717_v6  ;;  %v3056_v6 = vrot.slane %v15121_v1, 1  ;;  %v15630_v15 = vmax.f32 %v852_v62, 0.0  ;;  %v2743_v29 = vsel %vm1113_vm3, %v2740_v22, %v2742_v47 }
 0x2ce   :  { %19714 = vst [vmem:[#allocation157_spill] sm:$0xff] %v15611_v51  ;;  %v15615_v33 = vpop.f32.mrb[220].mxu0  ;;  %v15617_v14 = vpop.f32.mrb[88].mxu1  ;;  %12719 = vmatprep.subr.bf16.mxu1 %v19586_v55  ;;  %v2744_v50 = vrot.slane %v15611_v51, 4 }
 0x2cf   :  { %19715 = vst [vmem:[#allocation158_spill] sm:$0xff] %v15615_v33  ;;  %v908_v13 = vpop.f32.mrb[221].mxu0  ;;  %v11011_v0 = vpop.f32.mrb[89].mxu1  ;;  %11221 = vmatmul.mubr.msk.f32.gmra.mrb[70].mxu0 %vm1169_vm1, %v2741_v9  ;;  %11274 = vmatmul.mubr.msk.f32.gmra.mrb[194].mxu1 %vm1169_vm1, %v3053_v44  ;;  %19716 = vst [vmem:[#allocation159_spill] sm:$0xff] %v15630_v15  ;;  %v2746_v22 = vrot.slane %v15630_v15, 4 }
 0x2d0   :  { %11223 = vmatprep.mubr.msk.f32.mxu0 %vm13150_vm0, %v19571_v32  ;;  %11276 = vmatprep.mubr.msk.f32.mxu1 %vm13150_vm0, %v19571_v32  ;;  %v857_v0 = vadd.f32 %v15224_v8, %v15398_v18  ;;  %v3058_v18 = vrot.slane %v15138_v59, 1  ;;  %v862_v13 = vadd.f32 %v15224_v8, %v15419_v57 }
 0x2d1   :  { %12721 = vmatpush3.bf16.msra.mxu1 %v12720_v61  ;;  %v3057_v61 = vsel %vm1705_vm2, %v3054_v52, %v3056_v6  ;;  %v3060_v52 = vrot.slane %v15155_v2, 1 }
 0x2d2   :  { %v15634_v9 = vpop.f32.mrb[222].mxu0  ;;  %v15636_v48 = vpop.f32.mrb[90].mxu1  ;;  %12728 = vmatprep.subr.bf16.mxu1 %v19586_v55  ;;  %v15649_v62 = vmax.f32 %v857_v0, 0.0  ;;  %v3059_v57 = vsel %vm1705_vm2, %v3056_v6, %v3058_v18  ;;  %v15667_v59 = vmax.f32 %v862_v13, 0.0  ;;  %v3062_v6 = vrot.slane %v15171_v3, 1 }
 0x2d3   :  { %v10738_v44 = vpop.f32.mrb[223].mxu0  ;;  %v11014_v40 = vpop.f32.mrb[91].mxu1  ;;  %11224 = vmatmul.mubr.msk.f32.gmra.mrb[72].mxu0 %vm1169_vm1, %v2743_v29  ;;  %11277 = vmatmul.mubr.msk.f32.gmra.mrb[196].mxu1 %vm1169_vm1, %v3055_v5 }
 0x2d4   :  { %11226 = vmatprep.mubr.msk.f32.mxu0 %vm13150_vm0, %v19571_v32  ;;  %11279 = vmatprep.mubr.msk.f32.mxu1 %vm13150_vm0, %v19571_v32  ;;  %19717 = vst [vmem:[#allocation160_spill] sm:$0xff] %v15649_v62  ;;  %v2745_v44 = vsel %vm1113_vm3, %v2742_v47, %v2744_v50  ;;  %v2748_v0 = vrot.slane %v15649_v62, 4  ;;  %19718 = vst [vmem:[#allocation161_spill] sm:$0xff] %v15667_v59  ;;  %v867_v47 = vadd.f32 %v15224_v8, %v15440_v49 }
 0x2d5   :  { %v3061_v49 = vsel %vm1705_vm2, %v3058_v18, %v3060_v52  ;;  %v2750_v13 = vrot.slane %v15667_v59, 4  ;;  %v3064_v18 = vrot.slane %v15187_v19, 1 }
 0x2d6   :  { %v15653_v29 = vpop.f32.mrb[224].mxu0  ;;  %v15655_v5 = vpop.f32.mrb[92].mxu1  ;;  %v15685_v2 = vmax.f32 %v867_v47, 0.0 }
 0x2d7   :  { %v10741_v40 = vpop.f32.mrb[225].mxu0  ;;  %v11017_v33 = vpop.f32.mrb[93].mxu1  ;;  %11227 = vmatmul.mubr.msk.f32.gmra.mrb[74].mxu0 %vm1169_vm1, %v2745_v44  ;;  %11280 = vmatmul.mubr.msk.f32.gmra.mrb[198].mxu1 %vm1169_vm1, %v3057_v61  ;;  %v2747_v44 = vsel %vm1113_vm3, %v2744_v50, %v2746_v22 }
 0x2d8   :  { %11229 = vmatprep.mubr.msk.f32.mxu0 %vm13150_vm0, %v19571_v32  ;;  %11282 = vmatprep.mubr.msk.f32.mxu1 %vm13150_vm0, %v19571_v32  ;;  %19719 = vst [vmem:[#allocation162_spill] sm:$0xff] %v15685_v2  ;;  %v2752_v47 = vrot.slane %v15685_v2, 4 }
 0x2da   :  { %v15671_v33 = vpop.f32.mrb[226].mxu0  ;;  %v15673_v61 = vpop.f32.mrb[94].mxu1 }
 0x2db   :  { %v10744_v40 = vpop.f32.mrb[227].mxu0  ;;  %v11020_v1 = vpop.f32.mrb[95].mxu1  ;;  %11230 = vmatmul.mubr.msk.f32.gmra.mrb[76].mxu0 %vm1169_vm1, %v2747_v44  ;;  %11283 = vmatmul.mubr.msk.f32.gmra.mrb[200].mxu1 %vm1169_vm1, %v3059_v57  ;;  %v2749_v44 = vsel %vm1113_vm3, %v2746_v22, %v2748_v0 }
 0x2dc   :  { %11232 = vmatprep.mubr.msk.f32.mxu0 %vm13150_vm0, %v19571_v32  ;;  %11285 = vmatprep.mubr.msk.f32.mxu1 %vm13150_vm0, %v19571_v32  ;;  %v872_v1 = vadd.f32 %v15224_v8, %v15461_v43  ;;  %v3063_v43 = vsel %vm1705_vm2, %v3060_v52, %v3062_v6  ;;  %v3066_v52 = vrot.slane %v15203_v46, 1 }
 0x2de   :  { %v15689_v50 = vpop.f32.mrb[228].mxu0  ;;  %v15691_v57 = vpop.f32.mrb[96].mxu1  ;;  %v15703_v3 = vmax.f32 %v872_v1, 0.0 }
 0x2df   :  { %19720 = vst [vmem:[#allocation163_spill] sm:$0xff] %v15691_v57  ;;  %v10747_v40 = vpop.f32.mrb[229].mxu0  ;;  %v11023_v12 = vpop.f32.mrb[97].mxu1  ;;  %11233 = vmatmul.mubr.msk.f32.gmra.mrb[78].mxu0 %vm1169_vm1, %v2749_v44  ;;  %11286 = vmatmul.mubr.msk.f32.gmra.mrb[202].mxu1 %vm1169_vm1, %v3061_v49  ;;  %v2751_v44 = vsel %vm1113_vm3, %v2748_v0, %v2750_v13  ;;  %v882_v0 = vadd.f32 %v15224_v8, %v15503_v30 }
 0x2e0   :  { %11235 = vmatprep.mubr.msk.f32.mxu0 %vm13150_vm0, %v19571_v32  ;;  %11288 = vmatprep.mubr.msk.f32.mxu1 %vm13150_vm0, %v19571_v32  ;;  %19721 = vst [vmem:[#allocation164_spill] sm:$0xff] %v15703_v3  ;;  %v877_v12 = vadd.f32 %v15224_v8, %v15482_v7  ;;  %v3065_v7 = vsel %vm1705_vm2, %v3062_v6, %v3064_v18  ;;  %v2754_v1 = vrot.slane %v15703_v3, 4  ;;  %v3068_v6 = vrot.slane %v15219_v60, 1 }
 0x2e1   :  { %v3067_v30 = vsel %vm1705_vm2, %v3064_v18, %v3066_v52  ;;  %v15739_v46 = vmax.f32 %v882_v0, 0.0  ;;  %v3070_v18 = vrot.slane %v15240_v38, 1 }
 0x2e2   :  { %v15707_v22 = vpop.f32.mrb[230].mxu0  ;;  %v15709_v49 = vpop.f32.mrb[98].mxu1  ;;  %v15721_v19 = vmax.f32 %v877_v12, 0.0 }
 0x2e3   :  { %19722 = vst [vmem:[#allocation165_spill] sm:$0xff] %v15709_v49  ;;  %v10750_v40 = vpop.f32.mrb[231].mxu0  ;;  %v11026_v57 = vpop.f32.mrb[99].mxu1  ;;  %11236 = vmatmul.mubr.msk.f32.gmra.mrb[80].mxu0 %vm1169_vm1, %v2751_v44  ;;  %11289 = vmatmul.mubr.msk.f32.gmra.mrb[204].mxu1 %vm1169_vm1, %v3063_v43  ;;  %v2753_v44 = vsel %vm1113_vm3, %v2750_v13, %v2752_v47  ;;  %19725 = vst [vmem:[#allocation168_spill] sm:$0xff] %v15739_v46  ;;  %v887_v13 = vadd.f32 %v15224_v8, %v15524_v36  ;;  %v2758_v0 = vrot.slane %v15739_v46, 4 }
 0x2e4   :  { %11238 = vmatprep.mubr.msk.f32.mxu0 %vm13150_vm0, %v19571_v32  ;;  %11291 = vmatprep.mubr.msk.f32.mxu1 %vm13150_vm0, %v19571_v32  ;;  %19723 = vst [vmem:[#allocation166_spill] sm:$0xff] %v15721_v19  ;;  %v2756_v12 = vrot.slane %v15721_v19, 4  ;;  %v3069_v36 = vsel %vm1705_vm2, %v3066_v52, %v3068_v6  ;;  %v3072_v52 = vrot.slane %v15256_v39, 1 }
 0x2e5   :  { %v15757_v60 = vmax.f32 %v887_v13, 0.0 }
 0x2e6   :  { %v15725_v57 = vpop.f32.mrb[232].mxu0  ;;  %v15727_v43 = vpop.f32.mrb[100].mxu1 }
 0x2e7   :  { %19724 = vst [vmem:[#allocation167_spill] sm:$0xff] %v15727_v43  ;;  %v10753_v40 = vpop.f32.mrb[233].mxu0  ;;  %v11029_v49 = vpop.f32.mrb[101].mxu1  ;;  %11239 = vmatmul.mubr.msk.f32.gmra.mrb[82].mxu0 %vm1169_vm1, %v2753_v44  ;;  %11292 = vmatmul.mubr.msk.f32.gmra.mrb[206].mxu1 %vm1169_vm1, %v3065_v7  ;;  %v2755_v44 = vsel %vm1113_vm3, %v2752_v47, %v2754_v1  ;;  %19727 = vst [vmem:[#allocation170_spill] sm:$0xff] %v15757_v60  ;;  %v892_v47 = vadd.f32 %v15224_v8, %v15545_v53  ;;  %v2760_v13 = vrot.slane %v15757_v60, 4 }
 0x2e8   :  { %11241 = vmatprep.mubr.msk.f32.mxu0 %vm13150_vm0, %v19571_v32  ;;  %11294 = vmatprep.mubr.msk.f32.mxu1 %vm13150_vm0, %v19571_v32  ;;  %v3071_v53 = vsel %vm1705_vm2, %v3068_v6, %v3070_v18  ;;  %v3074_v6 = vrot.slane %v15272_v16, 1 }
 0x2e9   :  { %v15775_v38 = vmax.f32 %v892_v47, 0.0 }
 0x2ea   :  { %v15743_v49 = vpop.f32.mrb[234].mxu0  ;;  %v15745_v7 = vpop.f32.mrb[102].mxu1 }
 0x2eb   :  { %19726 = vst [vmem:[#allocation169_spill] sm:$0xff] %v15745_v7  ;;  %v10756_v40 = vpop.f32.mrb[235].mxu0  ;;  %v11032_v43 = vpop.f32.mrb[103].mxu1  ;;  %11242 = vmatmul.mubr.msk.f32.gmra.mrb[84].mxu0 %vm1169_vm1, %v2755_v44  ;;  %11295 = vmatmul.mubr.msk.f32.gmra.mrb[208].mxu1 %vm1169_vm1, %v3067_v30  ;;  %v2757_v44 = vsel %vm1113_vm3, %v2754_v1, %v2756_v12  ;;  %19729 = vst [vmem:[#allocation172_spill] sm:$0xff] %v15775_v38  ;;  %v897_v1 = vadd.f32 %v15224_v8, %v15565_v37  ;;  %v2762_v47 = vrot.slane %v15775_v38, 4 }
 0x2ec   :  { %11244 = vmatprep.mubr.msk.f32.mxu0 %vm13150_vm0, %v19571_v32  ;;  %11297 = vmatprep.mubr.msk.f32.mxu1 %vm13150_vm0, %v19571_v32  ;;  %v3073_v37 = vsel %vm1705_vm2, %v3070_v18, %v3072_v52  ;;  %v3075_v18 = vsel %vm1705_vm2, %v3072_v52, %v3074_v6 }
 0x2ed   :  { %v15793_v39 = vmax.f32 %v897_v1, 0.0 }
 0x2ee   :  { %v15761_v43 = vpop.f32.mrb[236].mxu0  ;;  %v15763_v30 = vpop.f32.mrb[104].mxu1 }
 0x2ef   :  { %19728 = vst [vmem:[#allocation171_spill] sm:$0xff] %v15763_v30  ;;  %v10759_v40 = vpop.f32.mrb[237].mxu0  ;;  %v11035_v7 = vpop.f32.mrb[105].mxu1  ;;  %11245 = vmatmul.mubr.msk.f32.gmra.mrb[86].mxu0 %vm1169_vm1, %v2757_v44  ;;  %11298 = vmatmul.mubr.msk.f32.gmra.mrb[210].mxu1 %vm1169_vm1, %v3069_v36  ;;  %v2759_v44 = vsel %vm1113_vm3, %v2756_v12, %v2758_v0  ;;  %19731 = vst [vmem:[#allocation174_spill] sm:$0xff] %v15793_v39  ;;  %v902_v12 = vadd.f32 %v15224_v8, %v15591_v28  ;;  %v2764_v8 = vrot.slane %v15793_v39, 4 }
 0x2f0   :  { %11247 = vmatprep.mubr.msk.f32.mxu0 %vm13150_vm0, %v19571_v32  ;;  %11300 = vmatprep.mubr.msk.f32.mxu1 %vm13150_vm0, %v19571_v32 }
 0x2f1   :  { %v15808_v28 = vmax.f32 %v902_v12, 0.0 }
 0x2f2   :  { %v15779_v7 = vpop.f32.mrb[238].mxu0  ;;  %v15781_v36 = vpop.f32.mrb[106].mxu1 }
 0x2f3   :  { %19730 = vst [vmem:[#allocation173_spill] sm:$0xff] %v15781_v36  ;;  %v10762_v40 = vpop.f32.mrb[239].mxu0  ;;  %v11038_v30 = vpop.f32.mrb[107].mxu1  ;;  %11248 = vmatmul.mubr.msk.f32.gmra.mrb[88].mxu0 %vm1169_vm1, %v2759_v44  ;;  %11301 = vmatmul.mubr.msk.f32.gmra.mrb[212].mxu1 %vm1169_vm1, %v3071_v53  ;;  %v2761_v44 = vsel %vm1113_vm3, %v2758_v0, %v2760_v13  ;;  %19732 = vst [vmem:[#allocation175_spill] sm:$0xff] %v15808_v28  ;;  %v2766_v52 = vrot.slane %v15808_v28, 4 }
 0x2f4   :  { %11250 = vmatprep.mubr.msk.f32.mxu0 %vm13150_vm0, %v19571_v32  ;;  %11303 = vmatprep.mubr.msk.f32.mxu1 %vm13150_vm0, %v19571_v32 }
 0x2f6   :  { %v15797_v30 = vpop.f32.mrb[240].mxu0  ;;  %v2276_v53 = vpop.f32.mrb[108].mxu1 }
 0x2f7   :  { %v10765_v40 = vpop.f32.mrb[241].mxu0  ;;  %v11041_v36 = vpop.f32.mrb[109].mxu1  ;;  %11251 = vmatmul.mubr.msk.f32.gmra.mrb[90].mxu0 %vm1169_vm1, %v2761_v44  ;;  %11304 = vmatmul.mubr.msk.f32.gmra.mrb[214].mxu1 %vm1169_vm1, %v3073_v37  ;;  %v3076_v37 = vrot.slane %v15290_v4, 1 }
 0x2f8   :  { %11253 = vmatprep.mubr.msk.f32.mxu0 %vm13150_vm0, %v19571_v32  ;;  %11306 = vmatprep.mubr.msk.f32.mxu1 %vm13150_vm0, %v19571_v32  ;;  %v2763_v36 = vsel %vm1113_vm3, %v2760_v13, %v2762_v47  ;;  %v2765_v13 = vsel %vm1113_vm3, %v2762_v47, %v2764_v8  ;;  %v2767_v47 = vsel %vm1113_vm3, %v2764_v8, %v2766_v52  ;;  %v3386_v52 = vrot.slane %v15294_v23, 5 }
 0x2fa   :  { %v15810_v1 = vpop.f32.mrb[242].mxu0  ;;  %v15812_v0 = vpop.f32.mrb[110].mxu1 }
 0x2fb   :  { %19733 = vst [vmem:[#allocation176_spill] sm:$0xff] %v15810_v1  ;;  %v10768_v44 = vpop.f32.mrb[243].mxu0  ;;  %v11044_v40 = vpop.f32.mrb[111].mxu1  ;;  %11254 = vmatmul.mubr.msk.f32.gmra.mrb[92].mxu0 %vm1169_vm1, %v2763_v36  ;;  %11307 = vmatmul.mubr.msk.f32.gmra.mrb[216].mxu1 %vm1169_vm1, %v3075_v18  ;;  %v3078_v36 = vrot.slane %v15316_v63, 1 }
 0x2fc   :  { %11256 = vmatprep.mubr.msk.f32.mxu0 %vm13150_vm0, %v19571_v32  ;;  %11309 = vmatprep.mubr.msk.f32.mxu1 %vm13150_vm0, %v19571_v32  ;;  %v3077_v44 = vsel %vm1705_vm2, %v3074_v6, %v3076_v37 }
 0x2fd   :  { %v3079_v6 = vsel %vm1705_vm2, %v3076_v37, %v3078_v36 }
 0x2fe   :  { %v15823_v12 = vpop.f32.mrb[244].mxu0  ;;  %v15825_v16 = vpop.f32.mrb[112].mxu1 }
 0x2ff   :  { %19734 = vst [vmem:[#allocation177_spill] sm:$0xff] %v15823_v12  ;;  %v10771_v40 = vpop.f32.mrb[245].mxu0  ;;  %v11047_v18 = vpop.f32.mrb[113].mxu1  ;;  %11257 = vmatmul.mubr.msk.f32.gmra.mrb[94].mxu0 %vm1169_vm1, %v2765_v13  ;;  %11310 = vmatmul.mubr.msk.f32.gmra.mrb[218].mxu1 %vm1169_vm1, %v3077_v44  ;;  %v1057_v13 = vld [vmem:[%s19340_s3 + $0x120] sm:$0xff]  ;;  %v1058_v44 = vld [vmem:[%s19340_s3 + $0x128] sm:$0xff] }
 0x300   :  { %11259 = vmatprep.mubr.msk.f32.mxu0 %vm13150_vm0, %v19571_v32  ;;  %11312 = vmatprep.mubr.msk.f32.mxu1 %vm13150_vm0, %v19571_v32  ;;  %v3080_v40 = vrot.slane %v15343_v31, 1  ;;  %v12723_v37 = vpack.c.bf16 %v1058_v44, %v1057_v13 }
 0x302   :  { %v1350_v4 = vpop.f32.mrb[246].mxu0  ;;  %v15836_v12 = vpop.f32.mrb[114].mxu1 }
 0x303   :  { %v1632_v18 = vadd.f32 %v14732_v56, %v1350_v4  ;;  %v10774_v63 = vpop.f32.mrb[247].mxu0  ;;  %v11050_v28 = vpop.f32.mrb[115].mxu1  ;;  %11260 = vmatmul.mubr.msk.f32.gmra.mrb[96].mxu0 %vm1169_vm1, %v2767_v47  ;;  %11313 = vmatmul.mubr.msk.f32.gmra.mrb[220].mxu1 %vm1169_vm1, %v3079_v6  ;;  %v3081_v56 = vsel %vm1705_vm2, %v3078_v36, %v3080_v40  ;;  %v3082_v4 = vrot.slane %v15367_v42, 1 }
 0x304   :  { %11315 = vmatprep.mubr.msk.f32.mxu1 %vm13150_vm0, %v19571_v32  ;;  %11359 = vmatprep.mubr.msk.f32.mxu0 %vm13150_vm0, %v19571_v32  ;;  %v1059_v63 = vld [vmem:[%s19340_s3 + $0x130] sm:$0xff]  ;;  %v1060_v28 = vld [vmem:[%s19340_s3 + $0x138] sm:$0xff] }
 0x305   :  { %v2025_v8 = vadd.f32 %v15246_v58, %v1632_v18  ;;  %v12726_v44 = vpack.c.bf16 %v1060_v28, %v1059_v63 }
 0x306   :  { %v1355_v31 = vpop.f32.mrb[248].mxu0  ;;  %v15856_v1 = vpop.f32.mrb[116].mxu1 }
 0x307   :  { %v1637_v58 = vadd.f32 %v14750_v10, %v1355_v31  ;;  %v10777_v47 = vpop.f32.mrb[249].mxu0  ;;  %v11053_v6 = vpop.f32.mrb[117].mxu1  ;;  %11316 = vmatmul.mubr.msk.f32.gmra.mrb[222].mxu1 %vm1169_vm1, %v3081_v56  ;;  %11360 = vmatmul.mubr.msk.f32.vlgmr.msra.gmra.mrb[98].mxu0 %vm1169_vm1, %v15095_v35  ;;  %v15870_v36 = vadd.f32 %v2276_v53, %v2025_v8  ;;  %v3388_v10 = vrot.slane %v15321_v26, 5  ;;  %v3083_v56 = vsel %vm1705_vm2, %v3080_v40, %v3082_v4  ;;  %v19736_v40 = vld [vmem:[#allocation115_spill] sm:$0xff] }
 0x308   :  { %11318 = vmatprep.mubr.msk.f32.mxu1 %vm13150_vm0, %v19571_v32  ;;  %11362 = vmatprep.mubr.msk.f32.mxu0 %vm13150_vm0, %v19571_v32  ;;  %v19735_v35 = vrot.slane %v15054_v20, 5  ;;  %v3084_v8 = vrot.slane %v15389_v17, 1  ;;  %v19772_v20 = vld [vmem:[#allocation145_spill] sm:$0xff] }
 0x309   :  { %v2026_v13 = vadd.f32 %v15262_v45, %v1637_v58  ;;  %12724 = vmatpush3.bf16.msra.mxu0 %v12723_v37  ;;  %v19737_v58 = vld [vmem:[#allocation123_spill] sm:$0xff] }
 0x30a   :  { %v1360_v31 = vpop.f32.mrb[250].mxu0  ;;  %v15878_v18 = vpop.f32.mrb[118].mxu1  ;;  %v3387_v53 = vsel %vm2040_vm5, %v19735_v35, %v3386_v52  ;;  %12725 = vmatprep.subr.bf16.mxu0 %v19586_v55  ;;  %v3389_v35 = vsel %vm2040_vm5, %v3386_v52, %v3388_v10  ;;  %v19739_v52 = vld [vmem:[#allocation118_spill] sm:$0xff] }
 0x30b   :  { %v1642_v47 = vadd.f32 %v14768_v34, %v1360_v31  ;;  %v10780_v45 = vpop.f32.mrb[251].mxu0  ;;  %v11056_v37 = vpop.f32.mrb[119].mxu1  ;;  %11319 = vmatmul.mubr.msk.f32.gmra.mrb[224].mxu1 %vm1169_vm1, %v3083_v56  ;;  %11363 = vmatmul.mubr.msk.f32.gmra.mrb[100].mxu0 %vm1169_vm1, %v3387_v53  ;;  %v15890_v63 = vadd.f32 %v15812_v0, %v2026_v13  ;;  %v3390_v34 = vrot.slane %v19737_v58, 5  ;;  %v3085_v56 = vsel %vm1705_vm2, %v3082_v4, %v3084_v8  ;;  %v19738_v13 = vld [vmem:[#allocation63_spill] sm:$0xff] }
 0x30c   :  { %11321 = vmatprep.mubr.msk.f32.mxu1 %vm13150_vm0, %v19571_v32  ;;  %11365 = vmatprep.mubr.msk.f32.mxu0 %vm13150_vm0, %v19571_v32  ;;  %v3086_v0 = vrot.slane %v15410_v21, 1 }
 0x30d   :  { %v2027_v28 = vadd.f32 %v19736_v40, %v1642_v47  ;;  %12727 = vmatpush3.bf16.msra.mxu0 %v12726_v44  ;;  %v19740_v47 = vld [vmem:[#allocation126_spill] sm:$0xff] }
 0x30e   :  { %v1365_v6 = vpop.f32.mrb[252].mxu0  ;;  %v15898_v31 = vpop.f32.mrb[120].mxu1  ;;  %12734 = vmatprep.subr.bf16.mxu0 %v19586_v55  ;;  %v3392_v40 = vrot.slane %v19740_v47, 5 }
 0x30f   :  { %v1647_v53 = vadd.f32 %v19738_v13, %v1365_v6  ;;  %v10783_v45 = vpop.f32.mrb[253].mxu0  ;;  %v11059_v37 = vpop.f32.mrb[121].mxu1  ;;  %11322 = vmatmul.mubr.msk.f32.gmra.mrb[226].mxu1 %vm1169_vm1, %v3085_v56  ;;  %11366 = vmatmul.mubr.msk.f32.gmra.mrb[102].mxu0 %vm1169_vm1, %v3389_v35  ;;  %v15908_v44 = vadd.f32 %v15825_v16, %v2027_v28  ;;  %v3087_v56 = vsel %vm1705_vm2, %v3084_v8, %v3086_v0  ;;  %v3088_v16 = vrot.slane %v15431_v25, 1  ;;  %v19741_v28 = vld [vmem:[#allocation65_spill] sm:$0xff] }
 0x310   :  { %11324 = vmatprep.mubr.msk.f32.mxu1 %vm13150_vm0, %v19571_v32  ;;  %11368 = vmatprep.mubr.msk.f32.mxu0 %vm13150_vm0, %v19571_v32  ;;  %v3391_v35 = vsel %vm2040_vm5, %v3388_v10, %v3390_v34  ;;  %v19742_v10 = vld [vmem:[#allocation121_spill] sm:$0xff] }
 0x311   :  { %v2028_v4 = vadd.f32 %v19739_v52, %v1647_v53  ;;  %v19743_v52 = vld [vmem:[#allocation129_spill] sm:$0xff] }
 0x312   :  { %v1370_v6 = vpop.f32.mrb[254].mxu0  ;;  %v15916_v13 = vpop.f32.mrb[122].mxu1  ;;  %v3394_v47 = vrot.slane %v19743_v52, 5 }
 0x313   :  { %v1652_v45 = vadd.f32 %v19741_v28, %v1370_v6  ;;  %v10786_v37 = vpop.f32.mrb[255].mxu0  ;;  %v11062_v58 = vpop.f32.mrb[123].mxu1  ;;  %11325 = vmatmul.mubr.msk.f32.gmra.mrb[228].mxu1 %vm1169_vm1, %v3087_v56  ;;  %11369 = vmatmul.mubr.msk.f32.gmra.mrb[104].mxu0 %vm1169_vm1, %v3391_v35  ;;  %v15925_v53 = vadd.f32 %v15836_v12, %v2028_v4  ;;  %v3393_v56 = vsel %vm2040_vm5, %v3390_v34, %v3392_v40  ;;  %v3090_v12 = vrot.slane %v15452_v24, 1  ;;  %v19744_v4 = vld [vmem:[#allocation67_spill] sm:$0xff]  ;;  %v19745_v34 = vld [vmem:[#allocation124_spill] sm:$0xff] }
 0x314   :  { %11327 = vmatprep.mubr.msk.f32.mxu1 %vm13150_vm0, %v19571_v32  ;;  %11371 = vmatprep.mubr.msk.f32.mxu0 %vm13150_vm0, %v19571_v32  ;;  %v3089_v58 = vsel %vm1705_vm2, %v3086_v0, %v3088_v16 }
 0x315   :  { %v2029_v8 = vadd.f32 %v19742_v10, %v1652_v45  ;;  %v19746_v10 = vld [vmem:[#allocation132_spill] sm:$0xff] }
 0x316   :  { %v1375_v6 = vpop.f32.mrb[0].mxu0  ;;  %v15933_v28 = vpop.f32.mrb[124].mxu1  ;;  %v3396_v52 = vrot.slane %v19746_v10, 5 }
 0x317   :  { %v1657_v35 = vadd.f32 %v19744_v4, %v1375_v6  ;;  %v10789_v37 = vpop.f32.mrb[1].mxu0  ;;  %v11065_v25 = vpop.f32.mrb[125].mxu1  ;;  %11328 = vmatmul.mubr.msk.f32.gmra.mrb[230].mxu1 %vm1169_vm1, %v3089_v58  ;;  %11372 = vmatmul.mubr.msk.f32.gmra.mrb[106].mxu0 %vm1169_vm1, %v3393_v56  ;;  %v15942_v45 = vadd.f32 %v15856_v1, %v2029_v8  ;;  %v3395_v58 = vsel %vm2040_vm5, %v3392_v40, %v3394_v47  ;;  %v3092_v1 = vrot.slane %v15473_v11, 1  ;;  %v19747_v8 = vld [vmem:[#allocation69_spill] sm:$0xff]  ;;  %v19748_v40 = vld [vmem:[#allocation127_spill] sm:$0xff] }
 0x318   :  { %11330 = vmatprep.mubr.msk.f32.mxu1 %vm13150_vm0, %v19571_v32  ;;  %11374 = vmatprep.mubr.msk.f32.mxu0 %vm13150_vm0, %v19571_v32  ;;  %v3091_v25 = vsel %vm1705_vm2, %v3088_v16, %v3090_v12 }
 0x319   :  { %v2030_v0 = vadd.f32 %v19745_v34, %v1657_v35  ;;  %v19749_v34 = vld [vmem:[#allocation135_spill] sm:$0xff] }
 0x31a   :  { %v1380_v6 = vpop.f32.mrb[2].mxu0  ;;  %v15950_v4 = vpop.f32.mrb[126].mxu1  ;;  %v3398_v10 = vrot.slane %v19749_v34, 5 }
 0x31b   :  { %v1662_v56 = vadd.f32 %v19747_v8, %v1380_v6  ;;  %v10792_v37 = vpop.f32.mrb[3].mxu0  ;;  %v11068_v24 = vpop.f32.mrb[127].mxu1  ;;  %11331 = vmatmul.mubr.msk.f32.gmra.mrb[232].mxu1 %vm1169_vm1, %v3091_v25  ;;  %11375 = vmatmul.mubr.msk.f32.gmra.mrb[108].mxu0 %vm1169_vm1, %v3395_v58  ;;  %v15959_v35 = vadd.f32 %v15878_v18, %v2030_v0  ;;  %v3397_v25 = vsel %vm2040_vm5, %v3394_v47, %v3396_v52  ;;  %v3094_v18 = vrot.slane %v15494_v27, 1  ;;  %v19750_v0 = vld [vmem:[#allocation71_spill] sm:$0xff]  ;;  %v19751_v47 = vld [vmem:[#allocation130_spill] sm:$0xff] }
 0x31c   :  { %11333 = vmatprep.mubr.msk.f32.mxu1 %vm13150_vm0, %v19571_v32  ;;  %11377 = vmatprep.mubr.msk.f32.mxu0 %vm13150_vm0, %v19571_v32  ;;  %v3093_v24 = vsel %vm1705_vm2, %v3090_v12, %v3092_v1 }
 0x31d   :  { %v2031_v16 = vadd.f32 %v19748_v40, %v1662_v56  ;;  %v19752_v40 = vld [vmem:[#allocation138_spill] sm:$0xff] }
 0x31e   :  { %v1385_v6 = vpop.f32.mrb[4].mxu0  ;;  %v15967_v8 = vpop.f32.mrb[128].mxu1  ;;  %v3400_v34 = vrot.slane %v19752_v40, 5 }
 0x31f   :  { %v1667_v58 = vadd.f32 %v19750_v0, %v1385_v6  ;;  %v10795_v37 = vpop.f32.mrb[5].mxu0  ;;  %v11071_v11 = vpop.f32.mrb[129].mxu1  ;;  %11334 = vmatmul.mubr.msk.f32.gmra.mrb[234].mxu1 %vm1169_vm1, %v3093_v24  ;;  %11378 = vmatmul.mubr.msk.f32.gmra.mrb[110].mxu0 %vm1169_vm1, %v3397_v25  ;;  %v15976_v56 = vadd.f32 %v15898_v31, %v2031_v16  ;;  %v3399_v24 = vsel %vm2040_vm5, %v3396_v52, %v3398_v10  ;;  %v3096_v31 = vrot.slane %v15515_v54, 1  ;;  %v19753_v16 = vld [vmem:[#allocation73_spill] sm:$0xff] }
 0x320   :  { %11336 = vmatprep.mubr.msk.f32.mxu1 %vm13150_vm0, %v19571_v32  ;;  %11380 = vmatprep.mubr.msk.f32.mxu0 %vm13150_vm0, %v19571_v32  ;;  %v3095_v11 = vsel %vm1705_vm2, %v3092_v1, %v3094_v18  ;;  %v19754_v52 = vld [vmem:[#allocation133_spill] sm:$0xff] }
 0x321   :  { %v2032_v12 = vadd.f32 %v19751_v47, %v1667_v58  ;;  %v19755_v47 = vld [vmem:[#allocation141_spill] sm:$0xff] }
 0x322   :  { %v1390_v6 = vpop.f32.mrb[6].mxu0  ;;  %v15984_v0 = vpop.f32.mrb[130].mxu1  ;;  %v3402_v40 = vrot.slane %v19755_v47, 5 }
 0x323   :  { %v1672_v25 = vadd.f32 %v19753_v16, %v1390_v6  ;;  %v10798_v37 = vpop.f32.mrb[7].mxu0  ;;  %v11074_v27 = vpop.f32.mrb[131].mxu1  ;;  %11337 = vmatmul.mubr.msk.f32.gmra.mrb[236].mxu1 %vm1169_vm1, %v3095_v11  ;;  %11381 = vmatmul.mubr.msk.f32.gmra.mrb[112].mxu0 %vm1169_vm1, %v3399_v24  ;;  %v15993_v58 = vadd.f32 %v15916_v13, %v2032_v12  ;;  %v3401_v11 = vsel %vm2040_vm5, %v3398_v10, %v3400_v34  ;;  %v19756_v24 = vld [vmem:[#allocation149_spill] sm:$0xff]  ;;  %v19757_v12 = vld [vmem:[#allocation75_spill] sm:$0xff]  ;;  %v19758_v10 = vld [vmem:[#allocation136_spill] sm:$0xff] }
 0x324   :  { %11339 = vmatprep.mubr.msk.f32.mxu1 %vm13150_vm0, %v19571_v32  ;;  %11383 = vmatprep.mubr.msk.f32.mxu0 %vm13150_vm0, %v19571_v32  ;;  %v3097_v27 = vsel %vm1705_vm2, %v3094_v18, %v3096_v31  ;;  %v3098_v13 = vrot.slane %v19756_v24, 1 }
 0x325   :  { %v2033_v1 = vadd.f32 %v19754_v52, %v1672_v25  ;;  %v19759_v52 = vld [vmem:[#allocation144_spill] sm:$0xff] }
 0x326   :  { %v1395_v6 = vpop.f32.mrb[8].mxu0  ;;  %v16001_v16 = vpop.f32.mrb[132].mxu1  ;;  %v3404_v47 = vrot.slane %v19759_v52, 5 }
 0x327   :  { %v1677_v37 = vadd.f32 %v19757_v12, %v1395_v6  ;;  %v10801_v54 = vpop.f32.mrb[9].mxu0  ;;  %v11077_v21 = vpop.f32.mrb[133].mxu1  ;;  %11340 = vmatmul.mubr.msk.f32.gmra.mrb[238].mxu1 %vm1169_vm1, %v3097_v27  ;;  %11384 = vmatmul.mubr.msk.f32.gmra.mrb[114].mxu0 %vm1169_vm1, %v3401_v11  ;;  %v16010_v25 = vadd.f32 %v15933_v28, %v2033_v1  ;;  %v3403_v27 = vsel %vm2040_vm5, %v3400_v34, %v3402_v40  ;;  %v19760_v11 = vld [vmem:[#allocation152_spill] sm:$0xff]  ;;  %v19761_v1 = vld [vmem:[#allocation77_spill] sm:$0xff]  ;;  %v19762_v34 = vld [vmem:[#allocation139_spill] sm:$0xff] }
 0x328   :  { %11342 = vmatprep.mubr.msk.f32.mxu1 %vm13150_vm0, %v19571_v32  ;;  %11386 = vmatprep.mubr.msk.f32.mxu0 %vm13150_vm0, %v19571_v32  ;;  %v3099_v21 = vsel %vm1705_vm2, %v3096_v31, %v3098_v13  ;;  %v3100_v28 = vrot.slane %v19760_v11, 1 }
 0x329   :  { %v2034_v18 = vadd.f32 %v19758_v10, %v1677_v37  ;;  %v19763_v10 = vld [vmem:[#allocation147_spill] sm:$0xff] }
 0x32a   :  { %v1400_v6 = vpop.f32.mrb[10].mxu0  ;;  %v16018_v54 = vpop.f32.mrb[134].mxu1  ;;  %v3406_v52 = vrot.slane %v19763_v10, 5 }
 0x32b   :  { %v1682_v12 = vadd.f32 %v19761_v1, %v1400_v6  ;;  %v10804_v24 = vpop.f32.mrb[11].mxu0  ;;  %v11080_v26 = vpop.f32.mrb[135].mxu1  ;;  %11343 = vmatmul.mubr.msk.f32.gmra.mrb[240].mxu1 %vm1169_vm1, %v3099_v21  ;;  %11387 = vmatmul.mubr.msk.f32.gmra.mrb[116].mxu0 %vm1169_vm1, %v3403_v27  ;;  %v16027_v37 = vadd.f32 %v15950_v4, %v2034_v18  ;;  %v3405_v21 = vsel %vm2040_vm5, %v3402_v40, %v3404_v47  ;;  %v19764_v27 = vld [vmem:[#allocation79_spill] sm:$0xff]  ;;  %v19767_v40 = vld [vmem:[#allocation30_spill] sm:$0xff] }
 0x32c   :  { %11345 = vmatprep.mubr.msk.f32.mxu1 %vm13150_vm0, %v19571_v32  ;;  %11389 = vmatprep.mubr.msk.f32.mxu0 %vm13150_vm0, %v19571_v32  ;;  %v3101_v26 = vsel %vm1705_vm2, %v3098_v13, %v3100_v28  ;;  %v19766_v13 = vld [vmem:[#allocation142_spill] sm:$0xff] }
 0x32d   :  { %v2035_v31 = vadd.f32 %v19762_v34, %v1682_v12  ;;  %v3721_v34 = vrot.slane %v19767_v40, 3 }
 0x32e   :  { %v1405_v6 = vpop.f32.mrb[12].mxu0  ;;  %v16035_v24 = vpop.f32.mrb[136].mxu1 }
 0x32f   :  { %v1687_v4 = vadd.f32 %v19764_v27, %v1405_v6  ;;  %v10807_v18 = vpop.f32.mrb[13].mxu0  ;;  %v11083_v1 = vpop.f32.mrb[137].mxu1  ;;  %11346 = vmatmul.mubr.msk.f32.gmra.mrb[242].mxu1 %vm1169_vm1, %v3101_v26  ;;  %11390 = vmatmul.mubr.msk.f32.gmra.mrb[118].mxu0 %vm1169_vm1, %v3405_v21  ;;  %v16043_v11 = vadd.f32 %v15967_v8, %v2035_v31  ;;  %v19768_v6 = vld [vmem:[#allocation150_spill] sm:$0xff]  ;;  %v3407_v26 = vsel %vm2040_vm5, %v3404_v47, %v3406_v52  ;;  %v1062_v31 = vld [vmem:[%s19340_s3 + $0x148] sm:$0xff]  ;;  %v19769_v21 = vld [vmem:[#allocation81_spill] sm:$0xff] }
 0x330   :  { %11348 = vmatprep.mubr.msk.f32.mxu1 %vm13150_vm0, %v19571_v32  ;;  %11392 = vmatprep.mubr.msk.f32.mxu0 %vm13150_vm0, %v19571_v32  ;;  %v3408_v27 = vrot.slane %v19768_v6, 5  ;;  %v1061_v8 = vld [vmem:[%s19340_s3 + $0x140] sm:$0xff]  ;;  %v19771_v47 = vld [vmem:[#allocation27_spill] sm:$0xff] }
 0x331   :  { %19765 = vst [vmem:[#allocation115_spill] sm:$0xff] %v16043_v11  ;;  %v2036_v12 = vadd.f32 %v19766_v13, %v1687_v4  ;;  %v3720_v17 = vrot.slane %v19771_v47, 3  ;;  %v1063_v47 = vld [vmem:[%s19340_s3 + $0x150] sm:$0xff] }
 0x332   :  { %v1410_v18 = vpop.f32.mrb[14].mxu0  ;;  %v16052_v1 = vpop.f32.mrb[138].mxu1 }
 0x333   :  { %v1692_v10 = vadd.f32 %v19769_v21, %v1410_v18  ;;  %v10810_v4 = vpop.f32.mrb[15].mxu0  ;;  %v11094_v13 = vpop.f32.mrb[139].mxu1  ;;  %11349 = vmatmul.mubr.msk.f32.gmra.mrb[244].mxu1 %vm1169_vm1, %v3100_v28  ;;  %11393 = vmatmul.mubr.msk.f32.gmra.mrb[120].mxu0 %vm1169_vm1, %v3407_v26  ;;  %v16065_v6 = vadd.f32 %v15984_v0, %v2036_v12  ;;  %v12729_v18 = vpack.c.bf16 %v1062_v31, %v1061_v8  ;;  %v19773_v21 = vld [vmem:[#allocation153_spill] sm:$0xff] }
 0x334   :  { %11395 = vmatprep.mubr.msk.f32.mxu0 %vm13150_vm0, %v19571_v32  ;;  %11448 = vmatprep.mubr.msk.f32.mxu1 %vm13150_vm0, %v19571_v32  ;;  %v3410_v4 = vrot.slane %v19773_v21, 5  ;;  %v3409_v26 = vsel %vm2040_vm5, %v3406_v52, %v3408_v27  ;;  %v3722_v0 = vsel %vm3719_vm4, %v3720_v17, %v3721_v34  ;;  %v19774_v12 = vld [vmem:[#allocation33_spill] sm:$0xff]  ;;  %v19777_v52 = vld [vmem:[#allocation148_spill] sm:$0xff] }
 0x335   :  { %19770 = vst [vmem:[#allocation63_spill] sm:$0xff] %v16065_v6  ;;  %v2037_v23 = vadd.f32 %v19772_v20, %v1692_v10  ;;  %v3723_v42 = vrot.slane %v19774_v12, 3  ;;  %v1064_v20 = vld [vmem:[%s19340_s3 + $0x158] sm:$0xff]  ;;  %v19775_v10 = vld [vmem:[#allocation83_spill] sm:$0xff] }
 0x336   :  { %v1415_v13 = vpop.f32.mrb[16].mxu0  ;;  %v16074_v28 = vpop.f32.mrb[140].mxu1  ;;  %v12732_v40 = vpack.c.bf16 %v1064_v20, %v1063_v47 }
 0x337   :  { %v1697_v8 = vadd.f32 %v19775_v10, %v1415_v13  ;;  %v10813_v31 = vpop.f32.mrb[17].mxu0  ;;  %v11097_v21 = vpop.f32.mrb[141].mxu1  ;;  %11396 = vmatmul.mubr.msk.f32.gmra.mrb[122].mxu0 %vm1169_vm1, %v3409_v26  ;;  %11449 = vmatmul.mubr.msk.f32.vlgmr.msra.gmra.mrb[246].mxu1 %vm1169_vm1, %v3722_v0  ;;  %v16089_v17 = vadd.f32 %v16001_v16, %v2037_v23  ;;  %v3412_v13 = vrot.slane %v15587_v41, 5  ;;  %v3411_v26 = vsel %vm2040_vm5, %v3408_v27, %v3410_v4  ;;  %v19778_v16 = vld [vmem:[#allocation37_spill] sm:$0xff] }
 0x338   :  { %11398 = vmatprep.mubr.msk.f32.mxu0 %vm13150_vm0, %v19571_v32  ;;  %11451 = vmatprep.mubr.msk.f32.mxu1 %vm13150_vm0, %v19571_v32  ;;  %v3724_v23 = vsel %vm3719_vm4, %v3721_v34, %v3723_v42  ;;  %v3725_v0 = vrot.slane %v19778_v16, 3  ;;  %v19779_v31 = vld [vmem:[#allocation84_spill] sm:$0xff]  ;;  %v19780_v34 = vld [vmem:[#allocation151_spill] sm:$0xff] }
 0x339   :  { %19776 = vst [vmem:[#allocation118_spill] sm:$0xff] %v16089_v17  ;;  %v2038_v12 = vadd.f32 %v19777_v52, %v1697_v8  ;;  %12730 = vmatpush3.bf16.msra.mxu1 %v12729_v18  ;;  %v3414_v18 = vrot.slane %v15611_v51, 5  ;;  %v3413_v20 = vsel %vm2040_vm5, %v3410_v4, %v3412_v13 }
 0x33a   :  { %v1420_v21 = vpop.f32.mrb[18].mxu0  ;;  %v16097_v10 = vpop.f32.mrb[142].mxu1  ;;  %12731 = vmatprep.subr.bf16.mxu1 %v19586_v55  ;;  %v3726_v8 = vsel %vm3719_vm4, %v3723_v42, %v3725_v0  ;;  %v19782_v42 = vld [vmem:[#allocation85_spill] sm:$0xff] }
 0x33b   :  { %v1702_v17 = vadd.f32 %v19779_v31, %v1420_v21  ;;  %v10816_v6 = vpop.f32.mrb[19].mxu0  ;;  %v11100_v11 = vpop.f32.mrb[143].mxu1  ;;  %11399 = vmatmul.mubr.msk.f32.gmra.mrb[124].mxu0 %vm1169_vm1, %v3411_v26  ;;  %11452 = vmatmul.mubr.msk.f32.gmra.mrb[248].mxu1 %vm1169_vm1, %v3724_v23  ;;  %v16107_v47 = vadd.f32 %v16018_v54, %v2038_v12  ;;  %v19781_v54 = vld [vmem:[#allocation40_spill] sm:$0xff]  ;;  %v3415_v31 = vsel %vm2040_vm5, %v3412_v13, %v3414_v18  ;;  %v19785_v13 = vld [vmem:[#allocation87_spill] sm:$0xff] }
 0x33c   :  { %11401 = vmatprep.mubr.msk.f32.mxu0 %vm13150_vm0, %v19571_v32  ;;  %11454 = vmatprep.mubr.msk.f32.mxu1 %vm13150_vm0, %v19571_v32  ;;  %v3727_v12 = vrot.slane %v19781_v54, 3 }
 0x33d   :  { %v2039_v27 = vadd.f32 %v19780_v34, %v1702_v17  ;;  %12733 = vmatpush3.bf16.msra.mxu1 %v12732_v40  ;;  %v3416_v17 = vrot.slane %v15630_v15, 5 }
 0x33e   :  { %v1571_v6 = vpop.f32.mrb[20].mxu0  ;;  %v16115_v11 = vpop.f32.mrb[144].mxu1  ;;  %12740 = vmatprep.subr.bf16.mxu1 %v19586_v55  ;;  %v3728_v34 = vsel %vm3719_vm4, %v3725_v0, %v3727_v12 }
 0x33f   :  { %v1572_v52 = vadd.f32 %v1571_v6, %v15634_v9  ;;  %v10827_v21 = vpop.f32.mrb[21].mxu0  ;;  %v11103_v26 = vpop.f32.mrb[145].mxu1  ;;  %11402 = vmatmul.mubr.msk.f32.gmra.mrb[126].mxu0 %vm1169_vm1, %v3413_v20  ;;  %11455 = vmatmul.mubr.msk.f32.gmra.mrb[250].mxu1 %vm1169_vm1, %v3726_v8  ;;  %v16125_v40 = vadd.f32 %v16035_v24, %v2039_v27  ;;  %v19783_v6 = vld [vmem:[#allocation41_spill] sm:$0xff] }
 0x340   :  { %11404 = vmatprep.mubr.msk.f32.mxu0 %vm13150_vm0, %v19571_v32  ;;  %11457 = vmatprep.mubr.msk.f32.mxu1 %vm13150_vm0, %v19571_v32  ;;  %v3729_v24 = vrot.slane %v19783_v6, 3 }
 0x341   :  { %v2013_v4 = vadd.f32 %v19782_v42, %v1572_v52  ;;  %v19784_v52 = vld [vmem:[#allocation154_spill] sm:$0xff] }
 0x342   :  { %v1576_v9 = vpop.f32.mrb[22].mxu0  ;;  %v16133_v23 = vpop.f32.mrb[146].mxu1 }
 0x343   :  { %v1577_v27 = vadd.f32 %v1576_v9, %v15653_v29  ;;  %v10830_v20 = vpop.f32.mrb[23].mxu0  ;;  %v11106_v8 = vpop.f32.mrb[147].mxu1  ;;  %11405 = vmatmul.mubr.msk.f32.gmra.mrb[128].mxu0 %vm1169_vm1, %v3415_v31  ;;  %11458 = vmatmul.mubr.msk.f32.gmra.mrb[252].mxu1 %vm1169_vm1, %v3728_v34  ;;  %v2350_v21 = vadd.f32 %v19784_v52, %v2013_v4  ;;  %v19786_v29 = vld [vmem:[#allocation42_spill] sm:$0xff]  ;;  %v3418_v9 = vrot.slane %v15649_v62, 5  ;;  %v3417_v4 = vsel %vm2040_vm5, %v3414_v18, %v3416_v17 }
 0x344   :  { %11407 = vmatprep.mubr.msk.f32.mxu0 %vm13150_vm0, %v19571_v32  ;;  %11460 = vmatprep.mubr.msk.f32.mxu1 %vm13150_vm0, %v19571_v32  ;;  %v3731_v42 = vrot.slane %v19786_v29, 3  ;;  %v3730_v34 = vsel %vm3719_vm4, %v3727_v12, %v3729_v24 }
 0x345   :  { %v2014_v0 = vadd.f32 %v19785_v13, %v1577_v27  ;;  %v16148_v26 = vadd.f32 %v16052_v1, %v2350_v21  ;;  %v19787_v1 = vld [vmem:[#allocation156_spill] sm:$0xff]  ;;  %v19788_v21 = vld [vmem:[#allocation90_spill] sm:$0xff] }
 0x346   :  { %v1581_v31 = vpop.f32.mrb[24].mxu0  ;;  %v16152_v20 = vpop.f32.mrb[148].mxu1 }
 0x347   :  { %v1582_v8 = vadd.f32 %v1581_v31, %v15671_v33  ;;  %v10833_v52 = vpop.f32.mrb[25].mxu0  ;;  %v11109_v15 = vpop.f32.mrb[149].mxu1  ;;  %11408 = vmatmul.mubr.msk.f32.gmra.mrb[130].mxu0 %vm1169_vm1, %v3417_v4  ;;  %11461 = vmatmul.mubr.msk.f32.gmra.mrb[254].mxu1 %vm1169_vm1, %v3730_v34  ;;  %v2351_v27 = vadd.f32 %v19787_v1, %v2014_v0  ;;  %v19789_v33 = vld [vmem:[#allocation43_spill] sm:$0xff]  ;;  %v3419_v0 = vsel %vm2040_vm5, %v3416_v17, %v3418_v9 }
 0x348   :  { %11410 = vmatprep.mubr.msk.f32.mxu0 %vm13150_vm0, %v19571_v32  ;;  %11463 = vmatprep.mubr.msk.f32.mxu1 %vm13150_vm0, %v19571_v32  ;;  %v3733_v13 = vrot.slane %v19789_v33, 3  ;;  %v3420_v15 = vrot.slane %v15667_v59, 5  ;;  %v3732_v34 = vsel %vm3719_vm4, %v3729_v24, %v3731_v42 }
 0x349   :  { %v2015_v18 = vadd.f32 %v19788_v21, %v1582_v8  ;;  %v16166_v12 = vadd.f32 %v16074_v28, %v2351_v27  ;;  %v19790_v8 = vld [vmem:[#allocation93_spill] sm:$0xff] }
 0x34a   :  { %v1586_v31 = vpop.f32.mrb[26].mxu0  ;;  %v16170_v4 = vpop.f32.mrb[150].mxu1 }
 0x34b   :  { %v1587_v52 = vadd.f32 %v1586_v31, %v15689_v50  ;;  %v10836_v1 = vpop.f32.mrb[27].mxu0  ;;  %v11112_v62 = vpop.f32.mrb[151].mxu1  ;;  %11411 = vmatmul.mubr.msk.f32.gmra.mrb[132].mxu0 %vm1169_vm1, %v3419_v0  ;;  %11464 = vmatmul.mubr.msk.f32.gmra.mrb[0].mxu1 %vm1169_vm1, %v3732_v34  ;;  %v2352_v28 = vadd.f32 %v15617_v14, %v2015_v18  ;;  %v19791_v50 = vld [vmem:[#allocation44_spill] sm:$0xff]  ;;  %v3421_v14 = vsel %vm2040_vm5, %v3418_v9, %v3420_v15 }
 0x34c   :  { %11413 = vmatprep.mubr.msk.f32.mxu0 %vm13150_vm0, %v19571_v32  ;;  %11466 = vmatprep.mubr.msk.f32.mxu1 %vm13150_vm0, %v19571_v32  ;;  %v3735_v27 = vrot.slane %v19791_v50, 3  ;;  %v3422_v62 = vrot.slane %v15685_v2, 5  ;;  %v3734_v18 = vsel %vm3719_vm4, %v3731_v42, %v3733_v13 }
 0x34d   :  { %v2016_v17 = vadd.f32 %v19790_v8, %v1587_v52  ;;  %v16184_v24 = vadd.f32 %v16097_v10, %v2352_v28  ;;  %v19792_v52 = vld [vmem:[#allocation97_spill] sm:$0xff]  ;;  %v3424_v8 = vrot.slane %v15703_v3, 5 }
 0x34e   :  { %v1591_v21 = vpop.f32.mrb[28].mxu0  ;;  %v16188_v31 = vpop.f32.mrb[152].mxu1 }
 0x34f   :  { %v1592_v0 = vadd.f32 %v1591_v21, %v15707_v22  ;;  %v10839_v34 = vpop.f32.mrb[29].mxu0  ;;  %v11115_v1 = vpop.f32.mrb[153].mxu1  ;;  %11414 = vmatmul.mubr.msk.f32.gmra.mrb[134].mxu0 %vm1169_vm1, %v3421_v14  ;;  %11467 = vmatmul.mubr.msk.f32.gmra.mrb[2].mxu1 %vm1169_vm1, %v3734_v18  ;;  %v2353_v10 = vadd.f32 %v15636_v48, %v2016_v17  ;;  %v19793_v22 = vld [vmem:[#allocation45_spill] sm:$0xff]  ;;  %v3423_v48 = vsel %vm2040_vm5, %v3420_v15, %v3422_v62 }
 0x350   :  { %11416 = vmatprep.mubr.msk.f32.mxu0 %vm13150_vm0, %v19571_v32  ;;  %11469 = vmatprep.mubr.msk.f32.mxu1 %vm13150_vm0, %v19571_v32  ;;  %v3737_v28 = vrot.slane %v19793_v22, 3  ;;  %v3736_v17 = vsel %vm3719_vm4, %v3733_v13, %v3735_v27 }
 0x351   :  { %v2017_v9 = vadd.f32 %v19792_v52, %v1592_v0  ;;  %v16202_v42 = vadd.f32 %v16115_v11, %v2353_v10  ;;  %v19794_v0 = vld [vmem:[#allocation99_spill] sm:$0xff]  ;;  %v3426_v52 = vrot.slane %v15721_v19, 5  ;;  %v19839_v19 = vld [vmem:[#allocation28_spill] sm:$0xff] }
 0x352   :  { %v1596_v21 = vpop.f32.mrb[30].mxu0  ;;  %v16206_v14 = vpop.f32.mrb[154].mxu1 }
 0x353   :  { %v1597_v18 = vadd.f32 %v1596_v21, %v15725_v57  ;;  %v10842_v34 = vpop.f32.mrb[31].mxu0  ;;  %v11118_v1 = vpop.f32.mrb[155].mxu1  ;;  %11417 = vmatmul.mubr.msk.f32.gmra.mrb[136].mxu0 %vm1169_vm1, %v3423_v48  ;;  %11470 = vmatmul.mubr.msk.f32.gmra.mrb[4].mxu1 %vm1169_vm1, %v3736_v17  ;;  %v2354_v11 = vadd.f32 %v15655_v5, %v2017_v9  ;;  %v19795_v57 = vld [vmem:[#allocation46_spill] sm:$0xff]  ;;  %v3425_v5 = vsel %vm2040_vm5, %v3422_v62, %v3424_v8 }
 0x354   :  { %11419 = vmatprep.mubr.msk.f32.mxu0 %vm13150_vm0, %v19571_v32  ;;  %11472 = vmatprep.mubr.msk.f32.mxu1 %vm13150_vm0, %v19571_v32  ;;  %v3739_v10 = vrot.slane %v19795_v57, 3  ;;  %v3738_v9 = vsel %vm3719_vm4, %v3735_v27, %v3737_v28 }
 0x355   :  { %v2018_v15 = vadd.f32 %v19794_v0, %v1597_v18  ;;  %v16220_v13 = vadd.f32 %v16133_v23, %v2354_v11  ;;  %v19796_v18 = vld [vmem:[#allocation101_spill] sm:$0xff] }
 0x356   :  { %v1601_v21 = vpop.f32.mrb[32].mxu0  ;;  %v16224_v48 = vpop.f32.mrb[156].mxu1 }
 0x357   :  { %v1602_v17 = vadd.f32 %v1601_v21, %v15743_v49  ;;  %v10845_v34 = vpop.f32.mrb[33].mxu0  ;;  %v11121_v1 = vpop.f32.mrb[157].mxu1  ;;  %11420 = vmatmul.mubr.msk.f32.gmra.mrb[138].mxu0 %vm1169_vm1, %v3425_v5  ;;  %11473 = vmatmul.mubr.msk.f32.gmra.mrb[6].mxu1 %vm1169_vm1, %v3738_v9  ;;  %v2355_v23 = vadd.f32 %v15673_v61, %v2018_v15  ;;  %v3428_v49 = vrot.slane %v15739_v46, 5  ;;  %v3427_v21 = vsel %vm2040_vm5, %v3424_v8, %v3426_v52 }
 0x358   :  { %11422 = vmatprep.mubr.msk.f32.mxu0 %vm13150_vm0, %v19571_v32  ;;  %11475 = vmatprep.mubr.msk.f32.mxu1 %vm13150_vm0, %v19571_v32  ;;  %v3740_v61 = vsel %vm3719_vm4, %v3737_v28, %v3739_v10  ;;  %v19798_v34 = vld [vmem:[#allocation103_spill] sm:$0xff] }
 0x359   :  { %v2019_v62 = vadd.f32 %v19796_v18, %v1602_v17  ;;  %v16238_v27 = vadd.f32 %v16152_v20, %v2355_v23  ;;  %v19797_v17 = vld [vmem:[#allocation163_spill] sm:$0xff]  ;;  %v3429_v18 = vsel %vm2040_vm5, %v3426_v52, %v3428_v49  ;;  %v19802_v52 = vld [vmem:[#allocation105_spill] sm:$0xff] }
 0x35a   :  { %v1606_v11 = vpop.f32.mrb[34].mxu0  ;;  %v16241_v0 = vpop.f32.mrb[158].mxu1 }
 0x35b   :  { %v1607_v15 = vadd.f32 %v1606_v11, %v15761_v43  ;;  %v10848_v5 = vpop.f32.mrb[35].mxu0  ;;  %v11124_v9 = vpop.f32.mrb[159].mxu1  ;;  %11423 = vmatmul.mubr.msk.f32.gmra.mrb[140].mxu0 %vm1169_vm1, %v3427_v21  ;;  %11476 = vmatmul.mubr.msk.f32.gmra.mrb[8].mxu1 %vm1169_vm1, %v3740_v61  ;;  %v2356_v20 = vadd.f32 %v19797_v17, %v2019_v62  ;;  %v3430_v43 = vrot.slane %v15757_v60, 5  ;;  %v19799_v11 = vld [vmem:[#allocation2_spill] sm:$0xff]  ;;  %v19836_v60 = vld [vmem:[#allocation25_spill] sm:$0xff] }
 0x35c   :  { %11425 = vmatprep.mubr.msk.f32.mxu0 %vm13150_vm0, %v19571_v32  ;;  %11478 = vmatprep.mubr.msk.f32.mxu1 %vm13150_vm0, %v19571_v32  ;;  %v19800_v62 = vrot.slane %v19799_v11, 3 }
 0x35d   :  { %v2020_v8 = vadd.f32 %v19798_v34, %v1607_v15  ;;  %v16255_v28 = vadd.f32 %v16170_v4, %v2356_v20  ;;  %v19801_v4 = vld [vmem:[#allocation165_spill] sm:$0xff] }
 0x35e   :  { %v1611_v1 = vpop.f32.mrb[36].mxu0  ;;  %v16258_v23 = vpop.f32.mrb[160].mxu1  ;;  %v3742_v21 = vsel %vm3719_vm4, %v3739_v10, %v19800_v62 }
 0x35f   :  { %v1612_v61 = vadd.f32 %v1611_v1, %v15779_v7  ;;  %v10851_v5 = vpop.f32.mrb[37].mxu0  ;;  %v11127_v9 = vpop.f32.mrb[161].mxu1  ;;  %11426 = vmatmul.mubr.msk.f32.gmra.mrb[142].mxu0 %vm1169_vm1, %v3429_v18  ;;  %11479 = vmatmul.mubr.msk.f32.gmra.mrb[10].mxu1 %vm1169_vm1, %v3742_v21  ;;  %v2357_v15 = vadd.f32 %v19801_v4, %v2020_v8  ;;  %v3432_v7 = vrot.slane %v15775_v38, 5  ;;  %v3431_v1 = vsel %vm2040_vm5, %v3428_v49, %v3430_v43  ;;  %v19805_v49 = vld [vmem:[#allocation107_spill] sm:$0xff] }
 0x360   :  { %11428 = vmatprep.mubr.msk.f32.mxu0 %vm13150_vm0, %v19571_v32  ;;  %11481 = vmatprep.mubr.msk.f32.mxu1 %vm13150_vm0, %v19571_v32  ;;  %v19803_v5 = vld [vmem:[#allocation3_spill] sm:$0xff]  ;;  %v3434_v9 = vrot.slane %v15793_v39, 5 }
 0x361   :  { %v2021_v17 = vadd.f32 %v19802_v52, %v1612_v61  ;;  %v16274_v10 = vadd.f32 %v16188_v31, %v2357_v15  ;;  %v19804_v31 = vld [vmem:[#allocation167_spill] sm:$0xff]  ;;  %v3433_v52 = vsel %vm2040_vm5, %v3430_v43, %v3432_v7  ;;  %v19809_v43 = vld [vmem:[#allocation109_spill] sm:$0xff] }
 0x362   :  { %v1616_v20 = vpop.f32.mrb[38].mxu0  ;;  %v2584_v34 = vpop.f32.mrb[162].mxu1  ;;  %v19833_v39 = vld [vmem:[#allocation23_spill] sm:$0xff] }
 0x363   :  { %v1617_v18 = vadd.f32 %v1616_v20, %v15797_v30  ;;  %v16280_v8 = vadd.f32 %v2584_v34, %v15870_v36  ;;  %v10854_v62 = vpop.f32.mrb[39].mxu0  ;;  %v11130_v21 = vpop.f32.mrb[163].mxu1  ;;  %11429 = vmatmul.mubr.msk.f32.gmra.mrb[144].mxu0 %vm1169_vm1, %v3431_v1  ;;  %11482 = vmatmul.mubr.msk.f32.gmra.mrb[12].mxu1 %vm1169_vm1, %v19803_v5  ;;  %v2358_v61 = vadd.f32 %v19804_v31, %v2021_v17  ;;  %v19806_v20 = vld [vmem:[#allocation176_spill] sm:$0xff]  ;;  %v19810_v31 = vld [vmem:[#allocation175_spill] sm:$0xff] }
 0x364   :  { %11431 = vmatprep.mubr.msk.f32.mxu0 %vm13150_vm0, %v19571_v32  ;;  %11484 = vmatprep.mubr.msk.f32.mxu1 %vm13150_vm0, %v19571_v32  ;;  %v19807_v21 = vld [vmem:[#allocation5_spill] sm:$0xff] }
 0x365   :  { %v2022_v30 = vadd.f32 %v19805_v49, %v1617_v18  ;;  %v16292_v36 = vadd.f32 %v16206_v14, %v2358_v61  ;;  %v19808_v14 = vld [vmem:[#allocation169_spill] sm:$0xff]  ;;  %v3436_v61 = vrot.slane %v19810_v31, 5 }
 0x366   :  { %v1621_v4 = vpop.f32.mrb[40].mxu0  ;;  %v2589_v15 = vpop.f32.mrb[164].mxu1 }
 0x367   :  { %v1622_v34 = vadd.f32 %v1621_v4, %v19806_v20  ;;  %v16298_v17 = vadd.f32 %v2589_v15, %v15890_v63  ;;  %v10857_v1 = vpop.f32.mrb[41].mxu0  ;;  %v11133_v62 = vpop.f32.mrb[165].mxu1  ;;  %11432 = vmatmul.mubr.msk.f32.gmra.mrb[146].mxu0 %vm1169_vm1, %v3433_v52  ;;  %11485 = vmatmul.mubr.msk.f32.gmra.mrb[14].mxu1 %vm1169_vm1, %v19807_v21  ;;  %v2359_v18 = vadd.f32 %v19808_v14, %v2022_v30  ;;  %v19811_v52 = vld [vmem:[#allocation177_spill] sm:$0xff]  ;;  %v19812_v21 = vld [vmem:[#allocation7_spill] sm:$0xff] }
 0x368   :  { %11434 = vmatprep.mubr.msk.f32.mxu0 %vm13150_vm0, %v19571_v32  ;;  %11487 = vmatprep.mubr.msk.f32.mxu1 %vm13150_vm0, %v19571_v32  ;;  %v3435_v15 = vsel %vm2040_vm5, %v3432_v7, %v3434_v9  ;;  %v19814_v7 = vld [vmem:[#allocation111_spill] sm:$0xff] }
 0x369   :  { %v2023_v5 = vadd.f32 %v19809_v43, %v1622_v34  ;;  %v16310_v63 = vadd.f32 %v16224_v48, %v2359_v18  ;;  %v19813_v48 = vld [vmem:[#allocation171_spill] sm:$0xff] }
 0x36a   :  { %v1626_v49 = vpop.f32.mrb[42].mxu0  ;;  %v2594_v4 = vpop.f32.mrb[166].mxu1  ;;  %v19815_v18 = vld [vmem:[#allocation47_spill] sm:$0xff] }
 0x36b   :  { %v1627_v20 = vadd.f32 %v1626_v49, %v19811_v52  ;;  %v16316_v30 = vadd.f32 %v2594_v4, %v15908_v44  ;;  %v10860_v1 = vpop.f32.mrb[43].mxu0  ;;  %v11136_v62 = vpop.f32.mrb[167].mxu1  ;;  %11435 = vmatmul.mubr.msk.f32.gmra.mrb[148].mxu0 %vm1169_vm1, %v3435_v15  ;;  %11488 = vmatmul.mubr.msk.f32.gmra.mrb[16].mxu1 %vm1169_vm1, %v19812_v21  ;;  %v2360_v34 = vadd.f32 %v19813_v48, %v2023_v5  ;;  %v4058_v43 = vrot.slane %v19815_v18, 7  ;;  %v1065_v5 = vld [vmem:[%s19340_s3 + $0x160] sm:$0xff]  ;;  %v1066_v52 = vld [vmem:[%s19340_s3 + $0x168] sm:$0xff]  ;;  %v19816_v21 = vld [vmem:[#allocation9_spill] sm:$0xff] }
 0x36c   :  { %11437 = vmatprep.mubr.msk.f32.mxu0 %vm13150_vm0, %v19571_v32  ;;  %11490 = vmatprep.mubr.msk.f32.mxu1 %vm13150_vm0, %v19571_v32  ;;  %v3437_v15 = vsel %vm2040_vm5, %v3434_v9, %v3436_v61  ;;  %v19817_v9 = vld [vmem:[#allocation173_spill] sm:$0xff]  ;;  %v19818_v48 = vld [vmem:[#allocation34_spill] sm:$0xff] }
 0x36d   :  { %v2024_v14 = vadd.f32 %v19814_v7, %v1627_v20  ;;  %v16328_v44 = vadd.f32 %v16241_v0, %v2360_v34  ;;  %v4057_v34 = vrot.slane %v19818_v48, 7  ;;  %v19819_v7 = vld [vmem:[#allocation48_spill] sm:$0xff] }
 0x36e   :  { %v2599_v49 = vpop.f32.mrb[168].mxu1  ;;  %v2888_v4 = vpop.f32.mrb[44].mxu0 }
 0x36f   :  { %v16339_v1 = vadd.f32 %v2599_v49, %v15925_v53  ;;  %v16342_v0 = vadd.f32 %v2888_v4, %v16148_v26  ;;  %v11139_v20 = vpop.f32.mrb[169].mxu1  ;;  %v11183_v62 = vpop.f32.mrb[45].mxu0  ;;  %11438 = vmatmul.mubr.msk.f32.gmra.mrb[150].mxu0 %vm1169_vm1, %v3437_v15  ;;  %11491 = vmatmul.mubr.msk.f32.gmra.mrb[18].mxu1 %vm1169_vm1, %v19816_v21  ;;  %v2361_v61 = vadd.f32 %v19817_v9, %v2024_v14  ;;  %v4060_v49 = vrot.slane %v19819_v7, 7  ;;  %v1067_v14 = vld [vmem:[%s19340_s3 + $0x170] sm:$0xff]  ;;  %v19820_v9 = vld [vmem:[#allocation11_spill] sm:$0xff] }
 0x370   :  { %11493 = vmatprep.mubr.msk.f32.mxu1 %vm13150_vm0, %v19571_v32  ;;  %11537 = vmatprep.mubr.msk.f32.mxu0 %vm13150_vm0, %v19571_v32  ;;  %v12735_v26 = vpack.c.bf16 %v1066_v52, %v1065_v5  ;;  %v4059_v20 = vsel %vm4056_vm6, %v4057_v34, %v4058_v43  ;;  %v1068_v62 = vld [vmem:[%s19340_s3 + $0x178] sm:$0xff] }
 0x371   :  { %v16354_v53 = vadd.f32 %v16258_v23, %v2361_v61  ;;  %v12738_v61 = vpack.c.bf16 %v1068_v62, %v1067_v14 }
 0x372   :  { %v2604_v4 = vpop.f32.mrb[170].mxu1  ;;  %v2893_v15 = vpop.f32.mrb[46].mxu0 }
 0x373   :  { %v16365_v21 = vadd.f32 %v2604_v4, %v15942_v45  ;;  %v16368_v23 = vadd.f32 %v2893_v15, %v16166_v12  ;;  %v11142_v5 = vpop.f32.mrb[171].mxu1  ;;  %v11186_v52 = vpop.f32.mrb[47].mxu0  ;;  %11494 = vmatmul.mubr.msk.f32.gmra.mrb[20].mxu1 %vm1169_vm1, %v19820_v9  ;;  %11538 = vmatmul.mubr.msk.f32.vlgmr.msra.gmra.mrb[152].mxu0 %vm1169_vm1, %v4059_v20  ;;  %v19821_v45 = vld [vmem:[#allocation49_spill] sm:$0xff]  ;;  %v4061_v4 = vsel %vm4056_vm6, %v4058_v43, %v4060_v49  ;;  %v19823_v43 = vld [vmem:[#allocation50_spill] sm:$0xff] }
 0x374   :  { %11496 = vmatprep.mubr.msk.f32.mxu1 %vm13150_vm0, %v19571_v32  ;;  %11540 = vmatprep.mubr.msk.f32.mxu0 %vm13150_vm0, %v19571_v32  ;;  %v4062_v48 = vrot.slane %v19821_v45, 7  ;;  %v19822_v9 = vld [vmem:[#allocation13_spill] sm:$0xff] }
 0x375   :  { %12736 = vmatpush3.bf16.msra.mxu0 %v12735_v26 }
 0x376   :  { %v2609_v34 = vpop.f32.mrb[172].mxu1  ;;  %v2898_v12 = vpop.f32.mrb[48].mxu0  ;;  %12737 = vmatprep.subr.bf16.mxu0 %v19586_v55 }
 0x377   :  { %v16381_v15 = vadd.f32 %v2609_v34, %v15959_v35  ;;  %v16384_v20 = vadd.f32 %v2898_v12, %v16184_v24  ;;  %v11145_v5 = vpop.f32.mrb[173].mxu1  ;;  %v11189_v52 = vpop.f32.mrb[49].mxu0  ;;  %11497 = vmatmul.mubr.msk.f32.gmra.mrb[22].mxu1 %vm1169_vm1, %v19822_v9  ;;  %11541 = vmatmul.mubr.msk.f32.gmra.mrb[154].mxu0 %vm1169_vm1, %v4061_v4  ;;  %v4064_v35 = vrot.slane %v19823_v43, 7  ;;  %v4063_v24 = vsel %vm4056_vm6, %v4060_v49, %v4062_v48  ;;  %v19825_v49 = vld [vmem:[#allocation51_spill] sm:$0xff] }
 0x378   :  { %11499 = vmatprep.mubr.msk.f32.mxu1 %vm13150_vm0, %v19571_v32  ;;  %11543 = vmatprep.mubr.msk.f32.mxu0 %vm13150_vm0, %v19571_v32  ;;  %v19824_v5 = vld [vmem:[#allocation15_spill] sm:$0xff] }
 0x379   :  { %12739 = vmatpush3.bf16.msra.mxu0 %v12738_v61  ;;  %v4066_v61 = vrot.slane %v19825_v49, 7 }
 0x37a   :  { %v2614_v26 = vpop.f32.mrb[174].mxu1  ;;  %v2903_v14 = vpop.f32.mrb[50].mxu0  ;;  %12746 = vmatprep.subr.bf16.mxu0 %v19586_v55 }
 0x37b   :  { %v16397_v62 = vadd.f32 %v2614_v26, %v15976_v56  ;;  %v16400_v34 = vadd.f32 %v2903_v14, %v16202_v42  ;;  %v11148_v12 = vpop.f32.mrb[175].mxu1  ;;  %v11192_v4 = vpop.f32.mrb[51].mxu0  ;;  %11500 = vmatmul.mubr.msk.f32.gmra.mrb[24].mxu1 %vm1169_vm1, %v19824_v5  ;;  %11544 = vmatmul.mubr.msk.f32.gmra.mrb[156].mxu0 %vm1169_vm1, %v4063_v24  ;;  %v4065_v42 = vsel %vm4056_vm6, %v4062_v48, %v4064_v35  ;;  %v19827_v48 = vld [vmem:[#allocation52_spill] sm:$0xff] }
 0x37c   :  { %11502 = vmatprep.mubr.msk.f32.mxu1 %vm13150_vm0, %v19571_v32  ;;  %11546 = vmatprep.mubr.msk.f32.mxu0 %vm13150_vm0, %v19571_v32  ;;  %v19826_v12 = vld [vmem:[#allocation17_spill] sm:$0xff]  ;;  %v4068_v4 = vrot.slane %v19827_v48, 7 }
 0x37e   :  { %v2619_v56 = vpop.f32.mrb[176].mxu1  ;;  %v2908_v52 = vpop.f32.mrb[52].mxu0 }
 0x37f   :  { %v16412_v9 = vadd.f32 %v2619_v56, %v15993_v58  ;;  %v16415_v26 = vadd.f32 %v2908_v52, %v16220_v13  ;;  %v11151_v14 = vpop.f32.mrb[177].mxu1  ;;  %v11195_v24 = vpop.f32.mrb[53].mxu0  ;;  %11503 = vmatmul.mubr.msk.f32.gmra.mrb[26].mxu1 %vm1169_vm1, %v19826_v12  ;;  %11547 = vmatmul.mubr.msk.f32.gmra.mrb[158].mxu0 %vm1169_vm1, %v4065_v42  ;;  %v4067_v13 = vsel %vm4056_vm6, %v4064_v35, %v4066_v61  ;;  %v19829_v35 = vld [vmem:[#allocation53_spill] sm:$0xff] }
 0x380   :  { %11505 = vmatprep.mubr.msk.f32.mxu1 %vm13150_vm0, %v19571_v32  ;;  %11549 = vmatprep.mubr.msk.f32.mxu0 %vm13150_vm0, %v19571_v32  ;;  %v19828_v24 = vld [vmem:[#allocation19_spill] sm:$0xff]  ;;  %v4070_v12 = vrot.slane %v19829_v35, 7 }
 0x382   :  { %v2624_v58 = vpop.f32.mrb[178].mxu1  ;;  %v2913_v5 = vpop.f32.mrb[54].mxu0 }
 0x383   :  { %v16427_v56 = vadd.f32 %v2624_v58, %v16010_v25  ;;  %v16430_v52 = vadd.f32 %v2913_v5, %v16238_v27  ;;  %v11154_v14 = vpop.f32.mrb[179].mxu1  ;;  %v11198_v42 = vpop.f32.mrb[55].mxu0  ;;  %11506 = vmatmul.mubr.msk.f32.gmra.mrb[28].mxu1 %vm1169_vm1, %v19828_v24  ;;  %11550 = vmatmul.mubr.msk.f32.gmra.mrb[160].mxu0 %vm1169_vm1, %v4067_v13  ;;  %v4069_v27 = vsel %vm4056_vm6, %v4066_v61, %v4068_v4  ;;  %v19830_v24 = vld [vmem:[#allocation21_spill] sm:$0xff]  ;;  %v19831_v61 = vld [vmem:[#allocation54_spill] sm:$0xff] }
 0x384   :  { %11508 = vmatprep.mubr.msk.f32.mxu1 %vm13150_vm0, %v19571_v32  ;;  %11552 = vmatprep.mubr.msk.f32.mxu0 %vm13150_vm0, %v19571_v32  ;;  %v4072_v31 = vrot.slane %v19831_v61, 7 }
 0x386   :  { %v2629_v25 = vpop.f32.mrb[180].mxu1  ;;  %v2918_v58 = vpop.f32.mrb[56].mxu0 }
 0x387   :  { %v16442_v5 = vadd.f32 %v2629_v25, %v16027_v37  ;;  %v16445_v14 = vadd.f32 %v2918_v58, %v16255_v28  ;;  %v11157_v42 = vpop.f32.mrb[181].mxu1  ;;  %v11201_v13 = vpop.f32.mrb[57].mxu0  ;;  %11509 = vmatmul.mubr.msk.f32.gmra.mrb[30].mxu1 %vm1169_vm1, %v19830_v24  ;;  %11553 = vmatmul.mubr.msk.f32.gmra.mrb[162].mxu0 %vm1169_vm1, %v4069_v27  ;;  %v4071_v28 = vsel %vm4056_vm6, %v4068_v4, %v4070_v12  ;;  %v19832_v58 = vld [vmem:[#allocation115_spill] sm:$0xff] }
 0x388   :  { %11511 = vmatprep.mubr.msk.f32.mxu1 %vm13150_vm0, %v19571_v32  ;;  %11555 = vmatprep.mubr.msk.f32.mxu0 %vm13150_vm0, %v19571_v32  ;;  %v19834_v4 = vld [vmem:[#allocation55_spill] sm:$0xff] }
 0x389   :  { %v4074_v38 = vrot.slane %v19834_v4, 7 }
 0x38a   :  { %v2634_v37 = vpop.f32.mrb[182].mxu1  ;;  %v2923_v25 = vpop.f32.mrb[58].mxu0 }
 0x38b   :  { %v16457_v42 = vadd.f32 %v2634_v37, %v19832_v58  ;;  %v16460_v13 = vadd.f32 %v2923_v25, %v16274_v10  ;;  %v11160_v24 = vpop.f32.mrb[183].mxu1  ;;  %v11204_v27 = vpop.f32.mrb[59].mxu0  ;;  %11512 = vmatmul.mubr.msk.f32.gmra.mrb[32].mxu1 %vm1169_vm1, %v19833_v39  ;;  %11556 = vmatmul.mubr.msk.f32.gmra.mrb[164].mxu0 %vm1169_vm1, %v4071_v28  ;;  %v4073_v10 = vsel %vm4056_vm6, %v4070_v12, %v4072_v31  ;;  %v19835_v25 = vld [vmem:[#allocation63_spill] sm:$0xff]  ;;  %v19837_v12 = vld [vmem:[#allocation56_spill] sm:$0xff] }
 0x38c   :  { %11514 = vmatprep.mubr.msk.f32.mxu1 %vm13150_vm0, %v19571_v32  ;;  %11558 = vmatprep.mubr.msk.f32.mxu0 %vm13150_vm0, %v19571_v32  ;;  %v4076_v46 = vrot.slane %v19837_v12, 7 }
 0x38e   :  { %v2639_v37 = vpop.f32.mrb[184].mxu1  ;;  %v2928_v58 = vpop.f32.mrb[60].mxu0 }
 0x38f   :  { %v16472_v24 = vadd.f32 %v2639_v37, %v19835_v25  ;;  %v16475_v27 = vadd.f32 %v2928_v58, %v16292_v36  ;;  %v11163_v39 = vpop.f32.mrb[185].mxu1  ;;  %v11207_v28 = vpop.f32.mrb[61].mxu0  ;;  %11515 = vmatmul.mubr.msk.f32.gmra.mrb[34].mxu1 %vm1169_vm1, %v19836_v60  ;;  %11559 = vmatmul.mubr.msk.f32.gmra.mrb[166].mxu0 %vm1169_vm1, %v4073_v10  ;;  %v4075_v36 = vsel %vm4056_vm6, %v4072_v31, %v4074_v38  ;;  %v19838_v58 = vld [vmem:[#allocation118_spill] sm:$0xff]  ;;  %v19840_v31 = vld [vmem:[#allocation57_spill] sm:$0xff] }
 0x390   :  { %11517 = vmatprep.mubr.msk.f32.mxu1 %vm13150_vm0, %v19571_v32  ;;  %11561 = vmatprep.mubr.msk.f32.mxu0 %vm13150_vm0, %v19571_v32  ;;  %v4078_v3 = vrot.slane %v19840_v31, 7 }
 0x392   :  { %v2644_v37 = vpop.f32.mrb[186].mxu1  ;;  %v2933_v25 = vpop.f32.mrb[62].mxu0 }
 0x393   :  { %v16487_v39 = vadd.f32 %v2644_v37, %v19838_v58  ;;  %v16490_v28 = vadd.f32 %v2933_v25, %v16310_v63  ;;  %v11166_v60 = vpop.f32.mrb[187].mxu1  ;;  %v11210_v10 = vpop.f32.mrb[63].mxu0  ;;  %11518 = vmatmul.mubr.msk.f32.gmra.mrb[36].mxu1 %vm1169_vm1, %v19839_v19  ;;  %11562 = vmatmul.mubr.msk.f32.gmra.mrb[168].mxu0 %vm1169_vm1, %v4075_v36  ;;  %v4077_v63 = vsel %vm4056_vm6, %v4074_v38, %v4076_v46  ;;  %v19842_v38 = vld [vmem:[#allocation58_spill] sm:$0xff] }
 0x394   :  { %11520 = vmatprep.mubr.msk.f32.mxu1 %vm13150_vm0, %v19571_v32  ;;  %11564 = vmatprep.mubr.msk.f32.mxu0 %vm13150_vm0, %v19571_v32  ;;  %v19841_v10 = vld [vmem:[#allocation31_spill] sm:$0xff]  ;;  %v4080_v2 = vrot.slane %v19842_v38, 7 }
 0x396   :  { %v2649_v37 = vpop.f32.mrb[188].mxu1  ;;  %v2938_v58 = vpop.f32.mrb[64].mxu0 }
 0x397   :  { %v16502_v25 = vadd.f32 %v2649_v37, %v16107_v47  ;;  %v16505_v60 = vadd.f32 %v2938_v58, %v16328_v44  ;;  %v11169_v19 = vpop.f32.mrb[189].mxu1  ;;  %v11213_v36 = vpop.f32.mrb[65].mxu0  ;;  %11521 = vmatmul.mubr.msk.f32.gmra.mrb[38].mxu1 %vm1169_vm1, %v19841_v10  ;;  %11565 = vmatmul.mubr.msk.f32.gmra.mrb[170].mxu0 %vm1169_vm1, %v4077_v63  ;;  %v4079_v44 = vsel %vm4056_vm6, %v4076_v46, %v4078_v3  ;;  %v19843_v10 = vld [vmem:[#allocation35_spill] sm:$0xff]  ;;  %v19844_v46 = vld [vmem:[#allocation30_spill] sm:$0xff] }
 0x398   :  { %11523 = vmatprep.mubr.msk.f32.mxu1 %vm13150_vm0, %v19571_v32  ;;  %11567 = vmatprep.mubr.msk.f32.mxu0 %vm13150_vm0, %v19571_v32  ;;  %v4394_v59 = vrot.slane %v19844_v46, 4 }
 0x39a   :  { %v2654_v47 = vpop.f32.mrb[190].mxu1  ;;  %v2943_v37 = vpop.f32.mrb[66].mxu0 }
 0x39b   :  { %v16517_v58 = vadd.f32 %v2654_v47, %v16125_v40  ;;  %v16520_v19 = vadd.f32 %v2943_v37, %v16354_v53  ;;  %v11172_v36 = vpop.f32.mrb[191].mxu1  ;;  %v11216_v63 = vpop.f32.mrb[67].mxu0  ;;  %11524 = vmatmul.mubr.msk.f32.gmra.mrb[40].mxu1 %vm1169_vm1, %v19843_v10  ;;  %11568 = vmatmul.mubr.msk.f32.gmra.mrb[172].mxu0 %vm1169_vm1, %v4079_v44  ;;  %v19845_v40 = vld [vmem:[#allocation59_spill] sm:$0xff]  ;;  %v4081_v37 = vsel %vm4056_vm6, %v4078_v3, %v4080_v2 }
 0x39c   :  { %11526 = vmatprep.mubr.msk.f32.mxu1 %vm13150_vm0, %v19571_v32  ;;  %11570 = vmatprep.mubr.msk.f32.mxu0 %vm13150_vm0, %v19571_v32  ;;  %v4082_v47 = vrot.slane %v19845_v40, 7  ;;  %v1069_v36 = vld [vmem:[%s19340_s3 + $0x180] sm:$0xff]  ;;  %v1070_v44 = vld [vmem:[%s19340_s3 + $0x188] sm:$0xff] }
 0x39d   :  { %v19846_v40 = vld [vmem:[#allocation39_spill] sm:$0xff] }
 0x39e   :  { %v2948_v51 = vpop.f32.mrb[68].mxu0  ;;  %v3222_v53 = vpop.f32.mrb[192].mxu1  ;;  %v19847_v3 = vld [vmem:[#allocation27_spill] sm:$0xff]  ;;  %v4083_v12 = vsel %vm4056_vm6, %v4080_v2, %v4082_v47 }
 0x39f   :  { %v16539_v63 = vadd.f32 %v2948_v51, %v16280_v8  ;;  %v16542_v10 = vadd.f32 %v3222_v53, %v16342_v0  ;;  %v11219_v46 = vpop.f32.mrb[69].mxu0  ;;  %v11272_v41 = vpop.f32.mrb[193].mxu1  ;;  %11527 = vmatmul.mubr.msk.f32.gmra.mrb[42].mxu1 %vm1169_vm1, %v19846_v40  ;;  %11571 = vmatmul.mubr.msk.f32.gmra.mrb[174].mxu0 %vm1169_vm1, %v4081_v37  ;;  %v4393_v38 = vrot.slane %v19847_v3, 4  ;;  %v12741_v51 = vpack.c.bf16 %v1070_v44, %v1069_v36  ;;  %v19848_v8 = vld [vmem:[#allocation33_spill] sm:$0xff]  ;;  %v19849_v0 = vld [vmem:[#allocation60_spill] sm:$0xff] }
 0x3a0   :  { %11573 = vmatprep.mubr.msk.f32.mxu0 %vm13150_vm0, %v19571_v32  ;;  %11626 = vmatprep.mubr.msk.f32.mxu1 %vm13150_vm0, %v19571_v32  ;;  %v4396_v31 = vrot.slane %v19848_v8, 4  ;;  %v4084_v53 = vrot.slane %v19849_v0, 7  ;;  %v1071_v37 = vld [vmem:[%s19340_s3 + $0x190] sm:$0xff]  ;;  %v1072_v3 = vld [vmem:[%s19340_s3 + $0x198] sm:$0xff] }
 0x3a1   :  { %v4395_v40 = vsel %vm1113_vm3, %v4393_v38, %v4394_v59  ;;  %v12744_v2 = vpack.c.bf16 %v1072_v3, %v1071_v37  ;;  %v19850_v38 = vld [vmem:[#allocation61_spill] sm:$0xff] }
 0x3a2   :  { %v2953_v46 = vpop.f32.mrb[70].mxu0  ;;  %v3227_v41 = vpop.f32.mrb[194].mxu1 }
 0x3a3   :  { %v16563_v36 = vadd.f32 %v2953_v46, %v16298_v17  ;;  %v16566_v44 = vadd.f32 %v3227_v41, %v16368_v23  ;;  %v11222_v8 = vpop.f32.mrb[71].mxu0  ;;  %v11275_v0 = vpop.f32.mrb[195].mxu1  ;;  %11574 = vmatmul.mubr.msk.f32.gmra.mrb[176].mxu0 %vm1169_vm1, %v4083_v12  ;;  %11627 = vmatmul.mubr.msk.f32.vlgmr.msra.gmra.mrb[44].mxu1 %vm1169_vm1, %v4395_v40  ;;  %v4398_v17 = vrot.slane %v19778_v16, 4  ;;  %v4086_v46 = vrot.slane %v19850_v38, 7  ;;  %v19851_v16 = vld [vmem:[#allocation62_spill] sm:$0xff] }
 0x3a4   :  { %11576 = vmatprep.mubr.msk.f32.mxu0 %vm13150_vm0, %v19571_v32  ;;  %11629 = vmatprep.mubr.msk.f32.mxu1 %vm13150_vm0, %v19571_v32  ;;  %v4085_v0 = vsel %vm4056_vm6, %v4082_v47, %v4084_v53  ;;  %v4397_v12 = vsel %vm1113_vm3, %v4394_v59, %v4396_v31  ;;  %v4400_v59 = vrot.slane %v19781_v54, 4  ;;  %v4402_v54 = vrot.slane %v19783_v6, 4 }
 0x3a5   :  { %12742 = vmatpush3.bf16.msra.mxu1 %v12741_v51  ;;  %v4087_v3 = vsel %vm4056_vm6, %v4084_v53, %v4086_v46  ;;  %v4404_v6 = vrot.slane %v19786_v29, 4  ;;  %v4406_v29 = vrot.slane %v19789_v33, 4  ;;  %v4408_v33 = vrot.slane %v19791_v50, 4 }
 0x3a6   :  { %v2958_v23 = vpop.f32.mrb[72].mxu0  ;;  %v3232_v41 = vpop.f32.mrb[196].mxu1  ;;  %12743 = vmatprep.subr.bf16.mxu1 %v19586_v55  ;;  %v4410_v50 = vrot.slane %v19793_v22, 4  ;;  %v4412_v22 = vrot.slane %v19795_v57, 4  ;;  %v19858_v57 = vld [vmem:[#allocation76_spill] sm:$0xff] }
 0x3a7   :  { %v16580_v40 = vadd.f32 %v2958_v23, %v16316_v30  ;;  %v16583_v8 = vadd.f32 %v3232_v41, %v16384_v20  ;;  %v11225_v51 = vpop.f32.mrb[73].mxu0  ;;  %v11278_v37 = vpop.f32.mrb[197].mxu1  ;;  %11577 = vmatmul.mubr.msk.f32.gmra.mrb[178].mxu0 %vm1169_vm1, %v4085_v0  ;;  %11630 = vmatmul.mubr.msk.f32.gmra.mrb[46].mxu1 %vm1169_vm1, %v4397_v12  ;;  %v4088_v30 = vrot.slane %v19851_v16, 7  ;;  %v4399_v23 = vsel %vm1113_vm3, %v4396_v31, %v4398_v17  ;;  %v19852_v31 = vld [vmem:[#allocation64_spill] sm:$0xff] }
 0x3a8   :  { %11579 = vmatprep.mubr.msk.f32.mxu0 %vm13150_vm0, %v19571_v32  ;;  %11632 = vmatprep.mubr.msk.f32.mxu1 %vm13150_vm0, %v19571_v32  ;;  %v4401_v37 = vsel %vm1113_vm3, %v4398_v17, %v4400_v59  ;;  %v19853_v17 = vld [vmem:[#allocation66_spill] sm:$0xff] }
 0x3a9   :  { %12745 = vmatpush3.bf16.msra.mxu1 %v12744_v2 }
 0x3aa   :  { %v2963_v47 = vpop.f32.mrb[74].mxu0  ;;  %v3237_v20 = vpop.f32.mrb[198].mxu1  ;;  %12752 = vmatprep.subr.bf16.mxu1 %v19586_v55 }
 0x3ab   :  { %v16597_v41 = vadd.f32 %v2963_v47, %v16339_v1  ;;  %v16600_v0 = vadd.f32 %v3237_v20, %v16400_v34  ;;  %v11228_v12 = vpop.f32.mrb[75].mxu0  ;;  %v11281_v2 = vpop.f32.mrb[199].mxu1  ;;  %11580 = vmatmul.mubr.msk.f32.gmra.mrb[180].mxu0 %vm1169_vm1, %v4087_v3  ;;  %11633 = vmatmul.mubr.msk.f32.gmra.mrb[48].mxu1 %vm1169_vm1, %v4399_v23  ;;  %v4090_v1 = vrot.slane %v19852_v31, 7  ;;  %v4089_v34 = vsel %vm4056_vm6, %v4086_v46, %v4088_v30 }
 0x3ac   :  { %11582 = vmatprep.mubr.msk.f32.mxu0 %vm13150_vm0, %v19571_v32  ;;  %11635 = vmatprep.mubr.msk.f32.mxu1 %vm13150_vm0, %v19571_v32  ;;  %v4403_v2 = vsel %vm1113_vm3, %v4400_v59, %v4402_v54  ;;  %v19854_v59 = vld [vmem:[#allocation68_spill] sm:$0xff] }
 0x3ae   :  { %v2968_v53 = vpop.f32.mrb[76].mxu0  ;;  %v3242_v51 = vpop.f32.mrb[200].mxu1 }
 0x3af   :  { %v16613_v47 = vadd.f32 %v2968_v53, %v16365_v21  ;;  %v16616_v20 = vadd.f32 %v3242_v51, %v16415_v26  ;;  %v11231_v3 = vpop.f32.mrb[77].mxu0  ;;  %v11284_v23 = vpop.f32.mrb[201].mxu1  ;;  %11583 = vmatmul.mubr.msk.f32.gmra.mrb[182].mxu0 %vm1169_vm1, %v4089_v34  ;;  %11636 = vmatmul.mubr.msk.f32.gmra.mrb[50].mxu1 %vm1169_vm1, %v4401_v37  ;;  %v4092_v21 = vrot.slane %v19853_v17, 7  ;;  %v4091_v26 = vsel %vm4056_vm6, %v4088_v30, %v4090_v1 }
 0x3b0   :  { %11585 = vmatprep.mubr.msk.f32.mxu0 %vm13150_vm0, %v19571_v32  ;;  %11638 = vmatprep.mubr.msk.f32.mxu1 %vm13150_vm0, %v19571_v32  ;;  %v4405_v23 = vsel %vm1113_vm3, %v4402_v54, %v4404_v6  ;;  %v19855_v54 = vld [vmem:[#allocation70_spill] sm:$0xff] }
 0x3b2   :  { %v2973_v46 = vpop.f32.mrb[78].mxu0  ;;  %v3247_v12 = vpop.f32.mrb[202].mxu1 }
 0x3b3   :  { %v16629_v53 = vadd.f32 %v2973_v46, %v16381_v15  ;;  %v16632_v51 = vadd.f32 %v3247_v12, %v16430_v52  ;;  %v11234_v34 = vpop.f32.mrb[79].mxu0  ;;  %v11287_v37 = vpop.f32.mrb[203].mxu1  ;;  %11586 = vmatmul.mubr.msk.f32.gmra.mrb[184].mxu0 %vm1169_vm1, %v4091_v26  ;;  %11639 = vmatmul.mubr.msk.f32.gmra.mrb[52].mxu1 %vm1169_vm1, %v4403_v2  ;;  %v4094_v15 = vrot.slane %v19854_v59, 7  ;;  %v4093_v52 = vsel %vm4056_vm6, %v4090_v1, %v4092_v21 }
 0x3b4   :  { %11588 = vmatprep.mubr.msk.f32.mxu0 %vm13150_vm0, %v19571_v32  ;;  %11641 = vmatprep.mubr.msk.f32.mxu1 %vm13150_vm0, %v19571_v32  ;;  %v4407_v37 = vsel %vm1113_vm3, %v4404_v6, %v4406_v29  ;;  %v19856_v6 = vld [vmem:[#allocation72_spill] sm:$0xff] }
 0x3b6   :  { %v2978_v30 = vpop.f32.mrb[80].mxu0  ;;  %v3252_v3 = vpop.f32.mrb[204].mxu1 }
 0x3b7   :  { %v16645_v46 = vadd.f32 %v2978_v30, %v16397_v62  ;;  %v16648_v12 = vadd.f32 %v3252_v3, %v16445_v14  ;;  %v11237_v26 = vpop.f32.mrb[81].mxu0  ;;  %v11290_v2 = vpop.f32.mrb[205].mxu1  ;;  %11589 = vmatmul.mubr.msk.f32.gmra.mrb[186].mxu0 %vm1169_vm1, %v4093_v52  ;;  %11642 = vmatmul.mubr.msk.f32.gmra.mrb[54].mxu1 %vm1169_vm1, %v4405_v23  ;;  %v4096_v62 = vrot.slane %v19855_v54, 7  ;;  %v4095_v14 = vsel %vm4056_vm6, %v4092_v21, %v4094_v15 }
 0x3b8   :  { %11591 = vmatprep.mubr.msk.f32.mxu0 %vm13150_vm0, %v19571_v32  ;;  %11644 = vmatprep.mubr.msk.f32.mxu1 %vm13150_vm0, %v19571_v32  ;;  %v4098_v21 = vrot.slane %v19856_v6, 7 }
 0x3ba   :  { %v2983_v1 = vpop.f32.mrb[82].mxu0  ;;  %v3257_v34 = vpop.f32.mrb[206].mxu1 }
 0x3bb   :  { %v11240_v30 = vpop.f32.mrb[83].mxu0  ;;  %v11293_v3 = vpop.f32.mrb[207].mxu1  ;;  %11592 = vmatmul.mubr.msk.f32.gmra.mrb[188].mxu0 %vm1169_vm1, %v4095_v14  ;;  %11645 = vmatmul.mubr.msk.f32.gmra.mrb[56].mxu1 %vm1169_vm1, %v4407_v37  ;;  %v16663_v52 = vadd.f32 %v2983_v1, %v16412_v9  ;;  %v16666_v23 = vadd.f32 %v3257_v34, %v16460_v13  ;;  %v4097_v14 = vsel %vm4056_vm6, %v4094_v15, %v4096_v62 }
 0x3bc   :  { %11594 = vmatprep.mubr.msk.f32.mxu0 %vm13150_vm0, %v19571_v32  ;;  %11647 = vmatprep.mubr.msk.f32.mxu1 %vm13150_vm0, %v19571_v32  ;;  %v4409_v9 = vsel %vm1113_vm3, %v4406_v29, %v4408_v33  ;;  %v19857_v29 = vld [vmem:[#allocation74_spill] sm:$0xff] }
 0x3bd   :  { %v4100_v15 = vrot.slane %v19857_v29, 7 }
 0x3be   :  { %v2988_v26 = vpop.f32.mrb[84].mxu0  ;;  %v3262_v2 = vpop.f32.mrb[208].mxu1 }
 0x3bf   :  { %v11243_v1 = vpop.f32.mrb[85].mxu0  ;;  %v11296_v37 = vpop.f32.mrb[209].mxu1  ;;  %11595 = vmatmul.mubr.msk.f32.gmra.mrb[190].mxu0 %vm1169_vm1, %v4097_v14  ;;  %11648 = vmatmul.mubr.msk.f32.gmra.mrb[58].mxu1 %vm1169_vm1, %v4409_v9  ;;  %v16679_v13 = vadd.f32 %v2988_v26, %v16427_v56  ;;  %v16682_v34 = vadd.f32 %v3262_v2, %v16475_v27  ;;  %v4099_v14 = vsel %vm4056_vm6, %v4096_v62, %v4098_v21 }
 0x3c0   :  { %11597 = vmatprep.mubr.msk.f32.mxu0 %vm13150_vm0, %v19571_v32  ;;  %11650 = vmatprep.mubr.msk.f32.mxu1 %vm13150_vm0, %v19571_v32  ;;  %v4411_v56 = vsel %vm1113_vm3, %v4408_v33, %v4410_v50  ;;  %v4102_v33 = vrot.slane %v19858_v57, 7  ;;  %v4101_v37 = vsel %vm4056_vm6, %v4098_v21, %v4100_v15  ;;  %v19859_v21 = vld [vmem:[#allocation78_spill] sm:$0xff] }
 0x3c2   :  { %v2993_v30 = vpop.f32.mrb[86].mxu0  ;;  %v3267_v3 = vpop.f32.mrb[210].mxu1 }
 0x3c3   :  { %v11246_v26 = vpop.f32.mrb[87].mxu0  ;;  %v11299_v9 = vpop.f32.mrb[211].mxu1  ;;  %11598 = vmatmul.mubr.msk.f32.gmra.mrb[192].mxu0 %vm1169_vm1, %v4099_v14  ;;  %11651 = vmatmul.mubr.msk.f32.gmra.mrb[60].mxu1 %vm1169_vm1, %v4411_v56  ;;  %v16695_v27 = vadd.f32 %v2993_v30, %v16442_v5  ;;  %v16698_v2 = vadd.f32 %v3267_v3, %v16490_v28  ;;  %v4413_v14 = vsel %vm1113_vm3, %v4410_v50, %v4412_v22  ;;  %v4104_v50 = vrot.slane %v19859_v21, 7 }
 0x3c4   :  { %11600 = vmatprep.mubr.msk.f32.mxu0 %vm13150_vm0, %v19571_v32  ;;  %11653 = vmatprep.mubr.msk.f32.mxu1 %vm13150_vm0, %v19571_v32  ;;  %v4103_v9 = vsel %vm4056_vm6, %v4100_v15, %v4102_v33 }
 0x3c6   :  { %v2998_v62 = vpop.f32.mrb[88].mxu0  ;;  %v3272_v1 = vpop.f32.mrb[212].mxu1 }
 0x3c7   :  { %v11249_v56 = vpop.f32.mrb[89].mxu0  ;;  %v11302_v5 = vpop.f32.mrb[213].mxu1  ;;  %11601 = vmatmul.mubr.msk.f32.gmra.mrb[194].mxu0 %vm1169_vm1, %v4101_v37  ;;  %11654 = vmatmul.mubr.msk.f32.gmra.mrb[62].mxu1 %vm1169_vm1, %v4413_v14  ;;  %v16710_v28 = vadd.f32 %v2998_v62, %v16457_v42  ;;  %v16713_v30 = vadd.f32 %v3272_v1, %v16505_v60  ;;  %v19860_v37 = vrot.slane %v19799_v11, 4  ;;  %v19861_v11 = vld [vmem:[#allocation80_spill] sm:$0xff] }
 0x3c8   :  { %11603 = vmatprep.mubr.msk.f32.mxu0 %vm13150_vm0, %v19571_v32  ;;  %11656 = vmatprep.mubr.msk.f32.mxu1 %vm13150_vm0, %v19571_v32  ;;  %v4105_v5 = vsel %vm4056_vm6, %v4102_v33, %v4104_v50  ;;  %v19863_v33 = vld [vmem:[#allocation82_spill] sm:$0xff] }
 0x3c9   :  { %v4415_v42 = vsel %vm1113_vm3, %v4412_v22, %v19860_v37  ;;  %v4106_v22 = vrot.slane %v19861_v11, 7 }
 0x3ca   :  { %v3003_v3 = vpop.f32.mrb[90].mxu0  ;;  %v3277_v26 = vpop.f32.mrb[214].mxu1 }
 0x3cb   :  { %v11252_v62 = vpop.f32.mrb[91].mxu0  ;;  %v11305_v14 = vpop.f32.mrb[215].mxu1  ;;  %11604 = vmatmul.mubr.msk.f32.gmra.mrb[196].mxu0 %vm1169_vm1, %v4103_v9  ;;  %11657 = vmatmul.mubr.msk.f32.gmra.mrb[64].mxu1 %vm1169_vm1, %v4415_v42  ;;  %v16727_v60 = vadd.f32 %v3003_v3, %v16472_v24  ;;  %v16730_v1 = vadd.f32 %v3277_v26, %v16520_v19  ;;  %v19862_v24 = vld [vmem:[#allocation4_spill] sm:$0xff]  ;;  %v4108_v26 = vrot.slane %v19863_v33, 7 }
 0x3cc   :  { %11606 = vmatprep.mubr.msk.f32.mxu0 %vm13150_vm0, %v19571_v32  ;;  %11659 = vmatprep.mubr.msk.f32.mxu1 %vm13150_vm0, %v19571_v32  ;;  %v4107_v14 = vsel %vm4056_vm6, %v4104_v50, %v4106_v22  ;;  %v19865_v50 = vld [vmem:[#allocation86_spill] sm:$0xff] }
 0x3ce   :  { %v3008_v15 = vpop.f32.mrb[92].mxu0  ;;  %v3282_v56 = vpop.f32.mrb[216].mxu1 }
 0x3cf   :  { %v11255_v9 = vpop.f32.mrb[93].mxu0  ;;  %v11308_v37 = vpop.f32.mrb[217].mxu1  ;;  %11607 = vmatmul.mubr.msk.f32.gmra.mrb[198].mxu0 %vm1169_vm1, %v4105_v5  ;;  %11660 = vmatmul.mubr.msk.f32.gmra.mrb[66].mxu1 %vm1169_vm1, %v19862_v24  ;;  %v16742_v19 = vadd.f32 %v3008_v15, %v16487_v39  ;;  %v16745_v3 = vadd.f32 %v3282_v56, %v16539_v63  ;;  %v19864_v39 = vld [vmem:[#allocation6_spill] sm:$0xff]  ;;  %v4110_v56 = vrot.slane %v19865_v50, 7 }
 0x3d0   :  { %11609 = vmatprep.mubr.msk.f32.mxu0 %vm13150_vm0, %v19571_v32  ;;  %11662 = vmatprep.mubr.msk.f32.mxu1 %vm13150_vm0, %v19571_v32 }
 0x3d2   :  { %v3013_v42 = vpop.f32.mrb[94].mxu0  ;;  %v3287_v62 = vpop.f32.mrb[218].mxu1 }
 0x3d3   :  { %v11258_v5 = vpop.f32.mrb[95].mxu0  ;;  %v11311_v9 = vpop.f32.mrb[219].mxu1  ;;  %11610 = vmatmul.mubr.msk.f32.gmra.mrb[200].mxu0 %vm1169_vm1, %v4107_v14  ;;  %11663 = vmatmul.mubr.msk.f32.gmra.mrb[68].mxu1 %vm1169_vm1, %v19864_v39  ;;  %v16757_v63 = vadd.f32 %v3013_v42, %v16502_v25  ;;  %v16760_v15 = vadd.f32 %v3287_v62, %v16563_v36  ;;  %v4109_v14 = vsel %vm4056_vm6, %v4106_v22, %v4108_v26  ;;  %v19866_v25 = vld [vmem:[#allocation8_spill] sm:$0xff] }
 0x3d4   :  { %11612 = vmatprep.mubr.msk.f32.mxu0 %vm13150_vm0, %v19571_v32  ;;  %11665 = vmatprep.mubr.msk.f32.mxu1 %vm13150_vm0, %v19571_v32  ;;  %v4111_v39 = vsel %vm4056_vm6, %v4108_v26, %v4110_v56 }
 0x3d6   :  { %v3018_v37 = vpop.f32.mrb[96].mxu0  ;;  %v3292_v24 = vpop.f32.mrb[220].mxu1 }
 0x3d7   :  { %v11261_v5 = vpop.f32.mrb[97].mxu0  ;;  %v11314_v9 = vpop.f32.mrb[221].mxu1  ;;  %11613 = vmatmul.mubr.msk.f32.gmra.mrb[202].mxu0 %vm1169_vm1, %v4109_v14  ;;  %11666 = vmatmul.mubr.msk.f32.gmra.mrb[70].mxu1 %vm1169_vm1, %v19866_v25  ;;  %v16772_v36 = vadd.f32 %v3018_v37, %v16517_v58  ;;  %v16775_v42 = vadd.f32 %v3292_v24, %v16580_v40  ;;  %v1073_v14 = vld [vmem:[%s19340_s3 + $0x1a0] sm:$0xff]  ;;  %v1074_v58 = vld [vmem:[%s19340_s3 + $0x1a8] sm:$0xff] }
 0x3d8   :  { %11615 = vmatprep.mubr.msk.f32.mxu0 %vm13150_vm0, %v19571_v32  ;;  %11668 = vmatprep.mubr.msk.f32.mxu1 %vm13150_vm0, %v19571_v32  ;;  %v19867_v24 = vld [vmem:[#allocation10_spill] sm:$0xff]  ;;  %v12747_v56 = vpack.c.bf16 %v1074_v58, %v1073_v14 }
 0x3da   :  { %v3297_v22 = vpop.f32.mrb[222].mxu1  ;;  %v3558_v62 = vpop.f32.mrb[98].mxu0 }
 0x3db   :  { %v11317_v40 = vpop.f32.mrb[223].mxu1  ;;  %v11361_v37 = vpop.f32.mrb[99].mxu0  ;;  %11616 = vmatmul.mubr.msk.f32.gmra.mrb[204].mxu0 %vm1169_vm1, %v4111_v39  ;;  %11669 = vmatmul.mubr.msk.f32.gmra.mrb[72].mxu1 %vm1169_vm1, %v19867_v24  ;;  %v16792_v5 = vadd.f32 %v3558_v62, %v16542_v10  ;;  %v16795_v26 = vadd.f32 %v3297_v22, %v16597_v41  ;;  %v1075_v39 = vld [vmem:[%s19340_s3 + $0x1b0] sm:$0xff]  ;;  %v1076_v10 = vld [vmem:[%s19340_s3 + $0x1b8] sm:$0xff] }
 0x3dc   :  { %11671 = vmatprep.mubr.msk.f32.mxu1 %vm13150_vm0, %v19571_v32  ;;  %11715 = vmatprep.mubr.msk.f32.mxu0 %vm13150_vm0, %v19571_v32  ;;  %v19868_v22 = vld [vmem:[#allocation12_spill] sm:$0xff]  ;;  %v12750_v40 = vpack.c.bf16 %v1076_v10, %v1075_v39 }
 0x3de   :  { %v3302_v9 = vpop.f32.mrb[224].mxu1  ;;  %v3563_v25 = vpop.f32.mrb[100].mxu0 }
 0x3df   :  { %v11320_v62 = vpop.f32.mrb[225].mxu1  ;;  %v11364_v41 = vpop.f32.mrb[101].mxu0  ;;  %11672 = vmatmul.mubr.msk.f32.gmra.mrb[74].mxu1 %vm1169_vm1, %v19868_v22  ;;  %11716 = vmatmul.mubr.msk.f32.vlgmr.msra.gmra.mrb[206].mxu0 %vm1169_vm1, %v19815_v18  ;;  %v16812_v14 = vadd.f32 %v3563_v25, %v16566_v44  ;;  %v16815_v58 = vadd.f32 %v3302_v9, %v16613_v47 }
 0x3e0   :  { %11674 = vmatprep.mubr.msk.f32.mxu1 %vm13150_vm0, %v19571_v32  ;;  %11718 = vmatprep.mubr.msk.f32.mxu0 %vm13150_vm0, %v19571_v32  ;;  %v19869_v41 = vld [vmem:[#allocation14_spill] sm:$0xff] }
 0x3e1   :  { %12748 = vmatpush3.bf16.msra.mxu0 %v12747_v56 }
 0x3e2   :  { %v3307_v37 = vpop.f32.mrb[226].mxu1  ;;  %v3568_v24 = vpop.f32.mrb[102].mxu0  ;;  %12749 = vmatprep.subr.bf16.mxu0 %v19586_v55 }
 0x3e3   :  { %v11323_v62 = vpop.f32.mrb[227].mxu1  ;;  %v11367_v18 = vpop.f32.mrb[103].mxu0  ;;  %11675 = vmatmul.mubr.msk.f32.gmra.mrb[76].mxu1 %vm1169_vm1, %v19869_v41  ;;  %11719 = vmatmul.mubr.msk.f32.gmra.mrb[208].mxu0 %vm1169_vm1, %v19819_v7  ;;  %v16827_v44 = vadd.f32 %v3568_v24, %v16583_v8  ;;  %v16830_v47 = vadd.f32 %v3307_v37, %v16629_v53  ;;  %v19870_v7 = vld [vmem:[#allocation16_spill] sm:$0xff] }
 0x3e4   :  { %11677 = vmatprep.mubr.msk.f32.mxu1 %vm13150_vm0, %v19571_v32  ;;  %11721 = vmatprep.mubr.msk.f32.mxu0 %vm13150_vm0, %v19571_v32 }
 0x3e5   :  { %12751 = vmatpush3.bf16.msra.mxu0 %v12750_v40 }
 0x3e6   :  { %v3312_v56 = vpop.f32.mrb[228].mxu1  ;;  %v3573_v9 = vpop.f32.mrb[104].mxu0  ;;  %12758 = vmatprep.subr.bf16.mxu0 %v19586_v55 }
 0x3e7   :  { %v11326_v25 = vpop.f32.mrb[229].mxu1  ;;  %v11370_v39 = vpop.f32.mrb[105].mxu0  ;;  %11678 = vmatmul.mubr.msk.f32.gmra.mrb[78].mxu1 %vm1169_vm1, %v19870_v7  ;;  %11722 = vmatmul.mubr.msk.f32.gmra.mrb[210].mxu0 %vm1169_vm1, %v19821_v45  ;;  %v16842_v8 = vadd.f32 %v3573_v9, %v16600_v0  ;;  %v16845_v53 = vadd.f32 %v3312_v56, %v16645_v46  ;;  %v19871_v45 = vld [vmem:[#allocation18_spill] sm:$0xff]  ;;  %v19872_v56 = vld [vmem:[#allocation20_spill] sm:$0xff] }
 0x3e8   :  { %11680 = vmatprep.mubr.msk.f32.mxu1 %vm13150_vm0, %v19571_v32  ;;  %11724 = vmatprep.mubr.msk.f32.mxu0 %vm13150_vm0, %v19571_v32  ;;  %v19873_v7 = vld [vmem:[#allocation22_spill] sm:$0xff] }
 0x3ea   :  { %v3317_v10 = vpop.f32.mrb[230].mxu1  ;;  %v3578_v22 = vpop.f32.mrb[106].mxu0 }
 0x3eb   :  { %v16852_v40 = vadd.f32 %v3317_v10, %v16663_v52  ;;  %v11329_v37 = vpop.f32.mrb[231].mxu1  ;;  %v11373_v24 = vpop.f32.mrb[107].mxu0  ;;  %11681 = vmatmul.mubr.msk.f32.gmra.mrb[80].mxu1 %vm1169_vm1, %v19871_v45  ;;  %11725 = vmatmul.mubr.msk.f32.gmra.mrb[212].mxu0 %vm1169_vm1, %v19823_v43  ;;  %v16859_v0 = vadd.f32 %v3578_v22, %v16616_v20 }
 0x3ec   :  { %11683 = vmatprep.mubr.msk.f32.mxu1 %vm13150_vm0, %v19571_v32  ;;  %11727 = vmatprep.mubr.msk.f32.mxu0 %vm13150_vm0, %v19571_v32  ;;  %v19874_v24 = vld [vmem:[#allocation24_spill] sm:$0xff] }
 0x3ee   :  { %v3322_v46 = vpop.f32.mrb[232].mxu1  ;;  %v3583_v52 = vpop.f32.mrb[108].mxu0 }
 0x3ef   :  { %v16866_v62 = vadd.f32 %v3322_v46, %v16679_v13  ;;  %v11332_v18 = vpop.f32.mrb[233].mxu1  ;;  %v11376_v41 = vpop.f32.mrb[109].mxu0  ;;  %11684 = vmatmul.mubr.msk.f32.gmra.mrb[82].mxu1 %vm1169_vm1, %v19872_v56  ;;  %11728 = vmatmul.mubr.msk.f32.gmra.mrb[214].mxu0 %vm1169_vm1, %v19825_v49  ;;  %v16873_v43 = vadd.f32 %v3583_v52, %v16632_v51 }
 0x3f0   :  { %11686 = vmatprep.mubr.msk.f32.mxu1 %vm13150_vm0, %v19571_v32  ;;  %11730 = vmatprep.mubr.msk.f32.mxu0 %vm13150_vm0, %v19571_v32  ;;  %v19875_v18 = vld [vmem:[#allocation26_spill] sm:$0xff] }
 0x3f2   :  { %v3327_v20 = vpop.f32.mrb[234].mxu1  ;;  %v3588_v13 = vpop.f32.mrb[110].mxu0 }
 0x3f3   :  { %v16880_v9 = vadd.f32 %v3327_v20, %v16695_v27  ;;  %v11335_v25 = vpop.f32.mrb[235].mxu1  ;;  %v11379_v39 = vpop.f32.mrb[111].mxu0  ;;  %11687 = vmatmul.mubr.msk.f32.gmra.mrb[84].mxu1 %vm1169_vm1, %v19873_v7  ;;  %11731 = vmatmul.mubr.msk.f32.gmra.mrb[216].mxu0 %vm1169_vm1, %v19827_v48  ;;  %v16887_v49 = vadd.f32 %v3588_v13, %v16648_v12  ;;  %v19876_v13 = vld [vmem:[#allocation29_spill] sm:$0xff] }
 0x3f4   :  { %11689 = vmatprep.mubr.msk.f32.mxu1 %vm13150_vm0, %v19571_v32  ;;  %11733 = vmatprep.mubr.msk.f32.mxu0 %vm13150_vm0, %v19571_v32 }
 0x3f6   :  { %v3332_v51 = vpop.f32.mrb[236].mxu1  ;;  %v3593_v27 = vpop.f32.mrb[112].mxu0 }
 0x3f7   :  { %v16894_v10 = vadd.f32 %v3332_v51, %v16710_v28  ;;  %v11338_v22 = vpop.f32.mrb[237].mxu1  ;;  %v11382_v37 = vpop.f32.mrb[113].mxu0  ;;  %11690 = vmatmul.mubr.msk.f32.gmra.mrb[86].mxu1 %vm1169_vm1, %v19874_v24  ;;  %11734 = vmatmul.mubr.msk.f32.gmra.mrb[218].mxu0 %vm1169_vm1, %v19829_v35  ;;  %v16901_v48 = vadd.f32 %v3593_v27, %v16666_v23  ;;  %v19877_v51 = vld [vmem:[#allocation32_spill] sm:$0xff] }
 0x3f8   :  { %11692 = vmatprep.mubr.msk.f32.mxu1 %vm13150_vm0, %v19571_v32  ;;  %11736 = vmatprep.mubr.msk.f32.mxu0 %vm13150_vm0, %v19571_v32 }
 0x3fa   :  { %v3337_v12 = vpop.f32.mrb[238].mxu1  ;;  %v3598_v28 = vpop.f32.mrb[114].mxu0 }
 0x3fb   :  { %v16908_v45 = vadd.f32 %v3337_v12, %v16727_v60  ;;  %v11341_v46 = vpop.f32.mrb[239].mxu1  ;;  %v11385_v52 = vpop.f32.mrb[115].mxu0  ;;  %11693 = vmatmul.mubr.msk.f32.gmra.mrb[88].mxu1 %vm1169_vm1, %v19875_v18  ;;  %11737 = vmatmul.mubr.msk.f32.gmra.mrb[220].mxu0 %vm1169_vm1, %v19831_v61  ;;  %v16915_v35 = vadd.f32 %v3598_v28, %v16682_v34  ;;  %v19879_v12 = vld [vmem:[#allocation36_spill] sm:$0xff]  ;;  %v19880_v28 = vld [vmem:[#allocation57_spill] sm:$0xff] }
 0x3fc   :  { %11695 = vmatprep.mubr.msk.f32.mxu1 %vm13150_vm0, %v19571_v32  ;;  %11739 = vmatprep.mubr.msk.f32.mxu0 %vm13150_vm0, %v19571_v32  ;;  %v19881_v46 = vld [vmem:[#allocation91_spill] sm:$0xff] }
 0x3fe   :  { %v3342_v23 = vpop.f32.mrb[240].mxu1  ;;  %v3603_v60 = vpop.f32.mrb[116].mxu0 }
 0x3ff   :  { %v16922_v41 = vadd.f32 %v3342_v23, %v16742_v19  ;;  %v11344_v56 = vpop.f32.mrb[241].mxu1  ;;  %v11388_v20 = vpop.f32.mrb[117].mxu0  ;;  %11696 = vmatmul.mubr.msk.f32.gmra.mrb[90].mxu1 %vm1169_vm1, %v19876_v13  ;;  %11740 = vmatmul.mubr.msk.f32.gmra.mrb[222].mxu0 %vm1169_vm1, %v19834_v4  ;;  %v16929_v61 = vadd.f32 %v3603_v60, %v16698_v2  ;;  %v19878_v4 = vld [vmem:[#allocation56_spill] sm:$0xff]  ;;  %v1077_v23 = vld [vmem:[%s19340_s3 + $0x1c0] sm:$0xff]  ;;  %v1078_v60 = vld [vmem:[%s19340_s3 + $0x1c8] sm:$0xff] }
 0x400   :  { %11698 = vmatprep.mubr.msk.f32.mxu1 %vm13150_vm0, %v19571_v32  ;;  %11742 = vmatprep.mubr.msk.f32.mxu0 %vm13150_vm0, %v19571_v32  ;;  %v19882_v13 = vld [vmem:[#allocation38_spill] sm:$0xff] }
 0x402   :  { %v3347_v34 = vpop.f32.mrb[242].mxu1  ;;  %v3608_v19 = vpop.f32.mrb[118].mxu0 }
 0x403   :  { %v16936_v25 = vadd.f32 %v3347_v34, %v16757_v63  ;;  %v11347_v39 = vpop.f32.mrb[243].mxu1  ;;  %v11391_v7 = vpop.f32.mrb[119].mxu0  ;;  %11699 = vmatmul.mubr.msk.f32.gmra.mrb[92].mxu1 %vm1169_vm1, %v19877_v51  ;;  %11743 = vmatmul.mubr.msk.f32.gmra.mrb[224].mxu0 %vm1169_vm1, %v19878_v4  ;;  %v16943_v2 = vadd.f32 %v3608_v19, %v16713_v30  ;;  %v19883_v34 = vld [vmem:[#allocation58_spill] sm:$0xff] }
 0x404   :  { %11701 = vmatprep.mubr.msk.f32.mxu1 %vm13150_vm0, %v19571_v32  ;;  %11745 = vmatprep.mubr.msk.f32.mxu0 %vm13150_vm0, %v19571_v32  ;;  %v19884_v39 = vld [vmem:[#allocation88_spill] sm:$0xff]  ;;  %v19885_v51 = vld [vmem:[#allocation94_spill] sm:$0xff] }
 0x405   :  { %v5003_v7 = vrot.slane %v19884_v39, 3  ;;  %v5006_v4 = vrot.slane %v19885_v51, 3 }
 0x406   :  { %v3352_v27 = vpop.f32.mrb[244].mxu1  ;;  %v3613_v63 = vpop.f32.mrb[120].mxu0 }
 0x407   :  { %v16950_v22 = vadd.f32 %v3352_v27, %v16772_v36  ;;  %v11350_v37 = vpop.f32.mrb[245].mxu1  ;;  %v11394_v24 = vpop.f32.mrb[121].mxu0  ;;  %11702 = vmatmul.mubr.msk.f32.gmra.mrb[94].mxu1 %vm1169_vm1, %v19879_v12  ;;  %11746 = vmatmul.mubr.msk.f32.gmra.mrb[226].mxu0 %vm1169_vm1, %v19880_v28  ;;  %v16957_v30 = vadd.f32 %v3613_v63, %v16730_v1  ;;  %v5004_v36 = vrot.slane %v19881_v46, 3 }
 0x408   :  { %11704 = vmatprep.mubr.msk.f32.mxu1 %vm13150_vm0, %v19571_v32  ;;  %11748 = vmatprep.mubr.msk.f32.mxu0 %vm13150_vm0, %v19571_v32  ;;  %v1080_v24 = vld [vmem:[%s19340_s3 + $0x1d8] sm:$0xff] }
 0x409   :  { %v5005_v37 = vsel %vm3719_vm4, %v5003_v7, %v5004_v36 }
 0x40a   :  { %v3618_v52 = vpop.f32.mrb[122].mxu0  ;;  %v3895_v18 = vpop.f32.mrb[246].mxu1 }
 0x40b   :  { %v16971_v1 = vadd.f32 %v3895_v18, %v16792_v5  ;;  %v11397_v56 = vpop.f32.mrb[123].mxu0  ;;  %v11450_v20 = vpop.f32.mrb[247].mxu1  ;;  %11705 = vmatmul.mubr.msk.f32.gmra.mrb[96].mxu1 %vm1169_vm1, %v19882_v13  ;;  %11749 = vmatmul.mubr.msk.f32.gmra.mrb[228].mxu0 %vm1169_vm1, %v19883_v34  ;;  %v16978_v19 = vadd.f32 %v3618_v52, %v16745_v3  ;;  %v12753_v5 = vpack.c.bf16 %v1078_v60, %v1077_v23  ;;  %v1079_v3 = vld [vmem:[%s19340_s3 + $0x1d0] sm:$0xff]  ;;  %v19886_v18 = vld [vmem:[#allocation59_spill] sm:$0xff] }
 0x40c   :  { %11751 = vmatprep.mubr.msk.f32.mxu0 %vm13150_vm0, %v19571_v32  ;;  %11804 = vmatprep.mubr.msk.f32.mxu1 %vm13150_vm0, %v19571_v32  ;;  %v12756_v60 = vpack.c.bf16 %v1080_v24, %v1079_v3  ;;  %v5007_v34 = vsel %vm3719_vm4, %v5004_v36, %v5006_v4  ;;  %v19889_v36 = vld [vmem:[#allocation100_spill] sm:$0xff] }
 0x40e   :  { %v3623_v27 = vpop.f32.mrb[124].mxu0  ;;  %v3900_v63 = vpop.f32.mrb[248].mxu1 }
 0x40f   :  { %v16994_v12 = vadd.f32 %v3900_v63, %v16812_v14  ;;  %v11400_v28 = vpop.f32.mrb[125].mxu0  ;;  %v11453_v52 = vpop.f32.mrb[249].mxu1  ;;  %11752 = vmatmul.mubr.msk.f32.gmra.mrb[230].mxu0 %vm1169_vm1, %v19886_v18  ;;  %11805 = vmatmul.mubr.msk.f32.vlgmr.msra.gmra.mrb[98].mxu1 %vm1169_vm1, %v5005_v37  ;;  %v17000_v23 = vadd.f32 %v3623_v27, %v16760_v15  ;;  %v19887_v14 = vld [vmem:[#allocation98_spill] sm:$0xff]  ;;  %v19888_v63 = vld [vmem:[#allocation60_spill] sm:$0xff] }
 0x410   :  { %11754 = vmatprep.mubr.msk.f32.mxu0 %vm13150_vm0, %v19571_v32  ;;  %11807 = vmatprep.mubr.msk.f32.mxu1 %vm13150_vm0, %v19571_v32  ;;  %v5008_v56 = vrot.slane %v19887_v14, 3 }
 0x411   :  { %12754 = vmatpush3.bf16.msra.mxu1 %v12753_v5 }
 0x412   :  { %v3628_v20 = vpop.f32.mrb[126].mxu0  ;;  %v3905_v13 = vpop.f32.mrb[250].mxu1  ;;  %12755 = vmatprep.subr.bf16.mxu1 %v19586_v55  ;;  %v5009_v24 = vsel %vm3719_vm4, %v5006_v4, %v5008_v56  ;;  %v19890_v4 = vld [vmem:[#allocation102_spill] sm:$0xff] }
 0x413   :  { %v17010_v7 = vadd.f32 %v3905_v13, %v16827_v44  ;;  %v11403_v15 = vpop.f32.mrb[127].mxu0  ;;  %v11456_v27 = vpop.f32.mrb[251].mxu1  ;;  %11755 = vmatmul.mubr.msk.f32.gmra.mrb[232].mxu0 %vm1169_vm1, %v19888_v63  ;;  %11808 = vmatmul.mubr.msk.f32.gmra.mrb[100].mxu1 %vm1169_vm1, %v5007_v34  ;;  %v17016_v5 = vadd.f32 %v3628_v20, %v16775_v42  ;;  %v5010_v44 = vrot.slane %v19889_v36, 3 }
 0x414   :  { %11757 = vmatprep.mubr.msk.f32.mxu0 %vm13150_vm0, %v19571_v32  ;;  %11810 = vmatprep.mubr.msk.f32.mxu1 %vm13150_vm0, %v19571_v32 }
 0x415   :  { %12757 = vmatpush3.bf16.msra.mxu1 %v12756_v60  ;;  %v5012_v60 = vrot.slane %v19890_v4, 3  ;;  %v5011_v13 = vsel %vm3719_vm4, %v5008_v56, %v5010_v44  ;;  %v19891_v56 = vld [vmem:[#allocation104_spill] sm:$0xff] }
 0x416   :  { %v3633_v37 = vpop.f32.mrb[128].mxu0  ;;  %v3910_v3 = vpop.f32.mrb[252].mxu1  ;;  %v5014_v27 = vrot.slane %v19891_v56, 3 }
 0x417   :  { %v17025_v28 = vadd.f32 %v3910_v3, %v16842_v8  ;;  %v11406_v52 = vpop.f32.mrb[129].mxu0  ;;  %v11459_v18 = vpop.f32.mrb[253].mxu1  ;;  %11758 = vmatmul.mubr.msk.f32.gmra.mrb[234].mxu0 %vm1169_vm1, %v19850_v38  ;;  %11811 = vmatmul.mubr.msk.f32.gmra.mrb[102].mxu1 %vm1169_vm1, %v5009_v24  ;;  %v17031_v42 = vadd.f32 %v3633_v37, %v16795_v26  ;;  %v5013_v37 = vsel %vm3719_vm4, %v5010_v44, %v5012_v60  ;;  %v19892_v44 = vld [vmem:[#allocation106_spill] sm:$0xff] }
 0x418   :  { %11760 = vmatprep.mubr.msk.f32.mxu0 %vm13150_vm0, %v19571_v32  ;;  %11813 = vmatprep.mubr.msk.f32.mxu1 %vm13150_vm0, %v19571_v32  ;;  %v5016_v52 = vrot.slane %v19892_v44, 3 }
 0x41a   :  { %v3638_v8 = vpop.f32.mrb[130].mxu0  ;;  %v3915_v20 = vpop.f32.mrb[254].mxu1 }
 0x41b   :  { %v17040_v34 = vadd.f32 %v3915_v20, %v16859_v0  ;;  %v11409_v38 = vpop.f32.mrb[131].mxu0  ;;  %v11462_v15 = vpop.f32.mrb[255].mxu1  ;;  %11761 = vmatmul.mubr.msk.f32.gmra.mrb[236].mxu0 %vm1169_vm1, %v19851_v16  ;;  %11814 = vmatmul.mubr.msk.f32.gmra.mrb[104].mxu1 %vm1169_vm1, %v5011_v13  ;;  %v17046_v26 = vadd.f32 %v3638_v8, %v16815_v58  ;;  %v5015_v8 = vsel %vm3719_vm4, %v5012_v60, %v5014_v27  ;;  %v19893_v60 = vld [vmem:[#allocation108_spill] sm:$0xff] }
 0x41c   :  { %11763 = vmatprep.mubr.msk.f32.mxu0 %vm13150_vm0, %v19571_v32  ;;  %11816 = vmatprep.mubr.msk.f32.mxu1 %vm13150_vm0, %v19571_v32  ;;  %v5018_v38 = vrot.slane %v19893_v60, 3 }
 0x41e   :  { %v3643_v0 = vpop.f32.mrb[132].mxu0  ;;  %v3920_v63 = vpop.f32.mrb[0].mxu1 }
 0x41f   :  { %v17055_v3 = vadd.f32 %v3920_v63, %v16873_v43  ;;  %v11412_v16 = vpop.f32.mrb[133].mxu0  ;;  %v11465_v24 = vpop.f32.mrb[1].mxu1  ;;  %11764 = vmatmul.mubr.msk.f32.gmra.mrb[238].mxu0 %vm1169_vm1, %v19852_v31  ;;  %11817 = vmatmul.mubr.msk.f32.gmra.mrb[106].mxu1 %vm1169_vm1, %v5013_v37  ;;  %v17061_v58 = vadd.f32 %v3643_v0, %v16830_v47  ;;  %v5017_v0 = vsel %vm3719_vm4, %v5014_v27, %v5016_v52  ;;  %v19894_v27 = vld [vmem:[#allocation110_spill] sm:$0xff] }
 0x420   :  { %11766 = vmatprep.mubr.msk.f32.mxu0 %vm13150_vm0, %v19571_v32  ;;  %11819 = vmatprep.mubr.msk.f32.mxu1 %vm13150_vm0, %v19571_v32  ;;  %v5020_v16 = vrot.slane %v19894_v27, 3 }
 0x422   :  { %v3648_v43 = vpop.f32.mrb[134].mxu0  ;;  %v3925_v18 = vpop.f32.mrb[2].mxu1 }
 0x423   :  { %v17070_v20 = vadd.f32 %v3925_v18, %v16887_v49  ;;  %v11415_v31 = vpop.f32.mrb[135].mxu0  ;;  %v11468_v13 = vpop.f32.mrb[3].mxu1  ;;  %11767 = vmatmul.mubr.msk.f32.gmra.mrb[240].mxu0 %vm1169_vm1, %v19853_v17  ;;  %11820 = vmatmul.mubr.msk.f32.gmra.mrb[108].mxu1 %vm1169_vm1, %v5015_v8  ;;  %v17076_v47 = vadd.f32 %v3648_v43, %v16845_v53  ;;  %v5019_v43 = vsel %vm3719_vm4, %v5016_v52, %v5018_v38  ;;  %v19895_v52 = vld [vmem:[#allocation112_spill] sm:$0xff] }
 0x424   :  { %11769 = vmatprep.mubr.msk.f32.mxu0 %vm13150_vm0, %v19571_v32  ;;  %11822 = vmatprep.mubr.msk.f32.mxu1 %vm13150_vm0, %v19571_v32  ;;  %v5022_v31 = vrot.slane %v19895_v52, 3 }
 0x426   :  { %v3653_v49 = vpop.f32.mrb[136].mxu0  ;;  %v3930_v15 = vpop.f32.mrb[4].mxu1 }
 0x427   :  { %v17085_v63 = vadd.f32 %v3930_v15, %v16901_v48  ;;  %v11418_v17 = vpop.f32.mrb[137].mxu0  ;;  %v11471_v37 = vpop.f32.mrb[5].mxu1  ;;  %11770 = vmatmul.mubr.msk.f32.gmra.mrb[242].mxu0 %vm1169_vm1, %v19854_v59  ;;  %11823 = vmatmul.mubr.msk.f32.gmra.mrb[110].mxu1 %vm1169_vm1, %v5017_v0  ;;  %v17091_v53 = vadd.f32 %v3653_v49, %v16852_v40 }
 0x428   :  { %11772 = vmatprep.mubr.msk.f32.mxu0 %vm13150_vm0, %v19571_v32  ;;  %11825 = vmatprep.mubr.msk.f32.mxu1 %vm13150_vm0, %v19571_v32 }
 0x42a   :  { %v3658_v48 = vpop.f32.mrb[138].mxu0  ;;  %v3935_v24 = vpop.f32.mrb[6].mxu1 }
 0x42b   :  { %v17100_v18 = vadd.f32 %v3658_v48, %v16866_v62  ;;  %v17103_v59 = vadd.f32 %v3935_v24, %v16915_v35  ;;  %v11421_v40 = vpop.f32.mrb[139].mxu0  ;;  %v11474_v8 = vpop.f32.mrb[7].mxu1  ;;  %11773 = vmatmul.mubr.msk.f32.gmra.mrb[244].mxu0 %vm1169_vm1, %v19855_v54  ;;  %11826 = vmatmul.mubr.msk.f32.gmra.mrb[112].mxu1 %vm1169_vm1, %v5019_v43  ;;  %v5021_v35 = vsel %vm3719_vm4, %v5018_v38, %v5020_v16  ;;  %v19896_v38 = vld [vmem:[#allocation113_spill] sm:$0xff] }
 0x42c   :  { %11775 = vmatprep.mubr.msk.f32.mxu0 %vm13150_vm0, %v19571_v32  ;;  %11828 = vmatprep.mubr.msk.f32.mxu1 %vm13150_vm0, %v19571_v32  ;;  %v5024_v17 = vrot.slane %v19896_v38, 3 }
 0x42e   :  { %v3663_v62 = vpop.f32.mrb[140].mxu0  ;;  %v3940_v13 = vpop.f32.mrb[8].mxu1 }
 0x42f   :  { %v17115_v49 = vadd.f32 %v3663_v62, %v16880_v9  ;;  %v17118_v15 = vadd.f32 %v3940_v13, %v16929_v61  ;;  %v11424_v54 = vpop.f32.mrb[141].mxu0  ;;  %v11477_v0 = vpop.f32.mrb[9].mxu1  ;;  %11776 = vmatmul.mubr.msk.f32.gmra.mrb[246].mxu0 %vm1169_vm1, %v19856_v6  ;;  %11829 = vmatmul.mubr.msk.f32.gmra.mrb[114].mxu1 %vm1169_vm1, %v5021_v35  ;;  %v5023_v61 = vsel %vm3719_vm4, %v5020_v16, %v5022_v31  ;;  %v19897_v16 = vld [vmem:[#allocation114_spill] sm:$0xff] }
 0x430   :  { %11778 = vmatprep.mubr.msk.f32.mxu0 %vm13150_vm0, %v19571_v32  ;;  %11831 = vmatprep.mubr.msk.f32.mxu1 %vm13150_vm0, %v19571_v32  ;;  %v5026_v40 = vrot.slane %v19897_v16, 3 }
 0x432   :  { %v3668_v9 = vpop.f32.mrb[142].mxu0  ;;  %v3945_v37 = vpop.f32.mrb[10].mxu1 }
 0x433   :  { %v17130_v48 = vadd.f32 %v3668_v9, %v16894_v10  ;;  %v17133_v24 = vadd.f32 %v3945_v37, %v16943_v2  ;;  %v11427_v6 = vpop.f32.mrb[143].mxu0  ;;  %v11480_v43 = vpop.f32.mrb[11].mxu1  ;;  %11779 = vmatmul.mubr.msk.f32.gmra.mrb[248].mxu0 %vm1169_vm1, %v19857_v29  ;;  %11832 = vmatmul.mubr.msk.f32.gmra.mrb[116].mxu1 %vm1169_vm1, %v5023_v61  ;;  %v5025_v2 = vsel %vm3719_vm4, %v5022_v31, %v5024_v17  ;;  %v19898_v31 = vld [vmem:[#allocation116_spill] sm:$0xff] }
 0x434   :  { %11781 = vmatprep.mubr.msk.f32.mxu0 %vm13150_vm0, %v19571_v32  ;;  %11834 = vmatprep.mubr.msk.f32.mxu1 %vm13150_vm0, %v19571_v32  ;;  %v5028_v54 = vrot.slane %v19898_v31, 3 }
 0x436   :  { %v3673_v10 = vpop.f32.mrb[144].mxu0  ;;  %v3950_v8 = vpop.f32.mrb[12].mxu1 }
 0x437   :  { %v17145_v62 = vadd.f32 %v3673_v10, %v16908_v45  ;;  %v17148_v13 = vadd.f32 %v3950_v8, %v16957_v30  ;;  %v11430_v29 = vpop.f32.mrb[145].mxu0  ;;  %v11483_v35 = vpop.f32.mrb[13].mxu1  ;;  %11782 = vmatmul.mubr.msk.f32.gmra.mrb[250].mxu0 %vm1169_vm1, %v19858_v57  ;;  %11835 = vmatmul.mubr.msk.f32.gmra.mrb[118].mxu1 %vm1169_vm1, %v5025_v2  ;;  %v5027_v30 = vsel %vm3719_vm4, %v5024_v17, %v5026_v40  ;;  %v19899_v17 = vld [vmem:[#allocation119_spill] sm:$0xff] }
 0x438   :  { %11784 = vmatprep.mubr.msk.f32.mxu0 %vm13150_vm0, %v19571_v32  ;;  %11837 = vmatprep.mubr.msk.f32.mxu1 %vm13150_vm0, %v19571_v32  ;;  %v5030_v6 = vrot.slane %v19899_v17, 3 }
 0x43a   :  { %v3678_v45 = vpop.f32.mrb[146].mxu0  ;;  %v3955_v0 = vpop.f32.mrb[14].mxu1 }
 0x43b   :  { %v17160_v9 = vadd.f32 %v3678_v45, %v16922_v41  ;;  %v17163_v37 = vadd.f32 %v3955_v0, %v16978_v19  ;;  %v11433_v57 = vpop.f32.mrb[147].mxu0  ;;  %v11486_v61 = vpop.f32.mrb[15].mxu1  ;;  %11785 = vmatmul.mubr.msk.f32.gmra.mrb[252].mxu0 %vm1169_vm1, %v19859_v21  ;;  %11838 = vmatmul.mubr.msk.f32.gmra.mrb[120].mxu1 %vm1169_vm1, %v5027_v30  ;;  %v5029_v19 = vsel %vm3719_vm4, %v5026_v40, %v5028_v54  ;;  %v19900_v40 = vld [vmem:[#allocation122_spill] sm:$0xff] }
 0x43c   :  { %11787 = vmatprep.mubr.msk.f32.mxu0 %vm13150_vm0, %v19571_v32  ;;  %11840 = vmatprep.mubr.msk.f32.mxu1 %vm13150_vm0, %v19571_v32  ;;  %v5032_v29 = vrot.slane %v19900_v40, 3 }
 0x43e   :  { %v3683_v41 = vpop.f32.mrb[148].mxu0  ;;  %v3960_v43 = vpop.f32.mrb[16].mxu1 }
 0x43f   :  { %v17175_v10 = vadd.f32 %v3683_v41, %v16936_v25  ;;  %v17178_v8 = vadd.f32 %v3960_v43, %v17000_v23  ;;  %v11436_v21 = vpop.f32.mrb[149].mxu0  ;;  %v11489_v2 = vpop.f32.mrb[17].mxu1  ;;  %11788 = vmatmul.mubr.msk.f32.gmra.mrb[254].mxu0 %vm1169_vm1, %v19861_v11  ;;  %11841 = vmatmul.mubr.msk.f32.gmra.mrb[122].mxu1 %vm1169_vm1, %v5029_v19  ;;  %v5031_v23 = vsel %vm3719_vm4, %v5028_v54, %v5030_v6  ;;  %v19901_v54 = vld [vmem:[#allocation125_spill] sm:$0xff]  ;;  %v1082_v19 = vld [vmem:[%s19340_s3 + $0x1e8] sm:$0xff] }
 0x440   :  { %11790 = vmatprep.mubr.msk.f32.mxu0 %vm13150_vm0, %v19571_v32  ;;  %11843 = vmatprep.mubr.msk.f32.mxu1 %vm13150_vm0, %v19571_v32  ;;  %v5034_v57 = vrot.slane %v19901_v54, 3  ;;  %v5033_v43 = vsel %vm3719_vm4, %v5030_v6, %v5032_v29  ;;  %v19903_v6 = vld [vmem:[#allocation92_spill] sm:$0xff] }
 0x442   :  { %v3688_v25 = vpop.f32.mrb[150].mxu0  ;;  %v3965_v35 = vpop.f32.mrb[18].mxu1 }
 0x443   :  { %v17190_v45 = vadd.f32 %v3688_v25, %v16950_v22  ;;  %v17193_v0 = vadd.f32 %v3965_v35, %v17016_v5  ;;  %v11439_v11 = vpop.f32.mrb[151].mxu0  ;;  %v11492_v30 = vpop.f32.mrb[19].mxu1  ;;  %11791 = vmatmul.mubr.msk.f32.gmra.mrb[0].mxu0 %vm1169_vm1, %v19863_v33  ;;  %11844 = vmatmul.mubr.msk.f32.gmra.mrb[124].mxu1 %vm1169_vm1, %v5031_v23  ;;  %v19902_v22 = vld [vmem:[#allocation117_spill] sm:$0xff]  ;;  %v1081_v33 = vld [vmem:[%s19340_s3 + $0x1e0] sm:$0xff]  ;;  %v5340_v23 = vrot.slane %v19903_v6, 7 }
 0x444   :  { %11793 = vmatprep.mubr.msk.f32.mxu0 %vm13150_vm0, %v19571_v32  ;;  %11846 = vmatprep.mubr.msk.f32.mxu1 %vm13150_vm0, %v19571_v32  ;;  %v5341_v61 = vrot.slane %v19902_v22, 7  ;;  %v19904_v11 = vld [vmem:[#allocation128_spill] sm:$0xff]  ;;  %v1084_v6 = vld [vmem:[%s19340_s3 + $0x1f8] sm:$0xff] }
 0x445   :  { %v5036_v30 = vrot.slane %v19904_v11, 3 }
 0x446   :  { %v3970_v41 = vpop.f32.mrb[20].mxu1  ;;  %v4232_v5 = vpop.f32.mrb[152].mxu0 }
 0x447   :  { %v17212_v21 = vadd.f32 %v3970_v41, %v17031_v42  ;;  %v17215_v2 = vadd.f32 %v4232_v5, %v16971_v1  ;;  %v11495_v25 = vpop.f32.mrb[21].mxu1  ;;  %v11539_v35 = vpop.f32.mrb[153].mxu0  ;;  %11794 = vmatmul.mubr.msk.f32.gmra.mrb[2].mxu0 %vm1169_vm1, %v19865_v50  ;;  %11847 = vmatmul.mubr.msk.f32.gmra.mrb[126].mxu1 %vm1169_vm1, %v5033_v43  ;;  %v12759_v42 = vpack.c.bf16 %v1082_v19, %v1081_v33  ;;  %v19905_v1 = vld [vmem:[#allocation120_spill] sm:$0xff] }
 0x448   :  { %11849 = vmatprep.mubr.msk.f32.mxu1 %vm13150_vm0, %v19571_v32  ;;  %11893 = vmatprep.mubr.msk.f32.mxu0 %vm13150_vm0, %v19571_v32  ;;  %v5343_v41 = vrot.slane %v19905_v1, 7  ;;  %v5035_v35 = vsel %vm3719_vm4, %v5032_v29, %v5034_v57  ;;  %v5342_v50 = vsel %vm4056_vm6, %v5340_v23, %v5341_v61  ;;  %v1083_v43 = vld [vmem:[%s19340_s3 + $0x1f0] sm:$0xff]  ;;  %v19906_v23 = vld [vmem:[#allocation131_spill] sm:$0xff] }
 0x449   :  { %v12762_v29 = vpack.c.bf16 %v1084_v6, %v1083_v43 }
 0x44a   :  { %v3975_v5 = vpop.f32.mrb[22].mxu1  ;;  %v4237_v25 = vpop.f32.mrb[154].mxu0 }
 0x44b   :  { %v17236_v33 = vadd.f32 %v3975_v5, %v17046_v26  ;;  %v17239_v19 = vadd.f32 %v4237_v25, %v16994_v12  ;;  %v11498_v1 = vpop.f32.mrb[23].mxu1  ;;  %v11542_v22 = vpop.f32.mrb[155].mxu0  ;;  %11850 = vmatmul.mubr.msk.f32.gmra.mrb[128].mxu1 %vm1169_vm1, %v5035_v35  ;;  %11894 = vmatmul.mubr.msk.f32.vlgmr.msra.gmra.mrb[4].mxu0 %vm1169_vm1, %v5342_v50  ;;  %v5038_v26 = vrot.slane %v19906_v23, 3  ;;  %v19907_v5 = vld [vmem:[#allocation123_spill] sm:$0xff] }
 0x44c   :  { %11852 = vmatprep.mubr.msk.f32.mxu1 %vm13150_vm0, %v19571_v32  ;;  %11896 = vmatprep.mubr.msk.f32.mxu0 %vm13150_vm0, %v19571_v32  ;;  %v5345_v11 = vrot.slane %v19907_v5, 7  ;;  %v5037_v22 = vsel %vm3719_vm4, %v5034_v57, %v5036_v30  ;;  %v5344_v1 = vsel %vm4056_vm6, %v5341_v61, %v5343_v41  ;;  %v19908_v57 = vld [vmem:[#allocation134_spill] sm:$0xff] }
 0x44d   :  { %12760 = vmatpush3.bf16.msra.mxu0 %v12759_v42  ;;  %v5040_v61 = vrot.slane %v19908_v57, 3 }
 0x44e   :  { %v3980_v12 = vpop.f32.mrb[24].mxu1  ;;  %v4242_v25 = vpop.f32.mrb[156].mxu0  ;;  %12761 = vmatprep.subr.bf16.mxu0 %v19586_v55 }
 0x44f   :  { %v17253_v35 = vadd.f32 %v3980_v12, %v17061_v58  ;;  %v17256_v50 = vadd.f32 %v4242_v25, %v17010_v7  ;;  %v11501_v42 = vpop.f32.mrb[25].mxu1  ;;  %v11545_v43 = vpop.f32.mrb[157].mxu0  ;;  %11853 = vmatmul.mubr.msk.f32.gmra.mrb[130].mxu1 %vm1169_vm1, %v5037_v22  ;;  %11897 = vmatmul.mubr.msk.f32.gmra.mrb[6].mxu0 %vm1169_vm1, %v5344_v1  ;;  %v19909_v58 = vld [vmem:[#allocation126_spill] sm:$0xff]  ;;  %v5039_v25 = vsel %vm3719_vm4, %v5036_v30, %v5038_v26  ;;  %v19910_v30 = vld [vmem:[#allocation137_spill] sm:$0xff] }
 0x450   :  { %11855 = vmatprep.mubr.msk.f32.mxu1 %vm13150_vm0, %v19571_v32  ;;  %11899 = vmatprep.mubr.msk.f32.mxu0 %vm13150_vm0, %v19571_v32  ;;  %v5347_v6 = vrot.slane %v19909_v58, 7  ;;  %v5346_v42 = vsel %vm4056_vm6, %v5343_v41, %v5345_v11  ;;  %v5042_v41 = vrot.slane %v19910_v30, 3 }
 0x451   :  { %12763 = vmatpush3.bf16.msra.mxu0 %v12762_v29 }
 0x452   :  { %v3985_v12 = vpop.f32.mrb[26].mxu1  ;;  %v4247_v7 = vpop.f32.mrb[158].mxu0  ;;  %12908 = vmatprep.subr.bf16.mxu0 %v19586_v55  ;;  %v19911_v55 = vld [vmem:[#allocation129_spill] sm:$0xff] }
 0x453   :  { %v17270_v22 = vadd.f32 %v3985_v12, %v17076_v47  ;;  %v17273_v1 = vadd.f32 %v4247_v7, %v17025_v28  ;;  %v11504_v43 = vpop.f32.mrb[27].mxu1  ;;  %v11548_v29 = vpop.f32.mrb[159].mxu0  ;;  %11856 = vmatmul.mubr.msk.f32.gmra.mrb[132].mxu1 %vm1169_vm1, %v5039_v25  ;;  %11900 = vmatmul.mubr.msk.f32.gmra.mrb[8].mxu0 %vm1169_vm1, %v5346_v42  ;;  %v5349_v47 = vrot.slane %v19911_v55, 7  ;;  %v5041_v28 = vsel %vm3719_vm4, %v5038_v26, %v5040_v61  ;;  %v19912_v26 = vld [vmem:[#allocation140_spill] sm:$0xff] }
 0x454   :  { %11858 = vmatprep.mubr.msk.f32.mxu1 %vm13150_vm0, %v19571_v32  ;;  %11902 = vmatprep.mubr.msk.f32.mxu0 %vm13150_vm0, %v19571_v32  ;;  %v5348_v7 = vsel %vm4056_vm6, %v5345_v11, %v5347_v6  ;;  %v5044_v11 = vrot.slane %v19912_v26, 3  ;;  %v19913_v55 = vld [vmem:[#allocation132_spill] sm:$0xff] }
 0x456   :  { %v3990_v12 = vpop.f32.mrb[28].mxu1  ;;  %v4252_v58 = vpop.f32.mrb[160].mxu0 }
 0x457   :  { %v17286_v25 = vadd.f32 %v3990_v12, %v17091_v53  ;;  %v17289_v42 = vadd.f32 %v4252_v58, %v17040_v34  ;;  %v11507_v43 = vpop.f32.mrb[29].mxu1  ;;  %v11551_v29 = vpop.f32.mrb[161].mxu0  ;;  %11859 = vmatmul.mubr.msk.f32.gmra.mrb[134].mxu1 %vm1169_vm1, %v5041_v28  ;;  %11903 = vmatmul.mubr.msk.f32.gmra.mrb[10].mxu0 %vm1169_vm1, %v5348_v7  ;;  %v5351_v53 = vrot.slane %v19913_v55, 7  ;;  %v5043_v34 = vsel %vm3719_vm4, %v5040_v61, %v5042_v41  ;;  %v19914_v61 = vld [vmem:[#allocation143_spill] sm:$0xff] }
 0x458   :  { %11861 = vmatprep.mubr.msk.f32.mxu1 %vm13150_vm0, %v19571_v32  ;;  %11905 = vmatprep.mubr.msk.f32.mxu0 %vm13150_vm0, %v19571_v32  ;;  %v5350_v58 = vsel %vm4056_vm6, %v5347_v6, %v5349_v47  ;;  %v5046_v6 = vrot.slane %v19914_v61, 3  ;;  %v19915_v55 = vld [vmem:[#allocation135_spill] sm:$0xff] }
 0x45a   :  { %v3995_v12 = vpop.f32.mrb[30].mxu1  ;;  %v4257_v30 = vpop.f32.mrb[162].mxu0 }
 0x45b   :  { %v17302_v28 = vadd.f32 %v3995_v12, %v17100_v18  ;;  %v17305_v7 = vadd.f32 %v4257_v30, %v17055_v3  ;;  %v11510_v43 = vpop.f32.mrb[31].mxu1  ;;  %v11554_v29 = vpop.f32.mrb[163].mxu0  ;;  %11862 = vmatmul.mubr.msk.f32.gmra.mrb[136].mxu1 %vm1169_vm1, %v5043_v34  ;;  %11906 = vmatmul.mubr.msk.f32.gmra.mrb[12].mxu0 %vm1169_vm1, %v5350_v58  ;;  %v5353_v18 = vrot.slane %v19915_v55, 7  ;;  %v5045_v3 = vsel %vm3719_vm4, %v5042_v41, %v5044_v11  ;;  %v19916_v41 = vld [vmem:[#allocation146_spill] sm:$0xff] }
 0x45c   :  { %11864 = vmatprep.mubr.msk.f32.mxu1 %vm13150_vm0, %v19571_v32  ;;  %11908 = vmatprep.mubr.msk.f32.mxu0 %vm13150_vm0, %v19571_v32  ;;  %v5352_v30 = vsel %vm4056_vm6, %v5349_v47, %v5351_v53  ;;  %v5048_v47 = vrot.slane %v19916_v41, 3  ;;  %v19917_v55 = vld [vmem:[#allocation138_spill] sm:$0xff] }
 0x45e   :  { %v4000_v12 = vpop.f32.mrb[32].mxu1  ;;  %v4262_v26 = vpop.f32.mrb[164].mxu0 }
 0x45f   :  { %v17318_v34 = vadd.f32 %v4000_v12, %v17115_v49  ;;  %v17321_v58 = vadd.f32 %v4262_v26, %v17070_v20  ;;  %v11513_v43 = vpop.f32.mrb[33].mxu1  ;;  %v11557_v29 = vpop.f32.mrb[165].mxu0  ;;  %11865 = vmatmul.mubr.msk.f32.gmra.mrb[138].mxu1 %vm1169_vm1, %v5045_v3  ;;  %11909 = vmatmul.mubr.msk.f32.gmra.mrb[14].mxu0 %vm1169_vm1, %v5352_v30  ;;  %v5355_v49 = vrot.slane %v19917_v55, 7  ;;  %v5047_v20 = vsel %vm3719_vm4, %v5044_v11, %v5046_v6  ;;  %v19918_v11 = vld [vmem:[#allocation149_spill] sm:$0xff] }
 0x460   :  { %11867 = vmatprep.mubr.msk.f32.mxu1 %vm13150_vm0, %v19571_v32  ;;  %11911 = vmatprep.mubr.msk.f32.mxu0 %vm13150_vm0, %v19571_v32  ;;  %v5354_v26 = vsel %vm4056_vm6, %v5351_v53, %v5353_v18  ;;  %v5050_v53 = vrot.slane %v19918_v11, 3  ;;  %v19919_v55 = vld [vmem:[#allocation141_spill] sm:$0xff] }
 0x462   :  { %v4005_v12 = vpop.f32.mrb[34].mxu1  ;;  %v4267_v61 = vpop.f32.mrb[166].mxu0 }
 0x463   :  { %v17334_v3 = vadd.f32 %v4005_v12, %v17130_v48  ;;  %v17337_v30 = vadd.f32 %v4267_v61, %v17085_v63  ;;  %v11516_v43 = vpop.f32.mrb[35].mxu1  ;;  %v11560_v29 = vpop.f32.mrb[167].mxu0  ;;  %11868 = vmatmul.mubr.msk.f32.gmra.mrb[140].mxu1 %vm1169_vm1, %v5047_v20  ;;  %11912 = vmatmul.mubr.msk.f32.gmra.mrb[16].mxu0 %vm1169_vm1, %v5354_v26  ;;  %v5357_v48 = vrot.slane %v19919_v55, 7  ;;  %v5049_v63 = vsel %vm3719_vm4, %v5046_v6, %v5048_v47  ;;  %v19920_v6 = vld [vmem:[#allocation152_spill] sm:$0xff] }
 0x464   :  { %11870 = vmatprep.mubr.msk.f32.mxu1 %vm13150_vm0, %v19571_v32  ;;  %11914 = vmatprep.mubr.msk.f32.mxu0 %vm13150_vm0, %v19571_v32  ;;  %v5356_v61 = vsel %vm4056_vm6, %v5353_v18, %v5355_v49  ;;  %v5052_v18 = vrot.slane %v19920_v6, 3  ;;  %v19921_v55 = vld [vmem:[#allocation144_spill] sm:$0xff] }
 0x466   :  { %v4010_v12 = vpop.f32.mrb[36].mxu1  ;;  %v4272_v41 = vpop.f32.mrb[168].mxu0 }
 0x467   :  { %v17350_v20 = vadd.f32 %v4010_v12, %v17145_v62  ;;  %v17353_v26 = vadd.f32 %v4272_v41, %v17103_v59  ;;  %v11519_v43 = vpop.f32.mrb[37].mxu1  ;;  %v11563_v29 = vpop.f32.mrb[169].mxu0  ;;  %11871 = vmatmul.mubr.msk.f32.gmra.mrb[142].mxu1 %vm1169_vm1, %v5049_v63  ;;  %11915 = vmatmul.mubr.msk.f32.gmra.mrb[18].mxu0 %vm1169_vm1, %v5356_v61  ;;  %v5359_v62 = vrot.slane %v19921_v55, 7  ;;  %v5051_v59 = vsel %vm3719_vm4, %v5048_v47, %v5050_v53  ;;  %v19922_v47 = vld [vmem:[#allocation147_spill] sm:$0xff] }
 0x468   :  { %11873 = vmatprep.mubr.msk.f32.mxu1 %vm13150_vm0, %v19571_v32  ;;  %11917 = vmatprep.mubr.msk.f32.mxu0 %vm13150_vm0, %v19571_v32  ;;  %v5358_v41 = vsel %vm4056_vm6, %v5355_v49, %v5357_v48  ;;  %v5361_v49 = vrot.slane %v19922_v47, 7 }
 0x46a   :  { %v4015_v12 = vpop.f32.mrb[38].mxu1  ;;  %v4277_v11 = vpop.f32.mrb[170].mxu0 }
 0x46b   :  { %v17366_v63 = vadd.f32 %v4015_v12, %v17160_v9  ;;  %v17369_v61 = vadd.f32 %v4277_v11, %v17118_v15  ;;  %v11522_v43 = vpop.f32.mrb[39].mxu1  ;;  %v11566_v29 = vpop.f32.mrb[171].mxu0  ;;  %11874 = vmatmul.mubr.msk.f32.gmra.mrb[144].mxu1 %vm1169_vm1, %v5051_v59  ;;  %11918 = vmatmul.mubr.msk.f32.gmra.mrb[20].mxu0 %vm1169_vm1, %v5358_v41  ;;  %v5053_v12 = vsel %vm3719_vm4, %v5050_v53, %v5052_v18  ;;  %v19923_v53 = vld [vmem:[#allocation150_spill] sm:$0xff] }
 0x46c   :  { %11876 = vmatprep.mubr.msk.f32.mxu1 %vm13150_vm0, %v19571_v32  ;;  %11920 = vmatprep.mubr.msk.f32.mxu0 %vm13150_vm0, %v19571_v32  ;;  %v5360_v15 = vsel %vm4056_vm6, %v5357_v48, %v5359_v62  ;;  %v5363_v48 = vrot.slane %v19923_v53, 7 }
 0x46e   :  { %v4020_v55 = vpop.f32.mrb[40].mxu1  ;;  %v4282_v9 = vpop.f32.mrb[172].mxu0 }
 0x46f   :  { %v17381_v11 = vadd.f32 %v4020_v55, %v17175_v10  ;;  %v17384_v59 = vadd.f32 %v4282_v9, %v17133_v24  ;;  %v11525_v41 = vpop.f32.mrb[41].mxu1  ;;  %v11569_v43 = vpop.f32.mrb[173].mxu0  ;;  %11877 = vmatmul.mubr.msk.f32.gmra.mrb[146].mxu1 %vm1169_vm1, %v5053_v12  ;;  %11921 = vmatmul.mubr.msk.f32.gmra.mrb[22].mxu0 %vm1169_vm1, %v5360_v15  ;;  %v19924_v10 = vld [vmem:[#allocation89_spill] sm:$0xff]  ;;  %v5362_v9 = vsel %vm4056_vm6, %v5359_v62, %v5361_v49 }
 0x470   :  { %11879 = vmatprep.mubr.msk.f32.mxu1 %vm13150_vm0, %v19571_v32  ;;  %11923 = vmatprep.mubr.msk.f32.mxu0 %vm13150_vm0, %v19571_v32  ;;  %v19925_v47 = vrot.slane %v19924_v10, 3  ;;  %v19926_v62 = vld [vmem:[#allocation153_spill] sm:$0xff] }
 0x472   :  { %v4025_v29 = vpop.f32.mrb[42].mxu1  ;;  %v4287_v55 = vpop.f32.mrb[174].mxu0  ;;  %v5055_v24 = vsel %vm3719_vm4, %v5052_v18, %v19925_v47  ;;  %v5677_v18 = vrot.slane %v19881_v46, 4  ;;  %v5676_v46 = vrot.slane %v19884_v39, 4 }
 0x473   :  { %v17398_v12 = vadd.f32 %v4025_v29, %v17190_v45  ;;  %v17401_v15 = vadd.f32 %v4287_v55, %v17148_v13  ;;  %v11528_v41 = vpop.f32.mrb[43].mxu1  ;;  %v11572_v43 = vpop.f32.mrb[175].mxu0  ;;  %11880 = vmatmul.mubr.msk.f32.gmra.mrb[148].mxu1 %vm1169_vm1, %v5055_v24  ;;  %11924 = vmatmul.mubr.msk.f32.gmra.mrb[24].mxu0 %vm1169_vm1, %v5362_v9  ;;  %v5365_v45 = vrot.slane %v19926_v62, 7  ;;  %v5364_v13 = vsel %vm4056_vm6, %v5361_v49, %v5363_v48  ;;  %v19928_v49 = vld [vmem:[#allocation155_spill] sm:$0xff] }
 0x474   :  { %11882 = vmatprep.mubr.msk.f32.mxu1 %vm13150_vm0, %v19571_v32  ;;  %11926 = vmatprep.mubr.msk.f32.mxu0 %vm13150_vm0, %v19571_v32  ;;  %v19927_v43 = vld [vmem:[#allocation96_spill] sm:$0xff] }
 0x476   :  { %v4292_v47 = vpop.f32.mrb[176].mxu0  ;;  %v4563_v29 = vpop.f32.mrb[44].mxu1 }
 0x477   :  { %v17413_v55 = vadd.f32 %v4292_v47, %v17163_v37  ;;  %v17416_v24 = vadd.f32 %v4563_v29, %v17215_v2  ;;  %v11575_v9 = vpop.f32.mrb[177].mxu0  ;;  %v11628_v41 = vpop.f32.mrb[45].mxu1  ;;  %11883 = vmatmul.mubr.msk.f32.gmra.mrb[150].mxu1 %vm1169_vm1, %v19927_v43  ;;  %11927 = vmatmul.mubr.msk.f32.gmra.mrb[26].mxu0 %vm1169_vm1, %v5364_v13  ;;  %v5679_v37 = vrot.slane %v19885_v51, 4  ;;  %v5367_v2 = vrot.slane %v19928_v49, 7 }
 0x478   :  { %11929 = vmatprep.mubr.msk.f32.mxu0 %vm13150_vm0, %v19571_v32  ;;  %11982 = vmatprep.mubr.msk.f32.mxu1 %vm13150_vm0, %v19571_v32  ;;  %v5366_v9 = vsel %vm4056_vm6, %v5363_v48, %v5365_v45  ;;  %v5678_v41 = vsel %vm1113_vm3, %v5676_v46, %v5677_v18  ;;  %v5681_v51 = vrot.slane %v19887_v14, 4  ;;  %v19929_v48 = vld [vmem:[#allocation157_spill] sm:$0xff]  ;;  %v5683_v14 = vrot.slane %v19889_v36, 4 }
 0x479   :  { %v5685_v36 = vrot.slane %v19890_v4, 4  ;;  %v5687_v4 = vrot.slane %v19891_v56, 4  ;;  %v5689_v56 = vrot.slane %v19892_v44, 4  ;;  %v5691_v44 = vrot.slane %v19893_v60, 4 }
 0x47a   :  { %v4297_v47 = vpop.f32.mrb[178].mxu0  ;;  %v4568_v29 = vpop.f32.mrb[46].mxu1  ;;  %v5693_v60 = vrot.slane %v19894_v27, 4  ;;  %v5695_v27 = vrot.slane %v19895_v52, 4  ;;  %v5697_v52 = vrot.slane %v19896_v38, 4  ;;  %v5699_v38 = vrot.slane %v19897_v16, 4 }
 0x47b   :  { %v17431_v13 = vadd.f32 %v4297_v47, %v17178_v8  ;;  %v17434_v39 = vadd.f32 %v4568_v29, %v17239_v19  ;;  %v11578_v43 = vpop.f32.mrb[179].mxu0  ;;  %v11631_v62 = vpop.f32.mrb[47].mxu1  ;;  %11930 = vmatmul.mubr.msk.f32.gmra.mrb[28].mxu0 %vm1169_vm1, %v5366_v9  ;;  %11983 = vmatmul.mubr.msk.f32.vlgmr.msra.gmra.mrb[152].mxu1 %vm1169_vm1, %v5678_v41  ;;  %v5369_v8 = vrot.slane %v19929_v48, 7  ;;  %v5368_v19 = vsel %vm4056_vm6, %v5365_v45, %v5367_v2 }
 0x47c   :  { %11932 = vmatprep.mubr.msk.f32.mxu0 %vm13150_vm0, %v19571_v32  ;;  %11985 = vmatprep.mubr.msk.f32.mxu1 %vm13150_vm0, %v19571_v32  ;;  %v5680_v62 = vsel %vm1113_vm3, %v5677_v18, %v5679_v37  ;;  %v19930_v18 = vld [vmem:[#allocation159_spill] sm:$0xff]  ;;  %v5701_v16 = vrot.slane %v19898_v31, 4 }
 0x47e   :  { %v4302_v46 = vpop.f32.mrb[180].mxu0  ;;  %v4573_v47 = vpop.f32.mrb[48].mxu1 }
 0x47f   :  { %v17447_v29 = vadd.f32 %v4302_v46, %v17193_v0  ;;  %v17450_v9 = vadd.f32 %v4573_v47, %v17256_v50  ;;  %v11581_v41 = vpop.f32.mrb[181].mxu0  ;;  %v11634_v43 = vpop.f32.mrb[49].mxu1  ;;  %11933 = vmatmul.mubr.msk.f32.gmra.mrb[30].mxu0 %vm1169_vm1, %v5368_v19  ;;  %11986 = vmatmul.mubr.msk.f32.gmra.mrb[154].mxu1 %vm1169_vm1, %v5680_v62  ;;  %v5371_v0 = vrot.slane %v19930_v18, 7  ;;  %v5370_v50 = vsel %vm4056_vm6, %v5367_v2, %v5369_v8 }
 0x480   :  { %11935 = vmatprep.mubr.msk.f32.mxu0 %vm13150_vm0, %v19571_v32  ;;  %11988 = vmatprep.mubr.msk.f32.mxu1 %vm13150_vm0, %v19571_v32  ;;  %v5682_v47 = vsel %vm1113_vm3, %v5679_v37, %v5681_v51  ;;  %v19931_v37 = vld [vmem:[#allocation160_spill] sm:$0xff] }
 0x482   :  { %v4307_v45 = vpop.f32.mrb[182].mxu0  ;;  %v4578_v46 = vpop.f32.mrb[50].mxu1 }
 0x483   :  { %v17463_v19 = vadd.f32 %v4307_v45, %v17212_v21  ;;  %v17466_v62 = vadd.f32 %v4578_v46, %v17273_v1  ;;  %v11584_v41 = vpop.f32.mrb[183].mxu0  ;;  %v11637_v43 = vpop.f32.mrb[51].mxu1  ;;  %11936 = vmatmul.mubr.msk.f32.gmra.mrb[32].mxu0 %vm1169_vm1, %v5370_v50  ;;  %11989 = vmatmul.mubr.msk.f32.gmra.mrb[156].mxu1 %vm1169_vm1, %v5682_v47  ;;  %v5373_v21 = vrot.slane %v19931_v37, 7  ;;  %v5372_v1 = vsel %vm4056_vm6, %v5369_v8, %v5371_v0 }
 0x484   :  { %11938 = vmatprep.mubr.msk.f32.mxu0 %vm13150_vm0, %v19571_v32  ;;  %11991 = vmatprep.mubr.msk.f32.mxu1 %vm13150_vm0, %v19571_v32  ;;  %v5684_v46 = vsel %vm1113_vm3, %v5681_v51, %v5683_v14  ;;  %v19932_v51 = vld [vmem:[#allocation161_spill] sm:$0xff] }
 0x486   :  { %v4312_v2 = vpop.f32.mrb[184].mxu0  ;;  %v4583_v45 = vpop.f32.mrb[52].mxu1 }
 0x487   :  { %v17479_v50 = vadd.f32 %v4312_v2, %v17236_v33  ;;  %v17482_v47 = vadd.f32 %v4583_v45, %v17289_v42  ;;  %v11587_v41 = vpop.f32.mrb[185].mxu0  ;;  %v11640_v43 = vpop.f32.mrb[53].mxu1  ;;  %11939 = vmatmul.mubr.msk.f32.gmra.mrb[34].mxu0 %vm1169_vm1, %v5372_v1  ;;  %11992 = vmatmul.mubr.msk.f32.gmra.mrb[158].mxu1 %vm1169_vm1, %v5684_v46  ;;  %v5375_v33 = vrot.slane %v19932_v51, 7  ;;  %v5374_v42 = vsel %vm4056_vm6, %v5371_v0, %v5373_v21 }
 0x488   :  { %11941 = vmatprep.mubr.msk.f32.mxu0 %vm13150_vm0, %v19571_v32  ;;  %11994 = vmatprep.mubr.msk.f32.mxu1 %vm13150_vm0, %v19571_v32  ;;  %v5686_v45 = vsel %vm1113_vm3, %v5683_v14, %v5685_v36  ;;  %v19933_v14 = vld [vmem:[#allocation162_spill] sm:$0xff] }
 0x48a   :  { %v4317_v8 = vpop.f32.mrb[186].mxu0  ;;  %v4588_v2 = vpop.f32.mrb[54].mxu1 }
 0x48b   :  { %v17495_v1 = vadd.f32 %v4317_v8, %v17253_v35  ;;  %v17498_v46 = vadd.f32 %v4588_v2, %v17305_v7  ;;  %v11590_v41 = vpop.f32.mrb[187].mxu0  ;;  %v11643_v43 = vpop.f32.mrb[55].mxu1  ;;  %11942 = vmatmul.mubr.msk.f32.gmra.mrb[36].mxu0 %vm1169_vm1, %v5374_v42  ;;  %11995 = vmatmul.mubr.msk.f32.gmra.mrb[160].mxu1 %vm1169_vm1, %v5686_v45  ;;  %v5377_v35 = vrot.slane %v19933_v14, 7  ;;  %v5376_v7 = vsel %vm4056_vm6, %v5373_v21, %v5375_v33 }
 0x48c   :  { %11944 = vmatprep.mubr.msk.f32.mxu0 %vm13150_vm0, %v19571_v32  ;;  %11997 = vmatprep.mubr.msk.f32.mxu1 %vm13150_vm0, %v19571_v32  ;;  %v5688_v2 = vsel %vm1113_vm3, %v5685_v36, %v5687_v4  ;;  %v19934_v36 = vld [vmem:[#allocation164_spill] sm:$0xff] }
 0x48e   :  { %v4322_v0 = vpop.f32.mrb[188].mxu0  ;;  %v4593_v8 = vpop.f32.mrb[56].mxu1 }
 0x48f   :  { %v17511_v42 = vadd.f32 %v4322_v0, %v17270_v22  ;;  %v17514_v45 = vadd.f32 %v4593_v8, %v17321_v58  ;;  %v11593_v41 = vpop.f32.mrb[189].mxu0  ;;  %v11646_v43 = vpop.f32.mrb[57].mxu1  ;;  %11945 = vmatmul.mubr.msk.f32.gmra.mrb[38].mxu0 %vm1169_vm1, %v5376_v7  ;;  %11998 = vmatmul.mubr.msk.f32.gmra.mrb[162].mxu1 %vm1169_vm1, %v5688_v2  ;;  %v5379_v22 = vrot.slane %v19934_v36, 7  ;;  %v5378_v58 = vsel %vm4056_vm6, %v5375_v33, %v5377_v35 }
 0x490   :  { %11947 = vmatprep.mubr.msk.f32.mxu0 %vm13150_vm0, %v19571_v32  ;;  %12000 = vmatprep.mubr.msk.f32.mxu1 %vm13150_vm0, %v19571_v32  ;;  %v5690_v8 = vsel %vm1113_vm3, %v5687_v4, %v5689_v56  ;;  %v19935_v4 = vld [vmem:[#allocation166_spill] sm:$0xff] }
 0x492   :  { %v4327_v21 = vpop.f32.mrb[190].mxu0  ;;  %v4598_v0 = vpop.f32.mrb[58].mxu1 }
 0x493   :  { %v17527_v7 = vadd.f32 %v4327_v21, %v17286_v25  ;;  %v17530_v2 = vadd.f32 %v4598_v0, %v17337_v30  ;;  %v11596_v41 = vpop.f32.mrb[191].mxu0  ;;  %v11649_v43 = vpop.f32.mrb[59].mxu1  ;;  %11948 = vmatmul.mubr.msk.f32.gmra.mrb[40].mxu0 %vm1169_vm1, %v5378_v58  ;;  %12001 = vmatmul.mubr.msk.f32.gmra.mrb[164].mxu1 %vm1169_vm1, %v5690_v8  ;;  %v5381_v25 = vrot.slane %v19935_v4, 7  ;;  %v5380_v30 = vsel %vm4056_vm6, %v5377_v35, %v5379_v22 }
 0x494   :  { %11950 = vmatprep.mubr.msk.f32.mxu0 %vm13150_vm0, %v19571_v32  ;;  %12003 = vmatprep.mubr.msk.f32.mxu1 %vm13150_vm0, %v19571_v32  ;;  %v5692_v0 = vsel %vm1113_vm3, %v5689_v56, %v5691_v44  ;;  %v19936_v56 = vld [vmem:[#allocation168_spill] sm:$0xff] }
 0x496   :  { %v4332_v33 = vpop.f32.mrb[192].mxu0  ;;  %v4603_v21 = vpop.f32.mrb[60].mxu1 }
 0x497   :  { %v17543_v58 = vadd.f32 %v4332_v33, %v17302_v28  ;;  %v17546_v8 = vadd.f32 %v4603_v21, %v17353_v26  ;;  %v11599_v41 = vpop.f32.mrb[193].mxu0  ;;  %v11652_v43 = vpop.f32.mrb[61].mxu1  ;;  %11951 = vmatmul.mubr.msk.f32.gmra.mrb[42].mxu0 %vm1169_vm1, %v5380_v30  ;;  %12004 = vmatmul.mubr.msk.f32.gmra.mrb[166].mxu1 %vm1169_vm1, %v5692_v0  ;;  %v5383_v28 = vrot.slane %v19936_v56, 7  ;;  %v5382_v26 = vsel %vm4056_vm6, %v5379_v22, %v5381_v25 }
 0x498   :  { %11953 = vmatprep.mubr.msk.f32.mxu0 %vm13150_vm0, %v19571_v32  ;;  %12006 = vmatprep.mubr.msk.f32.mxu1 %vm13150_vm0, %v19571_v32  ;;  %v5694_v21 = vsel %vm1113_vm3, %v5691_v44, %v5693_v60  ;;  %v19937_v44 = vld [vmem:[#allocation170_spill] sm:$0xff] }
 0x49a   :  { %v4337_v35 = vpop.f32.mrb[194].mxu0  ;;  %v4608_v33 = vpop.f32.mrb[62].mxu1 }
 0x49b   :  { %v17559_v30 = vadd.f32 %v4337_v35, %v17318_v34  ;;  %v17562_v0 = vadd.f32 %v4608_v33, %v17369_v61  ;;  %v11602_v41 = vpop.f32.mrb[195].mxu0  ;;  %v11655_v43 = vpop.f32.mrb[63].mxu1  ;;  %11954 = vmatmul.mubr.msk.f32.gmra.mrb[44].mxu0 %vm1169_vm1, %v5382_v26  ;;  %12007 = vmatmul.mubr.msk.f32.gmra.mrb[168].mxu1 %vm1169_vm1, %v5694_v21  ;;  %v5385_v34 = vrot.slane %v19937_v44, 7  ;;  %v5384_v61 = vsel %vm4056_vm6, %v5381_v25, %v5383_v28 }
 0x49c   :  { %11956 = vmatprep.mubr.msk.f32.mxu0 %vm13150_vm0, %v19571_v32  ;;  %12009 = vmatprep.mubr.msk.f32.mxu1 %vm13150_vm0, %v19571_v32  ;;  %v5696_v33 = vsel %vm1113_vm3, %v5693_v60, %v5695_v27  ;;  %v19938_v60 = vld [vmem:[#allocation172_spill] sm:$0xff] }
 0x49e   :  { %v4342_v22 = vpop.f32.mrb[196].mxu0  ;;  %v4613_v35 = vpop.f32.mrb[64].mxu1 }
 0x49f   :  { %v17575_v26 = vadd.f32 %v4342_v22, %v17334_v3  ;;  %v17578_v21 = vadd.f32 %v4613_v35, %v17384_v59  ;;  %v11605_v41 = vpop.f32.mrb[197].mxu0  ;;  %v11658_v43 = vpop.f32.mrb[65].mxu1  ;;  %11957 = vmatmul.mubr.msk.f32.gmra.mrb[46].mxu0 %vm1169_vm1, %v5384_v61  ;;  %12010 = vmatmul.mubr.msk.f32.gmra.mrb[170].mxu1 %vm1169_vm1, %v5696_v33  ;;  %v5387_v3 = vrot.slane %v19938_v60, 7  ;;  %v5386_v59 = vsel %vm4056_vm6, %v5383_v28, %v5385_v34  ;;  %v19940_v28 = vld [vmem:[#allocation158_spill] sm:$0xff] }
 0x4a0   :  { %11959 = vmatprep.mubr.msk.f32.mxu0 %vm13150_vm0, %v19571_v32  ;;  %12012 = vmatprep.mubr.msk.f32.mxu1 %vm13150_vm0, %v19571_v32  ;;  %v5698_v35 = vsel %vm1113_vm3, %v5695_v27, %v5697_v52  ;;  %v19939_v27 = vld [vmem:[#allocation174_spill] sm:$0xff] }
 0x4a2   :  { %v4347_v25 = vpop.f32.mrb[198].mxu0  ;;  %v4618_v22 = vpop.f32.mrb[66].mxu1 }
 0x4a3   :  { %v17591_v61 = vadd.f32 %v4347_v25, %v17350_v20  ;;  %v17594_v33 = vadd.f32 %v4618_v22, %v17401_v15  ;;  %v11608_v41 = vpop.f32.mrb[199].mxu0  ;;  %v11661_v43 = vpop.f32.mrb[67].mxu1  ;;  %11960 = vmatmul.mubr.msk.f32.gmra.mrb[48].mxu0 %vm1169_vm1, %v5386_v59  ;;  %12013 = vmatmul.mubr.msk.f32.gmra.mrb[172].mxu1 %vm1169_vm1, %v5698_v35  ;;  %v5389_v20 = vrot.slane %v19939_v27, 7  ;;  %v13147_v15 = vld [vmem:[%s19341_s2] ss:$0 sm:$0xff]  ;;  %v5388_v35 = vsel %vm4056_vm6, %v5385_v34, %v5387_v3  ;;  %v19941_v34 = vld [vmem:[#allocation175_spill] sm:$0xff] }
 0x4a4   :  { %11962 = vmatprep.mubr.msk.f32.mxu0 %vm13150_vm0, %v19571_v32  ;;  %12015 = vmatprep.mubr.msk.f32.mxu1 %vm13150_vm0, %v19571_v32  ;;  %v17608_v25 = vadd.f32 %v13147_v15, %v19940_v28  ;;  %v5700_v41 = vsel %vm1113_vm3, %v5697_v52, %v5699_v38  ;;  %v5702_v52 = vsel %vm1113_vm3, %v5699_v38, %v5701_v16  ;;  %v5391_v15 = vrot.slane %v19941_v34, 7 }
 0x4a5   :  { %v5390_v28 = vsel %vm4056_vm6, %v5387_v3, %v5389_v20 }
 0x4a6   :  { %v4352_v22 = vpop.f32.mrb[200].mxu0  ;;  %v4623_v59 = vpop.f32.mrb[68].mxu1  ;;  %v5392_v3 = vsel %vm4056_vm6, %v5389_v20, %v5391_v15 }
 0x4a7   :  { %v17613_v43 = vadd.f32 %v4352_v22, %v17366_v63  ;;  %v17616_v31 = vadd.f32 %v4623_v59, %v17413_v55  ;;  %v11611_v27 = vpop.f32.mrb[201].mxu0  ;;  %v11664_v60 = vpop.f32.mrb[69].mxu1  ;;  %11963 = vmatmul.mubr.msk.f32.gmra.mrb[50].mxu0 %vm1169_vm1, %v5388_v35  ;;  %12016 = vmatmul.mubr.msk.f32.gmra.mrb[174].mxu1 %vm1169_vm1, %v5700_v41  ;;  %v5703_v63 = vrot.slane %v19899_v17, 4  ;;  %v1020_v55 = vmax.f32 %v17608_v25, 0.0 }
 0x4a8   :  { %11965 = vmatprep.mubr.msk.f32.mxu0 %vm13150_vm0, %v19571_v32  ;;  %12018 = vmatprep.mubr.msk.f32.mxu1 %vm13150_vm0, %v19571_v32  ;;  %v5705_v17 = vrot.slane %v19900_v40, 4  ;;  %v5707_v40 = vrot.slane %v19901_v54, 4  ;;  %v19942_v54 = vld [vmem:[#allocation128_spill] sm:$0xff] }
 0x4aa   :  { %v4357_v27 = vpop.f32.mrb[202].mxu0  ;;  %v4628_v60 = vpop.f32.mrb[70].mxu1 }
 0x4ab   :  { %v17630_v22 = vadd.f32 %v4357_v27, %v17381_v11  ;;  %v17633_v59 = vadd.f32 %v4628_v60, %v17431_v13  ;;  %v11614_v35 = vpop.f32.mrb[203].mxu0  ;;  %v11667_v41 = vpop.f32.mrb[71].mxu1  ;;  %11966 = vmatmul.mubr.msk.f32.gmra.mrb[52].mxu0 %vm1169_vm1, %v5390_v28  ;;  %12019 = vmatmul.mubr.msk.f32.gmra.mrb[176].mxu1 %vm1169_vm1, %v5702_v52  ;;  %v5393_v11 = vrot.slane %v1020_v55, 7  ;;  %v5704_v27 = vsel %vm1113_vm3, %v5701_v16, %v5703_v63 }
 0x4ac   :  { %11968 = vmatprep.mubr.msk.f32.mxu0 %vm13150_vm0, %v19571_v32  ;;  %12021 = vmatprep.mubr.msk.f32.mxu1 %vm13150_vm0, %v19571_v32 }
 0x4ad   :  { %v5394_v20 = vsel %vm4056_vm6, %v5391_v15, %v5393_v11  ;;  %v5708_v11 = vsel %vm1113_vm3, %v5705_v17, %v5707_v40 }
 0x4ae   :  { %v4362_v38 = vpop.f32.mrb[204].mxu0  ;;  %v4633_v13 = vpop.f32.mrb[72].mxu1 }
 0x4af   :  { %v17647_v60 = vadd.f32 %v4362_v38, %v17398_v12  ;;  %v17650_v52 = vadd.f32 %v4633_v13, %v17447_v29  ;;  %v11617_v28 = vpop.f32.mrb[205].mxu0  ;;  %v11670_v35 = vpop.f32.mrb[73].mxu1  ;;  %11969 = vmatmul.mubr.msk.f32.gmra.mrb[54].mxu0 %vm1169_vm1, %v5392_v3  ;;  %12022 = vmatmul.mubr.msk.f32.gmra.mrb[178].mxu1 %vm1169_vm1, %v5704_v27  ;;  %v5706_v29 = vsel %vm1113_vm3, %v5703_v63, %v5705_v17  ;;  %v5709_v63 = vrot.slane %v19942_v54, 4  ;;  %v19944_v54 = vld [vmem:[#allocation120_spill] sm:$0xff] }
 0x4b0   :  { %11971 = vmatprep.mubr.msk.f32.mxu0 %vm13150_vm0, %v19571_v32  ;;  %12024 = vmatprep.mubr.msk.f32.mxu1 %vm13150_vm0, %v19571_v32  ;;  %v5711_v17 = vrot.slane %v19906_v23, 4  ;;  %v5713_v23 = vrot.slane %v19908_v57, 4  ;;  %v19945_v57 = vld [vmem:[#allocation137_spill] sm:$0xff] }
 0x4b2   :  { %v4638_v16 = vpop.f32.mrb[74].mxu1  ;;  %v4842_v12 = vpop.f32.mrb[206].mxu0 }
 0x4b3   :  { %v17662_v41 = vadd.f32 %v4638_v16, %v17463_v19  ;;  %v17665_v38 = vadd.f32 %v4842_v12, %v17416_v24  ;;  %v11673_v13 = vpop.f32.mrb[75].mxu1  ;;  %v11717_v3 = vpop.f32.mrb[207].mxu0  ;;  %11972 = vmatmul.mubr.msk.f32.gmra.mrb[56].mxu0 %vm1169_vm1, %v5394_v20  ;;  %12025 = vmatmul.mubr.msk.f32.gmra.mrb[180].mxu1 %vm1169_vm1, %v5706_v29  ;;  %v19943_v16 = vld [vmem:[#allocation117_spill] sm:$0xff] }
 0x4b4   :  { %12027 = vmatprep.mubr.msk.f32.mxu1 %vm13150_vm0, %v19571_v32  ;;  %12071 = vmatprep.mubr.msk.f32.mxu0 %vm13150_vm0, %v19571_v32 }
 0x4b6   :  { %v4643_v15 = vpop.f32.mrb[76].mxu1  ;;  %v4847_v19 = vpop.f32.mrb[208].mxu0 }
 0x4b7   :  { %v17676_v24 = vadd.f32 %v4643_v15, %v17479_v50  ;;  %v17679_v27 = vadd.f32 %v4847_v19, %v17434_v39  ;;  %v11676_v28 = vpop.f32.mrb[77].mxu1  ;;  %v11720_v35 = vpop.f32.mrb[209].mxu0  ;;  %12028 = vmatmul.mubr.msk.f32.gmra.mrb[182].mxu1 %vm1169_vm1, %v5708_v11  ;;  %12072 = vmatmul.mubr.msk.f32.vlgmr.msra.gmra.mrb[58].mxu0 %vm1169_vm1, %v19943_v16  ;;  %v5710_v39 = vsel %vm1113_vm3, %v5707_v40, %v5709_v63 }
 0x4b8   :  { %12030 = vmatprep.mubr.msk.f32.mxu1 %vm13150_vm0, %v19571_v32  ;;  %12074 = vmatprep.mubr.msk.f32.mxu0 %vm13150_vm0, %v19571_v32 }
 0x4ba   :  { %v4648_v50 = vpop.f32.mrb[78].mxu1  ;;  %v4852_v12 = vpop.f32.mrb[210].mxu0 }
 0x4bb   :  { %v17691_v20 = vadd.f32 %v4648_v50, %v17495_v1  ;;  %v17694_v29 = vadd.f32 %v4852_v12, %v17450_v9  ;;  %v11679_v13 = vpop.f32.mrb[79].mxu1  ;;  %v11723_v3 = vpop.f32.mrb[211].mxu0  ;;  %12031 = vmatmul.mubr.msk.f32.gmra.mrb[184].mxu1 %vm1169_vm1, %v5710_v39  ;;  %12075 = vmatmul.mubr.msk.f32.gmra.mrb[60].mxu0 %vm1169_vm1, %v19944_v54  ;;  %v5712_v9 = vsel %vm1113_vm3, %v5709_v63, %v5711_v17  ;;  %v5715_v63 = vrot.slane %v19945_v57, 4  ;;  %v19946_v39 = vld [vmem:[#allocation126_spill] sm:$0xff] }
 0x4bc   :  { %12033 = vmatprep.mubr.msk.f32.mxu1 %vm13150_vm0, %v19571_v32  ;;  %12077 = vmatprep.mubr.msk.f32.mxu0 %vm13150_vm0, %v19571_v32 }
 0x4be   :  { %v4653_v1 = vpop.f32.mrb[80].mxu1  ;;  %v4857_v40 = vpop.f32.mrb[212].mxu0 }
 0x4bf   :  { %v17706_v15 = vadd.f32 %v4653_v1, %v17511_v42  ;;  %v17709_v19 = vadd.f32 %v4857_v40, %v17466_v62  ;;  %v11682_v11 = vpop.f32.mrb[81].mxu1  ;;  %v11726_v28 = vpop.f32.mrb[213].mxu0  ;;  %12034 = vmatmul.mubr.msk.f32.gmra.mrb[186].mxu1 %vm1169_vm1, %v5712_v9  ;;  %12078 = vmatmul.mubr.msk.f32.gmra.mrb[62].mxu0 %vm1169_vm1, %v19907_v5  ;;  %v5714_v62 = vsel %vm1113_vm3, %v5711_v17, %v5713_v23  ;;  %v19947_v17 = vld [vmem:[#allocation140_spill] sm:$0xff] }
 0x4c0   :  { %12036 = vmatprep.mubr.msk.f32.mxu1 %vm13150_vm0, %v19571_v32  ;;  %12080 = vmatprep.mubr.msk.f32.mxu0 %vm13150_vm0, %v19571_v32  ;;  %v5717_v13 = vrot.slane %v19947_v17, 4  ;;  %v19948_v11 = vld [vmem:[#allocation129_spill] sm:$0xff] }
 0x4c2   :  { %v4658_v42 = vpop.f32.mrb[82].mxu1  ;;  %v4862_v35 = vpop.f32.mrb[214].mxu0 }
 0x4c3   :  { %v17721_v16 = vadd.f32 %v4658_v42, %v17527_v7  ;;  %v17724_v50 = vadd.f32 %v4862_v35, %v17482_v47  ;;  %v11685_v12 = vpop.f32.mrb[83].mxu1  ;;  %v11729_v5 = vpop.f32.mrb[215].mxu0  ;;  %12037 = vmatmul.mubr.msk.f32.gmra.mrb[188].mxu1 %vm1169_vm1, %v5714_v62  ;;  %12081 = vmatmul.mubr.msk.f32.gmra.mrb[64].mxu0 %vm1169_vm1, %v19946_v39  ;;  %v5716_v47 = vsel %vm1113_vm3, %v5713_v23, %v5715_v63  ;;  %v19949_v23 = vld [vmem:[#allocation143_spill] sm:$0xff] }
 0x4c4   :  { %12039 = vmatprep.mubr.msk.f32.mxu1 %vm13150_vm0, %v19571_v32  ;;  %12083 = vmatprep.mubr.msk.f32.mxu0 %vm13150_vm0, %v19571_v32  ;;  %v5719_v28 = vrot.slane %v19949_v23, 4  ;;  %v19950_v5 = vld [vmem:[#allocation132_spill] sm:$0xff] }
 0x4c6   :  { %v4663_v7 = vpop.f32.mrb[84].mxu1  ;;  %v4867_v3 = vpop.f32.mrb[216].mxu0 }
 0x4c7   :  { %v17736_v54 = vadd.f32 %v4663_v7, %v17543_v58  ;;  %v17739_v1 = vadd.f32 %v4867_v3, %v17498_v46  ;;  %v11688_v40 = vpop.f32.mrb[85].mxu1  ;;  %v11732_v9 = vpop.f32.mrb[217].mxu0  ;;  %12040 = vmatmul.mubr.msk.f32.gmra.mrb[190].mxu1 %vm1169_vm1, %v5716_v47  ;;  %12084 = vmatmul.mubr.msk.f32.gmra.mrb[66].mxu0 %vm1169_vm1, %v19948_v11  ;;  %v5718_v46 = vsel %vm1113_vm3, %v5715_v63, %v5717_v13  ;;  %v19951_v63 = vld [vmem:[#allocation146_spill] sm:$0xff] }
 0x4c8   :  { %12042 = vmatprep.mubr.msk.f32.mxu1 %vm13150_vm0, %v19571_v32  ;;  %12086 = vmatprep.mubr.msk.f32.mxu0 %vm13150_vm0, %v19571_v32  ;;  %v5721_v39 = vrot.slane %v19951_v63, 4  ;;  %v19952_v9 = vld [vmem:[#allocation135_spill] sm:$0xff] }
 0x4ca   :  { %v4668_v58 = vpop.f32.mrb[86].mxu1  ;;  %v4872_v57 = vpop.f32.mrb[218].mxu0 }
 0x4cb   :  { %v17751_v42 = vadd.f32 %v4668_v58, %v17559_v30  ;;  %v17754_v35 = vadd.f32 %v4872_v57, %v17514_v45  ;;  %v11691_v62 = vpop.f32.mrb[87].mxu1  ;;  %v11735_v12 = vpop.f32.mrb[219].mxu0  ;;  %12043 = vmatmul.mubr.msk.f32.gmra.mrb[192].mxu1 %vm1169_vm1, %v5718_v46  ;;  %12087 = vmatmul.mubr.msk.f32.gmra.mrb[68].mxu0 %vm1169_vm1, %v19950_v5  ;;  %v5720_v45 = vsel %vm1113_vm3, %v5717_v13, %v5719_v28  ;;  %v19953_v13 = vld [vmem:[#allocation149_spill] sm:$0xff] }
 0x4cc   :  { %12045 = vmatprep.mubr.msk.f32.mxu1 %vm13150_vm0, %v19571_v32  ;;  %12089 = vmatprep.mubr.msk.f32.mxu0 %vm13150_vm0, %v19571_v32  ;;  %v5723_v11 = vrot.slane %v19953_v13, 4  ;;  %v19954_v12 = vld [vmem:[#allocation138_spill] sm:$0xff] }
 0x4ce   :  { %v4673_v30 = vpop.f32.mrb[88].mxu1  ;;  %v4877_v17 = vpop.f32.mrb[220].mxu0 }
 0x4cf   :  { %v17766_v7 = vadd.f32 %v4673_v30, %v17575_v26  ;;  %v17769_v3 = vadd.f32 %v4877_v17, %v17530_v2  ;;  %v11694_v47 = vpop.f32.mrb[89].mxu1  ;;  %v11738_v40 = vpop.f32.mrb[221].mxu0  ;;  %12046 = vmatmul.mubr.msk.f32.gmra.mrb[194].mxu1 %vm1169_vm1, %v5720_v45  ;;  %12090 = vmatmul.mubr.msk.f32.gmra.mrb[70].mxu0 %vm1169_vm1, %v19952_v9  ;;  %v5722_v2 = vsel %vm1113_vm3, %v5719_v28, %v5721_v39  ;;  %v5725_v28 = vrot.slane %v19920_v6, 4 }
 0x4d0   :  { %12048 = vmatprep.mubr.msk.f32.mxu1 %vm13150_vm0, %v19571_v32  ;;  %12092 = vmatprep.mubr.msk.f32.mxu0 %vm13150_vm0, %v19571_v32  ;;  %v19955_v47 = vld [vmem:[#allocation141_spill] sm:$0xff] }
 0x4d2   :  { %v4678_v26 = vpop.f32.mrb[90].mxu1  ;;  %v4882_v23 = vpop.f32.mrb[222].mxu0 }
 0x4d3   :  { %v17781_v58 = vadd.f32 %v4678_v26, %v17591_v61  ;;  %v17784_v57 = vadd.f32 %v4882_v23, %v17546_v8  ;;  %v11697_v46 = vpop.f32.mrb[91].mxu1  ;;  %v11741_v62 = vpop.f32.mrb[223].mxu0  ;;  %12049 = vmatmul.mubr.msk.f32.gmra.mrb[196].mxu1 %vm1169_vm1, %v5722_v2  ;;  %12093 = vmatmul.mubr.msk.f32.gmra.mrb[72].mxu0 %vm1169_vm1, %v19954_v12  ;;  %v5724_v8 = vsel %vm1113_vm3, %v5721_v39, %v5723_v11  ;;  %v19956_v26 = vld [vmem:[#allocation144_spill] sm:$0xff] }
 0x4d4   :  { %12051 = vmatprep.mubr.msk.f32.mxu1 %vm13150_vm0, %v19571_v32  ;;  %12095 = vmatprep.mubr.msk.f32.mxu0 %vm13150_vm0, %v19571_v32 }
 0x4d6   :  { %v4683_v61 = vpop.f32.mrb[92].mxu1  ;;  %v4887_v5 = vpop.f32.mrb[224].mxu0 }
 0x4d7   :  { %v17796_v63 = vadd.f32 %v4683_v61, %v17613_v43  ;;  %v17799_v30 = vadd.f32 %v4887_v5, %v17562_v0  ;;  %v11700_v17 = vpop.f32.mrb[93].mxu1  ;;  %v11744_v45 = vpop.f32.mrb[225].mxu0  ;;  %12052 = vmatmul.mubr.msk.f32.gmra.mrb[198].mxu1 %vm1169_vm1, %v5724_v8  ;;  %12096 = vmatmul.mubr.msk.f32.gmra.mrb[74].mxu0 %vm1169_vm1, %v19955_v47  ;;  %v5726_v43 = vsel %vm1113_vm3, %v5723_v11, %v5725_v28  ;;  %v19958_v61 = vld [vmem:[#allocation147_spill] sm:$0xff] }
 0x4d8   :  { %12054 = vmatprep.mubr.msk.f32.mxu1 %vm13150_vm0, %v19571_v32  ;;  %12098 = vmatprep.mubr.msk.f32.mxu0 %vm13150_vm0, %v19571_v32  ;;  %v19959_v17 = vld [vmem:[#allocation95_spill] sm:$0xff] }
 0x4da   :  { %v4688_v6 = vpop.f32.mrb[94].mxu1  ;;  %v4892_v39 = vpop.f32.mrb[226].mxu0 }
 0x4db   :  { %v17810_v0 = vadd.f32 %v4688_v6, %v17630_v22  ;;  %v17813_v40 = vadd.f32 %v4892_v39, %v17578_v21  ;;  %v11703_v9 = vpop.f32.mrb[95].mxu1  ;;  %v11747_v13 = vpop.f32.mrb[227].mxu0  ;;  %12055 = vmatmul.mubr.msk.f32.gmra.mrb[200].mxu1 %vm1169_vm1, %v5726_v43  ;;  %12099 = vmatmul.mubr.msk.f32.gmra.mrb[76].mxu0 %vm1169_vm1, %v19956_v26  ;;  %v19957_v22 = vrot.slane %v19924_v10, 4  ;;  %v19960_v43 = vld [vmem:[#allocation153_spill] sm:$0xff] }
 0x4dc   :  { %12057 = vmatprep.mubr.msk.f32.mxu1 %vm13150_vm0, %v19571_v32  ;;  %12101 = vmatprep.mubr.msk.f32.mxu0 %vm13150_vm0, %v19571_v32 }
 0x4dd   :  { %v5727_v21 = vsel %vm1113_vm3, %v5725_v28, %v19957_v22 }
 0x4de   :  { %v4693_v11 = vpop.f32.mrb[96].mxu1  ;;  %v4897_v23 = vpop.f32.mrb[228].mxu0 }
 0x4df   :  { %v17826_v2 = vadd.f32 %v4693_v11, %v17647_v60  ;;  %v17829_v46 = vadd.f32 %v4897_v23, %v17594_v33  ;;  %v11706_v62 = vpop.f32.mrb[97].mxu1  ;;  %v11750_v12 = vpop.f32.mrb[229].mxu0  ;;  %12058 = vmatmul.mubr.msk.f32.gmra.mrb[202].mxu1 %vm1169_vm1, %v5727_v21  ;;  %12102 = vmatmul.mubr.msk.f32.gmra.mrb[78].mxu0 %vm1169_vm1, %v19958_v61 }
 0x4e0   :  { %12060 = vmatprep.mubr.msk.f32.mxu1 %vm13150_vm0, %v19571_v32  ;;  %12104 = vmatprep.mubr.msk.f32.mxu0 %vm13150_vm0, %v19571_v32 }
 0x4e2   :  { %v4902_v10 = vpop.f32.mrb[230].mxu0  ;;  %v5178_v28 = vpop.f32.mrb[98].mxu1 }
 0x4e3   :  { %v17839_v60 = vadd.f32 %v4902_v10, %v17616_v31  ;;  %v17842_v33 = vadd.f32 %v5178_v28, %v17665_v38  ;;  %v11753_v5 = vpop.f32.mrb[231].mxu0  ;;  %v11806_v8 = vpop.f32.mrb[99].mxu1  ;;  %12061 = vmatmul.mubr.msk.f32.gmra.mrb[204].mxu1 %vm1169_vm1, %v19959_v17  ;;  %12105 = vmatmul.mubr.msk.f32.gmra.mrb[80].mxu0 %vm1169_vm1, %v19923_v53 }
 0x4e4   :  { %12107 = vmatprep.mubr.msk.f32.mxu0 %vm13150_vm0, %v19571_v32 }
 0x4e6   :  { %v4907_v45 = vpop.f32.mrb[232].mxu0  ;;  %v5183_v47 = vpop.f32.mrb[100].mxu1 }
 0x4e7   :  { %v17851_v6 = vadd.f32 %v4907_v45, %v17633_v59  ;;  %v17854_v31 = vadd.f32 %v5183_v47, %v17679_v27  ;;  %v11756_v38 = vpop.f32.mrb[233].mxu0  ;;  %v11809_v39 = vpop.f32.mrb[101].mxu1  ;;  %12108 = vmatmul.mubr.msk.f32.gmra.mrb[82].mxu0 %vm1169_vm1, %v19960_v43 }
 0x4e8   :  { %12110 = vmatprep.mubr.msk.f32.mxu0 %vm13150_vm0, %v19571_v32 }
 0x4ea   :  { %v4912_v53 = vpop.f32.mrb[234].mxu0  ;;  %v5188_v9 = vpop.f32.mrb[102].mxu1 }
 0x4eb   :  { %v17861_v13 = vadd.f32 %v4912_v53, %v17650_v52  ;;  %v17864_v26 = vadd.f32 %v5188_v9, %v17694_v29  ;;  %v11759_v59 = vpop.f32.mrb[235].mxu0  ;;  %v11812_v11 = vpop.f32.mrb[103].mxu1  ;;  %12111 = vmatmul.mubr.msk.f32.gmra.mrb[84].mxu0 %vm1169_vm1, %v19928_v49 }
 0x4ec   :  { %12113 = vmatprep.mubr.msk.f32.mxu0 %vm13150_vm0, %v19571_v32 }
 0x4ee   :  { %v4917_v27 = vpop.f32.mrb[236].mxu0  ;;  %v5193_v23 = vpop.f32.mrb[104].mxu1 }
 0x4ef   :  { %v17871_v22 = vadd.f32 %v4917_v27, %v17662_v41  ;;  %v17874_v21 = vadd.f32 %v5193_v23, %v17709_v19  ;;  %v11762_v52 = vpop.f32.mrb[237].mxu0  ;;  %v11815_v62 = vpop.f32.mrb[105].mxu1  ;;  %12114 = vmatmul.mubr.msk.f32.gmra.mrb[86].mxu0 %vm1169_vm1, %v19929_v48 }
 0x4f0   :  { %12116 = vmatprep.mubr.msk.f32.mxu0 %vm13150_vm0, %v19571_v32  ;;  %v6357_v52 = vld [vmem:[%s19342_s5 + $0x40] sm:$0xff] }
 0x4f2   :  { %v4922_v49 = vpop.f32.mrb[238].mxu0  ;;  %v5198_v29 = vpop.f32.mrb[106].mxu1 }
 0x4f3   :  { %v17881_v12 = vadd.f32 %v4922_v49, %v17676_v24  ;;  %v17884_v61 = vadd.f32 %v5198_v29, %v17724_v50  ;;  %v11765_v41 = vpop.f32.mrb[239].mxu0  ;;  %v11818_v10 = vpop.f32.mrb[107].mxu1  ;;  %12117 = vmatmul.mubr.msk.f32.gmra.mrb[88].mxu0 %vm1169_vm1, %v19930_v18 }
 0x4f4   :  { %12119 = vmatprep.mubr.msk.f32.mxu0 %vm13150_vm0, %v19571_v32 }
 0x4f6   :  { %v4927_v48 = vpop.f32.mrb[240].mxu0  ;;  %v5203_v19 = vpop.f32.mrb[108].mxu1 }
 0x4f7   :  { %v17891_v28 = vadd.f32 %v4927_v48, %v17691_v20  ;;  %v17894_v5 = vadd.f32 %v5203_v19, %v17739_v1  ;;  %v11768_v24 = vpop.f32.mrb[241].mxu0  ;;  %v11821_v8 = vpop.f32.mrb[109].mxu1  ;;  %12120 = vmatmul.mubr.msk.f32.gmra.mrb[90].mxu0 %vm1169_vm1, %v19931_v37 }
 0x4f8   :  { %12122 = vmatprep.mubr.msk.f32.mxu0 %vm13150_vm0, %v19571_v32 }
 0x4fa   :  { %v4932_v18 = vpop.f32.mrb[242].mxu0  ;;  %v5208_v50 = vpop.f32.mrb[110].mxu1 }
 0x4fb   :  { %v17901_v17 = vadd.f32 %v4932_v18, %v17706_v15  ;;  %v17904_v45 = vadd.f32 %v5208_v50, %v17754_v35  ;;  %v11771_v20 = vpop.f32.mrb[243].mxu0  ;;  %v11824_v47 = vpop.f32.mrb[111].mxu1  ;;  %12123 = vmatmul.mubr.msk.f32.gmra.mrb[92].mxu0 %vm1169_vm1, %v19932_v51 }
 0x4fc   :  { %12125 = vmatprep.mubr.msk.f32.mxu0 %vm13150_vm0, %v19571_v32 }
 0x4fe   :  { %v4937_v37 = vpop.f32.mrb[244].mxu0  ;;  %v5213_v1 = vpop.f32.mrb[112].mxu1 }
 0x4ff   :  { %v17911_v38 = vadd.f32 %v4937_v37, %v17721_v16  ;;  %v17914_v39 = vadd.f32 %v5213_v1, %v17769_v3  ;;  %v11774_v15 = vpop.f32.mrb[245].mxu0  ;;  %v11827_v43 = vpop.f32.mrb[113].mxu1  ;;  %12126 = vmatmul.mubr.msk.f32.gmra.mrb[94].mxu0 %vm1169_vm1, %v19933_v14  ;;  %v19961_v1 = vld [vmem:[#allocation172_spill] sm:$0xff] }
 0x500   :  { %12128 = vmatprep.mubr.msk.f32.mxu0 %vm13150_vm0, %v19571_v32 }
 0x502   :  { %v4942_v51 = vpop.f32.mrb[246].mxu0  ;;  %v5218_v35 = vpop.f32.mrb[114].mxu1 }
 0x503   :  { %v17921_v53 = vadd.f32 %v4942_v51, %v17736_v54  ;;  %v17924_v9 = vadd.f32 %v5218_v35, %v17784_v57  ;;  %v11777_v16 = vpop.f32.mrb[247].mxu0  ;;  %v11830_v59 = vpop.f32.mrb[115].mxu1  ;;  %12129 = vmatmul.mubr.msk.f32.gmra.mrb[96].mxu0 %vm1169_vm1, %v19934_v36 }
 0x504   :  { %12131 = vmatprep.mubr.msk.f32.mxu0 %vm13150_vm0, %v19571_v32 }
 0x506   :  { %v4947_v14 = vpop.f32.mrb[248].mxu0  ;;  %v5223_v3 = vpop.f32.mrb[116].mxu1 }
 0x507   :  { %v17931_v11 = vadd.f32 %v4947_v14, %v17751_v42  ;;  %v17934_v27 = vadd.f32 %v5223_v3, %v17799_v30  ;;  %v11780_v54 = vpop.f32.mrb[249].mxu0  ;;  %v11833_v23 = vpop.f32.mrb[117].mxu1  ;;  %12132 = vmatmul.mubr.msk.f32.gmra.mrb[98].mxu0 %vm1169_vm1, %v19935_v4  ;;  %v6358_v42 = vld [vmem:[%s19342_s5 + $0x48] sm:$0xff]  ;;  %v19962_v3 = vld [vmem:[#allocation174_spill] sm:$0xff] }
 0x508   :  { %12134 = vmatprep.mubr.msk.f32.mxu0 %vm13150_vm0, %v19571_v32  ;;  %v12764_v29 = vpack.c.bf16 %v6358_v42, %v6357_v52 }
 0x50a   :  { %v4952_v36 = vpop.f32.mrb[250].mxu0  ;;  %v5228_v57 = vpop.f32.mrb[118].mxu1  ;;  %12765 = vmatprep.subr.bf16.mxu1 %v12764_v29 }
 0x50b   :  { %v17947_v30 = vadd.f32 %v4952_v36, %v17766_v7  ;;  %v17950_v62 = vadd.f32 %v5228_v57, %v17813_v40  ;;  %v11783_v4 = vpop.f32.mrb[251].mxu0  ;;  %v11836_v49 = vpop.f32.mrb[119].mxu1  ;;  %12135 = vmatmul.mubr.msk.f32.gmra.mrb[100].mxu0 %vm1169_vm1, %v19936_v56  ;;  %12767 = vmatpush3.bf16.msra.mxu1 %v12764_v29  ;;  %v6359_v7 = vld [vmem:[%s19342_s5 + $0x50] sm:$0xff]  ;;  %v6360_v40 = vld [vmem:[%s19342_s5 + $0x58] sm:$0xff] }
 0x50c   :  { %12137 = vmatprep.mubr.msk.f32.mxu0 %vm13150_vm0, %v19571_v32  ;;  %v12768_v8 = vpack.c.bf16 %v6360_v40, %v6359_v7 }
 0x50e   :  { %v4957_v41 = vpop.f32.mrb[252].mxu0  ;;  %v5233_v10 = vpop.f32.mrb[120].mxu1  ;;  %12769 = vmatprep.subr.bf16.mxu1 %v12768_v8 }
 0x50f   :  { %v17963_v48 = vadd.f32 %v4957_v41, %v17781_v58  ;;  %v17966_v56 = vadd.f32 %v5233_v10, %v17829_v46  ;;  %v11786_v19 = vpop.f32.mrb[253].mxu0  ;;  %v11839_v24 = vpop.f32.mrb[121].mxu1  ;;  %12138 = vmatmul.mubr.msk.f32.gmra.mrb[102].mxu0 %vm1169_vm1, %v19937_v44  ;;  %12771 = vmatpush3.bf16.msra.mxu1 %v12768_v8  ;;  %v6361_v58 = vld [vmem:[%s19342_s5 + $0x60] sm:$0xff]  ;;  %v6362_v46 = vld [vmem:[%s19342_s5 + $0x68] sm:$0xff] }
 0x510   :  { %12140 = vmatprep.mubr.msk.f32.mxu0 %vm13150_vm0, %v19571_v32  ;;  %v12772_v15 = vpack.c.bf16 %v6362_v46, %v6361_v58 }
 0x512   :  { %v4962_v18 = vpop.f32.mrb[254].mxu0  ;;  %v5238_v50 = vpop.f32.mrb[122].mxu1  ;;  %12773 = vmatprep.subr.bf16.mxu1 %v12772_v15 }
 0x513   :  { %v17979_v20 = vadd.f32 %v4962_v18, %v17796_v63  ;;  %v17982_v44 = vadd.f32 %v5238_v50, %v17839_v60  ;;  %v11789_v47 = vpop.f32.mrb[255].mxu0  ;;  %v11842_v37 = vpop.f32.mrb[123].mxu1  ;;  %12141 = vmatmul.mubr.msk.f32.gmra.mrb[104].mxu0 %vm1169_vm1, %v19961_v1  ;;  %12775 = vmatpush3.bf16.msra.mxu1 %v12772_v15  ;;  %v6363_v63 = vld [vmem:[%s19342_s5 + $0x70] sm:$0xff]  ;;  %v6364_v60 = vld [vmem:[%s19342_s5 + $0x78] sm:$0xff] }
 0x514   :  { %12143 = vmatprep.mubr.msk.f32.mxu0 %vm13150_vm0, %v19571_v32  ;;  %v12776_v54 = vpack.c.bf16 %v6364_v60, %v6363_v63 }
 0x516   :  { %v4967_v43 = vpop.f32.mrb[0].mxu0  ;;  %v5243_v51 = vpop.f32.mrb[124].mxu1  ;;  %12777 = vmatprep.subr.bf16.mxu1 %v12776_v54 }
 0x517   :  { %v17995_v35 = vadd.f32 %v4967_v43, %v17810_v0  ;;  %v17998_v16 = vadd.f32 %v5243_v51, %v17851_v6  ;;  %v11792_v59 = vpop.f32.mrb[1].mxu0  ;;  %v11845_v14 = vpop.f32.mrb[125].mxu1  ;;  %12144 = vmatmul.mubr.msk.f32.gmra.mrb[106].mxu0 %vm1169_vm1, %v19962_v3  ;;  %12779 = vmatpush3.bf16.msra.mxu1 %v12776_v54 }
 0x518   :  { %12146 = vmatprep.mubr.msk.f32.mxu0 %vm13150_vm0, %v19571_v32 }
 0x51a   :  { %v4972_v23 = vpop.f32.mrb[2].mxu0  ;;  %v5248_v36 = vpop.f32.mrb[126].mxu1 }
 0x51b   :  { %v18005_v57 = vadd.f32 %v4972_v23, %v17826_v2  ;;  %v18008_v0 = vadd.f32 %v5248_v36, %v17861_v13  ;;  %v11795_v6 = vpop.f32.mrb[3].mxu0  ;;  %v11848_v52 = vpop.f32.mrb[127].mxu1  ;;  %12147 = vmatmul.mubr.msk.f32.gmra.mrb[108].mxu0 %vm1169_vm1, %v19941_v34 }
 0x51c   :  { %12149 = vmatprep.mubr.msk.f32.mxu0 %vm13150_vm0, %v19571_v32 }
 0x51e   :  { %v5253_v42 = vpop.f32.mrb[128].mxu1  ;;  %v5515_v4 = vpop.f32.mrb[4].mxu0 }
 0x51f   :  { %v18015_v49 = vadd.f32 %v5253_v42, %v17871_v22  ;;  %v18018_v29 = vadd.f32 %v5515_v4, %v17842_v33  ;;  %v11851_v2 = vpop.f32.mrb[129].mxu1  ;;  %v11895_v41 = vpop.f32.mrb[5].mxu0  ;;  %12150 = vmatmul.mubr.msk.f32.gmra.mrb[110].mxu0 %vm1169_vm1, %v1020_v55 }
 0x522   :  { %v5258_v13 = vpop.f32.mrb[130].mxu1  ;;  %v5520_v10 = vpop.f32.mrb[6].mxu0 }
 0x523   :  { %v18024_v34 = vadd.f32 %v5258_v13, %v17881_v12  ;;  %v18027_v32 = vadd.f32 %v5520_v10, %v17854_v31  ;;  %v11854_v7 = vpop.f32.mrb[131].mxu1  ;;  %v11898_v22 = vpop.f32.mrb[7].mxu0 }
 0x526   :  { %v5263_v40 = vpop.f32.mrb[132].mxu1  ;;  %v5525_v19 = vpop.f32.mrb[8].mxu0 }
 0x527   :  { %v18030_v33 = vadd.f32 %v5263_v40, %v17891_v28  ;;  %v18033_v24 = vadd.f32 %v5525_v19, %v17864_v26  ;;  %v11857_v25 = vpop.f32.mrb[133].mxu1  ;;  %v11901_v55 = vpop.f32.mrb[9].mxu0 }
 0x52a   :  { %v5268_v8 = vpop.f32.mrb[134].mxu1  ;;  %v5530_v18 = vpop.f32.mrb[10].mxu0 }
 0x52b   :  { %v18036_v12 = vadd.f32 %v5268_v8, %v17901_v17  ;;  %v18039_v31 = vadd.f32 %v5530_v18, %v17874_v21  ;;  %v11860_v50 = vpop.f32.mrb[135].mxu1  ;;  %v11904_v58 = vpop.f32.mrb[11].mxu0 }
 0x52e   :  { %v5273_v46 = vpop.f32.mrb[136].mxu1  ;;  %v5535_v47 = vpop.f32.mrb[12].mxu0 }
 0x52f   :  { %v18042_v28 = vadd.f32 %v5273_v46, %v17911_v38  ;;  %v18045_v26 = vadd.f32 %v5535_v47, %v17884_v61  ;;  %v11863_v37 = vpop.f32.mrb[137].mxu1  ;;  %v11907_v1 = vpop.f32.mrb[13].mxu0 }
 0x532   :  { %v5278_v15 = vpop.f32.mrb[138].mxu1  ;;  %v5540_v43 = vpop.f32.mrb[14].mxu0 }
 0x533   :  { %v18048_v17 = vadd.f32 %v5278_v15, %v17921_v53  ;;  %v18051_v21 = vadd.f32 %v5540_v43, %v17894_v5  ;;  %v11866_v51 = vpop.f32.mrb[139].mxu1  ;;  %v11910_v63 = vpop.f32.mrb[15].mxu0 }
 0x536   :  { %v5283_v60 = vpop.f32.mrb[140].mxu1  ;;  %v5545_v59 = vpop.f32.mrb[16].mxu0 }
 0x537   :  { %v18054_v38 = vadd.f32 %v5283_v60, %v17931_v11  ;;  %v18057_v61 = vadd.f32 %v5545_v59, %v17904_v45  ;;  %v11869_v14 = vpop.f32.mrb[141].mxu1  ;;  %v11913_v3 = vpop.f32.mrb[17].mxu0 }
 0x53a   :  { %v5288_v54 = vpop.f32.mrb[142].mxu1  ;;  %v5550_v23 = vpop.f32.mrb[18].mxu0 }
 0x53b   :  { %v18060_v53 = vadd.f32 %v5288_v54, %v17947_v30  ;;  %v18063_v5 = vadd.f32 %v5550_v23, %v17914_v39  ;;  %v11872_v36 = vpop.f32.mrb[143].mxu1  ;;  %v11916_v6 = vpop.f32.mrb[19].mxu0 }
 0x53e   :  { %v5293_v52 = vpop.f32.mrb[144].mxu1  ;;  %v5555_v42 = vpop.f32.mrb[20].mxu0 }
 0x53f   :  { %v18066_v11 = vadd.f32 %v5293_v52, %v17963_v48  ;;  %v18069_v45 = vadd.f32 %v5555_v42, %v17924_v9  ;;  %v11875_v4 = vpop.f32.mrb[145].mxu1  ;;  %v11919_v2 = vpop.f32.mrb[21].mxu0 }
 0x542   :  { %v5298_v41 = vpop.f32.mrb[146].mxu1  ;;  %v5560_v13 = vpop.f32.mrb[22].mxu0 }
 0x543   :  { %v18072_v30 = vadd.f32 %v5298_v41, %v17979_v20  ;;  %v18075_v39 = vadd.f32 %v5560_v13, %v17934_v27  ;;  %v11878_v10 = vpop.f32.mrb[147].mxu1  ;;  %v11922_v7 = vpop.f32.mrb[23].mxu0 }
 0x546   :  { %v5303_v22 = vpop.f32.mrb[148].mxu1  ;;  %v5565_v40 = vpop.f32.mrb[24].mxu0 }
 0x547   :  { %v18078_v48 = vadd.f32 %v5303_v22, %v17995_v35  ;;  %v18081_v9 = vadd.f32 %v5565_v40, %v17950_v62  ;;  %v11881_v19 = vpop.f32.mrb[149].mxu1  ;;  %v11925_v25 = vpop.f32.mrb[25].mxu0 }
 0x54a   :  { %v5308_v55 = vpop.f32.mrb[150].mxu1  ;;  %v5570_v8 = vpop.f32.mrb[26].mxu0 }
 0x54b   :  { %v18084_v20 = vadd.f32 %v5308_v55, %v18005_v57  ;;  %v18087_v27 = vadd.f32 %v5570_v8, %v17966_v56  ;;  %v11884_v18 = vpop.f32.mrb[151].mxu1  ;;  %v11928_v50 = vpop.f32.mrb[27].mxu0 }
 0x54e   :  { %v5575_v58 = vpop.f32.mrb[28].mxu0  ;;  %v5846_v46 = vpop.f32.mrb[152].mxu1 }
 0x54f   :  { %v18090_v35 = vadd.f32 %v5575_v58, %v17982_v44  ;;  %v18093_v62 = vadd.f32 %v5846_v46, %v18018_v29  ;;  %v11931_v47 = vpop.f32.mrb[29].mxu0  ;;  %v11984_v37 = vpop.f32.mrb[153].mxu1 }
 0x552   :  { %v5580_v1 = vpop.f32.mrb[30].mxu0  ;;  %v5851_v15 = vpop.f32.mrb[154].mxu1 }
 0x553   :  { %v18096_v57 = vadd.f32 %v5580_v1, %v17998_v16  ;;  %v18099_v56 = vadd.f32 %v5851_v15, %v18027_v32  ;;  %v11934_v43 = vpop.f32.mrb[31].mxu0  ;;  %v11987_v51 = vpop.f32.mrb[155].mxu1 }
 0x556   :  { %v5585_v63 = vpop.f32.mrb[32].mxu0  ;;  %v5856_v60 = vpop.f32.mrb[156].mxu1 }
 0x557   :  { %v18102_v44 = vadd.f32 %v5585_v63, %v18008_v0  ;;  %v18105_v29 = vadd.f32 %v5856_v60, %v18033_v24  ;;  %v11937_v59 = vpop.f32.mrb[33].mxu0  ;;  %v11990_v14 = vpop.f32.mrb[157].mxu1 }
 0x55a   :  { %v5590_v3 = vpop.f32.mrb[34].mxu0  ;;  %v5861_v54 = vpop.f32.mrb[158].mxu1 }
 0x55b   :  { %v18108_v16 = vadd.f32 %v5590_v3, %v18015_v49  ;;  %v18111_v32 = vadd.f32 %v5861_v54, %v18039_v31  ;;  %v11940_v23 = vpop.f32.mrb[35].mxu0  ;;  %v11993_v36 = vpop.f32.mrb[159].mxu1 }
 0x55e   :  { %v5595_v6 = vpop.f32.mrb[36].mxu0  ;;  %v5866_v52 = vpop.f32.mrb[160].mxu1 }
 0x55f   :  { %v18114_v0 = vadd.f32 %v5595_v6, %v18024_v34  ;;  %v18117_v24 = vadd.f32 %v5866_v52, %v18045_v26  ;;  %v11943_v42 = vpop.f32.mrb[37].mxu0  ;;  %v11996_v4 = vpop.f32.mrb[161].mxu1  ;;  %v6349_v34 = vld [vmem:[%s19342_s5] sm:$0xff]  ;;  %v6350_v26 = vld [vmem:[%s19342_s5 + $0x8] sm:$0xff] }
 0x560   :  { %v18131_v7 = vpack.c.bf16 %v6350_v26, %v6349_v34 }
 0x562   :  { %v5600_v2 = vpop.f32.mrb[38].mxu0  ;;  %v5871_v41 = vpop.f32.mrb[162].mxu1  ;;  %12781 = vmatprep.subr.bf16.mxu1 %v18131_v7 }
 0x563   :  { %v18120_v49 = vadd.f32 %v5600_v2, %v18030_v33  ;;  %v18123_v31 = vadd.f32 %v5871_v41, %v18051_v21  ;;  %v11946_v13 = vpop.f32.mrb[39].mxu0  ;;  %v11999_v10 = vpop.f32.mrb[163].mxu1 }
 0x566   :  { %v5605_v22 = vpop.f32.mrb[40].mxu0  ;;  %v5876_v40 = vpop.f32.mrb[164].mxu1 }
 0x567   :  { %v18135_v33 = vadd.f32 %v5605_v22, %v18036_v12  ;;  %v18138_v21 = vadd.f32 %v5876_v40, %v18057_v61  ;;  %v11949_v19 = vpop.f32.mrb[41].mxu0  ;;  %v12002_v25 = vpop.f32.mrb[165].mxu1 }
 0x56a   :  { %v5610_v55 = vpop.f32.mrb[42].mxu0  ;;  %v5881_v8 = vpop.f32.mrb[166].mxu1 }
 0x56b   :  { %v18141_v18 = vadd.f32 %v5610_v55, %v18042_v28  ;;  %v18144_v50 = vadd.f32 %v5881_v8, %v18063_v5  ;;  %v11952_v58 = vpop.f32.mrb[43].mxu0  ;;  %v12005_v46 = vpop.f32.mrb[167].mxu1 }
 0x56e   :  { %v5615_v47 = vpop.f32.mrb[44].mxu0  ;;  %v5886_v37 = vpop.f32.mrb[168].mxu1 }
 0x56f   :  { %v18147_v12 = vadd.f32 %v5615_v47, %v18048_v17  ;;  %v18150_v61 = vadd.f32 %v5886_v37, %v18069_v45  ;;  %v11955_v1 = vpop.f32.mrb[45].mxu0  ;;  %v12008_v15 = vpop.f32.mrb[169].mxu1 }
 0x572   :  { %v5620_v43 = vpop.f32.mrb[46].mxu0  ;;  %v5891_v51 = vpop.f32.mrb[170].mxu1 }
 0x573   :  { %v18153_v28 = vadd.f32 %v5620_v43, %v18054_v38  ;;  %v18156_v5 = vadd.f32 %v5891_v51, %v18075_v39  ;;  %v11958_v63 = vpop.f32.mrb[47].mxu0  ;;  %v12011_v60 = vpop.f32.mrb[171].mxu1 }
 0x576   :  { %v5625_v59 = vpop.f32.mrb[48].mxu0  ;;  %v5896_v14 = vpop.f32.mrb[172].mxu1 }
 0x577   :  { %v18159_v17 = vadd.f32 %v5625_v59, %v18060_v53  ;;  %v18162_v45 = vadd.f32 %v5896_v14, %v18081_v9  ;;  %v11961_v3 = vpop.f32.mrb[49].mxu0  ;;  %v12014_v54 = vpop.f32.mrb[173].mxu1 }
 0x57a   :  { %v5630_v23 = vpop.f32.mrb[50].mxu0  ;;  %v5901_v36 = vpop.f32.mrb[174].mxu1 }
 0x57b   :  { %v18165_v38 = vadd.f32 %v5630_v23, %v18066_v11  ;;  %v18168_v39 = vadd.f32 %v5901_v36, %v18087_v27  ;;  %v11964_v6 = vpop.f32.mrb[51].mxu0  ;;  %v12017_v52 = vpop.f32.mrb[175].mxu1 }
 0x57e   :  { %v5635_v42 = vpop.f32.mrb[52].mxu0  ;;  %v5906_v4 = vpop.f32.mrb[176].mxu1 }
 0x57f   :  { %v18171_v53 = vadd.f32 %v5635_v42, %v18072_v30  ;;  %v18174_v9 = vadd.f32 %v5906_v4, %v18090_v35  ;;  %v11967_v2 = vpop.f32.mrb[53].mxu0  ;;  %v12020_v41 = vpop.f32.mrb[177].mxu1 }
 0x582   :  { %v5640_v13 = vpop.f32.mrb[54].mxu0  ;;  %v5911_v10 = vpop.f32.mrb[178].mxu1 }
 0x583   :  { %v18177_v11 = vadd.f32 %v5640_v13, %v18078_v48  ;;  %v18180_v27 = vadd.f32 %v5911_v10, %v18096_v57  ;;  %v11970_v34 = vpop.f32.mrb[55].mxu0  ;;  %v12023_v26 = vpop.f32.mrb[179].mxu1  ;;  %v18191_v48 = vld [vmem:[%s19343_s4] ss:$0 sm:$0xff]  ;;  %v6351_v13 = vld [vmem:[%s19342_s5 + $0x10] sm:$0xff]  ;;  %v6352_v10 = vld [vmem:[%s19342_s5 + $0x18] sm:$0xff] }
 0x586   :  { %v5645_v22 = vpop.f32.mrb[56].mxu0  ;;  %v5916_v40 = vpop.f32.mrb[180].mxu1 }
 0x587   :  { %v18183_v30 = vadd.f32 %v5645_v22, %v18084_v20  ;;  %v18186_v35 = vadd.f32 %v5916_v40, %v18102_v44  ;;  %v11973_v19 = vpop.f32.mrb[57].mxu0  ;;  %v12026_v25 = vpop.f32.mrb[181].mxu1  ;;  %v12784_v22 = vpack.c.bf16 %v6352_v10, %v6351_v13 }
 0x58a   :  { %v5921_v55 = vpop.f32.mrb[182].mxu1  ;;  %v6127_v8 = vpop.f32.mrb[58].mxu0 }
 0x58b   :  { %v18194_v57 = vadd.f32 %v5921_v55, %v18108_v16  ;;  %v6261_v58 = vadd.f32 %v6127_v8, %v18093_v62  ;;  %v12029_v46 = vpop.f32.mrb[183].mxu1  ;;  %v12073_v20 = vpop.f32.mrb[59].mxu0 }
 0x58c   :  { %v6353_v46 = vld [vmem:[%s19342_s5 + $0x20] sm:$0xff]  ;;  %v6354_v20 = vld [vmem:[%s19342_s5 + $0x28] sm:$0xff] }
 0x58d   :  { %v6295_v47 = vadd.f32 %v18191_v48, %v6261_v58 }
 0x58e   :  { %v5926_v44 = vpop.f32.mrb[184].mxu1  ;;  %v6132_v37 = vpop.f32.mrb[60].mxu0 }
 0x58f   :  { %v18199_v1 = vadd.f32 %v5926_v44, %v18114_v0  ;;  %v6262_v15 = vadd.f32 %v6132_v37, %v18099_v56  ;;  %v12032_v43 = vpop.f32.mrb[185].mxu1  ;;  %v12076_v51 = vpop.f32.mrb[61].mxu0  ;;  %v18202_v63 = vmax.f32 %v6295_v47, 0.0  ;;  %v12788_v37 = vpack.c.bf16 %v6354_v20, %v6353_v46 }
 0x591   :  { %v6296_v16 = vadd.f32 %v18191_v48, %v6262_v15  ;;  %v6445_v23 = vrot.slane %v18202_v63, 1 }
 0x592   :  { %v5931_v60 = vpop.f32.mrb[186].mxu1  ;;  %v6137_v59 = vpop.f32.mrb[62].mxu0 }
 0x593   :  { %v18205_v62 = vmax.f32 %v6296_v16, 0.0  ;;  %v18208_v14 = vadd.f32 %v5931_v60, %v18120_v49  ;;  %v6263_v3 = vadd.f32 %v6137_v59, %v18105_v29  ;;  %v12035_v54 = vpop.f32.mrb[187].mxu1  ;;  %v12079_v0 = vpop.f32.mrb[63].mxu0 }
 0x595   :  { %v6297_v56 = vadd.f32 %v18191_v48, %v6263_v3  ;;  %v6446_v36 = vrot.slane %v18205_v62, 1  ;;  %v6355_v3 = vld [vmem:[%s19342_s5 + $0x30] sm:$0xff] }
 0x596   :  { %v5936_v6 = vpop.f32.mrb[188].mxu1  ;;  %v6142_v52 = vpop.f32.mrb[64].mxu0 }
 0x597   :  { %v18214_v42 = vmax.f32 %v6297_v56, 0.0  ;;  %v18217_v4 = vadd.f32 %v5936_v6, %v18135_v33  ;;  %v6264_v49 = vadd.f32 %v6142_v52, %v18111_v32  ;;  %v12038_v2 = vpop.f32.mrb[189].mxu1  ;;  %v12082_v29 = vpop.f32.mrb[65].mxu0  ;;  %v6447_v41 = vsel %vm1705_vm2, %v6445_v23, %v6446_v36 }
 0x598   :  { %12168 = vmatprep.mubr.msk.f32.mxu1 %vm6492_vm7, %v6447_v41  ;;  %v6365_v29 = vld [vmem:[%s19342_s5 + $0x80] sm:$0xff]  ;;  %v6366_v41 = vld [vmem:[%s19342_s5 + $0x88] sm:$0xff] }
 0x599   :  { %v6298_v34 = vadd.f32 %v18191_v48, %v6264_v49  ;;  %v6448_v33 = vrot.slane %v18214_v42, 1 }
 0x59a   :  { %v5941_v26 = vpop.f32.mrb[190].mxu1  ;;  %v6147_v32 = vpop.f32.mrb[66].mxu0 }
 0x59b   :  { %v18230_v40 = vmax.f32 %v6298_v34, 0.0  ;;  %v6449_v19 = vsel %vm1705_vm2, %v6446_v36, %v6448_v33  ;;  %v18234_v25 = vadd.f32 %v5941_v26, %v18141_v18  ;;  %v6265_v55 = vadd.f32 %v6147_v32, %v18117_v24  ;;  %v12041_v8 = vpop.f32.mrb[191].mxu1  ;;  %v12085_v58 = vpop.f32.mrb[67].mxu0 }
 0x59c   :  { %12169 = vmatmul.mubr.msk.f32.vlgmr.msra.gmra.mrb[206].mxu1 %vm6492_vm7, %v6449_v19  ;;  %v18279_v34 = vpack.c.bf16 %v6366_v41, %v6365_v29 }
 0x59d   :  { %v6299_v47 = vadd.f32 %v18191_v48, %v6265_v55  ;;  %v6450_v44 = vrot.slane %v18230_v40, 1  ;;  %12783 = vmatpush3.bf16.msra.mxu1 %v18131_v7  ;;  %v6356_v7 = vld [vmem:[%s19342_s5 + $0x38] sm:$0xff] }
 0x59e   :  { %v5946_v18 = vpop.f32.mrb[192].mxu1  ;;  %v6152_v24 = vpop.f32.mrb[68].mxu0  ;;  %12785 = vmatprep.subr.bf16.mxu1 %v12784_v22  ;;  %v12792_v23 = vpack.c.bf16 %v6356_v7, %v6355_v3 }
 0x59f   :  { %v18247_v15 = vmax.f32 %v6299_v47, 0.0  ;;  %v18250_v43 = vadd.f32 %v5946_v18, %v18147_v12  ;;  %v6266_v51 = vadd.f32 %v6152_v24, %v18123_v31  ;;  %v12044_v16 = vpop.f32.mrb[193].mxu1  ;;  %v12088_v60 = vpop.f32.mrb[69].mxu0  ;;  %v6451_v59 = vsel %vm1705_vm2, %v6448_v33, %v6450_v44 }
 0x5a0   :  { %12171 = vmatprep.mubr.msk.f32.mxu1 %vm6492_vm7, %v6451_v59 }
 0x5a1   :  { %v6300_v54 = vadd.f32 %v18191_v48, %v6266_v51  ;;  %v6452_v12 = vrot.slane %v18247_v15, 1  ;;  %12787 = vmatpush3.bf16.msra.mxu1 %v12784_v22 }
 0x5a2   :  { %v5951_v31 = vpop.f32.mrb[194].mxu1  ;;  %v6157_v0 = vpop.f32.mrb[70].mxu0  ;;  %12789 = vmatprep.subr.bf16.mxu1 %v12788_v37 }
 0x5a3   :  { %v18263_v56 = vmax.f32 %v6300_v54, 0.0  ;;  %v18266_v36 = vadd.f32 %v5951_v31, %v18153_v28  ;;  %v6267_v6 = vadd.f32 %v6157_v0, %v18138_v21  ;;  %v12047_v52 = vpop.f32.mrb[195].mxu1  ;;  %v12091_v49 = vpop.f32.mrb[71].mxu0  ;;  %v6453_v2 = vsel %vm1705_vm2, %v6450_v44, %v6452_v12 }
 0x5a4   :  { %12172 = vmatmul.mubr.msk.f32.gmra.mrb[208].mxu1 %vm6492_vm7, %v6453_v2 }
 0x5a5   :  { %v6301_v13 = vadd.f32 %v18191_v48, %v6267_v6  ;;  %v6454_v28 = vrot.slane %v18263_v56, 1  ;;  %12791 = vmatpush3.bf16.msra.mxu1 %v12788_v37 }
 0x5a6   :  { %v5956_v21 = vpop.f32.mrb[196].mxu1  ;;  %v6162_v10 = vpop.f32.mrb[72].mxu0  ;;  %12793 = vmatprep.subr.bf16.mxu1 %v12792_v23 }
 0x5a7   :  { %v18281_v33 = vmax.f32 %v6301_v13, 0.0  ;;  %v18284_v26 = vadd.f32 %v5956_v21, %v18159_v17  ;;  %v6268_v32 = vadd.f32 %v6162_v10, %v18144_v50  ;;  %v12050_v22 = vpop.f32.mrb[197].mxu1  ;;  %v12094_v19 = vpop.f32.mrb[73].mxu0  ;;  %v6455_v55 = vsel %vm1705_vm2, %v6452_v12, %v6454_v28 }
 0x5a8   :  { %12174 = vmatprep.mubr.msk.f32.mxu1 %vm6492_vm7, %v6455_v55 }
 0x5a9   :  { %v6302_v8 = vadd.f32 %v18191_v48, %v6268_v32  ;;  %v6456_v58 = vrot.slane %v18281_v33, 1  ;;  %12795 = vmatpush3.bf16.msra.mxu1 %v12792_v23 }
 0x5aa   :  { %v5961_v46 = vpop.f32.mrb[198].mxu1  ;;  %v6167_v20 = vpop.f32.mrb[74].mxu0  ;;  %12797 = vmatprep.subr.bf16.mxu1 %v18279_v34 }
 0x5ab   :  { %v18292_v47 = vmax.f32 %v6302_v8, 0.0  ;;  %v18295_v17 = vadd.f32 %v5961_v46, %v18165_v38  ;;  %v6269_v50 = vadd.f32 %v6167_v20, %v18150_v61  ;;  %v12053_v44 = vpop.f32.mrb[199].mxu1  ;;  %v12097_v18 = vpop.f32.mrb[75].mxu0  ;;  %v6457_v24 = vsel %vm1705_vm2, %v6454_v28, %v6456_v58 }
 0x5ac   :  { %12175 = vmatmul.mubr.msk.f32.gmra.mrb[210].mxu1 %vm6492_vm7, %v6457_v24 }
 0x5ad   :  { %v6303_v37 = vadd.f32 %v18191_v48, %v6269_v50  ;;  %v6458_v51 = vrot.slane %v18292_v47, 1 }
 0x5ae   :  { %v5966_v16 = vpop.f32.mrb[200].mxu1  ;;  %v6172_v60 = vpop.f32.mrb[76].mxu0 }
 0x5af   :  { %v18302_v59 = vmax.f32 %v6303_v37, 0.0  ;;  %v18305_v3 = vadd.f32 %v5966_v16, %v18171_v53  ;;  %v6270_v38 = vadd.f32 %v6172_v60, %v18156_v5  ;;  %v12056_v61 = vpop.f32.mrb[201].mxu1  ;;  %v12100_v7 = vpop.f32.mrb[77].mxu0  ;;  %v6459_v54 = vsel %vm1705_vm2, %v6456_v58, %v6458_v51 }
 0x5b0   :  { %12177 = vmatprep.mubr.msk.f32.mxu1 %vm6492_vm7, %v6459_v54 }
 0x5b1   :  { %v6304_v12 = vadd.f32 %v18191_v48, %v6270_v38  ;;  %v6460_v31 = vrot.slane %v18302_v59, 1 }
 0x5b2   :  { %v5971_v0 = vpop.f32.mrb[202].mxu1  ;;  %v6177_v23 = vpop.f32.mrb[78].mxu0 }
 0x5b3   :  { %v18312_v6 = vmax.f32 %v6304_v12, 0.0  ;;  %v18315_v52 = vadd.f32 %v5971_v0, %v18177_v11  ;;  %v6271_v53 = vadd.f32 %v6177_v23, %v18162_v45  ;;  %v12059_v5 = vpop.f32.mrb[203].mxu1  ;;  %v12103_v49 = vpop.f32.mrb[79].mxu0  ;;  %v6461_v2 = vsel %vm1705_vm2, %v6458_v51, %v6460_v31 }
 0x5b4   :  { %12178 = vmatmul.mubr.msk.f32.gmra.mrb[212].mxu1 %vm6492_vm7, %v6461_v2 }
 0x5b5   :  { %v6305_v29 = vadd.f32 %v18191_v48, %v6271_v53  ;;  %v6462_v41 = vrot.slane %v18312_v6, 1 }
 0x5b6   :  { %v5976_v13 = vpop.f32.mrb[204].mxu1  ;;  %v6182_v28 = vpop.f32.mrb[80].mxu0 }
 0x5b7   :  { %v18322_v21 = vmax.f32 %v6305_v29, 0.0  ;;  %v18325_v10 = vadd.f32 %v5976_v13, %v18183_v30  ;;  %v6272_v11 = vadd.f32 %v6182_v28, %v18168_v39  ;;  %v12062_v45 = vpop.f32.mrb[205].mxu1  ;;  %v12106_v32 = vpop.f32.mrb[81].mxu0  ;;  %v6463_v22 = vsel %vm1705_vm2, %v6460_v31, %v6462_v41 }
 0x5b8   :  { %12180 = vmatprep.mubr.msk.f32.mxu1 %vm6492_vm7, %v6463_v22 }
 0x5b9   :  { %v6306_v19 = vadd.f32 %v18191_v48, %v6272_v11  ;;  %v6464_v55 = vrot.slane %v18322_v21, 1 }
 0x5ba   :  { %v6187_v8 = vpop.f32.mrb[82].mxu0 }
 0x5bb   :  { %v18332_v58 = vmax.f32 %v6306_v19, 0.0  ;;  %v6273_v46 = vadd.f32 %v6187_v8, %v18174_v9  ;;  %v12109_v20 = vpop.f32.mrb[83].mxu0  ;;  %v6465_v30 = vsel %vm1705_vm2, %v6462_v41, %v6464_v55 }
 0x5bc   :  { %12181 = vmatmul.mubr.msk.f32.gmra.mrb[214].mxu1 %vm6492_vm7, %v6465_v30 }
 0x5bd   :  { %v6307_v39 = vadd.f32 %v18191_v48, %v6273_v46  ;;  %v6466_v50 = vrot.slane %v18332_v58, 1 }
 0x5be   :  { %v6192_v44 = vpop.f32.mrb[84].mxu0 }
 0x5bf   :  { %v18339_v18 = vmax.f32 %v6307_v39, 0.0  ;;  %v6274_v24 = vadd.f32 %v6192_v44, %v18180_v27  ;;  %v12112_v37 = vpop.f32.mrb[85].mxu0  ;;  %v6467_v51 = vsel %vm1705_vm2, %v6464_v55, %v6466_v50 }
 0x5c0   :  { %12183 = vmatprep.mubr.msk.f32.mxu1 %vm6492_vm7, %v6467_v51 }
 0x5c1   :  { %v6308_v9 = vadd.f32 %v18191_v48, %v6274_v24  ;;  %v6468_v16 = vrot.slane %v18339_v18, 1 }
 0x5c2   :  { %v6197_v60 = vpop.f32.mrb[86].mxu0 }
 0x5c3   :  { %v18346_v38 = vmax.f32 %v6308_v9, 0.0  ;;  %v6275_v61 = vadd.f32 %v6197_v60, %v18186_v35  ;;  %v12115_v7 = vpop.f32.mrb[87].mxu0  ;;  %v6469_v54 = vsel %vm1705_vm2, %v6466_v50, %v6468_v16 }
 0x5c4   :  { %12184 = vmatmul.mubr.msk.f32.gmra.mrb[216].mxu1 %vm6492_vm7, %v6469_v54 }
 0x5c5   :  { %v6309_v27 = vadd.f32 %v18191_v48, %v6275_v61  ;;  %v6470_v12 = vrot.slane %v18346_v38, 1 }
 0x5c6   :  { %v6202_v31 = vpop.f32.mrb[88].mxu0 }
 0x5c7   :  { %v18353_v0 = vmax.f32 %v6309_v27, 0.0  ;;  %v6276_v23 = vadd.f32 %v6202_v31, %v18194_v57  ;;  %v12118_v53 = vpop.f32.mrb[89].mxu0  ;;  %v6471_v5 = vsel %vm1705_vm2, %v6468_v16, %v6470_v12 }
 0x5c8   :  { %12186 = vmatprep.mubr.msk.f32.mxu1 %vm6492_vm7, %v6471_v5 }
 0x5c9   :  { %v6310_v35 = vadd.f32 %v18191_v48, %v6276_v23  ;;  %v6472_v49 = vrot.slane %v18353_v0, 1 }
 0x5ca   :  { %v6207_v2 = vpop.f32.mrb[90].mxu0 }
 0x5cb   :  { %v18360_v29 = vmax.f32 %v6310_v35, 0.0  ;;  %v6277_v41 = vadd.f32 %v6207_v2, %v18199_v1  ;;  %v12121_v13 = vpop.f32.mrb[91].mxu0  ;;  %v6473_v28 = vsel %vm1705_vm2, %v6470_v12, %v6472_v49 }
 0x5cc   :  { %12187 = vmatmul.mubr.msk.f32.gmra.mrb[218].mxu1 %vm6492_vm7, %v6473_v28 }
 0x5cd   :  { %v6311_v57 = vadd.f32 %v18191_v48, %v6277_v41  ;;  %v6474_v11 = vrot.slane %v18360_v29, 1 }
 0x5ce   :  { %v6212_v45 = vpop.f32.mrb[92].mxu0 }
 0x5cf   :  { %v18367_v32 = vmax.f32 %v6311_v57, 0.0  ;;  %v6278_v22 = vadd.f32 %v6212_v45, %v18208_v14  ;;  %v12124_v19 = vpop.f32.mrb[93].mxu0  ;;  %v6475_v55 = vsel %vm1705_vm2, %v6472_v49, %v6474_v11 }
 0x5d0   :  { %12189 = vmatprep.mubr.msk.f32.mxu1 %vm6492_vm7, %v6475_v55 }
 0x5d1   :  { %v6312_v1 = vadd.f32 %v18191_v48, %v6278_v22  ;;  %v6476_v8 = vrot.slane %v18367_v32, 1 }
 0x5d2   :  { %v6217_v46 = vpop.f32.mrb[94].mxu0 }
 0x5d3   :  { %v18374_v20 = vmax.f32 %v6312_v1, 0.0  ;;  %v6279_v30 = vadd.f32 %v6217_v46, %v18217_v4  ;;  %v12127_v39 = vpop.f32.mrb[95].mxu0  ;;  %v6477_v50 = vsel %vm1705_vm2, %v6474_v11, %v6476_v8 }
 0x5d4   :  { %12190 = vmatmul.mubr.msk.f32.gmra.mrb[220].mxu1 %vm6492_vm7, %v6477_v50 }
 0x5d5   :  { %v6313_v14 = vadd.f32 %v18191_v48, %v6279_v30  ;;  %v6478_v44 = vrot.slane %v18374_v20, 1 }
 0x5d6   :  { %v6222_v24 = vpop.f32.mrb[96].mxu0 }
 0x5d7   :  { %v18381_v37 = vmax.f32 %v6313_v14, 0.0  ;;  %v6280_v51 = vadd.f32 %v6222_v24, %v18234_v25  ;;  %v12130_v9 = vpop.f32.mrb[97].mxu0  ;;  %v6479_v16 = vsel %vm1705_vm2, %v6476_v8, %v6478_v44 }
 0x5d8   :  { %12192 = vmatprep.mubr.msk.f32.mxu1 %vm6492_vm7, %v6479_v16 }
 0x5d9   :  { %v6314_v4 = vadd.f32 %v18191_v48, %v6280_v51  ;;  %v6480_v60 = vrot.slane %v18381_v37, 1 }
 0x5da   :  { %v6227_v61 = vpop.f32.mrb[98].mxu0 }
 0x5db   :  { %v18388_v7 = vmax.f32 %v6314_v4, 0.0  ;;  %v6281_v54 = vadd.f32 %v6227_v61, %v18250_v43  ;;  %v12133_v27 = vpop.f32.mrb[99].mxu0  ;;  %v6481_v12 = vsel %vm1705_vm2, %v6478_v44, %v6480_v60  ;;  %v6368_v4 = vld [vmem:[%s19342_s5 + $0x98] sm:$0xff] }
 0x5dc   :  { %12193 = vmatmul.mubr.msk.f32.gmra.mrb[222].mxu1 %vm6492_vm7, %v6481_v12  ;;  %v6369_v27 = vld [vmem:[%s19342_s5 + $0xa0] sm:$0xff]  ;;  %v6370_v12 = vld [vmem:[%s19342_s5 + $0xa8] sm:$0xff] }
 0x5dd   :  { %v6315_v25 = vadd.f32 %v18191_v48, %v6281_v54  ;;  %v6482_v31 = vrot.slane %v18388_v7, 1 }
 0x5de   :  { %v6232_v23 = vpop.f32.mrb[100].mxu0 }
 0x5df   :  { %v18395_v53 = vmax.f32 %v6315_v25, 0.0  ;;  %v6282_v5 = vadd.f32 %v6232_v23, %v18266_v36  ;;  %v12136_v35 = vpop.f32.mrb[101].mxu0  ;;  %v6483_v49 = vsel %vm1705_vm2, %v6480_v60, %v6482_v31  ;;  %v6371_v25 = vld [vmem:[%s19342_s5 + $0xb0] sm:$0xff] }
 0x5e0   :  { %12195 = vmatprep.mubr.msk.f32.mxu1 %vm6492_vm7, %v6483_v49  ;;  %v6961_v49 = vrot.slane %v18205_v62, 2 }
 0x5e1   :  { %v6316_v43 = vadd.f32 %v18191_v48, %v6282_v5  ;;  %v6484_v2 = vrot.slane %v18395_v53, 1  ;;  %v6374_v5 = vld [vmem:[%s19342_s5 + $0xc8] sm:$0xff] }
 0x5e2   :  { %v6237_v41 = vpop.f32.mrb[102].mxu0 }
 0x5e3   :  { %v18402_v13 = vmax.f32 %v6316_v43, 0.0  ;;  %v6283_v28 = vadd.f32 %v6237_v41, %v18284_v26  ;;  %v12139_v57 = vpop.f32.mrb[103].mxu0  ;;  %v6485_v11 = vsel %vm1705_vm2, %v6482_v31, %v6484_v2  ;;  %v6372_v31 = vld [vmem:[%s19342_s5 + $0xb8] sm:$0xff]  ;;  %v6960_v43 = vrot.slane %v18202_v63, 2  ;;  %v6375_v41 = vld [vmem:[%s19342_s5 + $0xd0] sm:$0xff] }
 0x5e4   :  { %12196 = vmatmul.mubr.msk.f32.gmra.mrb[224].mxu1 %vm6492_vm7, %v6485_v11  ;;  %v12808_v23 = vpack.c.bf16 %v6372_v31, %v6371_v25  ;;  %v6965_v11 = vrot.slane %v18230_v40, 2  ;;  %v6981_v31 = vrot.slane %v18332_v58, 2 }
 0x5e5   :  { %v6317_v36 = vadd.f32 %v18191_v48, %v6283_v28  ;;  %v6486_v45 = vrot.slane %v18402_v13, 1  ;;  %v6376_v28 = vld [vmem:[%s19342_s5 + $0xd8] sm:$0xff]  ;;  %v6962_v57 = vsel %vm6959_vm8, %v6960_v43, %v6961_v49  ;;  %v6987_v43 = vrot.slane %v18353_v0, 2 }
 0x5e6   :  { %v6242_v22 = vpop.f32.mrb[104].mxu0 }
 0x5e7   :  { %v18409_v19 = vmax.f32 %v6317_v36, 0.0  ;;  %v6284_v55 = vadd.f32 %v6242_v22, %v18295_v17  ;;  %v12142_v1 = vpop.f32.mrb[105].mxu0  ;;  %v6487_v8 = vsel %vm1705_vm2, %v6484_v2, %v6486_v45  ;;  %v6963_v2 = vrot.slane %v18214_v42, 2  ;;  %v6377_v22 = vld [vmem:[%s19342_s5 + $0xe0] sm:$0xff] }
 0x5e8   :  { %12198 = vmatprep.mubr.msk.f32.mxu1 %vm6492_vm7, %v6487_v8  ;;  %v6969_v8 = vrot.slane %v18263_v56, 2 }
 0x5e9   :  { %v6318_v26 = vadd.f32 %v18191_v48, %v6284_v55  ;;  %v6488_v46 = vrot.slane %v18409_v19, 1  ;;  %v6964_v36 = vsel %vm6959_vm8, %v6961_v49, %v6963_v2  ;;  %v6378_v55 = vld [vmem:[%s19342_s5 + $0xe8] sm:$0xff]  ;;  %v6966_v1 = vsel %vm6959_vm8, %v6963_v2, %v6965_v11 }
 0x5ea   :  { %v6247_v30 = vpop.f32.mrb[106].mxu0 }
 0x5eb   :  { %v18416_v39 = vmax.f32 %v6318_v26, 0.0  ;;  %v18419_v50 = vadd.f32 %v6247_v30, %v18305_v3  ;;  %v12145_v14 = vpop.f32.mrb[107].mxu0  ;;  %v6489_v44 = vsel %vm1705_vm2, %v6486_v45, %v6488_v46  ;;  %v6367_v3 = vld [vmem:[%s19342_s5 + $0x90] sm:$0xff]  ;;  %v6967_v45 = vrot.slane %v18247_v15, 2 }
 0x5ec   :  { %12199 = vmatmul.mubr.msk.f32.gmra.mrb[226].mxu1 %vm6492_vm7, %v6489_v44  ;;  %v12800_v54 = vpack.c.bf16 %v6368_v4, %v6367_v3  ;;  %v12820_v26 = vpack.c.bf16 %v6378_v55, %v6377_v22  ;;  %v6971_v30 = vrot.slane %v18281_v33, 2  ;;  %v6379_v14 = vld [vmem:[%s19342_s5 + $0xf0] sm:$0xff]  ;;  %v6380_v44 = vld [vmem:[%s19342_s5 + $0xf8] sm:$0xff]  ;;  %v6975_v3 = vrot.slane %v18302_v59, 2  ;;  %v6381_v4 = vld [vmem:[%s19342_s5 + $0x100] sm:$0xff] }
 0x5ed   :  { %v6490_v17 = vrot.slane %v18416_v39, 1  ;;  %v6997_v55 = vrot.slane %v18388_v7, 2 }
 0x5ee   :  { %v6252_v24 = vpop.f32.mrb[108].mxu0 }
 0x5ef   :  { %v18425_v51 = vadd.f32 %v6252_v24, %v18315_v52  ;;  %v12148_v9 = vpop.f32.mrb[109].mxu0  ;;  %v6491_v16 = vsel %vm1705_vm2, %v6488_v46, %v6490_v17  ;;  %v6968_v46 = vsel %vm6959_vm8, %v6965_v11, %v6967_v45  ;;  %v6973_v24 = vrot.slane %v18292_v47, 2 }
 0x5f0   :  { %12201 = vmatprep.mubr.msk.f32.mxu1 %vm6492_vm7, %v6491_v16  ;;  %v12824_v9 = vpack.c.bf16 %v6380_v44, %v6379_v14  ;;  %v6972_v16 = vsel %vm6959_vm8, %v6969_v8, %v6971_v30  ;;  %v7003_v14 = vrot.slane %v18409_v19, 2 }
 0x5f1   :  { %12202 = vmatmul.mubr.msk.f32.gmra.mrb[228].mxu1 %vm6492_vm7, %v6490_v17  ;;  %v6970_v17 = vsel %vm6959_vm8, %v6967_v45, %v6969_v8  ;;  %v6995_v45 = vrot.slane %v18381_v37, 2  ;;  %v6999_v8 = vrot.slane %v18395_v53, 2 }
 0x5f2   :  { %v6257_v60 = vpop.f32.mrb[110].mxu0  ;;  %12220 = vmatprep.mubr.msk.f32.mxu1 %vm6492_vm7, %v18202_v63  ;;  %v12816_v63 = vpack.c.bf16 %v6376_v28, %v6375_v41  ;;  %v6989_v41 = vrot.slane %v18360_v29, 2 }
 0x5f3   :  { %v18439_v52 = vadd.f32 %v6257_v60, %v18325_v10  ;;  %v12151_v61 = vpop.f32.mrb[111].mxu0  ;;  %v12804_v10 = vpack.c.bf16 %v6370_v12, %v6369_v27  ;;  %v6382_v60 = vld [vmem:[%s19342_s5 + $0x108] sm:$0xff]  ;;  %v6976_v12 = vsel %vm6959_vm8, %v6973_v24, %v6975_v3 }
 0x5f4   :  { %v6974_v61 = vsel %vm6959_vm8, %v6971_v30, %v6973_v24  ;;  %v18554_v27 = vpack.c.bf16 %v6382_v60, %v6381_v4  ;;  %v6990_v11 = vsel %vm6959_vm8, %v6987_v43, %v6989_v41  ;;  %v7000_v30 = vsel %vm6959_vm8, %v6997_v55, %v6999_v8  ;;  %v6383_v60 = vld [vmem:[%s19342_s5 + $0x110] sm:$0xff] }
 0x5f5   :  { %12221 = vmatmul.mubr.msk.f32.vlgmr.msra.gmra.mrb[206].mxu1 %vm6492_vm7, %v18205_v62  ;;  %v7268_v4 = vrot.slane %v18230_v40, 3 }
 0x5f6   :  { %12223 = vmatprep.mubr.msk.f32.mxu1 %vm6492_vm7, %v18214_v42  ;;  %12799 = vmatpush3.bf16.msra.mxu1 %v18279_v34  ;;  %v6373_v34 = vld [vmem:[%s19342_s5 + $0xc0] sm:$0xff] }
 0x5f7   :  { %12801 = vmatprep.subr.bf16.mxu1 %v12800_v54  ;;  %v12812_v35 = vpack.c.bf16 %v6374_v5, %v6373_v34  ;;  %v6983_v34 = vrot.slane %v18339_v18, 2 }
 0x5f9   :  { %12224 = vmatmul.mubr.msk.f32.gmra.mrb[208].mxu1 %vm6492_vm7, %v18230_v40  ;;  %v6984_v49 = vsel %vm6959_vm8, %v6981_v31, %v6983_v34 }
 0x5fa   :  { %12226 = vmatprep.mubr.msk.f32.mxu1 %vm6492_vm7, %v18247_v15  ;;  %12803 = vmatpush3.bf16.msra.mxu1 %v12800_v54  ;;  %v6977_v54 = vrot.slane %v18312_v6, 2 }
 0x5fb   :  { %12805 = vmatprep.subr.bf16.mxu1 %v12804_v10 }
 0x5fc   :  { %v6978_v25 = vsel %vm6959_vm8, %v6975_v3, %v6977_v54  ;;  %v7265_v3 = vrot.slane %v18205_v62, 3 }
 0x5fd   :  { %12227 = vmatmul.mubr.msk.f32.gmra.mrb[210].mxu1 %vm6492_vm7, %v18263_v56 }
 0x5fe   :  { %12229 = vmatprep.mubr.msk.f32.mxu1 %vm6492_vm7, %v18281_v33  ;;  %12807 = vmatpush3.bf16.msra.mxu1 %v12804_v10  ;;  %v6979_v10 = vrot.slane %v18322_v21, 2 }
 0x5ff   :  { %12809 = vmatprep.subr.bf16.mxu1 %v12808_v23 }
 0x600   :  { %v6982_v5 = vsel %vm6959_vm8, %v6979_v10, %v6981_v31  ;;  %v7272_v31 = vrot.slane %v18263_v56, 3 }
 0x601   :  { %12230 = vmatmul.mubr.msk.f32.gmra.mrb[212].mxu1 %vm6492_vm7, %v18292_v47 }
 0x602   :  { %12232 = vmatprep.mubr.msk.f32.mxu1 %vm6492_vm7, %v18302_v59  ;;  %12811 = vmatpush3.bf16.msra.mxu1 %v12808_v23  ;;  %v6980_v23 = vsel %vm6959_vm8, %v6977_v54, %v6979_v10 }
 0x603   :  { %12813 = vmatprep.subr.bf16.mxu1 %v12812_v35 }
 0x605   :  { %12233 = vmatmul.mubr.msk.f32.gmra.mrb[214].mxu1 %vm6492_vm7, %v18312_v6 }
 0x606   :  { %12235 = vmatprep.mubr.msk.f32.mxu1 %vm6492_vm7, %v18322_v21 }
 0x609   :  { %12236 = vmatmul.mubr.msk.f32.gmra.mrb[216].mxu1 %vm6492_vm7, %v18332_v58 }
 0x60a   :  { %12238 = vmatprep.mubr.msk.f32.mxu1 %vm6492_vm7, %v18339_v18 }
 0x60d   :  { %12239 = vmatmul.mubr.msk.f32.gmra.mrb[218].mxu1 %vm6492_vm7, %v18346_v38 }
 0x60e   :  { %12241 = vmatprep.mubr.msk.f32.mxu1 %vm6492_vm7, %v18353_v0 }
 0x611   :  { %12242 = vmatmul.mubr.msk.f32.gmra.mrb[220].mxu1 %vm6492_vm7, %v18360_v29 }
 0x612   :  { %12244 = vmatprep.mubr.msk.f32.mxu1 %vm6492_vm7, %v18367_v32 }
 0x615   :  { %12245 = vmatmul.mubr.msk.f32.gmra.mrb[222].mxu1 %vm6492_vm7, %v18374_v20 }
 0x616   :  { %12247 = vmatprep.mubr.msk.f32.mxu1 %vm6492_vm7, %v18381_v37 }
 0x619   :  { %12248 = vmatmul.mubr.msk.f32.gmra.mrb[224].mxu1 %vm6492_vm7, %v18388_v7 }
 0x61a   :  { %12250 = vmatprep.mubr.msk.f32.mxu1 %vm6492_vm7, %v18395_v53 }
 0x61d   :  { %12251 = vmatmul.mubr.msk.f32.gmra.mrb[226].mxu1 %vm6492_vm7, %v18402_v13 }
 0x61e   :  { %12253 = vmatprep.mubr.msk.f32.mxu1 %vm6492_vm7, %v18409_v19 }
 0x621   :  { %12254 = vmatmul.mubr.msk.f32.gmra.mrb[228].mxu1 %vm6492_vm7, %v18416_v39 }
 0x622   :  { %12272 = vmatprep.mubr.msk.f32.mxu1 %vm6492_vm7, %v6962_v57  ;;  %v6991_v57 = vrot.slane %v18367_v32, 2 }
 0x625   :  { %12273 = vmatmul.mubr.msk.f32.vlgmr.msra.gmra.mrb[206].mxu1 %vm6492_vm7, %v6964_v36  ;;  %v6992_v36 = vsel %vm6959_vm8, %v6989_v41, %v6991_v57  ;;  %v6387_v41 = vld [vmem:[%s19342_s5 + $0x130] sm:$0xff] }
 0x626   :  { %12275 = vmatprep.mubr.msk.f32.mxu1 %vm6492_vm7, %v6966_v1  ;;  %12815 = vmatpush3.bf16.msra.mxu1 %v12812_v35  ;;  %v6985_v35 = vrot.slane %v18346_v38, 2 }
 0x627   :  { %12817 = vmatprep.subr.bf16.mxu1 %v12816_v63 }
 0x628   :  { %v6986_v2 = vsel %vm6959_vm8, %v6983_v34, %v6985_v35  ;;  %v6988_v28 = vsel %vm6959_vm8, %v6985_v35, %v6987_v43  ;;  %v6386_v34 = vld [vmem:[%s19342_s5 + $0x128] sm:$0xff]  ;;  %v7274_v35 = vrot.slane %v18281_v33, 3 }
 0x629   :  { %12276 = vmatmul.mubr.msk.f32.gmra.mrb[208].mxu1 %vm6492_vm7, %v6968_v46  ;;  %v7001_v46 = vrot.slane %v18402_v13, 2 }
 0x62a   :  { %12278 = vmatprep.mubr.msk.f32.mxu1 %vm6492_vm7, %v6970_v17  ;;  %12819 = vmatpush3.bf16.msra.mxu1 %v12816_v63  ;;  %v6993_v63 = vrot.slane %v18374_v20, 2  ;;  %v7005_v17 = vrot.slane %v18416_v39, 2 }
 0x62b   :  { %12821 = vmatprep.subr.bf16.mxu1 %v12820_v26  ;;  %v7002_v44 = vsel %vm6959_vm8, %v6999_v8, %v7001_v46  ;;  %v7004_v24 = vsel %vm6959_vm8, %v7001_v46, %v7003_v14  ;;  %v7284_v46 = vrot.slane %v18332_v58, 3 }
 0x62c   :  { %v6994_v22 = vsel %vm6959_vm8, %v6991_v57, %v6993_v63  ;;  %v6996_v1 = vsel %vm6959_vm8, %v6993_v63, %v6995_v45  ;;  %v7275_v57 = vsel %vm3719_vm4, %v7272_v31, %v7274_v35 }
 0x62d   :  { %12279 = vmatmul.mubr.msk.f32.gmra.mrb[210].mxu1 %vm6492_vm7, %v6972_v16  ;;  %v7266_v16 = vrot.slane %v18214_v42, 3 }
 0x62e   :  { %12281 = vmatprep.mubr.msk.f32.mxu1 %vm6492_vm7, %v6974_v61  ;;  %12823 = vmatpush3.bf16.msra.mxu1 %v12820_v26  ;;  %v6998_v26 = vsel %vm6959_vm8, %v6995_v45, %v6997_v55  ;;  %v6384_v61 = vld [vmem:[%s19342_s5 + $0x118] sm:$0xff]  ;;  %v6389_v45 = vld [vmem:[%s19342_s5 + $0x140] sm:$0xff] }
 0x62f   :  { %12825 = vmatprep.subr.bf16.mxu1 %v12824_v9  ;;  %v7267_v54 = vsel %vm3719_vm4, %v7265_v3, %v7266_v16  ;;  %v12832_v10 = vpack.c.bf16 %v6384_v61, %v6383_v60  ;;  %v7292_v3 = vrot.slane %v18360_v29, 3  ;;  %v7294_v60 = vrot.slane %v18367_v32, 3 }
 0x631   :  { %12282 = vmatmul.mubr.msk.f32.gmra.mrb[212].mxu1 %vm6492_vm7, %v6976_v12  ;;  %v7270_v12 = vrot.slane %v18247_v15, 3 }
 0x632   :  { %12284 = vmatprep.mubr.msk.f32.mxu1 %vm6492_vm7, %v6978_v25  ;;  %12827 = vmatpush3.bf16.msra.mxu1 %v12824_v9  ;;  %v7006_v9 = vsel %vm6959_vm8, %v7003_v14, %v7005_v17  ;;  %v7269_v25 = vsel %vm3719_vm4, %v7266_v16, %v7268_v4  ;;  %v7286_v14 = vrot.slane %v18339_v18, 3 }
 0x633   :  { %12829 = vmatprep.subr.bf16.mxu1 %v18554_v27  ;;  %v7273_v43 = vsel %vm3719_vm4, %v7270_v12, %v7272_v31  ;;  %v7300_v31 = vrot.slane %v18388_v7, 3 }
 0x635   :  { %12285 = vmatmul.mubr.msk.f32.gmra.mrb[214].mxu1 %vm6492_vm7, %v6980_v23  ;;  %v6385_v23 = vld [vmem:[%s19342_s5 + $0x120] sm:$0xff] }
 0x636   :  { %12287 = vmatprep.mubr.msk.f32.mxu1 %vm6492_vm7, %v6982_v5  ;;  %v7271_v5 = vsel %vm3719_vm4, %v7268_v4, %v7270_v12  ;;  %v7295_v12 = vsel %vm3719_vm4, %v7292_v3, %v7294_v60 }
 0x639   :  { %12288 = vmatmul.mubr.msk.f32.gmra.mrb[216].mxu1 %vm6492_vm7, %v6984_v49  ;;  %v12836_v49 = vpack.c.bf16 %v6386_v34, %v6385_v23  ;;  %v6319_v23 = vadd.f32 %v18191_v48, %v18419_v50  ;;  %v7306_v48 = vrot.slane %v18409_v19, 3 }
 0x63a   :  { %12290 = vmatprep.mubr.msk.f32.mxu1 %vm6492_vm7, %v6986_v2  ;;  %v7276_v2 = vrot.slane %v18292_v47, 3 }
 0x63c   :  { %v7277_v63 = vsel %vm3719_vm4, %v7274_v35, %v7276_v2 }
 0x63d   :  { %12291 = vmatmul.mubr.msk.f32.gmra.mrb[218].mxu1 %vm6492_vm7, %v6988_v28  ;;  %v6388_v28 = vld [vmem:[%s19342_s5 + $0x138] sm:$0xff] }
 0x63e   :  { %12293 = vmatprep.mubr.msk.f32.mxu1 %vm6492_vm7, %v6990_v11  ;;  %v12840_v11 = vpack.c.bf16 %v6388_v28, %v6387_v41  ;;  %v7308_v41 = vrot.slane %v18416_v39, 3 }
 0x641   :  { %12294 = vmatmul.mubr.msk.f32.gmra.mrb[220].mxu1 %vm6492_vm7, %v6992_v36  ;;  %v7280_v36 = vrot.slane %v18312_v6, 3 }
 0x642   :  { %12296 = vmatprep.mubr.msk.f32.mxu1 %vm6492_vm7, %v6994_v22  ;;  %v6390_v22 = vld [vmem:[%s19342_s5 + $0x148] sm:$0xff] }
 0x643   :  { %v18653_v8 = vpack.c.bf16 %v6390_v22, %v6389_v45  ;;  %v7572_v45 = vrot.slane %v18230_v40, 4  ;;  %v6391_v22 = vld [vmem:[%s19342_s5 + $0x150] sm:$0xff] }
 0x645   :  { %12297 = vmatmul.mubr.msk.f32.gmra.mrb[222].mxu1 %vm6492_vm7, %v6996_v1  ;;  %v7282_v1 = vrot.slane %v18322_v21, 3 }
 0x646   :  { %12299 = vmatprep.mubr.msk.f32.mxu1 %vm6492_vm7, %v6998_v26 }
 0x649   :  { %12300 = vmatmul.mubr.msk.f32.gmra.mrb[224].mxu1 %vm6492_vm7, %v7000_v30  ;;  %v7283_v30 = vsel %vm3719_vm4, %v7280_v36, %v7282_v1 }
 0x64a   :  { %12302 = vmatprep.mubr.msk.f32.mxu1 %vm6492_vm7, %v7002_v44  ;;  %v7285_v44 = vsel %vm3719_vm4, %v7282_v1, %v7284_v46 }
 0x64d   :  { %12303 = vmatmul.mubr.msk.f32.gmra.mrb[226].mxu1 %vm6492_vm7, %v7004_v24  ;;  %v7287_v24 = vsel %vm3719_vm4, %v7284_v46, %v7286_v14 }
 0x64e   :  { %12305 = vmatprep.mubr.msk.f32.mxu1 %vm6492_vm7, %v7006_v9  ;;  %v7290_v9 = vrot.slane %v18353_v0, 3 }
 0x650   :  { %v7293_v61 = vsel %vm3719_vm4, %v7290_v9, %v7292_v3 }
 0x651   :  { %12306 = vmatmul.mubr.msk.f32.gmra.mrb[228].mxu1 %vm6492_vm7, %v7005_v17  ;;  %v7288_v17 = vrot.slane %v18346_v38, 3 }
 0x652   :  { %12324 = vmatprep.mubr.msk.f32.mxu1 %vm6492_vm7, %v7267_v54  ;;  %v7296_v54 = vrot.slane %v18374_v20, 3 }
 0x653   :  { %v7289_v16 = vsel %vm3719_vm4, %v7286_v14, %v7288_v17  ;;  %v7291_v4 = vsel %vm3719_vm4, %v7288_v17, %v7290_v9  ;;  %v7576_v14 = vrot.slane %v18263_v56, 4  ;;  %v6394_v17 = vld [vmem:[%s19342_s5 + $0x168] sm:$0xff]  ;;  %v7578_v9 = vrot.slane %v18281_v33, 4 }
 0x655   :  { %12325 = vmatmul.mubr.msk.f32.vlgmr.msra.gmra.mrb[206].mxu1 %vm6492_vm7, %v7269_v25  ;;  %v7297_v25 = vsel %vm3719_vm4, %v7294_v60, %v7296_v54  ;;  %v6395_v60 = vld [vmem:[%s19342_s5 + $0x170] sm:$0xff] }
 0x656   :  { %12327 = vmatprep.mubr.msk.f32.mxu1 %vm6492_vm7, %v7271_v5  ;;  %12831 = vmatpush3.bf16.msra.mxu1 %v18554_v27  ;;  %v7278_v27 = vrot.slane %v18302_v59, 3  ;;  %v7302_v5 = vrot.slane %v18395_v53, 3 }
 0x657   :  { %12833 = vmatprep.subr.bf16.mxu1 %v12832_v10 }
 0x658   :  { %v7279_v55 = vsel %vm3719_vm4, %v7276_v2, %v7278_v27  ;;  %v7281_v26 = vsel %vm3719_vm4, %v7278_v27, %v7280_v36  ;;  %v7303_v2 = vsel %vm3719_vm4, %v7300_v31, %v7302_v5  ;;  %v7309_v27 = vsel %vm3719_vm4, %v7306_v48, %v7308_v41 }
 0x659   :  { %12328 = vmatmul.mubr.msk.f32.gmra.mrb[208].mxu1 %vm6492_vm7, %v7273_v43  ;;  %v18690_v43 = vmax.f32 %v6319_v23, 0.0  ;;  %v7569_v36 = vrot.slane %v18205_v62, 4  ;;  %v6398_v23 = vld [vmem:[%s19342_s5 + $0x188] sm:$0xff] }
 0x65a   :  { %12330 = vmatprep.mubr.msk.f32.mxu1 %vm6492_vm7, %v7275_v57  ;;  %12835 = vmatpush3.bf16.msra.mxu1 %v12832_v10  ;;  %v7298_v10 = vrot.slane %v18381_v37, 3 }
 0x65b   :  { %12837 = vmatprep.subr.bf16.mxu1 %v12836_v49  ;;  %v7310_v57 = vrot.slane %v18690_v43, 3 }
 0x65c   :  { %v7299_v34 = vsel %vm3719_vm4, %v7296_v54, %v7298_v10  ;;  %v7301_v35 = vsel %vm3719_vm4, %v7298_v10, %v7300_v31  ;;  %v7579_v54 = vsel %vm1113_vm3, %v7576_v14, %v7578_v9  ;;  %v6397_v31 = vld [vmem:[%s19342_s5 + $0x180] sm:$0xff] }
 0x65d   :  { %12331 = vmatmul.mubr.msk.f32.gmra.mrb[210].mxu1 %vm6492_vm7, %v7277_v63  ;;  %v7570_v63 = vrot.slane %v18214_v42, 4 }
 0x65e   :  { %12333 = vmatprep.mubr.msk.f32.mxu1 %vm6492_vm7, %v7279_v55  ;;  %12839 = vmatpush3.bf16.msra.mxu1 %v12836_v49  ;;  %v7304_v49 = vrot.slane %v18402_v13, 3  ;;  %v6392_v55 = vld [vmem:[%s19342_s5 + $0x158] sm:$0xff] }
 0x65f   :  { %12841 = vmatprep.subr.bf16.mxu1 %v12840_v11  ;;  %v7571_v1 = vsel %vm1113_vm3, %v7569_v36, %v7570_v63  ;;  %v12848_v46 = vpack.c.bf16 %v6392_v55, %v6391_v22  ;;  %v7600_v55 = vrot.slane %v18374_v20, 4 }
 0x660   :  { %v7305_v50 = vsel %vm3719_vm4, %v7302_v5, %v7304_v49  ;;  %v7307_v28 = vsel %vm3719_vm4, %v7304_v49, %v7306_v48  ;;  %v7586_v5 = vrot.slane %v18322_v21, 4 }
 0x661   :  { %12334 = vmatmul.mubr.msk.f32.gmra.mrb[212].mxu1 %vm6492_vm7, %v7281_v26  ;;  %v7574_v26 = vrot.slane %v18247_v15, 4 }
 0x662   :  { %12336 = vmatprep.mubr.msk.f32.mxu1 %vm6492_vm7, %v7283_v30  ;;  %12843 = vmatpush3.bf16.msra.mxu1 %v12840_v11  ;;  %v7311_v11 = vsel %vm3719_vm4, %v7308_v41, %v7310_v57  ;;  %v7573_v30 = vsel %vm1113_vm3, %v7570_v63, %v7572_v45  ;;  %v7596_v63 = vrot.slane %v18360_v29, 4 }
 0x663   :  { %12845 = vmatprep.subr.bf16.mxu1 %v18653_v8  ;;  %v7577_v3 = vsel %vm1113_vm3, %v7574_v26, %v7576_v14 }
 0x665   :  { %12337 = vmatmul.mubr.msk.f32.gmra.mrb[214].mxu1 %vm6492_vm7, %v7285_v44  ;;  %v6393_v44 = vld [vmem:[%s19342_s5 + $0x160] sm:$0xff] }
 0x666   :  { %12339 = vmatprep.mubr.msk.f32.mxu1 %vm6492_vm7, %v7287_v24  ;;  %v7575_v24 = vsel %vm1113_vm3, %v7572_v45, %v7574_v26  ;;  %v7598_v45 = vrot.slane %v18367_v32, 4  ;;  %v7602_v26 = vrot.slane %v18381_v37, 4 }
 0x668   :  { %v7603_v14 = vsel %vm1113_vm3, %v7600_v55, %v7602_v26 }
 0x669   :  { %12340 = vmatmul.mubr.msk.f32.gmra.mrb[216].mxu1 %vm6492_vm7, %v7289_v16  ;;  %v12852_v16 = vpack.c.bf16 %v6394_v17, %v6393_v44  ;;  %v7606_v44 = vrot.slane %v18395_v53, 4 }
 0x66a   :  { %12342 = vmatprep.mubr.msk.f32.mxu1 %vm6492_vm7, %v7291_v4  ;;  %v7580_v4 = vrot.slane %v18292_v47, 4 }
 0x66c   :  { %v7581_v10 = vsel %vm1113_vm3, %v7578_v9, %v7580_v4 }
 0x66d   :  { %12343 = vmatmul.mubr.msk.f32.gmra.mrb[218].mxu1 %vm6492_vm7, %v7293_v61  ;;  %v6396_v61 = vld [vmem:[%s19342_s5 + $0x178] sm:$0xff] }
 0x66e   :  { %12345 = vmatprep.mubr.msk.f32.mxu1 %vm6492_vm7, %v7295_v12  ;;  %v12856_v12 = vpack.c.bf16 %v6396_v61, %v6395_v60  ;;  %v7614_v61 = vrot.slane %v18690_v43, 4 }
 0x671   :  { %12346 = vmatmul.mubr.msk.f32.gmra.mrb[220].mxu1 %vm6492_vm7, %v7297_v25  ;;  %v7584_v25 = vrot.slane %v18312_v6, 4 }
 0x672   :  { %12348 = vmatprep.mubr.msk.f32.mxu1 %vm6492_vm7, %v7299_v34 }
 0x673   :  { %v7587_v48 = vsel %vm1113_vm3, %v7584_v25, %v7586_v5 }
 0x675   :  { %12349 = vmatmul.mubr.msk.f32.gmra.mrb[222].mxu1 %vm6492_vm7, %v7301_v35  ;;  %v18756_v35 = vpack.c.bf16 %v6398_v23, %v6397_v31  ;;  %v6399_v31 = vld [vmem:[%s19342_s5 + $0x190] sm:$0xff]  ;;  %v6400_v23 = vld [vmem:[%s19342_s5 + $0x198] sm:$0xff] }
 0x676   :  { %12351 = vmatprep.mubr.msk.f32.mxu1 %vm6492_vm7, %v7303_v2  ;;  %v7588_v2 = vrot.slane %v18332_v58, 4 }
 0x678   :  { %v7589_v41 = vsel %vm1113_vm3, %v7586_v5, %v7588_v2  ;;  %v7878_v5 = vrot.slane %v18247_v15, 5 }
 0x679   :  { %12352 = vmatmul.mubr.msk.f32.gmra.mrb[224].mxu1 %vm6492_vm7, %v7305_v50  ;;  %v7590_v50 = vrot.slane %v18339_v18, 4 }
 0x67a   :  { %12354 = vmatprep.mubr.msk.f32.mxu1 %vm6492_vm7, %v7307_v28  ;;  %v7592_v28 = vrot.slane %v18346_v38, 4 }
 0x67d   :  { %12355 = vmatmul.mubr.msk.f32.gmra.mrb[226].mxu1 %vm6492_vm7, %v7309_v27  ;;  %v7594_v27 = vrot.slane %v18353_v0, 4 }
 0x67e   :  { %12357 = vmatprep.mubr.msk.f32.mxu1 %vm6492_vm7, %v7311_v11  ;;  %v7593_v11 = vsel %vm1113_vm3, %v7590_v50, %v7592_v28 }
 0x67f   :  { %v7595_v36 = vsel %vm1113_vm3, %v7592_v28, %v7594_v27  ;;  %v7597_v22 = vsel %vm1113_vm3, %v7594_v27, %v7596_v63  ;;  %v7882_v28 = vrot.slane %v18281_v33, 5 }
 0x681   :  { %12358 = vmatmul.mubr.msk.f32.gmra.mrb[228].mxu1 %vm6492_vm7, %v7310_v57  ;;  %v7591_v57 = vsel %vm1113_vm3, %v7588_v2, %v7590_v50  ;;  %v7880_v2 = vrot.slane %v18263_v56, 5  ;;  %v6402_v50 = vld [vmem:[%s19342_s5 + $0x1a8] sm:$0xff] }
 0x682   :  { %12376 = vmatprep.mubr.msk.f32.mxu1 %vm6492_vm7, %v7571_v1  ;;  %v7599_v1 = vsel %vm1113_vm3, %v7596_v63, %v7598_v45  ;;  %v6403_v63 = vld [vmem:[%s19342_s5 + $0x1b0] sm:$0xff] }
 0x683   :  { %v7881_v27 = vsel %vm2040_vm5, %v7878_v5, %v7880_v2 }
 0x685   :  { %12377 = vmatmul.mubr.msk.f32.vlgmr.msra.gmra.mrb[206].mxu1 %vm6492_vm7, %v7573_v30  ;;  %v7604_v30 = vrot.slane %v18388_v7, 4 }
 0x686   :  { %12379 = vmatprep.mubr.msk.f32.mxu1 %vm6492_vm7, %v7575_v24  ;;  %12847 = vmatpush3.bf16.msra.mxu1 %v18653_v8  ;;  %v7582_v8 = vrot.slane %v18302_v59, 4  ;;  %v7608_v24 = vrot.slane %v18402_v13, 4 }
 0x687   :  { %12849 = vmatprep.subr.bf16.mxu1 %v12848_v46  ;;  %v7605_v17 = vsel %vm1113_vm3, %v7602_v26, %v7604_v30  ;;  %v7607_v9 = vsel %vm1113_vm3, %v7604_v30, %v7606_v44  ;;  %v6405_v26 = vld [vmem:[%s19342_s5 + $0x1c0] sm:$0xff] }
 0x688   :  { %v7583_v34 = vsel %vm1113_vm3, %v7580_v4, %v7582_v8  ;;  %v7585_v49 = vsel %vm1113_vm3, %v7582_v8, %v7584_v25  ;;  %v7612_v4 = vrot.slane %v18416_v39, 4  ;;  %v7876_v25 = vrot.slane %v18230_v40, 5 }
 0x689   :  { %12380 = vmatmul.mubr.msk.f32.gmra.mrb[208].mxu1 %vm6492_vm7, %v7577_v3  ;;  %v7609_v3 = vsel %vm1113_vm3, %v7606_v44, %v7608_v24 }
 0x68a   :  { %12382 = vmatprep.mubr.msk.f32.mxu1 %vm6492_vm7, %v7579_v54  ;;  %12851 = vmatpush3.bf16.msra.mxu1 %v12848_v46  ;;  %v7601_v46 = vsel %vm1113_vm3, %v7598_v45, %v7600_v55  ;;  %v7615_v8 = vsel %vm1113_vm3, %v7612_v4, %v7614_v61  ;;  %v7883_v45 = vsel %vm2040_vm5, %v7880_v2, %v7882_v28  ;;  %v7910_v2 = vrot.slane %v18395_v53, 5 }
 0x68b   :  { %12853 = vmatprep.subr.bf16.mxu1 %v12852_v16 }
 0x68d   :  { %12383 = vmatmul.mubr.msk.f32.gmra.mrb[210].mxu1 %vm6492_vm7, %v7581_v10  ;;  %v7873_v10 = vrot.slane %v18205_v62, 5 }
 0x68e   :  { %12385 = vmatprep.mubr.msk.f32.mxu1 %vm6492_vm7, %v7583_v34  ;;  %12855 = vmatpush3.bf16.msra.mxu1 %v12852_v16  ;;  %v7610_v16 = vrot.slane %v18409_v19, 4 }
 0x68f   :  { %12857 = vmatprep.subr.bf16.mxu1 %v12856_v12 }
 0x690   :  { %v7611_v60 = vsel %vm1113_vm3, %v7608_v24, %v7610_v16  ;;  %v7613_v54 = vsel %vm1113_vm3, %v7610_v16, %v7612_v4  ;;  %v7892_v24 = vrot.slane %v18332_v58, 5  ;;  %v7894_v16 = vrot.slane %v18339_v18, 5 }
 0x691   :  { %12386 = vmatmul.mubr.msk.f32.gmra.mrb[212].mxu1 %vm6492_vm7, %v7585_v49  ;;  %v12864_v49 = vpack.c.bf16 %v6400_v23, %v6399_v31  ;;  %v7896_v4 = vrot.slane %v18346_v38, 5  ;;  %v7904_v31 = vrot.slane %v18374_v20, 5 }
 0x692   :  { %12388 = vmatprep.mubr.msk.f32.mxu1 %vm6492_vm7, %v7587_v48  ;;  %12859 = vmatpush3.bf16.msra.mxu1 %v12856_v12  ;;  %v7874_v12 = vrot.slane %v18214_v42, 5  ;;  %v6401_v48 = vld [vmem:[%s19342_s5 + $0x1a0] sm:$0xff] }
 0x693   :  { %12861 = vmatprep.subr.bf16.mxu1 %v18756_v35 }
 0x694   :  { %v7875_v34 = vsel %vm2040_vm5, %v7873_v10, %v7874_v12  ;;  %v7877_v62 = vsel %vm2040_vm5, %v7874_v12, %v7876_v25  ;;  %v7902_v10 = vrot.slane %v18367_v32, 5 }
 0x695   :  { %12389 = vmatmul.mubr.msk.f32.gmra.mrb[214].mxu1 %vm6492_vm7, %v7589_v41  ;;  %v7879_v41 = vsel %vm2040_vm5, %v7876_v25, %v7878_v5 }
 0x696   :  { %12391 = vmatprep.mubr.msk.f32.mxu1 %vm6492_vm7, %v7591_v57  ;;  %v12868_v57 = vpack.c.bf16 %v6402_v50, %v6401_v48  ;;  %v7905_v5 = vsel %vm2040_vm5, %v7902_v10, %v7904_v31  ;;  %v7912_v50 = vrot.slane %v18402_v13, 5 }
 0x699   :  { %12392 = vmatmul.mubr.msk.f32.gmra.mrb[216].mxu1 %vm6492_vm7, %v7593_v11  ;;  %v7884_v11 = vrot.slane %v18292_v47, 5 }
 0x69a   :  { %12394 = vmatprep.mubr.msk.f32.mxu1 %vm6492_vm7, %v7595_v36  ;;  %v6404_v36 = vld [vmem:[%s19342_s5 + $0x1b8] sm:$0xff] }
 0x69b   :  { %v7885_v55 = vsel %vm2040_vm5, %v7882_v28, %v7884_v11  ;;  %v7914_v28 = vrot.slane %v18409_v19, 5 }
 0x69d   :  { %12395 = vmatmul.mubr.msk.f32.gmra.mrb[218].mxu1 %vm6492_vm7, %v7597_v22  ;;  %v12872_v22 = vpack.c.bf16 %v6404_v36, %v6403_v63  ;;  %v7918_v63 = vrot.slane %v18690_v43, 5 }
 0x69e   :  { %12397 = vmatprep.mubr.msk.f32.mxu1 %vm6492_vm7, %v7599_v1  ;;  %v7888_v1 = vrot.slane %v18312_v6, 5 }
 0x6a1   :  { %12398 = vmatmul.mubr.msk.f32.gmra.mrb[220].mxu1 %vm6492_vm7, %v7601_v46  ;;  %v6406_v46 = vld [vmem:[%s19342_s5 + $0x1c8] sm:$0xff] }
 0x6a2   :  { %12400 = vmatprep.mubr.msk.f32.mxu1 %vm6492_vm7, %v7603_v14  ;;  %v7890_v14 = vrot.slane %v18322_v21, 5  ;;  %v18855_v44 = vpack.c.bf16 %v6406_v46, %v6405_v26  ;;  %v6408_v26 = vld [vmem:[%s19342_s5 + $0x1d8] sm:$0xff] }
 0x6a5   :  { %12401 = vmatmul.mubr.msk.f32.gmra.mrb[222].mxu1 %vm6492_vm7, %v7605_v17 }
 0x6a6   :  { %12403 = vmatprep.mubr.msk.f32.mxu1 %vm6492_vm7, %v7607_v9  ;;  %v7891_v9 = vsel %vm2040_vm5, %v7888_v1, %v7890_v14 }
 0x6a9   :  { %12404 = vmatmul.mubr.msk.f32.gmra.mrb[224].mxu1 %vm6492_vm7, %v7609_v3  ;;  %v7893_v3 = vsel %vm2040_vm5, %v7890_v14, %v7892_v24 }
 0x6aa   :  { %12406 = vmatprep.mubr.msk.f32.mxu1 %vm6492_vm7, %v7611_v60  ;;  %v7895_v60 = vsel %vm2040_vm5, %v7892_v24, %v7894_v16  ;;  %v8187_v24 = vrot.slane %v18281_v33, 6 }
 0x6ad   :  { %12407 = vmatmul.mubr.msk.f32.gmra.mrb[226].mxu1 %vm6492_vm7, %v7613_v54  ;;  %v7897_v54 = vsel %vm2040_vm5, %v7894_v16, %v7896_v4  ;;  %v6410_v16 = vld [vmem:[%s19342_s5 + $0x1e8] sm:$0xff] }
 0x6ae   :  { %12409 = vmatprep.mubr.msk.f32.mxu1 %vm6492_vm7, %v7615_v8  ;;  %v7900_v8 = vrot.slane %v18360_v29, 5 }
 0x6b0   :  { %v7903_v23 = vsel %vm2040_vm5, %v7900_v8, %v7902_v10 }
 0x6b1   :  { %12410 = vmatmul.mubr.msk.f32.gmra.mrb[228].mxu1 %vm6492_vm7, %v7614_v61  ;;  %v7898_v61 = vrot.slane %v18353_v0, 5 }
 0x6b2   :  { %12428 = vmatprep.mubr.msk.f32.mxu1 %vm6492_vm7, %v7875_v34  ;;  %v7906_v34 = vrot.slane %v18381_v37, 5 }
 0x6b3   :  { %v7899_v12 = vsel %vm2040_vm5, %v7896_v4, %v7898_v61  ;;  %v7901_v25 = vsel %vm2040_vm5, %v7898_v61, %v7900_v8  ;;  %v8189_v4 = vrot.slane %v18292_v47, 6  ;;  %v6411_v8 = vld [vmem:[%s19342_s5 + $0x1f0] sm:$0xff] }
 0x6b5   :  { %12429 = vmatmul.mubr.msk.f32.vlgmr.msra.gmra.mrb[206].mxu1 %vm6492_vm7, %v7877_v62  ;;  %v7907_v62 = vsel %vm2040_vm5, %v7904_v31, %v7906_v34  ;;  %v8190_v10 = vsel %vm8179_vm9, %v8187_v24, %v8189_v4 }
 0x6b6   :  { %12431 = vmatprep.mubr.msk.f32.mxu1 %vm6492_vm7, %v7879_v41  ;;  %12863 = vmatpush3.bf16.msra.mxu1 %v18756_v35  ;;  %v7886_v35 = vrot.slane %v18302_v59, 5 }
 0x6b7   :  { %12865 = vmatprep.subr.bf16.mxu1 %v12864_v49 }
 0x6b8   :  { %v7887_v30 = vsel %vm2040_vm5, %v7884_v11, %v7886_v35  ;;  %v7889_v17 = vsel %vm2040_vm5, %v7886_v35, %v7888_v1  ;;  %v7915_v11 = vsel %vm2040_vm5, %v7912_v50, %v7914_v28  ;;  %v8181_v35 = vrot.slane %v18230_v40, 6  ;;  %v6407_v1 = vld [vmem:[%s19342_s5 + $0x1d0] sm:$0xff] }
 0x6b9   :  { %12432 = vmatmul.mubr.msk.f32.gmra.mrb[208].mxu1 %vm6492_vm7, %v7881_v27  ;;  %v7916_v27 = vrot.slane %v18416_v39, 5  ;;  %v12880_v14 = vpack.c.bf16 %v6408_v26, %v6407_v1  ;;  %v8211_v1 = vrot.slane %v18381_v37, 6 }
 0x6ba   :  { %12434 = vmatprep.mubr.msk.f32.mxu1 %vm6492_vm7, %v7883_v45  ;;  %12867 = vmatpush3.bf16.msra.mxu1 %v12864_v49  ;;  %v7908_v49 = vrot.slane %v18388_v7, 5 }
 0x6bb   :  { %12869 = vmatprep.subr.bf16.mxu1 %v12868_v57  ;;  %v7917_v36 = vsel %vm2040_vm5, %v7914_v28, %v7916_v27  ;;  %v7919_v45 = vsel %vm2040_vm5, %v7916_v27, %v7918_v63  ;;  %v8201_v28 = vrot.slane %v18346_v38, 6  ;;  %v8203_v27 = vrot.slane %v18353_v0, 6 }
 0x6bc   :  { %v7909_v48 = vsel %vm2040_vm5, %v7906_v34, %v7908_v49  ;;  %v7911_v41 = vsel %vm2040_vm5, %v7908_v49, %v7910_v2  ;;  %v6413_v34 = vld [vmem:[%s19342_s5 + $0x200] sm:$0xff] }
 0x6bd   :  { %12435 = vmatmul.mubr.msk.f32.gmra.mrb[210].mxu1 %vm6492_vm7, %v7885_v55  ;;  %v8183_v55 = vrot.slane %v18247_v15, 6 }
 0x6be   :  { %12437 = vmatprep.mubr.msk.f32.mxu1 %vm6492_vm7, %v7887_v30  ;;  %12871 = vmatpush3.bf16.msra.mxu1 %v12868_v57  ;;  %v7913_v57 = vsel %vm2040_vm5, %v7910_v2, %v7912_v50  ;;  %v8185_v30 = vrot.slane %v18263_v56, 6  ;;  %v8199_v50 = vrot.slane %v18339_v18, 6 }
 0x6bf   :  { %12873 = vmatprep.subr.bf16.mxu1 %v12872_v22 }
 0x6c0   :  { %v8188_v61 = vsel %vm8179_vm9, %v8185_v30, %v8187_v24 }
 0x6c1   :  { %12438 = vmatmul.mubr.msk.f32.gmra.mrb[212].mxu1 %vm6492_vm7, %v7889_v17  ;;  %v8184_v17 = vsel %vm8179_vm9, %v8181_v35, %v8183_v55 }
 0x6c2   :  { %12440 = vmatprep.mubr.msk.f32.mxu1 %vm6492_vm7, %v7891_v9  ;;  %12875 = vmatpush3.bf16.msra.mxu1 %v12872_v22  ;;  %v8180_v22 = vrot.slane %v18214_v42, 6  ;;  %v6409_v9 = vld [vmem:[%s19342_s5 + $0x1e0] sm:$0xff] }
 0x6c3   :  { %12877 = vmatprep.subr.bf16.mxu1 %v18855_v44 }
 0x6c4   :  { %v8182_v46 = vsel %vm8179_vm9, %v8180_v22, %v8181_v35  ;;  %v8209_v22 = vrot.slane %v18374_v20, 6 }
 0x6c5   :  { %12441 = vmatmul.mubr.msk.f32.gmra.mrb[214].mxu1 %vm6492_vm7, %v7893_v3  ;;  %v8186_v3 = vsel %vm8179_vm9, %v8183_v55, %v8185_v30 }
 0x6c6   :  { %12443 = vmatprep.mubr.msk.f32.mxu1 %vm6492_vm7, %v7895_v60  ;;  %v12884_v60 = vpack.c.bf16 %v6410_v16, %v6409_v9  ;;  %v8212_v30 = vsel %vm8179_vm9, %v8209_v22, %v8211_v1  ;;  %v8217_v16 = vrot.slane %v18402_v13, 6 }
 0x6c9   :  { %12444 = vmatmul.mubr.msk.f32.gmra.mrb[216].mxu1 %vm6492_vm7, %v7897_v54  ;;  %v8191_v54 = vrot.slane %v18302_v59, 6 }
 0x6ca   :  { %12446 = vmatprep.mubr.msk.f32.mxu1 %vm6492_vm7, %v7899_v12  ;;  %v6412_v12 = vld [vmem:[%s19342_s5 + $0x1f8] sm:$0xff] }
 0x6cb   :  { %v8192_v31 = vsel %vm8179_vm9, %v8189_v4, %v8191_v54 }
 0x6cd   :  { %12447 = vmatmul.mubr.msk.f32.gmra.mrb[218].mxu1 %vm6492_vm7, %v7901_v25  ;;  %v12888_v25 = vpack.c.bf16 %v6412_v12, %v6411_v8 }
 0x6ce   :  { %12449 = vmatprep.mubr.msk.f32.mxu1 %vm6492_vm7, %v7903_v23  ;;  %v8195_v23 = vrot.slane %v18322_v21, 6 }
 0x6d1   :  { %12450 = vmatmul.mubr.msk.f32.gmra.mrb[220].mxu1 %vm6492_vm7, %v7905_v5  ;;  %v6414_v5 = vld [vmem:[%s19342_s5 + $0x208] sm:$0xff] }
 0x6d2   :  { %12452 = vmatprep.mubr.msk.f32.mxu1 %vm6492_vm7, %v7907_v62  ;;  %v8197_v62 = vrot.slane %v18332_v58, 6  ;;  %v18954_v2 = vpack.c.bf16 %v6414_v5, %v6413_v34  ;;  %v8487_v34 = vrot.slane %v18230_v40, 7  ;;  %v8486_v5 = vrot.slane %v18214_v42, 7 }
 0x6d5   :  { %12453 = vmatmul.mubr.msk.f32.gmra.mrb[222].mxu1 %vm6492_vm7, %v7909_v48 }
 0x6d6   :  { %12455 = vmatprep.mubr.msk.f32.mxu1 %vm6492_vm7, %v7911_v41  ;;  %v8198_v41 = vsel %vm8179_vm9, %v8195_v23, %v8197_v62 }
 0x6d9   :  { %12456 = vmatmul.mubr.msk.f32.gmra.mrb[224].mxu1 %vm6492_vm7, %v7913_v57  ;;  %v8200_v57 = vsel %vm8179_vm9, %v8197_v62, %v8199_v50  ;;  %v8489_v62 = vrot.slane %v18247_v15, 7 }
 0x6da   :  { %12458 = vmatprep.mubr.msk.f32.mxu1 %vm6492_vm7, %v7915_v11  ;;  %v8202_v11 = vsel %vm8179_vm9, %v8199_v50, %v8201_v28  ;;  %v6416_v50 = vld [vmem:[%s19342_s5 + $0x218] sm:$0xff] }
 0x6dd   :  { %12459 = vmatmul.mubr.msk.f32.gmra.mrb[226].mxu1 %vm6492_vm7, %v7917_v36  ;;  %v8204_v36 = vsel %vm8179_vm9, %v8201_v28, %v8203_v27  ;;  %v8491_v28 = vrot.slane %v18263_v56, 7 }
 0x6de   :  { %12461 = vmatprep.mubr.msk.f32.mxu1 %vm6492_vm7, %v7919_v45  ;;  %v8207_v45 = vrot.slane %v18367_v32, 6 }
 0x6e0   :  { %v8210_v26 = vsel %vm8179_vm9, %v8207_v45, %v8209_v22 }
 0x6e1   :  { %12462 = vmatmul.mubr.msk.f32.gmra.mrb[228].mxu1 %vm6492_vm7, %v7918_v63  ;;  %v8205_v63 = vrot.slane %v18360_v29, 6 }
 0x6e2   :  { %12480 = vmatprep.mubr.msk.f32.mxu1 %vm6492_vm7, %v8182_v46  ;;  %v8213_v46 = vrot.slane %v18388_v7, 6 }
 0x6e3   :  { %v8206_v35 = vsel %vm8179_vm9, %v8203_v27, %v8205_v63  ;;  %v8208_v55 = vsel %vm8179_vm9, %v8205_v63, %v8207_v45  ;;  %v8493_v27 = vrot.slane %v18281_v33, 7  ;;  %v6418_v63 = vld [vmem:[%s19342_s5 + $0x228] sm:$0xff]  ;;  %v8495_v45 = vrot.slane %v18292_v47, 7 }
 0x6e4   :  { %v8214_v9 = vsel %vm8179_vm9, %v8211_v1, %v8213_v46  ;;  %v6419_v1 = vld [vmem:[%s19342_s5 + $0x230] sm:$0xff] }
 0x6e5   :  { %12481 = vmatmul.mubr.msk.f32.vlgmr.msra.gmra.mrb[206].mxu1 %vm6492_vm7, %v8184_v17  ;;  %v13148_v17 = vld [vmem:[%s19343_s4] ss:$0 sm:$0xff]  ;;  %v8494_v22 = vsel %vm4056_vm6, %v8491_v28, %v8493_v27 }
 0x6e6   :  { %12483 = vmatprep.mubr.msk.f32.mxu1 %vm6492_vm7, %v8186_v3  ;;  %12879 = vmatpush3.bf16.msra.mxu1 %v18855_v44  ;;  %v8193_v44 = vrot.slane %v18312_v6, 6  ;;  %v6320_v24 = vadd.f32 %v13148_v17, %v18425_v51  ;;  %v6321_v3 = vadd.f32 %v13148_v17, %v18439_v52  ;;  %v8223_v52 = vrot.slane %v18690_v43, 6 }
 0x6e7   :  { %12881 = vmatprep.subr.bf16.mxu1 %v12880_v14  ;;  %v8501_v17 = vrot.slane %v18322_v21, 7 }
 0x6e8   :  { %v8194_v49 = vsel %vm8179_vm9, %v8191_v54, %v8193_v44  ;;  %v8196_v48 = vsel %vm8179_vm9, %v8193_v44, %v8195_v23  ;;  %v8221_v54 = vrot.slane %v18416_v39, 6  ;;  %v19000_v8 = vmax.f32 %v6321_v3, 0.0 }
 0x6e9   :  { %12484 = vmatmul.mubr.msk.f32.gmra.mrb[208].mxu1 %vm6492_vm7, %v8188_v61  ;;  %v18994_v61 = vmax.f32 %v6320_v24, 0.0  ;;  %v8505_v3 = vrot.slane %v18339_v18, 7 }
 0x6ea   :  { %12486 = vmatprep.mubr.msk.f32.mxu1 %vm6492_vm7, %v8190_v10  ;;  %12883 = vmatpush3.bf16.msra.mxu1 %v12880_v14  ;;  %v8215_v14 = vrot.slane %v18395_v53, 6 }
 0x6eb   :  { %12885 = vmatprep.subr.bf16.mxu1 %v12884_v60  ;;  %v8225_v10 = vrot.slane %v18994_v61, 6 }
 0x6ec   :  { %v8216_v4 = vsel %vm8179_vm9, %v8213_v46, %v8215_v14  ;;  %v8218_v51 = vsel %vm8179_vm9, %v8215_v14, %v8217_v16  ;;  %v8496_v46 = vsel %vm4056_vm6, %v8493_v27, %v8495_v45  ;;  %v8527_v27 = vrot.slane %v18416_v39, 7 }
 0x6ed   :  { %12487 = vmatmul.mubr.msk.f32.gmra.mrb[210].mxu1 %vm6492_vm7, %v8192_v31  ;;  %v8224_v31 = vsel %vm8179_vm9, %v8221_v54, %v8223_v52  ;;  %v8226_v23 = vsel %vm8179_vm9, %v8223_v52, %v8225_v10  ;;  %v8511_v52 = vrot.slane %v18360_v29, 7 }
 0x6ee   :  { %12489 = vmatprep.mubr.msk.f32.mxu1 %vm6492_vm7, %v8194_v49  ;;  %12887 = vmatpush3.bf16.msra.mxu1 %v12884_v60  ;;  %v8219_v60 = vrot.slane %v18409_v19, 6 }
 0x6ef   :  { %12889 = vmatprep.subr.bf16.mxu1 %v12888_v25 }
 0x6f0   :  { %v8220_v12 = vsel %vm8179_vm9, %v8217_v16, %v8219_v60  ;;  %v8222_v44 = vsel %vm8179_vm9, %v8219_v60, %v8221_v54  ;;  %v8507_v60 = vrot.slane %v18346_v38, 7  ;;  %v8509_v54 = vrot.slane %v18353_v0, 7 }
 0x6f1   :  { %12490 = vmatmul.mubr.msk.f32.gmra.mrb[212].mxu1 %vm6492_vm7, %v8196_v48  ;;  %v6415_v48 = vld [vmem:[%s19342_s5 + $0x210] sm:$0xff] }
 0x6f2   :  { %12492 = vmatprep.mubr.msk.f32.mxu1 %vm6492_vm7, %v8198_v41  ;;  %12891 = vmatpush3.bf16.msra.mxu1 %v12888_v25  ;;  %v8227_v25 = vrot.slane %v19000_v8, 6  ;;  %v8488_v41 = vsel %vm4056_vm6, %v8486_v5, %v8487_v34  ;;  %v12896_v42 = vpack.c.bf16 %v6416_v50, %v6415_v48  ;;  %v8521_v48 = vrot.slane %v18395_v53, 7 }
 0x6f3   :  { %12893 = vmatprep.subr.bf16.mxu1 %v18954_v2 }
 0x6f4   :  { %v8228_v49 = vsel %vm8179_vm9, %v8225_v10, %v8227_v25  ;;  %v8510_v10 = vsel %vm4056_vm6, %v8507_v60, %v8509_v54  ;;  %v8512_v25 = vsel %vm4056_vm6, %v8509_v54, %v8511_v52 }
 0x6f5   :  { %12493 = vmatmul.mubr.msk.f32.gmra.mrb[214].mxu1 %vm6492_vm7, %v8200_v57  ;;  %v8490_v57 = vsel %vm4056_vm6, %v8487_v34, %v8489_v62  ;;  %v8517_v34 = vrot.slane %v18381_v37, 7 }
 0x6f6   :  { %12495 = vmatprep.mubr.msk.f32.mxu1 %vm6492_vm7, %v8202_v11  ;;  %v6417_v11 = vld [vmem:[%s19342_s5 + $0x220] sm:$0xff] }
 0x6f9   :  { %12496 = vmatmul.mubr.msk.f32.gmra.mrb[216].mxu1 %vm6492_vm7, %v8204_v36  ;;  %v8492_v36 = vsel %vm4056_vm6, %v8489_v62, %v8491_v28 }
 0x6fa   :  { %12498 = vmatprep.mubr.msk.f32.mxu1 %vm6492_vm7, %v8206_v35  ;;  %v12900_v35 = vpack.c.bf16 %v6418_v63, %v6417_v11  ;;  %v8529_v63 = vrot.slane %v18690_v43, 7 }
 0x6fd   :  { %12499 = vmatmul.mubr.msk.f32.gmra.mrb[218].mxu1 %vm6492_vm7, %v8208_v55  ;;  %v8497_v55 = vrot.slane %v18302_v59, 7 }
 0x6fe   :  { %12501 = vmatprep.mubr.msk.f32.mxu1 %vm6492_vm7, %v8210_v26  ;;  %v6420_v26 = vld [vmem:[%s19342_s5 + $0x238] sm:$0xff] }
 0x6ff   :  { %v8498_v14 = vsel %vm4056_vm6, %v8495_v45, %v8497_v55 }
 0x701   :  { %12502 = vmatmul.mubr.msk.f32.gmra.mrb[220].mxu1 %vm6492_vm7, %v8212_v30  ;;  %v12904_v30 = vpack.c.bf16 %v6420_v26, %v6419_v1 }
 0x702   :  { %12504 = vmatprep.mubr.msk.f32.mxu1 %vm6492_vm7, %v8214_v9  ;;  %v8503_v9 = vrot.slane %v18332_v58, 7 }
 0x705   :  { %12505 = vmatmul.mubr.msk.f32.gmra.mrb[222].mxu1 %vm6492_vm7, %v8216_v4  ;;  %v8504_v4 = vsel %vm4056_vm6, %v8501_v17, %v8503_v9 }
 0x706   :  { %12507 = vmatprep.mubr.msk.f32.mxu1 %vm6492_vm7, %v8218_v51  ;;  %v8506_v51 = vsel %vm4056_vm6, %v8503_v9, %v8505_v3 }
 0x709   :  { %12508 = vmatmul.mubr.msk.f32.gmra.mrb[224].mxu1 %vm6492_vm7, %v8220_v12  ;;  %v8508_v12 = vsel %vm4056_vm6, %v8505_v3, %v8507_v60 }
 0x70a   :  { %12510 = vmatprep.mubr.msk.f32.mxu1 %vm6492_vm7, %v8222_v44  ;;  %v8513_v44 = vrot.slane %v18367_v32, 7 }
 0x70d   :  { %12511 = vmatmul.mubr.msk.f32.gmra.mrb[226].mxu1 %vm6492_vm7, %v8224_v31  ;;  %v8515_v31 = vrot.slane %v18374_v20, 7 }
 0x70e   :  { %12513 = vmatprep.mubr.msk.f32.mxu1 %vm6492_vm7, %v8226_v23  ;;  %v8514_v23 = vsel %vm4056_vm6, %v8511_v52, %v8513_v44 }
 0x70f   :  { %v8516_v5 = vsel %vm4056_vm6, %v8513_v44, %v8515_v31  ;;  %v8518_v62 = vsel %vm4056_vm6, %v8515_v31, %v8517_v34 }
 0x711   :  { %12514 = vmatmul.mubr.msk.f32.gmra.mrb[228].mxu1 %vm6492_vm7, %v8228_v49  ;;  %v8519_v49 = vrot.slane %v18388_v7, 7 }
 0x712   :  { %12532 = vmatprep.mubr.msk.f32.mxu1 %vm6492_vm7, %v8488_v41  ;;  %v8523_v41 = vrot.slane %v18402_v13, 7 }
 0x713   :  { %v8520_v50 = vsel %vm4056_vm6, %v8517_v34, %v8519_v49  ;;  %v8522_v28 = vsel %vm4056_vm6, %v8519_v49, %v8521_v48 }
 0x715   :  { %12533 = vmatmul.mubr.msk.f32.vlgmr.msra.gmra.mrb[206].mxu1 %vm6492_vm7, %v8490_v57  ;;  %v8524_v57 = vsel %vm4056_vm6, %v8521_v48, %v8523_v41 }
 0x716   :  { %12535 = vmatprep.mubr.msk.f32.mxu1 %vm6492_vm7, %v8492_v36  ;;  %12895 = vmatpush3.bf16.msra.mxu1 %v18954_v2  ;;  %v8499_v2 = vrot.slane %v18312_v6, 7  ;;  %v8531_v36 = vrot.slane %v18994_v61, 7 }
 0x717   :  { %12897 = vmatprep.subr.bf16.mxu1 %v12896_v42 }
 0x718   :  { %v8500_v24 = vsel %vm4056_vm6, %v8497_v55, %v8499_v2  ;;  %v8502_v16 = vsel %vm4056_vm6, %v8499_v2, %v8501_v17  ;;  %v8532_v55 = vsel %vm4056_vm6, %v8529_v63, %v8531_v36 }
 0x719   :  { %12536 = vmatmul.mubr.msk.f32.gmra.mrb[208].mxu1 %vm6492_vm7, %v8494_v22  ;;  %v8530_v22 = vsel %vm4056_vm6, %v8527_v27, %v8529_v63 }
 0x71a   :  { %12538 = vmatprep.mubr.msk.f32.mxu1 %vm6492_vm7, %v8496_v46  ;;  %12899 = vmatpush3.bf16.msra.mxu1 %v12896_v42  ;;  %v8525_v42 = vrot.slane %v18409_v19, 7 }
 0x71b   :  { %12901 = vmatprep.subr.bf16.mxu1 %v12900_v35 }
 0x71c   :  { %v8526_v11 = vsel %vm4056_vm6, %v8523_v41, %v8525_v42  ;;  %v8528_v45 = vsel %vm4056_vm6, %v8525_v42, %v8527_v27 }
 0x71d   :  { %12539 = vmatmul.mubr.msk.f32.gmra.mrb[210].mxu1 %vm6492_vm7, %v8498_v14 }
 0x71e   :  { %12541 = vmatprep.mubr.msk.f32.mxu1 %vm6492_vm7, %v8500_v24  ;;  %12903 = vmatpush3.bf16.msra.mxu1 %v12900_v35  ;;  %v8533_v35 = vrot.slane %v19000_v8, 7 }
 0x71f   :  { %12905 = vmatprep.subr.bf16.mxu1 %v12904_v30 }
 0x720   :  { %v8534_v1 = vsel %vm4056_vm6, %v8531_v36, %v8533_v35 }
 0x721   :  { %12542 = vmatmul.mubr.msk.f32.gmra.mrb[212].mxu1 %vm6492_vm7, %v8502_v16 }
 0x722   :  { %12544 = vmatprep.mubr.msk.f32.mxu1 %vm6492_vm7, %v8504_v4  ;;  %12907 = vmatpush3.bf16.msra.mxu1 %v12904_v30 }
 0x725   :  { %12545 = vmatmul.mubr.msk.f32.gmra.mrb[214].mxu1 %vm6492_vm7, %v8506_v51 }
 0x726   :  { %12547 = vmatprep.mubr.msk.f32.mxu1 %vm6492_vm7, %v8508_v12 }
 0x729   :  { %12548 = vmatmul.mubr.msk.f32.gmra.mrb[216].mxu1 %vm6492_vm7, %v8510_v10 }
 0x72a   :  { %12550 = vmatprep.mubr.msk.f32.mxu1 %vm6492_vm7, %v8512_v25 }
 0x72d   :  { %12551 = vmatmul.mubr.msk.f32.gmra.mrb[218].mxu1 %vm6492_vm7, %v8514_v23 }
 0x72e   :  { %12553 = vmatprep.mubr.msk.f32.mxu1 %vm6492_vm7, %v8516_v5 }
 0x731   :  { %12554 = vmatmul.mubr.msk.f32.gmra.mrb[220].mxu1 %vm6492_vm7, %v8518_v62 }
 0x732   :  { %12556 = vmatprep.mubr.msk.f32.mxu1 %vm6492_vm7, %v8520_v50 }
 0x735   :  { %12557 = vmatmul.mubr.msk.f32.gmra.mrb[222].mxu1 %vm6492_vm7, %v8522_v28 }
 0x736   :  { %12559 = vmatprep.mubr.msk.f32.mxu1 %vm6492_vm7, %v8524_v57 }
 0x739   :  { %12560 = vmatmul.mubr.msk.f32.gmra.mrb[224].mxu1 %vm6492_vm7, %v8526_v11 }
 0x73a   :  { %12562 = vmatprep.mubr.msk.f32.mxu1 %vm6492_vm7, %v8528_v45 }
 0x73d   :  { %12563 = vmatmul.mubr.msk.f32.gmra.mrb[226].mxu1 %vm6492_vm7, %v8530_v22 }
 0x73e   :  { %12565 = vmatprep.mubr.msk.f32.mxu1 %vm6492_vm7, %v8532_v55 }
 0x741   :  { %12566 = vmatmul.mubr.msk.f32.gmra.mrb[228].mxu1 %vm6492_vm7, %v8534_v1 }
 0x742   :  { %12584 = vmatprep.mubr.msk.f32.mxu1 %vm6492_vm7, %v18230_v40  ;;  %v9063_v40 = vld [vmem:[%s19344_s7 + $0x8] sm:$0xff] }
 0x743   :  { %9931 = vmatprep.mubr.msk.f32.mxu0 %vm9088_vm10, %v9063_v40 }
 0x745   :  { %12585 = vmatmul.mubr.msk.f32.vlgmr.msra.gmra.mrb[206].mxu1 %vm6492_vm7, %v18247_v15  ;;  %v19162_v15 = vld [vmem:[%s19345_s6] ss:$0 sm:$0xff] }
 0x746   :  { %12587 = vmatprep.mubr.msk.f32.mxu1 %vm6492_vm7, %v18263_v56 }
 0x749   :  { %12588 = vmatmul.mubr.msk.f32.gmra.mrb[208].mxu1 %vm6492_vm7, %v18281_v33 }
 0x74a   :  { %12590 = vmatprep.mubr.msk.f32.mxu1 %vm6492_vm7, %v18292_v47 }
 0x74d   :  { %12591 = vmatmul.mubr.msk.f32.gmra.mrb[210].mxu1 %vm6492_vm7, %v18302_v59 }
 0x74e   :  { %12593 = vmatprep.mubr.msk.f32.mxu1 %vm6492_vm7, %v18312_v6 }
 0x751   :  { %12594 = vmatmul.mubr.msk.f32.gmra.mrb[212].mxu1 %vm6492_vm7, %v18322_v21 }
 0x752   :  { %12596 = vmatprep.mubr.msk.f32.mxu1 %vm6492_vm7, %v18332_v58 }
 0x755   :  { %12597 = vmatmul.mubr.msk.f32.gmra.mrb[214].mxu1 %vm6492_vm7, %v18339_v18 }
 0x756   :  { %12599 = vmatprep.mubr.msk.f32.mxu1 %vm6492_vm7, %v18346_v38 }
 0x759   :  { %12600 = vmatmul.mubr.msk.f32.gmra.mrb[216].mxu1 %vm6492_vm7, %v18353_v0 }
 0x75a   :  { %12602 = vmatprep.mubr.msk.f32.mxu1 %vm6492_vm7, %v18360_v29 }
 0x75d   :  { %12603 = vmatmul.mubr.msk.f32.gmra.mrb[218].mxu1 %vm6492_vm7, %v18367_v32 }
 0x75e   :  { %12605 = vmatprep.mubr.msk.f32.mxu1 %vm6492_vm7, %v18374_v20 }
 0x761   :  { %12606 = vmatmul.mubr.msk.f32.gmra.mrb[220].mxu1 %vm6492_vm7, %v18381_v37 }
 0x762   :  { %12608 = vmatprep.mubr.msk.f32.mxu1 %vm6492_vm7, %v18388_v7 }
 0x765   :  { %12609 = vmatmul.mubr.msk.f32.gmra.mrb[222].mxu1 %vm6492_vm7, %v18395_v53 }
 0x766   :  { %12611 = vmatprep.mubr.msk.f32.mxu1 %vm6492_vm7, %v18402_v13  ;;  %v19963_v13 = vmov 0.0|0.0  }
 0x769   :  { %12612 = vmatmul.mubr.msk.f32.gmra.mrb[224].mxu1 %vm6492_vm7, %v18409_v19 }
 0x76a   :  { %12614 = vmatprep.mubr.msk.f32.mxu1 %vm6492_vm7, %v18416_v39 }
 0x76d   :  { %12615 = vmatmul.mubr.msk.f32.gmra.mrb[226].mxu1 %vm6492_vm7, %v18690_v43 }
 0x76e   :  { %12617 = vmatprep.mubr.msk.f32.mxu1 %vm6492_vm7, %v18994_v61 }
 0x771   :  { %12618 = vmatmul.mubr.msk.f32.gmra.mrb[228].mxu1 %vm6492_vm7, %v19000_v8 }
 0x818   :  { %v12586_v56 = vpop.f32.mrb[206].mxu1 }
 0x819   :  { %v9015_v33 = vadd.f32 %v12586_v56, %v19162_v15  ;;  %v8864_v47 = vpop.f32.mrb[207].mxu1 }
 0x81a   :  { %v9014_v59 = vadd.f32 %v19162_v15, %v8864_v47 }
 0x81b   :  { %v9039_v6 = vmax.f32 %v9015_v33, 0.0 }
 0x81c   :  { %v9038_v21 = vmax.f32 %v9014_v59, 0.0  ;;  %v12589_v58 = vpop.f32.mrb[208].mxu1 }
 0x81d   :  { %v9017_v18 = vadd.f32 %v12589_v58, %v19162_v15  ;;  %v8874_v38 = vpop.f32.mrb[209].mxu1 }
 0x81e   :  { %v12909_v0 = vpack.c.bf16 %v9039_v6, %v9038_v21  ;;  %v9016_v29 = vadd.f32 %v19162_v15, %v8874_v38 }
 0x81f   :  { %v9041_v32 = vmax.f32 %v9017_v18, 0.0 }
 0x820   :  { %v9040_v20 = vmax.f32 %v9016_v29, 0.0  ;;  %v12592_v37 = vpop.f32.mrb[210].mxu1  ;;  %12910 = vmatpush1.bf16.msra.mxu0 %v12909_v0 }
 0x821   :  { %v9019_v7 = vadd.f32 %v12592_v37, %v19162_v15  ;;  %v8884_v53 = vpop.f32.mrb[211].mxu1  ;;  %12911 = vmatprep.subr.bf16.mxu0 %v19963_v13 }
 0x822   :  { %v12912_v19 = vpack.c.bf16 %v9041_v32, %v9040_v20  ;;  %v9018_v39 = vadd.f32 %v19162_v15, %v8884_v53 }
 0x823   :  { %v9043_v43 = vmax.f32 %v9019_v7, 0.0 }
 0x824   :  { %v9042_v61 = vmax.f32 %v9018_v39, 0.0  ;;  %v12595_v8 = vpop.f32.mrb[212].mxu1  ;;  %12913 = vmatpush1.bf16.msra.mxu0 %v12912_v19 }
 0x825   :  { %v9021_v26 = vadd.f32 %v12595_v8, %v19162_v15  ;;  %v8894_v46 = vpop.f32.mrb[213].mxu1  ;;  %12914 = vmatprep.subr.bf16.mxu0 %v19963_v13 }
 0x826   :  { %v12915_v2 = vpack.c.bf16 %v9043_v43, %v9042_v61  ;;  %v9020_v30 = vadd.f32 %v19162_v15, %v8894_v46  ;;  %v9062_v46 = vld [vmem:[%s19344_s7] sm:$0xff] }
 0x827   :  { %v9045_v14 = vmax.f32 %v9021_v26, 0.0 }
 0x828   :  { %v9044_v17 = vmax.f32 %v9020_v30, 0.0  ;;  %v12598_v24 = vpop.f32.mrb[214].mxu1  ;;  %12916 = vmatpush1.bf16.msra.mxu0 %v12915_v2  ;;  %v9065_v2 = vld [vmem:[%s19344_s7 + $0x18] sm:$0xff]  ;;  %v9066_v30 = vld [vmem:[%s19344_s7 + $0x20] sm:$0xff] }
 0x829   :  { %v9023_v9 = vadd.f32 %v12598_v24, %v19162_v15  ;;  %v8904_v16 = vpop.f32.mrb[215].mxu1  ;;  %12917 = vmatprep.subr.bf16.mxu0 %v19963_v13  ;;  %v9071_v24 = vld [vmem:[%s19344_s7 + $0x48] sm:$0xff] }
 0x82a   :  { %v12918_v3 = vpack.c.bf16 %v9045_v14, %v9044_v17  ;;  %v9022_v4 = vadd.f32 %v19162_v15, %v8904_v16  ;;  %v9069_v14 = vld [vmem:[%s19344_s7 + $0x38] sm:$0xff]  ;;  %v9068_v17 = vld [vmem:[%s19344_s7 + $0x30] sm:$0xff] }
 0x82b   :  { %v9047_v60 = vmax.f32 %v9023_v9, 0.0  ;;  %v9070_v9 = vld [vmem:[%s19344_s7 + $0x40] sm:$0xff]  ;;  %v9073_v16 = vld [vmem:[%s19344_s7 + $0x58] sm:$0xff] }
 0x82c   :  { %v9046_v51 = vmax.f32 %v9022_v4, 0.0  ;;  %v12601_v54 = vpop.f32.mrb[216].mxu1  ;;  %12919 = vmatpush1.bf16.msra.mxu0 %v12918_v3  ;;  %v9072_v3 = vld [vmem:[%s19344_s7 + $0x50] sm:$0xff]  ;;  %v9075_v4 = vld [vmem:[%s19344_s7 + $0x68] sm:$0xff] }
 0x82d   :  { %v9025_v12 = vadd.f32 %v12601_v54, %v19162_v15  ;;  %v8914_v52 = vpop.f32.mrb[217].mxu1  ;;  %12920 = vmatprep.subr.bf16.mxu0 %v19963_v13  ;;  %v9076_v54 = vld [vmem:[%s19344_s7 + $0x70] sm:$0xff] }
 0x82e   :  { %v12921_v10 = vpack.c.bf16 %v9047_v60, %v9046_v51  ;;  %v9024_v44 = vadd.f32 %v19162_v15, %v8914_v52  ;;  %v9074_v60 = vld [vmem:[%s19344_s7 + $0x60] sm:$0xff]  ;;  %v9077_v51 = vld [vmem:[%s19344_s7 + $0x78] sm:$0xff] }
 0x82f   :  { %v9049_v25 = vmax.f32 %v9025_v12, 0.0  ;;  %v9079_v12 = vld [vmem:[%s19344_s7 + $0x88] sm:$0xff]  ;;  %v9078_v52 = vld [vmem:[%s19344_s7 + $0x80] sm:$0xff] }
 0x830   :  { %v9048_v31 = vmax.f32 %v9024_v44, 0.0  ;;  %v12604_v23 = vpop.f32.mrb[218].mxu1  ;;  %12922 = vmatpush1.bf16.msra.mxu0 %v12921_v10  ;;  %v9081_v10 = vld [vmem:[%s19344_s7 + $0x98] sm:$0xff]  ;;  %v9080_v44 = vld [vmem:[%s19344_s7 + $0x90] sm:$0xff] }
 0x831   :  { %v9027_v34 = vadd.f32 %v12604_v23, %v19162_v15  ;;  %v8924_v5 = vpop.f32.mrb[219].mxu1  ;;  %12923 = vmatprep.subr.bf16.mxu0 %v19963_v13  ;;  %v9085_v23 = vld [vmem:[%s19344_s7 + $0xb8] sm:$0xff] }
 0x832   :  { %v12924_v49 = vpack.c.bf16 %v9049_v25, %v9048_v31  ;;  %v9026_v62 = vadd.f32 %v19162_v15, %v8924_v5  ;;  %v9083_v25 = vld [vmem:[%s19344_s7 + $0xa8] sm:$0xff]  ;;  %v9082_v31 = vld [vmem:[%s19344_s7 + $0xa0] sm:$0xff] }
 0x833   :  { %v9051_v48 = vmax.f32 %v9027_v34, 0.0  ;;  %v9084_v34 = vld [vmem:[%s19344_s7 + $0xb0] sm:$0xff]  ;;  %v9087_v5 = vld [vmem:[%s19344_s7 + $0xc8] sm:$0xf] }
 0x834   :  { %v9050_v50 = vmax.f32 %v9026_v62, 0.0  ;;  %v12607_v41 = vpop.f32.mrb[220].mxu1  ;;  %12925 = vmatpush1.bf16.msra.mxu0 %v12924_v49  ;;  %v9086_v49 = vld [vmem:[%s19344_s7 + $0xc0] sm:$0xf] }
 0x835   :  { %v9029_v28 = vadd.f32 %v12607_v41, %v19162_v15  ;;  %v8934_v42 = vpop.f32.mrb[221].mxu1  ;;  %12926 = vmatprep.subr.bf16.mxu0 %v19963_v13 }
 0x836   :  { %v12927_v57 = vpack.c.bf16 %v9051_v48, %v9050_v50  ;;  %v9028_v27 = vadd.f32 %v19162_v15, %v8934_v42 }
 0x837   :  { %v9053_v11 = vmax.f32 %v9029_v28, 0.0 }
 0x838   :  { %v9052_v63 = vmax.f32 %v9028_v27, 0.0  ;;  %v12610_v36 = vpop.f32.mrb[222].mxu1  ;;  %12928 = vmatpush1.bf16.msra.mxu0 %v12927_v57 }
 0x839   :  { %v9031_v45 = vadd.f32 %v12610_v36, %v19162_v15  ;;  %v8944_v35 = vpop.f32.mrb[223].mxu1  ;;  %12929 = vmatprep.subr.bf16.mxu0 %v19963_v13 }
 0x83a   :  { %v12930_v22 = vpack.c.bf16 %v9053_v11, %v9052_v63  ;;  %v9030_v55 = vadd.f32 %v19162_v15, %v8944_v35 }
 0x83b   :  { %v9055_v1 = vmax.f32 %v9031_v45, 0.0 }
 0x83c   :  { %v9054_v40 = vmax.f32 %v9030_v55, 0.0  ;;  %v12613_v56 = vpop.f32.mrb[224].mxu1  ;;  %12931 = vmatpush1.bf16.msra.mxu0 %v12930_v22 }
 0x83d   :  { %v9033_v33 = vadd.f32 %v12613_v56, %v19162_v15  ;;  %v8954_v47 = vpop.f32.mrb[225].mxu1  ;;  %12932 = vmatprep.subr.bf16.mxu0 %v19963_v13 }
 0x83e   :  { %v12933_v59 = vpack.c.bf16 %v9055_v1, %v9054_v40  ;;  %v9032_v6 = vadd.f32 %v19162_v15, %v8954_v47 }
 0x83f   :  { %v9057_v21 = vmax.f32 %v9033_v33, 0.0 }
 0x840   :  { %v9056_v58 = vmax.f32 %v9032_v6, 0.0  ;;  %v12616_v18 = vpop.f32.mrb[226].mxu1  ;;  %12934 = vmatpush1.bf16.msra.mxu0 %v12933_v59 }
 0x841   :  { %v9035_v38 = vadd.f32 %v12616_v18, %v19162_v15  ;;  %v8964_v0 = vpop.f32.mrb[227].mxu1  ;;  %12935 = vmatprep.subr.bf16.mxu0 %v19963_v13 }
 0x842   :  { %v12936_v29 = vpack.c.bf16 %v9057_v21, %v9056_v58  ;;  %v9034_v32 = vadd.f32 %v19162_v15, %v8964_v0 }
 0x843   :  { %v9059_v20 = vmax.f32 %v9035_v38, 0.0 }
 0x844   :  { %v9058_v37 = vmax.f32 %v9034_v32, 0.0  ;;  %v12619_v7 = vpop.f32.mrb[228].mxu1  ;;  %12937 = vmatpush1.bf16.msra.mxu0 %v12936_v29 }
 0x845   :  { %v9037_v53 = vadd.f32 %v12619_v7, %v19162_v15  ;;  %v8974_v19 = vpop.f32.mrb[229].mxu1  ;;  %12938 = vmatprep.subr.bf16.mxu0 %v19963_v13 }
 0x846   :  { %v12939_v39 = vpack.c.bf16 %v9059_v20, %v9058_v37  ;;  %v9036_v43 = vadd.f32 %v19162_v15, %v8974_v19  ;;  %v9064_v15 = vld [vmem:[%s19344_s7 + $0x10] sm:$0xff] }
 0x847   :  { %v9061_v61 = vmax.f32 %v9037_v53, 0.0 }
 0x848   :  { %v9060_v8 = vmax.f32 %v9036_v43, 0.0  ;;  %12940 = vmatpush1.bf16.msra.mxu0 %v12939_v39 }
 0x849   :  { %12941 = vmatprep.subr.bf16.mxu0 %v19963_v13  ;;  %v9067_v13 = vld [vmem:[%s19344_s7 + $0x28] sm:$0xff] }
 0x84a   :  { %v12942_v26 = vpack.c.bf16 %v9061_v61, %v9060_v8 }
 0x84c   :  { %12944 = vmatpush1.bf16.msk.msra.mxu0 %vm12943_vm12, %v12942_v26 }
 0x84f   :  { %9196 = vmatmul.mubr.f32.vlgmr.msra.gmra.mrb[112].mxu0 %v9062_v46 }
 0x850   :  { %9932 = vmatprep.mubr.msk.f32.mxu0 %vm9088_vm10, %v9065_v2 }
 0x853   :  { %9201 = vmatmul.mubr.f32.gmra.mrb[114].mxu0 %v9064_v15 }
 0x854   :  { %9933 = vmatprep.mubr.msk.f32.mxu0 %vm9088_vm10, %v9067_v13 }
 0x857   :  { %9206 = vmatmul.mubr.f32.gmra.mrb[116].mxu0 %v9066_v30 }
 0x858   :  { %9934 = vmatprep.mubr.msk.f32.mxu0 %vm9088_vm10, %v9069_v14 }
 0x85b   :  { %9211 = vmatmul.mubr.f32.gmra.mrb[118].mxu0 %v9068_v17 }
 0x85c   :  { %9935 = vmatprep.mubr.msk.f32.mxu0 %vm9088_vm10, %v9071_v24 }
 0x85f   :  { %9216 = vmatmul.mubr.f32.gmra.mrb[120].mxu0 %v9070_v9 }
 0x860   :  { %9936 = vmatprep.mubr.msk.f32.mxu0 %vm9088_vm10, %v9073_v16 }
 0x863   :  { %9221 = vmatmul.mubr.f32.gmra.mrb[122].mxu0 %v9072_v3 }
 0x864   :  { %9937 = vmatprep.mubr.msk.f32.mxu0 %vm9088_vm10, %v9075_v4 }
 0x867   :  { %9226 = vmatmul.mubr.f32.gmra.mrb[124].mxu0 %v9074_v60 }
 0x868   :  { %9938 = vmatprep.mubr.msk.f32.mxu0 %vm9088_vm10, %v9077_v51 }
 0x86b   :  { %9231 = vmatmul.mubr.f32.gmra.mrb[126].mxu0 %v9076_v54 }
 0x86c   :  { %9939 = vmatprep.mubr.msk.f32.mxu0 %vm9088_vm10, %v9079_v12 }
 0x86f   :  { %9236 = vmatmul.mubr.f32.gmra.mrb[128].mxu0 %v9078_v52 }
 0x870   :  { %9940 = vmatprep.mubr.msk.f32.mxu0 %vm9088_vm10, %v9081_v10 }
 0x873   :  { %9241 = vmatmul.mubr.f32.gmra.mrb[130].mxu0 %v9080_v44 }
 0x874   :  { %9941 = vmatprep.mubr.msk.f32.mxu0 %vm9088_vm10, %v9083_v25 }
 0x877   :  { %9246 = vmatmul.mubr.f32.gmra.mrb[132].mxu0 %v9082_v31 }
 0x878   :  { %9942 = vmatprep.mubr.msk.f32.mxu0 %vm9088_vm10, %v9085_v23 }
 0x87b   :  { %9251 = vmatmul.mubr.f32.gmra.mrb[134].mxu0 %v9084_v34 }
 0x87c   :  { %9943 = vmatprep.mubr.msk.f32.mxu0 %vm9088_vm10, %v9087_v5 }
 0x87f   :  { %9256 = vmatmul.mubr.f32.gmra.mrb[136].mxu0 %v9086_v49 }
 0x922   :  { %v9197_v62 = vpop.f32.mrb[112].mxu0 }
 0x923   :  { %9261 = vst.msk [vmem:[%s19346_s8] sm:$0xff] %vm6492_vm7, %v9197_v62  ;;  %v9199_v48 = vpop.f32.mrb[113].mxu0 }
 0x926   :  { %v9202_v50 = vpop.f32.mrb[114].mxu0 }
 0x927   :  { %9262 = vst.msk [vmem:[%s19346_s8 + $0x8] sm:$0xff] %vm6492_vm7, %v9202_v50  ;;  %v9204_v41 = vpop.f32.mrb[115].mxu0 }
 0x92a   :  { %v9207_v28 = vpop.f32.mrb[116].mxu0 }
 0x92b   :  { %9263 = vst.msk [vmem:[%s19346_s8 + $0x10] sm:$0xff] %vm6492_vm7, %v9207_v28  ;;  %v9209_v42 = vpop.f32.mrb[117].mxu0 }
 0x92e   :  { %v9212_v57 = vpop.f32.mrb[118].mxu0 }
 0x92f   :  { %9264 = vst.msk [vmem:[%s19346_s8 + $0x18] sm:$0xff] %vm6492_vm7, %v9212_v57  ;;  %v9214_v27 = vpop.f32.mrb[119].mxu0 }
 0x932   :  { %v9217_v11 = vpop.f32.mrb[120].mxu0 }
 0x933   :  { %9265 = vst.msk [vmem:[%s19346_s8 + $0x20] sm:$0xff] %vm6492_vm7, %v9217_v11  ;;  %v9219_v63 = vpop.f32.mrb[121].mxu0 }
 0x936   :  { %v9222_v36 = vpop.f32.mrb[122].mxu0 }
 0x937   :  { %9266 = vst.msk [vmem:[%s19346_s8 + $0x28] sm:$0xff] %vm6492_vm7, %v9222_v36  ;;  %v9224_v45 = vpop.f32.mrb[123].mxu0 }
 0x93a   :  { %v9227_v35 = vpop.f32.mrb[124].mxu0 }
 0x93b   :  { %9267 = vst.msk [vmem:[%s19346_s8 + $0x30] sm:$0xff] %vm6492_vm7, %v9227_v35  ;;  %v9229_v22 = vpop.f32.mrb[125].mxu0 }
 0x93e   :  { %v9232_v55 = vpop.f32.mrb[126].mxu0 }
 0x93f   :  { %9268 = vst.msk [vmem:[%s19346_s8 + $0x38] sm:$0xff] %vm6492_vm7, %v9232_v55  ;;  %v9234_v1 = vpop.f32.mrb[127].mxu0 }
 0x942   :  { %v9237_v40 = vpop.f32.mrb[128].mxu0 }
 0x943   :  { %9269 = vst.msk [vmem:[%s19346_s8 + $0x40] sm:$0xff] %vm6492_vm7, %v9237_v40  ;;  %v9239_v56 = vpop.f32.mrb[129].mxu0 }
 0x946   :  { %v9242_v33 = vpop.f32.mrb[130].mxu0 }
 0x947   :  { %9270 = vst.msk [vmem:[%s19346_s8 + $0x48] sm:$0xff] %vm6492_vm7, %v9242_v33  ;;  %v9244_v47 = vpop.f32.mrb[131].mxu0 }
 0x94a   :  { %v9247_v59 = vpop.f32.mrb[132].mxu0 }
 0x94b   :  { %9271 = vst.msk [vmem:[%s19346_s8 + $0x50] sm:$0xff] %vm6492_vm7, %v9247_v59  ;;  %v9249_v6 = vpop.f32.mrb[133].mxu0 }
 0x94e   :  { %v9252_v21 = vpop.f32.mrb[134].mxu0 }
 0x94f   :  { %9272 = vst.msk [vmem:[%s19346_s8 + $0x58] sm:$0xff] %vm6492_vm7, %v9252_v21  ;;  %v9254_v58 = vpop.f32.mrb[135].mxu0 }
 0x952   :  { %v9257_v18 = vpop.f32.mrb[136].mxu0 }
 0x953   :  { %9274 = vst.msk [vmem:[%s19346_s8 + $0x60] sm:$0xf] %vm9273_vm13, %v9257_v18  ;;  %v9259_v38 = vpop.f32.mrb[137].mxu0 }

</bundles_post_ra>
